<compile_context>
chip_gen: v5e
topology: v5e:2x2
jax: 0.10.0
libtpu: 0.0.40
codegen_flags: <defaults>
</compile_context>

<pallas_src>
import functools

import jax
import jax.numpy as jnp
import numpy as np
from jax import lax
from jax.experimental import pallas as pl
from jax.experimental.pallas import tpu as pltpu

_LPAD = 8  # left column pad (multiple of 8) -> aligned residual & tap slices


def _round_up(x, m):
    return ((x + m - 1) // m) * m


def bottleneck_kernel(x_ref, w1_ref, b1_ref, w2_ref, b2_ref, w3_ref, b3_ref,
                      out_ref, hp_ref, *, th, pad, dilation, w, w8, lpad):
    """One (batch, row-tile) step.

    x_ref : (H+2p, Wp8, Cin_p) bf16   spatially pre-padded, channel padded, resident
    hp_ref: (TH+2p, Wp8, P_p)  bf16   conv1 output incl. halo (scratch)
    out_ref: (TH, W8, Cout_p)  bf16
    """
    i = pl.program_id(1)
    pp = w1_ref.shape[1]           # padded planes
    thd = th + 2 * pad             # rows incl. halo
    wp8 = x_ref.shape[1]           # padded width (multiple of 8)
    row0 = i * th                  # window start row (padded coords)

    # ---- conv1 (1x1, BN-scale folded) + bias + relu over the halo window ----
    xw = x_ref[pl.ds(row0, thd), :, :]                       # (thd, wp8, Cin_p) bf16
    h1 = jnp.dot(xw.reshape(thd * wp8, xw.shape[-1]), w1_ref[...],
                 preferred_element_type=jnp.float32)         # (thd*wp8, P_p) f32
    h1 = jnp.maximum(h1 + b1_ref[...], 0.0)
    hp_ref[...] = h1.reshape(thd, wp8, pp).astype(hp_ref.dtype)   # free reshape (wp8 % 8 == 0)

    # Zero only conv2's zero-pad positions (border cols every step; border rows
    # only on the first / last row tile) instead of masking the whole tile.
    zc = jnp.zeros((thd, pad, pp), dtype=hp_ref.dtype)
    hp_ref[:, lpad - pad:lpad, :] = zc
    hp_ref[:, lpad + w:lpad + w + pad, :] = zc

    @pl.when(i == 0)
    def _():
        hp_ref[0:pad, :, :] = jnp.zeros((pad, wp8, pp), dtype=hp_ref.dtype)

    @pl.when(i == pl.num_programs(1) - 1)
    def _():
        hp_ref[thd - pad:thd, :, :] = jnp.zeros((pad, wp8, pp), dtype=hp_ref.dtype)

    # ---- conv2 (3x3, stride=1, dilation) = 9 shifted 1x1 matmuls -------------
    # SSA accumulator (no VMEM RMW); one shifted column window per dx (3 shifts).
    acc = None
    for dx in range(3):
        col0 = lpad - pad + dx * dilation
        hp_dx = hp_ref[:, col0:col0 + w8, :]                 # (thd, w8, P_p)
        for dy in range(3):
            lhs = hp_dx[dy * dilation:dy * dilation + th].reshape(th * w8, pp)
            contrib = jnp.dot(lhs, w2_ref[dy, dx],
                              preferred_element_type=jnp.float32)
            acc = contrib if acc is None else acc + contrib
    h2 = jnp.maximum(acc + b2_ref[...], 0.0).astype(jnp.bfloat16)   # (th*w8, P_p)

    # ---- conv3 (1x1, BN-scale folded) + bias --------------------------------
    h3 = jnp.dot(h2, w3_ref[...], preferred_element_type=jnp.float32)
    h3 = h3 + b3_ref[...]                                    # (th*w8, Cout_p)

    # ---- residual add (identity shortcut, aligned slice) + relu, bf16 store --
    res = x_ref[pl.ds(row0 + pad, th), lpad:lpad + w8, :]    # (th, w8, Cin_p) bf16
    out = jnp.maximum(h3 + res.reshape(th * w8, res.shape[-1]).astype(jnp.float32), 0.0)
    out_ref[...] = out.reshape(th, w8, out.shape[-1]).astype(out_ref.dtype)


def _pick_vmem_limit():
    try:
        cap = int(pltpu.get_tpu_info().vmem_capacity_bytes)
    except Exception:
        cap = 64 * 1024 * 1024
    # ~25% headroom for Mosaic-internal scratch; 96 MiB cap (v5e/v6e), ~48 MiB on v7x.
    return max(32 * 1024 * 1024, min(96 * 1024 * 1024, (cap * 3) // 4))


def bottleneck_forward_nhwc(x_nhwc, p, *, stride=1, dilation=1, row_tile=16):
    """x_nhwc: (N, H, W, Cin).  Returns NHWC bf16 (N, H, W, 4*planes)."""
    assert stride == 1, "identity shortcut (downsample=None) requires stride == 1"
    pad = (3 * dilation - 1) // 2
    assert pad == dilation, "spatial size must be preserved (dilation in {1, 2})"

    N, H, W, Cin = x_nhwc.shape
    P = p["conv1_w"].shape[0]
    Cout = p["conv3_w"].shape[0]
    assert Cin == Cout, "identity shortcut requires inplanes == 4 * planes"

    # Row tile: largest divisor of H that is <= row_tile.
    TH = min(row_tile, H)
    while H % TH:
        TH -= 1
    assert TH >= pad

    eps = 1e-5
    Cin_p = _round_up(Cin, 128)
    P_p = _round_up(P, 128)
    Cout_p = _round_up(Cout, 128)
    W8 = _round_up(W, 8)                       # output tile width (sublane aligned)
    Wp8 = _round_up(_LPAD + W8 + pad, 8)       # padded image / scratch width
    Hp = H + 2 * pad
    thd = TH + 2 * pad

    def fold(gamma, beta, mean, var):
        s = gamma / jnp.sqrt(var + eps)
        return s, beta - mean * s

    s1, b1 = fold(p["bn1_g"], p["bn1_b"], p["bn1_m"], p["bn1_v"])
    s2, b2 = fold(p["bn2_g"], p["bn2_b"], p["bn2_m"], p["bn2_v"])
    s3, b3 = fold(p["bn3_g"], p["bn3_b"], p["bn3_m"], p["bn3_v"])

    # Fold BN scale into conv weights, pad channels to lane multiples, cast bf16.
    w1 = jnp.transpose(p["conv1_w"][:, :, 0, 0], (1, 0)) * s1[None, :]        # (Cin, P)
    w2 = jnp.transpose(p["conv2_w"], (2, 3, 1, 0)) * s2[None, None, None, :]  # (3,3,P,P)
    w3 = jnp.transpose(p["conv3_w"][:, :, 0, 0], (1, 0)) * s3[None, :]        # (P, 4P)

    w1 = jnp.pad(w1, ((0, Cin_p - Cin), (0, P_p - P))).astype(jnp.bfloat16)
    w2 = jnp.pad(w2, ((0, 0), (0, 0), (0, P_p - P), (0, P_p - P))).astype(jnp.bfloat16)
    w3 = jnp.pad(w3, ((0, P_p - P), (0, Cout_p - Cout))).astype(jnp.bfloat16)
    b1 = jnp.pad(b1, (0, P_p - P)).reshape(1, P_p).astype(jnp.float32)
    b2 = jnp.pad(b2, (0, P_p - P)).reshape(1, P_p).astype(jnp.float32)
    b3 = jnp.pad(b3, (0, Cout_p - Cout)).reshape(1, Cout_p).astype(jnp.float32)

    # bf16 image with spatial halo: rows padded by `pad`, real columns at
    # [_LPAD, _LPAD+W), channels padded to a lane multiple.
    xp = jnp.pad(x_nhwc.astype(jnp.bfloat16),
                 ((0, 0), (pad, pad), (_LPAD, Wp8 - _LPAD - W), (0, Cin_p - Cin)))

    kernel = functools.partial(bottleneck_kernel, th=TH, pad=pad,
                               dilation=dilation, w=W, w8=W8, lpad=_LPAD)

    n_tiles = H // TH
    flops = 2 * N * (n_tiles * thd * Wp8 * Cin_p * P_p
                     + H * W8 * 9 * P_p * P_p
                     + H * W8 * P_p * Cout_p)
    bytes_accessed = (N * Hp * Wp8 * Cin_p * 2 + N * H * W8 * Cout_p * 2
                      + 2 * (Cin_p * P_p + 9 * P_p * P_p + P_p * Cout_p)
                      + 4 * (2 * P_p + Cout_p))
    ce = pl.CostEstimate(flops=int(flops), transcendentals=0,
                         bytes_accessed=int(bytes_accessed))
    vmem_limit = _pick_vmem_limit()

    def run(single_buffer):
        pm = {"pipeline_mode": pl.Buffered(1)} if single_buffer else {}
        in_specs = [
            # Padded image: resident across the row-tile axis (constant block
            # index along it); single-buffered when supported (VMEM headroom).
            pl.BlockSpec((pl.Squeezed(), Hp, Wp8, Cin_p),
                         lambda n, i: (n, 0, 0, 0), **pm),
            pl.BlockSpec((Cin_p, P_p), lambda n, i: (0, 0), **pm),
            pl.BlockSpec((1, P_p), lambda n, i: (0, 0), **pm),
            pl.BlockSpec((3, 3, P_p, P_p), lambda n, i: (0, 0, 0, 0), **pm),
            pl.BlockSpec((1, P_p), lambda n, i: (0, 0), **pm),
            pl.BlockSpec((P_p, Cout_p), lambda n, i: (0, 0), **pm),
            pl.BlockSpec((1, Cout_p), lambda n, i: (0, 0), **pm),
        ]
        out = pl.pallas_call(
            kernel,
            out_shape=jax.ShapeDtypeStruct((N, H, W8, Cout_p), jnp.bfloat16),
            grid_spec=pltpu.PrefetchScalarGridSpec(
                num_scalar_prefetch=0,
                grid=(N, n_tiles),
                in_specs=in_specs,
                out_specs=pl.BlockSpec((pl.Squeezed(), TH, W8, Cout_p),
                                       lambda n, i: (n, i, 0, 0)),
                scratch_shapes=[pltpu.VMEM((thd, Wp8, P_p), jnp.bfloat16)],
            ),
            compiler_params=pltpu.CompilerParams(
                dimension_semantics=("parallel", "parallel"),
                vmem_limit_bytes=int(vmem_limit)),
            cost_estimate=ce,
        )(xp, w1, b1, w2, b2, w3, b3)
        return jax.block_until_ready(out)

    try:
        out = run(True)
    except Exception:
        # pl.Buffered(1) unsupported in this Pallas build -> default buffering.
        out = run(False)

    return out[:, :, :W, :Cout]


def bottleneck_forward(x_nchw, p, *, stride=1, dilation=1, row_tile=16):
    """PyTorch-parity entry: (N, Cin, H, W) f32 -> (N, 4*planes, H, W) f32."""
    x = jnp.transpose(x_nchw, (0, 2, 3, 1))
    out = bottleneck_forward_nhwc(x, p, stride=stride, dilation=dilation,
                                  row_tile=row_tile)
    return jnp.transpose(out, (0, 3, 1, 2)).astype(jnp.float32)


def make_params(key, inplanes, planes):
    """Deterministic synthetic parameters matching the PyTorch module shapes."""
    ks = jax.random.split(key, 16)
    P, C4 = planes, planes * 4

    def bn(k, c):
        k1, k2, k3, k4 = jax.random.split(k, 4)
        return (jax.random.uniform(k1, (c,), minval=0.5, maxval=1.5),   # gamma
                0.1 * jax.random.normal(k2, (c,)),                      # beta
                0.1 * jax.random.normal(k3, (c,)),                      # running_mean
                jax.random.uniform(k4, (c,), minval=0.5, maxval=1.5))   # running_var

    g1, b1, m1, v1 = bn(ks[3], P)
    g2, b2, m2, v2 = bn(ks[4], P)
    g3, b3, m3, v3 = bn(ks[5], C4)
    return {
        "conv1_w": 0.1 * jax.random.normal(ks[0], (P, inplanes, 1, 1)),
        "conv2_w": 0.1 * jax.random.normal(ks[1], (P, P, 3, 3)),
        "conv3_w": 0.1 * jax.random.normal(ks[2], (C4, P, 1, 1)),
        "bn1_g": g1, "bn1_b": b1, "bn1_m": m1, "bn1_v": v1,
        "bn2_g": g2, "bn2_b": b2, "bn2_m": m2, "bn2_v": v2,
        "bn3_g": g3, "bn3_b": b3, "bn3_m": m3, "bn3_v": v3,
    }


def bottleneck_reference(x_nchw, p, *, stride=1, dilation=1):
    """Pure-JAX f32 reference mirroring the PyTorch forward (eval-mode BN)."""
    eps = 1e-5

    def conv(x, w, stride=1, dilation=1, padding=0):
        return lax.conv_general_dilated(
            x, w, window_strides=(stride, stride),
            padding=[(padding, padding), (padding, padding)],
            rhs_dilation=(dilation, dilation),
            dimension_numbers=("NCHW", "OIHW", "NCHW"))

    def bn(x, g, b, m, v):
        g, b, m, v = (a[None, :, None, None] for a in (g, b, m, v))
        return (x - m) / jnp.sqrt(v + eps) * g + b

    out = jax.nn.relu(bn(conv(x_nchw, p["conv1_w"]),
                         p["bn1_g"], p["bn1_b"], p["bn1_m"], p["bn1_v"]))
    out = jax.nn.relu(bn(conv(out, p["conv2_w"], stride=stride, dilation=dilation,
                              padding=(3 * dilation - 1) // 2),
                         p["bn2_g"], p["bn2_b"], p["bn2_m"], p["bn2_v"]))
    out = bn(conv(out, p["conv3_w"]), p["bn3_g"], p["bn3_b"], p["bn3_m"], p["bn3_v"])
    return jax.nn.relu(out + x_nchw)


if __name__ == "__main__":
    # small shapes: identity shortcut requires inplanes == planes * 4, stride == 1
    N, inplanes, planes, HW = 2, 16, 4, 16

    key = jax.random.PRNGKey(0)
    kx, kp = jax.random.split(key)
    x = jax.random.normal(kx, (N, inplanes, HW, HW), dtype=jnp.float32)
    params = make_params(kp, inplanes, planes)

    out = bottleneck_forward(x, params, stride=1, dilation=1)
    out = jax.block_until_ready(out)

    ref = jax.block_until_ready(bottleneck_reference(x, params, stride=1, dilation=1))
    assert out.shape == (N, planes * 4, HW, HW), out.shape
    # bf16 activations / weights vs f32 reference -> bf16-level tolerance
    np.testing.assert_allclose(np.asarray(out), np.asarray(ref), atol=6e-2, rtol=6e-2)

    print("KERNEL_OK")
</pallas_src>

<mosaic_0001>
module attributes {stable_mosaic.version = 11 : i64} {
  func.func @bottleneck_kernel(%arg0: i32, %arg1: i32, %arg2: memref<1x18x32x128xbf16, #tpu.memory_space<vmem>>, %arg3: memref<128x128xbf16, #tpu.memory_space<vmem>>, %arg4: memref<1x128xf32, #tpu.memory_space<vmem>>, %arg5: memref<3x3x128x128xbf16, #tpu.memory_space<vmem>>, %arg6: memref<1x128xf32, #tpu.memory_space<vmem>>, %arg7: memref<128x128xbf16, #tpu.memory_space<vmem>>, %arg8: memref<1x128xf32, #tpu.memory_space<vmem>>, %arg9: memref<1x16x16x128xbf16, #tpu.memory_space<vmem>>, %arg10: memref<18x32x128xbf16, #tpu.memory_space<vmem>>) attributes {dimension_semantics = [#tpu.dimension_semantics<parallel>, #tpu.dimension_semantics<parallel>], iteration_bounds = array<i64: 2, 1>, scalar_prefetch = 0 : i64, scratch_operands = 1 : i64, tpu.core_type = #tpu.core_type<tc>, window_params = [{pipeline_mode = #tpu.pipeline_mode<synchronous>, transform_indices = @transform_0, window_bounds = array<i64: 1, 18, 32, 128>}, {pipeline_mode = #tpu.pipeline_mode<synchronous>, transform_indices = @transform_1, window_bounds = array<i64: 128, 128>}, {pipeline_mode = #tpu.pipeline_mode<synchronous>, transform_indices = @transform_2, window_bounds = array<i64: 1, 128>}, {pipeline_mode = #tpu.pipeline_mode<synchronous>, transform_indices = @transform_3, window_bounds = array<i64: 3, 3, 128, 128>}, {pipeline_mode = #tpu.pipeline_mode<synchronous>, transform_indices = @transform_4, window_bounds = array<i64: 1, 128>}, {pipeline_mode = #tpu.pipeline_mode<synchronous>, transform_indices = @transform_5, window_bounds = array<i64: 128, 128>}, {pipeline_mode = #tpu.pipeline_mode<synchronous>, transform_indices = @transform_6, window_bounds = array<i64: 1, 128>}, {transform_indices = @transform_7, window_bounds = array<i64: 1, 16, 16, 128>}]} {
    %c16_i32 = arith.constant 16 : i32
    %0 = arith.muli %arg1, %c16_i32 : i32
    %c0 = arith.constant 0 : index
    %1 = arith.index_cast %0 : i32 to index
    %c0_0 = arith.constant 0 : index
    %c0_1 = arith.constant 0 : index
    %2 = vector.load %arg2[%c0, %1, %c0_0, %c0_1] : memref<1x18x32x128xbf16, #tpu.memory_space<vmem>>, vector<1x18x32x128xbf16>
    %3 = vector.shape_cast %2 : vector<1x18x32x128xbf16> to vector<18x32x128xbf16>
    %4 = vector.shape_cast %3 : vector<18x32x128xbf16> to vector<576x128xbf16>
    %c0_2 = arith.constant 0 : index
    %c0_3 = arith.constant 0 : index
    %5 = vector.load %arg3[%c0_2, %c0_3] : memref<128x128xbf16, #tpu.memory_space<vmem>>, vector<128x128xbf16>
    %cst = arith.constant dense<0.000000e+00> : vector<576x128xf32>
    %6 = tpu.matmul %4, %5, %cst {dimension_numbers = #tpu.dot_dimension_numbers<[1], [0], [0], [1], [0, 0, 1, 1], [], []>} : vector<576x128xbf16>, vector<128x128xbf16>, vector<576x128xf32> -> vector<576x128xf32>
    %c0_4 = arith.constant 0 : index
    %c0_5 = arith.constant 0 : index
    %7 = vector.load %arg4[%c0_4, %c0_5] : memref<1x128xf32, #tpu.memory_space<vmem>>, vector<1x128xf32>
    %8 = vector.broadcast %7 : vector<1x128xf32> to vector<576x128xf32>
    %9 = arith.addf %6, %8 : vector<576x128xf32>
    %cst_6 = arith.constant 0.000000e+00 : f32
    %10 = vector.broadcast %cst_6 : f32 to vector<576x128xf32>
    %11 = arith.maximumf %9, %10 : vector<576x128xf32>
    %12 = vector.shape_cast %11 : vector<576x128xf32> to vector<18x32x128xf32>
    %13 = arith.truncf %12 : vector<18x32x128xf32> to vector<18x32x128xbf16>
    %c0_7 = arith.constant 0 : index
    %c0_8 = arith.constant 0 : index
    %c0_9 = arith.constant 0 : index
    %14 = vector.load %arg10[%c0_7, %c0_8, %c0_9] : memref<18x32x128xbf16, #tpu.memory_space<vmem>>, vector<18x32x128xbf16>
    tpu.vector_store %arg10[%c0_7, %c0_8, %c0_9], %13 {strides = array<i32>} : memref<18x32x128xbf16, #tpu.memory_space<vmem>>, vector<18x32x128xbf16>,
    %cst_10 = arith.constant 0.000000e+00 : bf16
    %15 = vector.broadcast %cst_10 : bf16 to vector<18x1x128xbf16>
    %c0_11 = arith.constant 0 : index
    %c7 = arith.constant 7 : index
    %c0_12 = arith.constant 0 : index
    %16 = vector.load %arg10[%c0_11, %c7, %c0_12] : memref<18x32x128xbf16, #tpu.memory_space<vmem>>, vector<18x1x128xbf16>
    tpu.vector_store %arg10[%c0_11, %c7, %c0_12], %15 {strides = array<i32>} : memref<18x32x128xbf16, #tpu.memory_space<vmem>>, vector<18x1x128xbf16>,
    %c0_13 = arith.constant 0 : index
    %c24 = arith.constant 24 : index
    %c0_14 = arith.constant 0 : index
    %17 = vector.load %arg10[%c0_13, %c24, %c0_14] : memref<18x32x128xbf16, #tpu.memory_space<vmem>>, vector<18x1x128xbf16>
    tpu.vector_store %arg10[%c0_13, %c24, %c0_14], %15 {strides = array<i32>} : memref<18x32x128xbf16, #tpu.memory_space<vmem>>, vector<18x1x128xbf16>,
    %c0_i32 = arith.constant 0 : i32
    %18 = arith.cmpi eq, %arg1, %c0_i32 : i32
    %19 = arith.extui %18 : i1 to i32
    %c0_i32_15 = arith.constant 0 : i32
    %20 = arith.cmpi ne, %19, %c0_i32_15 : i32
    scf.if %20 {
      %cst_84 = arith.constant 0.000000e+00 : bf16
      %105 = vector.broadcast %cst_84 : bf16 to vector<1x32x128xbf16>
      %c0_85 = arith.constant 0 : index
      %c0_86 = arith.constant 0 : index
      %c0_87 = arith.constant 0 : index
      %106 = vector.load %arg10[%c0_85, %c0_86, %c0_87] : memref<18x32x128xbf16, #tpu.memory_space<vmem>>, vector<1x32x128xbf16>
      tpu.vector_store %arg10[%c0_85, %c0_86, %c0_87], %105 {strides = array<i32>} : memref<18x32x128xbf16, #tpu.memory_space<vmem>>, vector<1x32x128xbf16>,
    } else {
    }
    %c0_i32_16 = arith.constant 0 : i32
    %21 = arith.cmpi eq, %arg1, %c0_i32_16 : i32
    %22 = arith.extui %21 : i1 to i32
    %c0_i32_17 = arith.constant 0 : i32
    %23 = arith.cmpi ne, %22, %c0_i32_17 : i32
    scf.if %23 {
      %cst_84 = arith.constant 0.000000e+00 : bf16
      %105 = vector.broadcast %cst_84 : bf16 to vector<1x32x128xbf16>
      %c17 = arith.constant 17 : index
      %c0_85 = arith.constant 0 : index
      %c0_86 = arith.constant 0 : index
      %106 = vector.load %arg10[%c17, %c0_85, %c0_86] : memref<18x32x128xbf16, #tpu.memory_space<vmem>>, vector<1x32x128xbf16>
      tpu.vector_store %arg10[%c17, %c0_85, %c0_86], %105 {strides = array<i32>} : memref<18x32x128xbf16, #tpu.memory_space<vmem>>, vector<1x32x128xbf16>,
    } else {
    }
    %c0_18 = arith.constant 0 : index
    %c7_19 = arith.constant 7 : index
    %c0_20 = arith.constant 0 : index
    %24 = vector.load %arg10[%c0_18, %c7_19, %c0_20] : memref<18x32x128xbf16, #tpu.memory_space<vmem>>, vector<18x16x128xbf16>
    %25 = vector.extract_strided_slice %24 {offsets = [0, 0, 0], sizes = [16, 16, 128], strides = [1, 1, 1]} : vector<18x16x128xbf16> to vector<16x16x128xbf16>
    %26 = vector.shape_cast %25 : vector<16x16x128xbf16> to vector<256x128xbf16>
    %c0_21 = arith.constant 0 : index
    %c0_22 = arith.constant 0 : index
    %c0_23 = arith.constant 0 : index
    %c0_24 = arith.constant 0 : index
    %27 = vector.load %arg5[%c0_21, %c0_22, %c0_23, %c0_24] : memref<3x3x128x128xbf16, #tpu.memory_space<vmem>>, vector<1x1x128x128xbf16>
    %28 = vector.shape_cast %27 : vector<1x1x128x128xbf16> to vector<128x128xbf16>
    %cst_25 = arith.constant dense<0.000000e+00> : vector<256x128xf32>
    %29 = tpu.matmul %26, %28, %cst_25 {dimension_numbers = #tpu.dot_dimension_numbers<[1], [0], [0], [1], [0, 0, 1, 1], [], []>} : vector<256x128xbf16>, vector<128x128xbf16>, vector<256x128xf32> -> vector<256x128xf32>
    %30 = vector.extract_strided_slice %24 {offsets = [1, 0, 0], sizes = [16, 16, 128], strides = [1, 1, 1]} : vector<18x16x128xbf16> to vector<16x16x128xbf16>
    %31 = vector.shape_cast %30 : vector<16x16x128xbf16> to vector<256x128xbf16>
    %c1 = arith.constant 1 : index
    %c0_26 = arith.constant 0 : index
    %c0_27 = arith.constant 0 : index
    %c0_28 = arith.constant 0 : index
    %32 = vector.load %arg5[%c1, %c0_26, %c0_27, %c0_28] : memref<3x3x128x128xbf16, #tpu.memory_space<vmem>>, vector<1x1x128x128xbf16>
    %33 = vector.shape_cast %32 : vector<1x1x128x128xbf16> to vector<128x128xbf16>
    %cst_29 = arith.constant dense<0.000000e+00> : vector<256x128xf32>
    %34 = tpu.matmul %31, %33, %cst_29 {dimension_numbers = #tpu.dot_dimension_numbers<[1], [0], [0], [1], [0, 0, 1, 1], [], []>} : vector<256x128xbf16>, vector<128x128xbf16>, vector<256x128xf32> -> vector<256x128xf32>
    %35 = arith.addf %29, %34 : vector<256x128xf32>
    %36 = vector.extract_strided_slice %24 {offsets = [2, 0, 0], sizes = [16, 16, 128], strides = [1, 1, 1]} : vector<18x16x128xbf16> to vector<16x16x128xbf16>
    %37 = vector.shape_cast %36 : vector<16x16x128xbf16> to vector<256x128xbf16>
    %c2 = arith.constant 2 : index
    %c0_30 = arith.constant 0 : index
    %c0_31 = arith.constant 0 : index
    %c0_32 = arith.constant 0 : index
    %38 = vector.load %arg5[%c2, %c0_30, %c0_31, %c0_32] : memref<3x3x128x128xbf16, #tpu.memory_space<vmem>>, vector<1x1x128x128xbf16>
    %39 = vector.shape_cast %38 : vector<1x1x128x128xbf16> to vector<128x128xbf16>
    %cst_33 = arith.constant dense<0.000000e+00> : vector<256x128xf32>
    %40 = tpu.matmul %37, %39, %cst_33 {dimension_numbers = #tpu.dot_dimension_numbers<[1], [0], [0], [1], [0, 0, 1, 1], [], []>} : vector<256x128xbf16>, vector<128x128xbf16>, vector<256x128xf32> -> vector<256x128xf32>
    %41 = arith.addf %35, %40 : vector<256x128xf32>
    %c0_34 = arith.constant 0 : index
    %c8 = arith.constant 8 : index
    %c0_35 = arith.constant 0 : index
    %42 = vector.load %arg10[%c0_34, %c8, %c0_35] : memref<18x32x128xbf16, #tpu.memory_space<vmem>>, vector<18x16x128xbf16>
    %43 = vector.extract_strided_slice %42 {offsets = [0, 0, 0], sizes = [16, 16, 128], strides = [1, 1, 1]} : vector<18x16x128xbf16> to vector<16x16x128xbf16>
    %44 = vector.shape_cast %43 : vector<16x16x128xbf16> to vector<256x128xbf16>
    %c0_36 = arith.constant 0 : index
    %c1_37 = arith.constant 1 : index
    %c0_38 = arith.constant 0 : index
    %c0_39 = arith.constant 0 : index
    %45 = vector.load %arg5[%c0_36, %c1_37, %c0_38, %c0_39] : memref<3x3x128x128xbf16, #tpu.memory_space<vmem>>, vector<1x1x128x128xbf16>
    %46 = vector.shape_cast %45 : vector<1x1x128x128xbf16> to vector<128x128xbf16>
    %cst_40 = arith.constant dense<0.000000e+00> : vector<256x128xf32>
    %47 = tpu.matmul %44, %46, %cst_40 {dimension_numbers = #tpu.dot_dimension_numbers<[1], [0], [0], [1], [0, 0, 1, 1], [], []>} : vector<256x128xbf16>, vector<128x128xbf16>, vector<256x128xf32> -> vector<256x128xf32>
    %48 = arith.addf %41, %47 : vector<256x128xf32>
    %49 = vector.extract_strided_slice %42 {offsets = [1, 0, 0], sizes = [16, 16, 128], strides = [1, 1, 1]} : vector<18x16x128xbf16> to vector<16x16x128xbf16>
    %50 = vector.shape_cast %49 : vector<16x16x128xbf16> to vector<256x128xbf16>
    %c1_41 = arith.constant 1 : index
    %c1_42 = arith.constant 1 : index
    %c0_43 = arith.constant 0 : index
    %c0_44 = arith.constant 0 : index
    %51 = vector.load %arg5[%c1_41, %c1_42, %c0_43, %c0_44] : memref<3x3x128x128xbf16, #tpu.memory_space<vmem>>, vector<1x1x128x128xbf16>
    %52 = vector.shape_cast %51 : vector<1x1x128x128xbf16> to vector<128x128xbf16>
    %cst_45 = arith.constant dense<0.000000e+00> : vector<256x128xf32>
    %53 = tpu.matmul %50, %52, %cst_45 {dimension_numbers = #tpu.dot_dimension_numbers<[1], [0], [0], [1], [0, 0, 1, 1], [], []>} : vector<256x128xbf16>, vector<128x128xbf16>, vector<256x128xf32> -> vector<256x128xf32>
    %54 = arith.addf %48, %53 : vector<256x128xf32>
    %55 = vector.extract_strided_slice %42 {offsets = [2, 0, 0], sizes = [16, 16, 128], strides = [1, 1, 1]} : vector<18x16x128xbf16> to vector<16x16x128xbf16>
    %56 = vector.shape_cast %55 : vector<16x16x128xbf16> to vector<256x128xbf16>
    %c2_46 = arith.constant 2 : index
    %c1_47 = arith.constant 1 : index
    %c0_48 = arith.constant 0 : index
    %c0_49 = arith.constant 0 : index
    %57 = vector.load %arg5[%c2_46, %c1_47, %c0_48, %c0_49] : memref<3x3x128x128xbf16, #tpu.memory_space<vmem>>, vector<1x1x128x128xbf16>
    %58 = vector.shape_cast %57 : vector<1x1x128x128xbf16> to vector<128x128xbf16>
    %cst_50 = arith.constant dense<0.000000e+00> : vector<256x128xf32>
    %59 = tpu.matmul %56, %58, %cst_50 {dimension_numbers = #tpu.dot_dimension_numbers<[1], [0], [0], [1], [0, 0, 1, 1], [], []>} : vector<256x128xbf16>, vector<128x128xbf16>, vector<256x128xf32> -> vector<256x128xf32>
    %60 = arith.addf %54, %59 : vector<256x128xf32>
    %c0_51 = arith.constant 0 : index
    %c9 = arith.constant 9 : index
    %c0_52 = arith.constant 0 : index
    %61 = vector.load %arg10[%c0_51, %c9, %c0_52] : memref<18x32x128xbf16, #tpu.memory_space<vmem>>, vector<18x16x128xbf16>
    %62 = vector.extract_strided_slice %61 {offsets = [0, 0, 0], sizes = [16, 16, 128], strides = [1, 1, 1]} : vector<18x16x128xbf16> to vector<16x16x128xbf16>
    %63 = vector.shape_cast %62 : vector<16x16x128xbf16> to vector<256x128xbf16>
    %c0_53 = arith.constant 0 : index
    %c2_54 = arith.constant 2 : index
    %c0_55 = arith.constant 0 : index
    %c0_56 = arith.constant 0 : index
    %64 = vector.load %arg5[%c0_53, %c2_54, %c0_55, %c0_56] : memref<3x3x128x128xbf16, #tpu.memory_space<vmem>>, vector<1x1x128x128xbf16>
    %65 = vector.shape_cast %64 : vector<1x1x128x128xbf16> to vector<128x128xbf16>
    %cst_57 = arith.constant dense<0.000000e+00> : vector<256x128xf32>
    %66 = tpu.matmul %63, %65, %cst_57 {dimension_numbers = #tpu.dot_dimension_numbers<[1], [0], [0], [1], [0, 0, 1, 1], [], []>} : vector<256x128xbf16>, vector<128x128xbf16>, vector<256x128xf32> -> vector<256x128xf32>
    %67 = arith.addf %60, %66 : vector<256x128xf32>
    %68 = vector.extract_strided_slice %61 {offsets = [1, 0, 0], sizes = [16, 16, 128], strides = [1, 1, 1]} : vector<18x16x128xbf16> to vector<16x16x128xbf16>
    %69 = vector.shape_cast %68 : vector<16x16x128xbf16> to vector<256x128xbf16>
    %c1_58 = arith.constant 1 : index
    %c2_59 = arith.constant 2 : index
    %c0_60 = arith.constant 0 : index
    %c0_61 = arith.constant 0 : index
    %70 = vector.load %arg5[%c1_58, %c2_59, %c0_60, %c0_61] : memref<3x3x128x128xbf16, #tpu.memory_space<vmem>>, vector<1x1x128x128xbf16>
    %71 = vector.shape_cast %70 : vector<1x1x128x128xbf16> to vector<128x128xbf16>
    %cst_62 = arith.constant dense<0.000000e+00> : vector<256x128xf32>
    %72 = tpu.matmul %69, %71, %cst_62 {dimension_numbers = #tpu.dot_dimension_numbers<[1], [0], [0], [1], [0, 0, 1, 1], [], []>} : vector<256x128xbf16>, vector<128x128xbf16>, vector<256x128xf32> -> vector<256x128xf32>
    %73 = arith.addf %67, %72 : vector<256x128xf32>
    %74 = vector.extract_strided_slice %61 {offsets = [2, 0, 0], sizes = [16, 16, 128], strides = [1, 1, 1]} : vector<18x16x128xbf16> to vector<16x16x128xbf16>
    %75 = vector.shape_cast %74 : vector<16x16x128xbf16> to vector<256x128xbf16>
    %c2_63 = arith.constant 2 : index
    %c2_64 = arith.constant 2 : index
    %c0_65 = arith.constant 0 : index
    %c0_66 = arith.constant 0 : index
    %76 = vector.load %arg5[%c2_63, %c2_64, %c0_65, %c0_66] : memref<3x3x128x128xbf16, #tpu.memory_space<vmem>>, vector<1x1x128x128xbf16>
    %77 = vector.shape_cast %76 : vector<1x1x128x128xbf16> to vector<128x128xbf16>
    %cst_67 = arith.constant dense<0.000000e+00> : vector<256x128xf32>
    %78 = tpu.matmul %75, %77, %cst_67 {dimension_numbers = #tpu.dot_dimension_numbers<[1], [0], [0], [1], [0, 0, 1, 1], [], []>} : vector<256x128xbf16>, vector<128x128xbf16>, vector<256x128xf32> -> vector<256x128xf32>
    %79 = arith.addf %73, %78 : vector<256x128xf32>
    %c0_68 = arith.constant 0 : index
    %c0_69 = arith.constant 0 : index
    %80 = vector.load %arg6[%c0_68, %c0_69] : memref<1x128xf32, #tpu.memory_space<vmem>>, vector<1x128xf32>
    %81 = vector.broadcast %80 : vector<1x128xf32> to vector<256x128xf32>
    %82 = arith.addf %79, %81 : vector<256x128xf32>
    %cst_70 = arith.constant 0.000000e+00 : f32
    %83 = vector.broadcast %cst_70 : f32 to vector<256x128xf32>
    %84 = arith.maximumf %82, %83 : vector<256x128xf32>
    %85 = arith.truncf %84 : vector<256x128xf32> to vector<256x128xbf16>
    %c0_71 = arith.constant 0 : index
    %c0_72 = arith.constant 0 : index
    %86 = vector.load %arg7[%c0_71, %c0_72] : memref<128x128xbf16, #tpu.memory_space<vmem>>, vector<128x128xbf16>
    %cst_73 = arith.constant dense<0.000000e+00> : vector<256x128xf32>
    %87 = tpu.matmul %85, %86, %cst_73 {dimension_numbers = #tpu.dot_dimension_numbers<[1], [0], [0], [1], [0, 0, 1, 1], [], []>} : vector<256x128xbf16>, vector<128x128xbf16>, vector<256x128xf32> -> vector<256x128xf32>
    %c0_74 = arith.constant 0 : index
    %c0_75 = arith.constant 0 : index
    %88 = vector.load %arg8[%c0_74, %c0_75] : memref<1x128xf32, #tpu.memory_space<vmem>>, vector<1x128xf32>
    %89 = vector.broadcast %88 : vector<1x128xf32> to vector<256x128xf32>
    %90 = arith.addf %87, %89 : vector<256x128xf32>
    %c1_i32 = arith.constant 1 : i32
    %91 = arith.addi %0, %c1_i32 : i32
    %c0_76 = arith.constant 0 : index
    %92 = arith.index_cast %91 : i32 to index
    %c8_77 = arith.constant 8 : index
    %c0_78 = arith.constant 0 : index
    %93 = vector.load %arg2[%c0_76, %92, %c8_77, %c0_78] : memref<1x18x32x128xbf16, #tpu.memory_space<vmem>>, vector<1x16x16x128xbf16>
    %94 = vector.shape_cast %93 : vector<1x16x16x128xbf16> to vector<16x16x128xbf16>
    %95 = vector.shape_cast %94 : vector<16x16x128xbf16> to vector<256x128xbf16>
    %96 = arith.extf %95 : vector<256x128xbf16> to vector<256x128xf32>
    %97 = arith.addf %90, %96 : vector<256x128xf32>
    %cst_79 = arith.constant 0.000000e+00 : f32
    %98 = vector.broadcast %cst_79 : f32 to vector<256x128xf32>
    %99 = arith.maximumf %97, %98 : vector<256x128xf32>
    %100 = vector.shape_cast %99 : vector<256x128xf32> to vector<16x16x128xf32>
    %101 = arith.truncf %100 : vector<16x16x128xf32> to vector<16x16x128xbf16>
    %c0_80 = arith.constant 0 : index
    %c0_81 = arith.constant 0 : index
    %c0_82 = arith.constant 0 : index
    %c0_83 = arith.constant 0 : index
    %102 = vector.load %arg9[%c0_80, %c0_81, %c0_82, %c0_83] : memref<1x16x16x128xbf16, #tpu.memory_space<vmem>>, vector<1x16x16x128xbf16>
    %103 = vector.shape_cast %102 : vector<1x16x16x128xbf16> to vector<16x16x128xbf16>
    %104 = vector.shape_cast %101 : vector<16x16x128xbf16> to vector<1x16x16x128xbf16>
    tpu.vector_store %arg9[%c0_80, %c0_81, %c0_82, %c0_83], %104 {strides = array<i32>} : memref<1x16x16x128xbf16, #tpu.memory_space<vmem>>, vector<1x16x16x128xbf16>,
    return
  }
  func.func @transform_0(%arg0: i32, %arg1: i32) -> (i32, i32, i32, i32) {
    %c0_i32 = arith.constant 0 : i32
    %c0_i32_0 = arith.constant 0 : i32
    %c0_i32_1 = arith.constant 0 : i32
    %c0_i32_2 = arith.constant 0 : i32
    return %arg0, %c0_i32, %c0_i32_0, %c0_i32_1 : i32, i32, i32, i32
  }
  func.func @transform_1(%arg0: i32, %arg1: i32) -> (i32, i32) {
    %c0_i32 = arith.constant 0 : i32
    %c0_i32_0 = arith.constant 0 : i32
    %c0_i32_1 = arith.constant 0 : i32
    return %c0_i32, %c0_i32_0 : i32, i32
  }
  func.func @transform_2(%arg0: i32, %arg1: i32) -> (i32, i32) {
    %c0_i32 = arith.constant 0 : i32
    %c0_i32_0 = arith.constant 0 : i32
    %c0_i32_1 = arith.constant 0 : i32
    return %c0_i32, %c0_i32_0 : i32, i32
  }
  func.func @transform_3(%arg0: i32, %arg1: i32) -> (i32, i32, i32, i32) {
    %c0_i32 = arith.constant 0 : i32
    %c0_i32_0 = arith.constant 0 : i32
    %c0_i32_1 = arith.constant 0 : i32
    %c0_i32_2 = arith.constant 0 : i32
    %c0_i32_3 = arith.constant 0 : i32
    return %c0_i32, %c0_i32_0, %c0_i32_1, %c0_i32_2 : i32, i32, i32, i32
  }
  func.func @transform_4(%arg0: i32, %arg1: i32) -> (i32, i32) {
    %c0_i32 = arith.constant 0 : i32
    %c0_i32_0 = arith.constant 0 : i32
    %c0_i32_1 = arith.constant 0 : i32
    return %c0_i32, %c0_i32_0 : i32, i32
  }
  func.func @transform_5(%arg0: i32, %arg1: i32) -> (i32, i32) {
    %c0_i32 = arith.constant 0 : i32
    %c0_i32_0 = arith.constant 0 : i32
    %c0_i32_1 = arith.constant 0 : i32
    return %c0_i32, %c0_i32_0 : i32, i32
  }
  func.func @transform_6(%arg0: i32, %arg1: i32) -> (i32, i32) {
    %c0_i32 = arith.constant 0 : i32
    %c0_i32_0 = arith.constant 0 : i32
    %c0_i32_1 = arith.constant 0 : i32
    return %c0_i32, %c0_i32_0 : i32, i32
  }
  func.func @transform_7(%arg0: i32, %arg1: i32) -> (i32, i32, i32, i32) {
    %c0_i32 = arith.constant 0 : i32
    %c0_i32_0 = arith.constant 0 : i32
    %c0_i32_1 = arith.constant 0 : i32
    return %arg0, %arg1, %c0_i32, %c0_i32_0 : i32, i32, i32, i32
  }
}

module attributes {stable_mosaic.version = 11 : i64} {
  func.func @bottleneck_kernel(%arg0: i32, %arg1: i32, %arg2: memref<1x18x32x128xbf16, #tpu.memory_space<vmem>>, %arg3: memref<128x128xbf16, #tpu.memory_space<vmem>>, %arg4: memref<1x128xf32, #tpu.memory_space<vmem>>, %arg5: memref<3x3x128x128xbf16, #tpu.memory_space<vmem>>, %arg6: memref<1x128xf32, #tpu.memory_space<vmem>>, %arg7: memref<128x128xbf16, #tpu.memory_space<vmem>>, %arg8: memref<1x128xf32, #tpu.memory_space<vmem>>, %arg9: memref<1x16x16x128xbf16, #tpu.memory_space<vmem>>, %arg10: memref<18x32x128xbf16, #tpu.memory_space<vmem>>) attributes {dimension_semantics = [#tpu.dimension_semantics<parallel>, #tpu.dimension_semantics<parallel>], iteration_bounds = array<i64: 2, 1>, scalar_prefetch = 0 : i64, scratch_operands = 1 : i64, tpu.core_type = #tpu.core_type<tc>, window_params = [{transform_indices = @transform_0, window_bounds = array<i64: 1, 18, 32, 128>}, {pipeline_mode = #tpu.pipeline_mode<synchronous>, transform_indices = @transform_1, window_bounds = array<i64: 128, 128>}, {pipeline_mode = #tpu.pipeline_mode<synchronous>, transform_indices = @transform_2, window_bounds = array<i64: 1, 128>}, {pipeline_mode = #tpu.pipeline_mode<synchronous>, transform_indices = @transform_3, window_bounds = array<i64: 3, 3, 128, 128>}, {pipeline_mode = #tpu.pipeline_mode<synchronous>, transform_indices = @transform_4, window_bounds = array<i64: 1, 128>}, {pipeline_mode = #tpu.pipeline_mode<synchronous>, transform_indices = @transform_5, window_bounds = array<i64: 128, 128>}, {pipeline_mode = #tpu.pipeline_mode<synchronous>, transform_indices = @transform_6, window_bounds = array<i64: 1, 128>}, {transform_indices = @transform_7, window_bounds = array<i64: 1, 16, 16, 128>}]} {
    %c16_i32 = arith.constant 16 : i32
    %0 = arith.muli %arg1, %c16_i32 : i32
    %c0 = arith.constant 0 : index
    %1 = arith.index_cast %0 : i32 to index
    %c0_0 = arith.constant 0 : index
    %c0_1 = arith.constant 0 : index
    %2 = vector.load %arg2[%c0, %1, %c0_0, %c0_1] : memref<1x18x32x128xbf16, #tpu.memory_space<vmem>>, vector<1x18x32x128xbf16>
    %3 = vector.shape_cast %2 : vector<1x18x32x128xbf16> to vector<18x32x128xbf16>
    %4 = vector.shape_cast %3 : vector<18x32x128xbf16> to vector<576x128xbf16>
    %c0_2 = arith.constant 0 : index
    %c0_3 = arith.constant 0 : index
    %5 = vector.load %arg3[%c0_2, %c0_3] : memref<128x128xbf16, #tpu.memory_space<vmem>>, vector<128x128xbf16>
    %cst = arith.constant dense<0.000000e+00> : vector<576x128xf32>
    %6 = tpu.matmul %4, %5, %cst {dimension_numbers = #tpu.dot_dimension_numbers<[1], [0], [0], [1], [0, 0, 1, 1], [], []>} : vector<576x128xbf16>, vector<128x128xbf16>, vector<576x128xf32> -> vector<576x128xf32>
    %c0_4 = arith.constant 0 : index
    %c0_5 = arith.constant 0 : index
    %7 = vector.load %arg4[%c0_4, %c0_5] : memref<1x128xf32, #tpu.memory_space<vmem>>, vector<1x128xf32>
    %8 = vector.broadcast %7 : vector<1x128xf32> to vector<576x128xf32>
    %9 = arith.addf %6, %8 : vector<576x128xf32>
    %cst_6 = arith.constant 0.000000e+00 : f32
    %10 = vector.broadcast %cst_6 : f32 to vector<576x128xf32>
    %11 = arith.maximumf %9, %10 : vector<576x128xf32>
    %12 = vector.shape_cast %11 : vector<576x128xf32> to vector<18x32x128xf32>
    %13 = arith.truncf %12 : vector<18x32x128xf32> to vector<18x32x128xbf16>
    %c0_7 = arith.constant 0 : index
    %c0_8 = arith.constant 0 : index
    %c0_9 = arith.constant 0 : index
    %14 = vector.load %arg10[%c0_7, %c0_8, %c0_9] : memref<18x32x128xbf16, #tpu.memory_space<vmem>>, vector<18x32x128xbf16>
    tpu.vector_store %arg10[%c0_7, %c0_8, %c0_9], %13 {strides = array<i32>} : memref<18x32x128xbf16, #tpu.memory_space<vmem>>, vector<18x32x128xbf16>,
    %cst_10 = arith.constant 0.000000e+00 : bf16
    %15 = vector.broadcast %cst_10 : bf16 to vector<18x1x128xbf16>
    %c0_11 = arith.constant 0 : index
    %c7 = arith.constant 7 : index
    %c0_12 = arith.constant 0 : index
    %16 = vector.load %arg10[%c0_11, %c7, %c0_12] : memref<18x32x128xbf16, #tpu.memory_space<vmem>>, vector<18x1x128xbf16>
    tpu.vector_store %arg10[%c0_11, %c7, %c0_12], %15 {strides = array<i32>} : memref<18x32x128xbf16, #tpu.memory_space<vmem>>, vector<18x1x128xbf16>,
    %c0_13 = arith.constant 0 : index
    %c24 = arith.constant 24 : index
    %c0_14 = arith.constant 0 : index
    %17 = vector.load %arg10[%c0_13, %c24, %c0_14] : memref<18x32x128xbf16, #tpu.memory_space<vmem>>, vector<18x1x128xbf16>
    tpu.vector_store %arg10[%c0_13, %c24, %c0_14], %15 {strides = array<i32>} : memref<18x32x128xbf16, #tpu.memory_space<vmem>>, vector<18x1x128xbf16>,
    %c0_i32 = arith.constant 0 : i32
    %18 = arith.cmpi eq, %arg1, %c0_i32 : i32
    %19 = arith.extui %18 : i1 to i32
    %c0_i32_15 = arith.constant 0 : i32
    %20 = arith.cmpi ne, %19, %c0_i32_15 : i32
    scf.if %20 {
      %cst_84 = arith.constant 0.000000e+00 : bf16
      %105 = vector.broadcast %cst_84 : bf16 to vector<1x32x128xbf16>
      %c0_85 = arith.constant 0 : index
      %c0_86 = arith.constant 0 : index
      %c0_87 = arith.constant 0 : index
      %106 = vector.load %arg10[%c0_85, %c0_86, %c0_87] : memref<18x32x128xbf16, #tpu.memory_space<vmem>>, vector<1x32x128xbf16>
      tpu.vector_store %arg10[%c0_85, %c0_86, %c0_87], %105 {strides = array<i32>} : memref<18x32x128xbf16, #tpu.memory_space<vmem>>, vector<1x32x128xbf16>,
    } else {
    }
    %c0_i32_16 = arith.constant 0 : i32
    %21 = arith.cmpi eq, %arg1, %c0_i32_16 : i32
    %22 = arith.extui %21 : i1 to i32
    %c0_i32_17 = arith.constant 0 : i32
    %23 = arith.cmpi ne, %22, %c0_i32_17 : i32
    scf.if %23 {
      %cst_84 = arith.constant 0.000000e+00 : bf16
      %105 = vector.broadcast %cst_84 : bf16 to vector<1x32x128xbf16>
      %c17 = arith.constant 17 : index
      %c0_85 = arith.constant 0 : index
      %c0_86 = arith.constant 0 : index
      %106 = vector.load %arg10[%c17, %c0_85, %c0_86] : memref<18x32x128xbf16, #tpu.memory_space<vmem>>, vector<1x32x128xbf16>
      tpu.vector_store %arg10[%c17, %c0_85, %c0_86], %105 {strides = array<i32>} : memref<18x32x128xbf16, #tpu.memory_space<vmem>>, vector<1x32x128xbf16>,
    } else {
    }
    %c0_18 = arith.constant 0 : index
    %c7_19 = arith.constant 7 : index
    %c0_20 = arith.constant 0 : index
    %24 = vector.load %arg10[%c0_18, %c7_19, %c0_20] : memref<18x32x128xbf16, #tpu.memory_space<vmem>>, vector<18x16x128xbf16>
    %25 = vector.extract_strided_slice %24 {offsets = [0, 0, 0], sizes = [16, 16, 128], strides = [1, 1, 1]} : vector<18x16x128xbf16> to vector<16x16x128xbf16>
    %26 = vector.shape_cast %25 : vector<16x16x128xbf16> to vector<256x128xbf16>
    %c0_21 = arith.constant 0 : index
    %c0_22 = arith.constant 0 : index
    %c0_23 = arith.constant 0 : index
    %c0_24 = arith.constant 0 : index
    %27 = vector.load %arg5[%c0_21, %c0_22, %c0_23, %c0_24] : memref<3x3x128x128xbf16, #tpu.memory_space<vmem>>, vector<1x1x128x128xbf16>
    %28 = vector.shape_cast %27 : vector<1x1x128x128xbf16> to vector<128x128xbf16>
    %cst_25 = arith.constant dense<0.000000e+00> : vector<256x128xf32>
    %29 = tpu.matmul %26, %28, %cst_25 {dimension_numbers = #tpu.dot_dimension_numbers<[1], [0], [0], [1], [0, 0, 1, 1], [], []>} : vector<256x128xbf16>, vector<128x128xbf16>, vector<256x128xf32> -> vector<256x128xf32>
    %30 = vector.extract_strided_slice %24 {offsets = [1, 0, 0], sizes = [16, 16, 128], strides = [1, 1, 1]} : vector<18x16x128xbf16> to vector<16x16x128xbf16>
    %31 = vector.shape_cast %30 : vector<16x16x128xbf16> to vector<256x128xbf16>
    %c1 = arith.constant 1 : index
    %c0_26 = arith.constant 0 : index
    %c0_27 = arith.constant 0 : index
    %c0_28 = arith.constant 0 : index
    %32 = vector.load %arg5[%c1, %c0_26, %c0_27, %c0_28] : memref<3x3x128x128xbf16, #tpu.memory_space<vmem>>, vector<1x1x128x128xbf16>
    %33 = vector.shape_cast %32 : vector<1x1x128x128xbf16> to vector<128x128xbf16>
    %cst_29 = arith.constant dense<0.000000e+00> : vector<256x128xf32>
    %34 = tpu.matmul %31, %33, %cst_29 {dimension_numbers = #tpu.dot_dimension_numbers<[1], [0], [0], [1], [0, 0, 1, 1], [], []>} : vector<256x128xbf16>, vector<128x128xbf16>, vector<256x128xf32> -> vector<256x128xf32>
    %35 = arith.addf %29, %34 : vector<256x128xf32>
    %36 = vector.extract_strided_slice %24 {offsets = [2, 0, 0], sizes = [16, 16, 128], strides = [1, 1, 1]} : vector<18x16x128xbf16> to vector<16x16x128xbf16>
    %37 = vector.shape_cast %36 : vector<16x16x128xbf16> to vector<256x128xbf16>
    %c2 = arith.constant 2 : index
    %c0_30 = arith.constant 0 : index
    %c0_31 = arith.constant 0 : index
    %c0_32 = arith.constant 0 : index
    %38 = vector.load %arg5[%c2, %c0_30, %c0_31, %c0_32] : memref<3x3x128x128xbf16, #tpu.memory_space<vmem>>, vector<1x1x128x128xbf16>
    %39 = vector.shape_cast %38 : vector<1x1x128x128xbf16> to vector<128x128xbf16>
    %cst_33 = arith.constant dense<0.000000e+00> : vector<256x128xf32>
    %40 = tpu.matmul %37, %39, %cst_33 {dimension_numbers = #tpu.dot_dimension_numbers<[1], [0], [0], [1], [0, 0, 1, 1], [], []>} : vector<256x128xbf16>, vector<128x128xbf16>, vector<256x128xf32> -> vector<256x128xf32>
    %41 = arith.addf %35, %40 : vector<256x128xf32>
    %c0_34 = arith.constant 0 : index
    %c8 = arith.constant 8 : index
    %c0_35 = arith.constant 0 : index
    %42 = vector.load %arg10[%c0_34, %c8, %c0_35] : memref<18x32x128xbf16, #tpu.memory_space<vmem>>, vector<18x16x128xbf16>
    %43 = vector.extract_strided_slice %42 {offsets = [0, 0, 0], sizes = [16, 16, 128], strides = [1, 1, 1]} : vector<18x16x128xbf16> to vector<16x16x128xbf16>
    %44 = vector.shape_cast %43 : vector<16x16x128xbf16> to vector<256x128xbf16>
    %c0_36 = arith.constant 0 : index
    %c1_37 = arith.constant 1 : index
    %c0_38 = arith.constant 0 : index
    %c0_39 = arith.constant 0 : index
    %45 = vector.load %arg5[%c0_36, %c1_37, %c0_38, %c0_39] : memref<3x3x128x128xbf16, #tpu.memory_space<vmem>>, vector<1x1x128x128xbf16>
    %46 = vector.shape_cast %45 : vector<1x1x128x128xbf16> to vector<128x128xbf16>
    %cst_40 = arith.constant dense<0.000000e+00> : vector<256x128xf32>
    %47 = tpu.matmul %44, %46, %cst_40 {dimension_numbers = #tpu.dot_dimension_numbers<[1], [0], [0], [1], [0, 0, 1, 1], [], []>} : vector<256x128xbf16>, vector<128x128xbf16>, vector<256x128xf32> -> vector<256x128xf32>
    %48 = arith.addf %41, %47 : vector<256x128xf32>
    %49 = vector.extract_strided_slice %42 {offsets = [1, 0, 0], sizes = [16, 16, 128], strides = [1, 1, 1]} : vector<18x16x128xbf16> to vector<16x16x128xbf16>
    %50 = vector.shape_cast %49 : vector<16x16x128xbf16> to vector<256x128xbf16>
    %c1_41 = arith.constant 1 : index
    %c1_42 = arith.constant 1 : index
    %c0_43 = arith.constant 0 : index
    %c0_44 = arith.constant 0 : index
    %51 = vector.load %arg5[%c1_41, %c1_42, %c0_43, %c0_44] : memref<3x3x128x128xbf16, #tpu.memory_space<vmem>>, vector<1x1x128x128xbf16>
    %52 = vector.shape_cast %51 : vector<1x1x128x128xbf16> to vector<128x128xbf16>
    %cst_45 = arith.constant dense<0.000000e+00> : vector<256x128xf32>
    %53 = tpu.matmul %50, %52, %cst_45 {dimension_numbers = #tpu.dot_dimension_numbers<[1], [0], [0], [1], [0, 0, 1, 1], [], []>} : vector<256x128xbf16>, vector<128x128xbf16>, vector<256x128xf32> -> vector<256x128xf32>
    %54 = arith.addf %48, %53 : vector<256x128xf32>
    %55 = vector.extract_strided_slice %42 {offsets = [2, 0, 0], sizes = [16, 16, 128], strides = [1, 1, 1]} : vector<18x16x128xbf16> to vector<16x16x128xbf16>
    %56 = vector.shape_cast %55 : vector<16x16x128xbf16> to vector<256x128xbf16>
    %c2_46 = arith.constant 2 : index
    %c1_47 = arith.constant 1 : index
    %c0_48 = arith.constant 0 : index
    %c0_49 = arith.constant 0 : index
    %57 = vector.load %arg5[%c2_46, %c1_47, %c0_48, %c0_49] : memref<3x3x128x128xbf16, #tpu.memory_space<vmem>>, vector<1x1x128x128xbf16>
    %58 = vector.shape_cast %57 : vector<1x1x128x128xbf16> to vector<128x128xbf16>
    %cst_50 = arith.constant dense<0.000000e+00> : vector<256x128xf32>
    %59 = tpu.matmul %56, %58, %cst_50 {dimension_numbers = #tpu.dot_dimension_numbers<[1], [0], [0], [1], [0, 0, 1, 1], [], []>} : vector<256x128xbf16>, vector<128x128xbf16>, vector<256x128xf32> -> vector<256x128xf32>
    %60 = arith.addf %54, %59 : vector<256x128xf32>
    %c0_51 = arith.constant 0 : index
    %c9 = arith.constant 9 : index
    %c0_52 = arith.constant 0 : index
    %61 = vector.load %arg10[%c0_51, %c9, %c0_52] : memref<18x32x128xbf16, #tpu.memory_space<vmem>>, vector<18x16x128xbf16>
    %62 = vector.extract_strided_slice %61 {offsets = [0, 0, 0], sizes = [16, 16, 128], strides = [1, 1, 1]} : vector<18x16x128xbf16> to vector<16x16x128xbf16>
    %63 = vector.shape_cast %62 : vector<16x16x128xbf16> to vector<256x128xbf16>
    %c0_53 = arith.constant 0 : index
    %c2_54 = arith.constant 2 : index
    %c0_55 = arith.constant 0 : index
    %c0_56 = arith.constant 0 : index
    %64 = vector.load %arg5[%c0_53, %c2_54, %c0_55, %c0_56] : memref<3x3x128x128xbf16, #tpu.memory_space<vmem>>, vector<1x1x128x128xbf16>
    %65 = vector.shape_cast %64 : vector<1x1x128x128xbf16> to vector<128x128xbf16>
    %cst_57 = arith.constant dense<0.000000e+00> : vector<256x128xf32>
    %66 = tpu.matmul %63, %65, %cst_57 {dimension_numbers = #tpu.dot_dimension_numbers<[1], [0], [0], [1], [0, 0, 1, 1], [], []>} : vector<256x128xbf16>, vector<128x128xbf16>, vector<256x128xf32> -> vector<256x128xf32>
    %67 = arith.addf %60, %66 : vector<256x128xf32>
    %68 = vector.extract_strided_slice %61 {offsets = [1, 0, 0], sizes = [16, 16, 128], strides = [1, 1, 1]} : vector<18x16x128xbf16> to vector<16x16x128xbf16>
    %69 = vector.shape_cast %68 : vector<16x16x128xbf16> to vector<256x128xbf16>
    %c1_58 = arith.constant 1 : index
    %c2_59 = arith.constant 2 : index
    %c0_60 = arith.constant 0 : index
    %c0_61 = arith.constant 0 : index
    %70 = vector.load %arg5[%c1_58, %c2_59, %c0_60, %c0_61] : memref<3x3x128x128xbf16, #tpu.memory_space<vmem>>, vector<1x1x128x128xbf16>
    %71 = vector.shape_cast %70 : vector<1x1x128x128xbf16> to vector<128x128xbf16>
    %cst_62 = arith.constant dense<0.000000e+00> : vector<256x128xf32>
    %72 = tpu.matmul %69, %71, %cst_62 {dimension_numbers = #tpu.dot_dimension_numbers<[1], [0], [0], [1], [0, 0, 1, 1], [], []>} : vector<256x128xbf16>, vector<128x128xbf16>, vector<256x128xf32> -> vector<256x128xf32>
    %73 = arith.addf %67, %72 : vector<256x128xf32>
    %74 = vector.extract_strided_slice %61 {offsets = [2, 0, 0], sizes = [16, 16, 128], strides = [1, 1, 1]} : vector<18x16x128xbf16> to vector<16x16x128xbf16>
    %75 = vector.shape_cast %74 : vector<16x16x128xbf16> to vector<256x128xbf16>
    %c2_63 = arith.constant 2 : index
    %c2_64 = arith.constant 2 : index
    %c0_65 = arith.constant 0 : index
    %c0_66 = arith.constant 0 : index
    %76 = vector.load %arg5[%c2_63, %c2_64, %c0_65, %c0_66] : memref<3x3x128x128xbf16, #tpu.memory_space<vmem>>, vector<1x1x128x128xbf16>
    %77 = vector.shape_cast %76 : vector<1x1x128x128xbf16> to vector<128x128xbf16>
    %cst_67 = arith.constant dense<0.000000e+00> : vector<256x128xf32>
    %78 = tpu.matmul %75, %77, %cst_67 {dimension_numbers = #tpu.dot_dimension_numbers<[1], [0], [0], [1], [0, 0, 1, 1], [], []>} : vector<256x128xbf16>, vector<128x128xbf16>, vector<256x128xf32> -> vector<256x128xf32>
    %79 = arith.addf %73, %78 : vector<256x128xf32>
    %c0_68 = arith.constant 0 : index
    %c0_69 = arith.constant 0 : index
    %80 = vector.load %arg6[%c0_68, %c0_69] : memref<1x128xf32, #tpu.memory_space<vmem>>, vector<1x128xf32>
    %81 = vector.broadcast %80 : vector<1x128xf32> to vector<256x128xf32>
    %82 = arith.addf %79, %81 : vector<256x128xf32>
    %cst_70 = arith.constant 0.000000e+00 : f32
    %83 = vector.broadcast %cst_70 : f32 to vector<256x128xf32>
    %84 = arith.maximumf %82, %83 : vector<256x128xf32>
    %85 = arith.truncf %84 : vector<256x128xf32> to vector<256x128xbf16>
    %c0_71 = arith.constant 0 : index
    %c0_72 = arith.constant 0 : index
    %86 = vector.load %arg7[%c0_71, %c0_72] : memref<128x128xbf16, #tpu.memory_space<vmem>>, vector<128x128xbf16>
    %cst_73 = arith.constant dense<0.000000e+00> : vector<256x128xf32>
    %87 = tpu.matmul %85, %86, %cst_73 {dimension_numbers = #tpu.dot_dimension_numbers<[1], [0], [0], [1], [0, 0, 1, 1], [], []>} : vector<256x128xbf16>, vector<128x128xbf16>, vector<256x128xf32> -> vector<256x128xf32>
    %c0_74 = arith.constant 0 : index
    %c0_75 = arith.constant 0 : index
    %88 = vector.load %arg8[%c0_74, %c0_75] : memref<1x128xf32, #tpu.memory_space<vmem>>, vector<1x128xf32>
    %89 = vector.broadcast %88 : vector<1x128xf32> to vector<256x128xf32>
    %90 = arith.addf %87, %89 : vector<256x128xf32>
    %c1_i32 = arith.constant 1 : i32
    %91 = arith.addi %0, %c1_i32 : i32
    %c0_76 = arith.constant 0 : index
    %92 = arith.index_cast %91 : i32 to index
    %c8_77 = arith.constant 8 : index
    %c0_78 = arith.constant 0 : index
    %93 = vector.load %arg2[%c0_76, %92, %c8_77, %c0_78] : memref<1x18x32x128xbf16, #tpu.memory_space<vmem>>, vector<1x16x16x128xbf16>
    %94 = vector.shape_cast %93 : vector<1x16x16x128xbf16> to vector<16x16x128xbf16>
    %95 = vector.shape_cast %94 : vector<16x16x128xbf16> to vector<256x128xbf16>
    %96 = arith.extf %95 : vector<256x128xbf16> to vector<256x128xf32>
    %97 = arith.addf %90, %96 : vector<256x128xf32>
    %cst_79 = arith.constant 0.000000e+00 : f32
    %98 = vector.broadcast %cst_79 : f32 to vector<256x128xf32>
    %99 = arith.maximumf %97, %98 : vector<256x128xf32>
    %100 = vector.shape_cast %99 : vector<256x128xf32> to vector<16x16x128xf32>
    %101 = arith.truncf %100 : vector<16x16x128xf32> to vector<16x16x128xbf16>
    %c0_80 = arith.constant 0 : index
    %c0_81 = arith.constant 0 : index
    %c0_82 = arith.constant 0 : index
    %c0_83 = arith.constant 0 : index
    %102 = vector.load %arg9[%c0_80, %c0_81, %c0_82, %c0_83] : memref<1x16x16x128xbf16, #tpu.memory_space<vmem>>, vector<1x16x16x128xbf16>
    %103 = vector.shape_cast %102 : vector<1x16x16x128xbf16> to vector<16x16x128xbf16>
    %104 = vector.shape_cast %101 : vector<16x16x128xbf16> to vector<1x16x16x128xbf16>
    tpu.vector_store %arg9[%c0_80, %c0_81, %c0_82, %c0_83], %104 {strides = array<i32>} : memref<1x16x16x128xbf16, #tpu.memory_space<vmem>>, vector<1x16x16x128xbf16>,
    return
  }
  func.func @transform_0(%arg0: i32, %arg1: i32) -> (i32, i32, i32, i32) {
    %c0_i32 = arith.constant 0 : i32
    %c0_i32_0 = arith.constant 0 : i32
    %c0_i32_1 = arith.constant 0 : i32
    %c0_i32_2 = arith.constant 0 : i32
    return %arg0, %c0_i32, %c0_i32_0, %c0_i32_1 : i32, i32, i32, i32
  }
  func.func @transform_1(%arg0: i32, %arg1: i32) -> (i32, i32) {
    %c0_i32 = arith.constant 0 : i32
    %c0_i32_0 = arith.constant 0 : i32
    %c0_i32_1 = arith.constant 0 : i32
    return %c0_i32, %c0_i32_0 : i32, i32
  }
  func.func @transform_2(%arg0: i32, %arg1: i32) -> (i32, i32) {
    %c0_i32 = arith.constant 0 : i32
    %c0_i32_0 = arith.constant 0 : i32
    %c0_i32_1 = arith.constant 0 : i32
    return %c0_i32, %c0_i32_0 : i32, i32
  }
  func.func @transform_3(%arg0: i32, %arg1: i32) -> (i32, i32, i32, i32) {
    %c0_i32 = arith.constant 0 : i32
    %c0_i32_0 = arith.constant 0 : i32
    %c0_i32_1 = arith.constant 0 : i32
    %c0_i32_2 = arith.constant 0 : i32
    %c0_i32_3 = arith.constant 0 : i32
    return %c0_i32, %c0_i32_0, %c0_i32_1, %c0_i32_2 : i32, i32, i32, i32
  }
  func.func @transform_4(%arg0: i32, %arg1: i32) -> (i32, i32) {
    %c0_i32 = arith.constant 0 : i32
    %c0_i32_0 = arith.constant 0 : i32
    %c0_i32_1 = arith.constant 0 : i32
    return %c0_i32, %c0_i32_0 : i32, i32
  }
  func.func @transform_5(%arg0: i32, %arg1: i32) -> (i32, i32) {
    %c0_i32 = arith.constant 0 : i32
    %c0_i32_0 = arith.constant 0 : i32
    %c0_i32_1 = arith.constant 0 : i32
    return %c0_i32, %c0_i32_0 : i32, i32
  }
  func.func @transform_6(%arg0: i32, %arg1: i32) -> (i32, i32) {
    %c0_i32 = arith.constant 0 : i32
    %c0_i32_0 = arith.constant 0 : i32
    %c0_i32_1 = arith.constant 0 : i32
    return %c0_i32, %c0_i32_0 : i32, i32
  }
  func.func @transform_7(%arg0: i32, %arg1: i32) -> (i32, i32, i32, i32) {
    %c0_i32 = arith.constant 0 : i32
    %c0_i32_0 = arith.constant 0 : i32
    %c0_i32_1 = arith.constant 0 : i32
    return %arg0, %arg1, %c0_i32, %c0_i32_0 : i32, i32, i32, i32
  }
}

</mosaic_0001>

<bundles_post_ra>
// kernel: tpu_custom_call.1
= control target key start
LH: loop header
LB: loop body
LE: loop exit
PB: predicated region body
PF: predicated region fallthrough
CT: control target
= control target key end

     0   :  { %s7131_s0 = inlined_call_operand.hbm [shape: bf16[2,18,32,128], index: 0, kind: input, shape index: {}]   ;;  %s7132_s1 = inlined_call_operand.hbm [shape: bf16[128,128], index: 1, kind: input, shape index: {}]   ;;  %s7133_s2 = inlined_call_operand.vmem [shape: f32[1,128], index: 2, kind: input, shape index: {}]   ;;  %s7134_s3 = inlined_call_operand.hbm [shape: bf16[3,3,128,128], index: 3, kind: input, shape index: {}]   ;;  %s7135_s4 = inlined_call_operand.vmem [shape: f32[1,128], index: 4, kind: input, shape index: {}]   ;;  %s7136_s5 = inlined_call_operand.hbm [shape: bf16[128,128], index: 5, kind: input, shape index: {}]   ;;  %s7137_s6 = inlined_call_operand.vmem [shape: f32[1,128], index: 6, kind: input, shape index: {}]   ;;  %s7138_s7 = inlined_call_operand.hbm [shape: bf16[2,16,16,128], index: 7, kind: output, shape index: {}]  }
   0x1   :  { %7146 = sst [smem:[#allocation35_spill]] %s7132_s1 }
   0x2   :  { %12 = vsyncpa [#allocation4], 0 }
   0x3   :  { %13 = vsyncpa [#allocation7], 0 }
   0x4   :  { %14 = vsyncpa [#allocation10], 0 }
   0x5   :  { %15 = vsyncpa [#allocation5], 0 }
   0x6   :  { %17 = vsyncpa [#allocation5 + $0x1], 0  ;;  %s6075_s24 = smov 0   ;;  %s6077_s25 = smov 0  }
   0x7   :  { %s6079_s26 = smov 0   ;;  %s6081_s27 = smov 0  }
   0x8   :  { %s6083_s28 = smov 0   ;;  %s6085_s29 = smov 0  }
   0x9 LB: > { %7147 = sst [smem:[#allocation16_spill]] %s6012_s26  ;;  %s4608_s30 = sadd.s32 4294967295, %s6024_s29   ;;  %s6024_s29 = sphi %s6085_s29, %s23_s29   ;;  %s6020_s28 = sphi %s6083_s28, %s7207_s28   ;;  %s6016_s27 = sphi %s6081_s27, %s7203_s27   ;;  %s6012_s26 = sphi %s6079_s26, %s7202_s26   ;;  %s6008_s25 = sphi %s6077_s25, %s7206_s25   ;;  %s6004_s24 = sphi %s6075_s24, %s7205_s24  }
   0xa   : > { %7148 = sst [smem:[#allocation17_spill]] %s6020_s28  ;;  %p4610_p0 = scmp.ge.s32.totalorder %s6024_s29, 1 }
   0xb   : > { %p6107_p1 = scmp.eq.s32.totalorder %s4608_s30, 0  ;;  %p6111_p2 = scmp.eq.s32.totalorder %s4608_s30, 1 }
   0xc   : > { %p220_p3 = scmp.lt.s32.totalorder %s6024_s29, 3  ;;  %s7151_s1 = sld [smem:[#allocation35_spill]] }
   0xd   : > { %s6026_s14 = smov [#allocation6]   ;;  %s7139_s17 = smov 64  }
   0xe   : > { %p6119_p4 = pnand %p4610_p0, %p220_p3  ;;  %s250_s15 = sshll.u32 %s6026_s14, 4  ;;  %s251_s15 = int_to_ptr.vmem [resolvable:$true] %s250_s15 }
   0xf   : > { %s7141_s18 = smov 4   ;;  %s4609_s19 = sadd.s32 4294967294, %s6024_s29  }
  0x10   : > { %p5729_p5 = pneg %p6119_p4  ;;  %s35_s20 = sadd.s32 1, %s6020_s28 }
  0x11   : > { %s42_s21 = sadd.s32 1, %s6012_s26  ;;  %p37_p7 = scmp.ge.s32.totalorder %s35_s20, 2 }
  0x12   : > { %s248_s12 = sshll.u32 %s7151_s1, 4  ;;  %p6130_p6 = pnand %p5729_p5, %p6107_p1  ;;  %s249_s12 = int_to_ptr.hbm [resolvable:$true] %s248_s12 }
  0x13   : > { %p55_p8 = scmp.ne.s32.totalorder %s6008_s25, %s6004_s24  ;;  %p206_p9 = scmp.ne.s32.totalorder %s6012_s26, %s6008_s25 }
  0x14   : > { %5735 = dma.hbm_to_vmem [thread:$0]  (!%p6130_p6), %s249_s12, 1024, %s251_s15, [#allocation7], %s7139_s17, %s7139_s17, %s7141_s18  }
  0x15   : > { %p213_p10 = scmp.eq.s32.totalorder %s4609_s19, 1  ;;  %s7209_s20 = smov (%p37_p7, %s35_s20), 0 }
  0x16   : > { %7154 = sst [smem:[#allocation18_spill]] %s7209_s20  ;;  %p6150_p11 = por %p6107_p1, %p55_p8 }
  0x17   : > { %p6156_p12 = por %p6111_p2, %p206_p9  ;;  %s39_s30 = ssub.s32 %s6020_s28, %s7209_s20 }
  0x18   : > { %p6162_p13 = por %p213_p10, %p55_p8  ;;  %p40_p0 = scmp.eq.s32.totalorder %s39_s30, 0 }
  0x19   : > { %s5712_s11 = smul.u32 288, %s6016_s27  ;;  %p6172_p3 = pnand %p5729_p5, %p6150_p11 }
  0x1a   : > { %s7157_s10 = scalar_select %p6162_p13, 1, 0 }
  0x1b   : > { %s6177_s9 = scalar_select %p40_p0, %s6012_s26, %s42_s21  }
  0x1c   : > { %s233_s19 = scalar_lea.hbm %s7131_s0, %s5712_s11  ;;  %s6029_s17 = smov [#allocation3]  }
  0x1d   : > { %7159 = sst [smem:[#allocation19_spill]] %s6177_s9  ;;  %s236_s18 = sshll.u32 %s6029_s17, 4  ;;  %s237_s18 = int_to_ptr.vmem [resolvable:$true] %s236_s18 }
  0x1e   : > { %s234_s1 = sshll.u32 %s233_s19, 4  ;;  %p5848_p5 = pneg %p6172_p3  ;;  %s235_s1 = int_to_ptr.hbm [resolvable:$true] %s234_s1 }
  0x1f   : > { %s5844_s30 = sshra.s32 %s235_s1, 4  ;;  %s5851_s9 = scalar_lea.hbm %s7131_s0, 576  ;;  %s5845_s30 = int_to_ptr.hbm [resolvable:$true] %s5844_s30 }
  0x20   : > { %s5846_s20 = scalar_lea.hbm %s5845_s30, 288  ;;  %p5852_p9 = scmp.lt.s32.totalorder %s5845_s30, %s7131_s0 }
  0x21   : > { %p5847_p2 = scmp.ne.s32.totalorder %s5845_s30, %s5846_s20  ;;  %p5853_p10 = scmp.lt.s32.totalorder %s5851_s9, %s5846_s20 }
  0x23   : > { %p5849_p7 = pnand %p5848_p5, %p5847_p2  ;;  %p5854_p0 = por %p5853_p10, %p5852_p9 }
  0x25   : > { %p5850_p8 = pneg %p5849_p7 }
  0x27   : > { %p5855_p13 = pnand %p5854_p0, %p5850_p8 }
  0x29   : > { %5858 = shalt.err (!%p5855_p13)
}
  0x2a   : > { %s7160_s17 = smov 4   ;;  %s7161_s11 = smov 64  }
  0x2b   : > { %5732 = dma.hbm_to_vmem [thread:$0]  (!%p6172_p3), %s235_s1, 4608, %s237_s18, [#allocation4], %s7161_s11, %s7161_s11, %s7160_s17  }
  0x2c   : > { %s265_s28 = sshll.u32 %s7134_s3, 4  ;;  %s6030_s21 = smov [#allocation8]   ;;  %s266_s28 = int_to_ptr.hbm [resolvable:$true] %s265_s28 }
  0x2d   : > { %s267_s26 = sshll.u32 %s6030_s21, 4  ;;  %s282_s30 = sshll.u32 %s7136_s5, 4  ;;  %s268_s26 = int_to_ptr.vmem [resolvable:$true] %s267_s26  ;;  %s283_s30 = int_to_ptr.hbm [resolvable:$true] %s282_s30 }
  0x2e   : > { %5738 = dma.hbm_to_vmem [thread:$0]  (!%p6130_p6), %s266_s28, 9216, %s268_s26, [#allocation7], %s7161_s11, %s7161_s11, %s7160_s17  }
  0x2f   : > { %s6031_s12 = smov [#allocation9]   ;;  %303 = sbr.rel (%p6119_p4) target bundleno = 1589 (0x635), region = 48 }
  0x30   : > { %s284_s1 = sshll.u32 %s6031_s12, 4  ;;  %s285_s1 = int_to_ptr.vmem [resolvable:$true] %s284_s1 }
  0x31   : > { %5741 = dma.hbm_to_vmem [thread:$0]  (!%p6130_p6), %s283_s30, 1024, %s285_s1, [#allocation10], %s7161_s11, %s7161_s11, %s7160_s17  }
  0x34   : > { %5987 = dma.done.wait (%p6150_p11), [#allocation4], 4608  }
  0x35   : > { %5989 = vsyncadd (%p6150_p11), [#allocation4], 4294962688 }
  0x36   : > { %5991 = dma.done.wait (%p6107_p1), [#allocation7], 10240  }
  0x37   : > { %5993 = vsyncadd (%p6107_p1), [#allocation7], 4294957056 }
  0x38   : > { %5995 = dma.done.wait (%p6107_p1), [#allocation10], 1024  }
  0x39   : > { %5997 = vsyncadd (%p6107_p1), [#allocation10], 4294966272  ;;  %v5286_v0 = vld [vmem:[#allocation6 + $0x38] sm:$0xff]  ;;  %v5285_v1 = vld [vmem:[#allocation6 + $0x30] sm:$0xff]  ;;  %v6032_v30 = vmov 0   ;;  %vm1113_vm0 = vcmask 1043459  }
  0x3a   : > { %708 = vmatpush.bf16.msra.mxu0 %v5286_v0  ;;  %5697 = vmatpush.bf16.msra.mxu2 %v5286_v0  ;;  %v5284_v2 = vld [vmem:[#allocation6 + $0x28] sm:$0xff]  ;;  %v5283_v3 = vld [vmem:[#allocation6 + $0x20] sm:$0xff]  ;;  %v5282_v4 = vld [vmem:[#allocation6 + $0x18] sm:$0xff]  ;;  %vm1114_vm1 = vsmask.f32 7950  ;;  %vm1170_vm3 = vcmask 1040384  }
  0x3b   : > { %5696 = vmatpush.bf16.msra.mxu1 %v5286_v0  ;;  %v5281_v5 = vld [vmem:[#allocation6 + $0x10] sm:$0xff]  ;;  %v5280_v6 = vld [vmem:[#allocation6 + $0x8] sm:$0xff]  ;;  %v5279_v7 = vld [vmem:[#allocation6] sm:$0xff]  ;;  %vm1171_vm4 = vsmask.f32 256  ;;  %s343_s15 = sand.u32 1, %s6008_s25  }
  0x3c   : > { %v5243_v8 = vld [vmem:[#allocation3] sm:$0xff]  ;;  %v5244_v9 = vld [vmem:[#allocation3 + $0x8] sm:$0xff]  ;;  %v5245_v10 = vld [vmem:[#allocation3 + $0x10] sm:$0xff]  ;;  %vm1294_vm6 = vsmask.f32 4368  ;;  %s4619_s19 = sshll.u32 %s343_s15, 7 }
  0x3d   : > { %v5246_v11 = vld [vmem:[#allocation3 + $0x18] sm:$0xff]  ;;  %v5247_v12 = vld [vmem:[#allocation3 + $0x20] sm:$0xff]  ;;  %v5248_v13 = vld [vmem:[#allocation3 + $0x28] sm:$0xff]  ;;  %vm2977_vm8 = vsmask.f32 3328  ;;  %s7021_s28 = scalar_lea.vmem [#allocation11], %s4619_s19 }
  0x3e   : > { %709 = vmatpush.bf16.msra.mxu0 %v5285_v1  ;;  %5699 = vmatpush.bf16.msra.mxu2 %v5285_v1  ;;  %v5249_v14 = vld [vmem:[#allocation3 + $0x30] sm:$0xff]  ;;  %v5250_v15 = vld [vmem:[#allocation3 + $0x38] sm:$0xff]  ;;  %v5251_v16 = vld [vmem:[#allocation3 + $0x40] sm:$0xff]  ;;  %vm2978_vm9 = vsmask.f32 7440  ;;  %s5385_s21 = sshll.u32 %s6016_s27, 7 }
  0x3f   : > { %5698 = vmatpush.bf16.msra.mxu1 %v5285_v1  ;;  %v5312_v18 = vld [vmem:[#allocation8 + $0x38] sm:$0xff]  ;;  %v6228_v19 = vld [vmem:[%s7133_s2] ss:$0 sm:$0xff]  ;;  %v5311_v20 = vld [vmem:[#allocation8 + $0x30] sm:$0xff]  ;;  %s4494_s9 = scalar_lea.hbm %s7138_s7, %s5385_s21  ;;  %s4495_s30 = sshll.u32 %s7021_s28, 4  ;;  %s4496_s30 = int_to_ptr.vmem [resolvable:$true] %s4495_s30 }
  0x40   : > { %v5310_v24 = vld [vmem:[#allocation8 + $0x28] sm:$0xff]  ;;  %v5309_v28 = vld [vmem:[#allocation8 + $0x20] sm:$0xff]  ;;  %v5278_v33 = vld [vmem:[#allocation3 + $0x118] sm:$0xff]  ;;  %s4497_s12 = sshll.u32 %s4494_s9, 4  ;;  %s4480_s27 = scalar_lea.sflag [#allocation5], %s343_s15  ;;  %s4498_s12 = int_to_ptr.hbm [resolvable:$true] %s4497_s12 }
  0x41   : > { %v5252_v29 = vld [vmem:[#allocation3 + $0x48] sm:$0xff]  ;;  %v5320_v34 = vld [vmem:[#allocation8 + $0xf8] sm:$0xff]  ;;  %vm6233_vm2 = vmand %vm1113_vm0, %vm1114_vm1  ;;  %s5948_s1 = sshra.s32 %s4498_s12, 4  ;;  %s5954_s18 = scalar_lea.hbm %s7138_s7, 256  ;;  %s5949_s1 = int_to_ptr.hbm [resolvable:$true] %s5948_s1 }
  0x42   : > { %710 = vmatpush.bf16.msra.mxu0 %v5284_v2  ;;  %5701 = vmatpush.bf16.msra.mxu2 %v5284_v2  ;;  %v5276_v32 = vld [vmem:[#allocation3 + $0x108] sm:$0xff]  ;;  %v5308_v35 = vld [vmem:[#allocation8 + $0x18] sm:$0xff]  ;;  %v5319_v37 = vld [vmem:[#allocation8 + $0xf0] sm:$0xff]  ;;  %s5950_s8 = scalar_lea.hbm %s5949_s1, 128  ;;  %p5955_p11 = scmp.lt.s32.totalorder %s5949_s1, %s7138_s7 }
  0x43   : > { %5700 = vmatpush.bf16.msra.mxu1 %v5284_v2  ;;  %v5307_v38 = vld [vmem:[#allocation8 + $0x10] sm:$0xff]  ;;  %v5318_v44 = vld [vmem:[#allocation8 + $0xe8] sm:$0xff]  ;;  %v5317_v50 = vld [vmem:[#allocation8 + $0xe0] sm:$0xff]  ;;  %p5951_p1 = scmp.ne.s32.totalorder %s5949_s1, %s5950_s8  ;;  %p5956_p13 = scmp.lt.s32.totalorder %s5954_s18, %s5950_s8 }
  0x44   : > { %v5306_v45 = vld [vmem:[#allocation8 + $0x8] sm:$0xff]  ;;  %v5305_v51 = vld [vmem:[#allocation8] sm:$0xff]  ;;  %v5253_v53 = vld [vmem:[#allocation3 + $0x50] sm:$0xff] }
  0x45   : > { %v5277_v55 = vld [vmem:[#allocation3 + $0x110] sm:$0xff]  ;;  %v5316_v57 = vld [vmem:[#allocation8 + $0xd8] sm:$0xff]  ;;  %vm6244_vm5 = vmand %vm1170_vm3, %vm1171_vm4  ;;  %p5952_p4 = pnand %p5951_p1, %p6156_p12  ;;  %p5957_p3 = por %p5956_p13, %p5955_p11 }
  0x46   : > { %711 = vmatpush.bf16.msra.mxu0 %v5283_v3  ;;  %5703 = vmatpush.bf16.msra.mxu2 %v5283_v3  ;;  %v5315_v62 = vld [vmem:[#allocation8 + $0xd0] sm:$0xff]  ;;  %vm6251_vm7 = vmor %vm1171_vm4, %vm1294_vm6 }
  0x47   : > { %5702 = vmatpush.bf16.msra.mxu1 %v5283_v3  ;;  %v5367_v3 = vld [vmem:[#allocation8 + $0x170] sm:$0xff]  ;;  %vm6678_vm10 = vmor %vm2977_vm8, %vm2978_vm9  ;;  %p5953_p6 = pneg %p5952_p4 }
  0x49   : > { %p5958_p2 = pnand %p5957_p3, %p5953_p6 }
  0x4a   : > { %712 = vmatpush.bf16.msra.mxu0 %v5282_v4  ;;  %5705 = vmatpush.bf16.msra.mxu2 %v5282_v4 }
  0x4b   : > { %5704 = vmatpush.bf16.msra.mxu1 %v5282_v4 }
  0x4e   : > { %713 = vmatpush.bf16.msra.mxu0 %v5281_v5  ;;  %5707 = vmatpush.bf16.msra.mxu2 %v5281_v5 }
  0x4f   : > { %5706 = vmatpush.bf16.msra.mxu1 %v5281_v5 }
  0x52   : > { %714 = vmatpush.bf16.msra.mxu0 %v5280_v6  ;;  %5709 = vmatpush.bf16.msra.mxu2 %v5280_v6 }
  0x53   : > { %5708 = vmatpush.bf16.msra.mxu1 %v5280_v6 }
  0x56   : > { %715 = vmatpush.bf16.msra.mxu0 %v5279_v7  ;;  %5711 = vmatpush.bf16.msra.mxu2 %v5279_v7 }
  0x57   : > { %5710 = vmatpush.bf16.msra.mxu1 %v5279_v7 }
  0x59   : > { %716 = vmatmul.bf16.vlgmr.msra.gmra.mxu0 %v5243_v8  ;;  %891 = vmatmul.bf16.vlgmr.msra.gmra.mxu2 %v5278_v33 }
  0x5a   : > { %1956 = vmatpush.bf16.msrb.mxu2 %v5312_v18  ;;  %881 = vmatmul.bf16.vlgmr.msra.gmra.mxu1 %v5276_v32 }
  0x5b   : > { %1815 = vmatpush.bf16.msrb.mxu1 %v5320_v34  ;;  %v5326_v34 = vld [vmem:[#allocation8 + $0x1a8] sm:$0xff] }
  0x5e   : > { %1957 = vmatpush.bf16.msrb.mxu2 %v5311_v20  ;;  %v5313_v20 = vld [vmem:[#allocation8 + $0xc0] sm:$0xff] }
  0x5f   : > { %1816 = vmatpush.bf16.msrb.mxu1 %v5319_v37 }
  0x62   : > { %1958 = vmatpush.bf16.msrb.mxu2 %v5310_v24 }
  0x63   : > { %1817 = vmatpush.bf16.msrb.mxu1 %v5318_v44 }
  0x66   : > { %1959 = vmatpush.bf16.msrb.mxu2 %v5309_v28 }
  0x67   : > { %1818 = vmatpush.bf16.msrb.mxu1 %v5317_v50 }
  0x69   : > { %721 = vmatmul.bf16.gmra.mxu0 %v5244_v9 }
  0x6a   : > { %1960 = vmatpush.bf16.msrb.mxu2 %v5308_v35  ;;  %886 = vmatmul.bf16.gmra.mxu1 %v5277_v55 }
  0x6b   : > { %1819 = vmatpush.bf16.msrb.mxu1 %v5316_v57 }
  0x6e   : > { %1961 = vmatpush.bf16.msrb.mxu2 %v5307_v38 }
  0x6f   : > { %1820 = vmatpush.bf16.msrb.mxu1 %v5315_v62  ;;  %v5322_v62 = vld [vmem:[#allocation8 + $0x188] sm:$0xff] }
  0x72   : > { %1962 = vmatpush.bf16.msrb.mxu2 %v5306_v45  ;;  %v5324_v45 = vld [vmem:[#allocation8 + $0x198] sm:$0xff] }
  0x76   : > { %1963 = vmatpush.bf16.msrb.mxu2 %v5305_v51 }
  0x79   : > { %726 = vmatmul.bf16.gmra.mxu0 %v5245_v10  ;;  %v5314_v10 = vld [vmem:[#allocation8 + $0xc8] sm:$0xff] }
  0x7a   : > { %1821 = vmatpush.bf16.msrb.mxu1 %v5314_v10  ;;  %v5256_v10 = vld [vmem:[#allocation3 + $0x68] sm:$0xff] }
  0x7e   : > { %1822 = vmatpush.bf16.msrb.mxu1 %v5313_v20 }
  0x89   : > { %731 = vmatmul.bf16.gmra.mxu0 %v5246_v11 }
  0x99   : > { %736 = vmatmul.bf16.gmra.mxu0 %v5247_v12 }
  0xa9   : > { %741 = vmatmul.bf16.gmra.mxu0 %v5248_v13 }
  0xb9   : > { %746 = vmatmul.bf16.gmra.mxu0 %v5249_v14 }
  0xc9   : > { %751 = vmatmul.bf16.gmra.mxu0 %v5250_v15 }
  0xd6   : > { %v717_v17 = vpop.f32.mrf.mxu0 }
  0xd7   : > { %v718_v21 = vadd.f32 %v6228_v19, %v717_v17 }
  0xd9   : > { %756 = vmatmul.bf16.gmra.mxu0 %v5251_v16  ;;  %v897_v25 = vmax.f32 %v718_v21, 0.0 }
  0xde   : > { %v719_v22 = vpop.f32.mrf.mxu0 }
  0xdf   : > { %v720_v23 = vadd.f32 %v6228_v19, %v719_v22  ;;  %v5254_v22 = vld [vmem:[#allocation3 + $0x58] sm:$0xff] }
  0xe1   : > { %v898_v26 = vmax.f32 %v720_v23, 0.0 }
  0xe3   : > { %v5389_v27 = vpack.c.bf16 %v898_v26, %v897_v25  ;;  %v5328_v26 = vld [vmem:[#allocation8 + $0x1b8] sm:$0xff] }
  0xe4   : > { %2136 = vmatpush.bf16.msra.mxu3 %v5328_v26 }
  0xe5   : > { %5390 = vst [vmem:[#allocation2] sm:$0xff] %v5389_v27   ;;  %v5327_v27 = vld [vmem:[#allocation8 + $0x1b0] sm:$0xff] }
  0xe6   : > { %1232 = vst [vmem:[#allocation2 + $0x4] sm:$0xf] %v6032_v30  ;;  %v722_v31 = vpop.f32.mrf.mxu0 }
  0xe7   : > { %v723_v41 = vadd.f32 %v6228_v19, %v722_v31 }
  0xe8   : > { %2137 = vmatpush.bf16.msra.mxu3 %v5327_v27 }
  0xe9   : > { %761 = vmatmul.bf16.gmra.mxu0 %v5252_v29  ;;  %v899_v46 = vmax.f32 %v723_v41, 0.0  ;;  %v5255_v41 = vld [vmem:[#allocation3 + $0x60] sm:$0xff] }
  0xec   : > { %v1116_v39 = vld [vmem:[#allocation2] sm:$0x8]  ;;  %2138 = vmatpush.bf16.msra.mxu3 %v5326_v34 }
  0xed   : > { %v1117_v40 = vsel %vm6233_vm2, 0, %v1116_v39  ;;  %v1241_v48 = vld [vmem:[#allocation2 + $0x4] sm:$0xf] }
  0xee   : > { %1118 = vst [vmem:[#allocation2] sm:$0x8] %v1117_v40  ;;  %v724_v42 = vpop.f32.mrf.mxu0  ;;  %v1302_v52 = vshrl.u32 %v1241_v48, 16  ;;  %v1305_v60 = vshll.u32 %v1241_v48, 16  ;;  %v5325_v39 = vld [vmem:[#allocation8 + $0x1a0] sm:$0xff]  ;;  %v5323_v48 = vld [vmem:[#allocation8 + $0x190] sm:$0xff] }
  0xef   : > { %1231 = vst [vmem:[#allocation2] sm:$0xf] %v6032_v30  ;;  %v725_v43 = vadd.f32 %v6228_v19, %v724_v42 }
  0xf0   : > { %v1304_v59 = vrot.slane %v1302_v52, 7  ;;  %2139 = vmatpush.bf16.msra.mxu3 %v5325_v39 }
  0xf1   : > { %v900_v47 = vmax.f32 %v725_v43, 0.0 }
  0xf2   : > { %v1307_v1 = vor.u32 %v1305_v60, %v1304_v59  ;;  %v1309_v12 = vrot.slane %v1304_v59, 4 }
  0xf3   : > { %v5394_v49 = vpack.c.bf16 %v900_v47, %v899_v46 }
  0xf4   : > { %2140 = vmatpush.bf16.msra.mxu3 %v5324_v45 }
  0xf5   : > { %5646 = vst [vmem:[#allocation2 + $0x8] sm:$0xff] %v5394_v49  }
  0xf6   : > { %1233 = vst [vmem:[#allocation2 + $0x8] sm:$0xf] %v6032_v30  ;;  %v727_v54 = vpop.f32.mrf.mxu0  ;;  %v1240_v56 = vld [vmem:[#allocation2] sm:$0x8] }
  0xf7   : > { %v1297_v58 = vshrl.u32 %v1240_v56, 16  ;;  %v728_v4 = vadd.f32 %v6228_v19, %v727_v54 }
  0xf8   : > { %2141 = vmatpush.bf16.msra.mxu3 %v5323_v48 }
  0xf9   : > { %766 = vmatmul.bf16.gmra.mxu0 %v5253_v53  ;;  %v4796_v0 = vrot.slane %v1297_v58, 11  ;;  %v901_v14 = vmax.f32 %v728_v4, 0.0 }
  0xfb   : > { %v1308_v11 = vsel %vm6251_vm7, %v4796_v0, %v1307_v1 }
  0xfc   : > { %v1173_v63 = vld [vmem:[#allocation2 + $0xc] sm:$0x1]  ;;  %v1904_v18 = vunpack.c.l.b16 %v1308_v11  ;;  %2142 = vmatpush.bf16.msra.mxu3 %v5322_v62 }
  0xfd   : > { %v1174_v2 = vsel %vm6244_vm5, 0, %v1173_v63  ;;  %v1242_v5 = vld [vmem:[#allocation2 + $0x8] sm:$0xf] }
  0xfe   : > { %1175 = vst [vmem:[#allocation2 + $0xc] sm:$0x1] %v1174_v2  ;;  %v729_v6 = vpop.f32.mrf.mxu0  ;;  %v1311_v7 = vshrl.u32 %v1242_v5, 16  ;;  %v1314_v8 = vshll.u32 %v1242_v5, 16 }
  0xff   : > { %1234 = vst [vmem:[#allocation2 + $0xc] sm:$0xf] %v6032_v30  ;;  %v730_v9 = vadd.f32 %v6228_v19, %v729_v6 }
 0x100   : > { %v1313_v13 = vrot.slane %v1311_v7, 7  ;;  %v5321_v7 = vld [vmem:[#allocation8 + $0x180] sm:$0xff] }
 0x101   : > { %v902_v15 = vmax.f32 %v730_v9, 0.0  ;;  %2143 = vmatpush.bf16.msra.mxu3 %v5321_v7 }
 0x102   : > { %v1316_v16 = vor.u32 %v1314_v8, %v1313_v13 }
 0x103   : > { %v5399_v17 = vpack.c.bf16 %v902_v15, %v901_v14 }
 0x104   : > { %v1317_v21 = vsel %vm6251_vm7, %v1309_v12, %v1316_v16 }
 0x105   : > { %5647 = vst [vmem:[#allocation2 + $0x10] sm:$0xff] %v5399_v17   ;;  %v1905_v23 = vunpack.c.l.b16 %v1317_v21 }
 0x106   : > { %v732_v24 = vpop.f32.mrf.mxu0 }
 0x107   : > { %v1906_v25 = vpack.c.b16 %v1905_v23, %v1904_v18  ;;  %v733_v31 = vadd.f32 %v6228_v19, %v732_v24  ;;  %v5257_v23 = vld [vmem:[#allocation3 + $0x70] sm:$0xff] }
 0x109   : > { %771 = vmatmul.bf16.gmra.mxu0 %v5254_v22  ;;  %1964 = vmatmul.bf16.vlgmr.msrb.gmra.mxu2 %v1906_v25  ;;  %v903_v35 = vmax.f32 %v733_v31, 0.0 }
 0x10c   : > { %v1119_v28 = vld [vmem:[#allocation2 + $0x10] sm:$0x8]  ;;  %v1244_v40 = vld [vmem:[#allocation2 + $0x14] sm:$0xf] }
 0x10d   : > { %v1120_v29 = vsel %vm6233_vm2, 0, %v1119_v28  ;;  %v1324_v44 = vshrl.u32 %v1244_v40, 16  ;;  %v1327_v51 = vshll.u32 %v1244_v40, 16 }
 0x10e   : > { %1121 = vst [vmem:[#allocation2 + $0x10] sm:$0x8] %v1120_v29  ;;  %v734_v32 = vpop.f32.mrf.mxu0 }
 0x10f   : > { %v735_v33 = vadd.f32 %v6228_v19, %v734_v32  ;;  %v1326_v47 = vrot.slane %v1324_v44, 7 }
 0x111   : > { %v904_v37 = vmax.f32 %v735_v33, 0.0  ;;  %v1329_v58 = vor.u32 %v1327_v51, %v1326_v47  ;;  %v1331_v63 = vrot.slane %v1326_v47, 4 }
 0x113   : > { %v5404_v38 = vpack.c.bf16 %v904_v37, %v903_v35 }
 0x115   : > { %5648 = vst [vmem:[#allocation2 + $0x18] sm:$0xff] %v5404_v38   ;;  %v1243_v43 = vld [vmem:[#allocation2 + $0x10] sm:$0x8] }
 0x116   : > { %v737_v42 = vpop.f32.mrf.mxu0  ;;  %v1319_v46 = vshrl.u32 %v1243_v43, 16 }
 0x117   : > { %v738_v53 = vadd.f32 %v6228_v19, %v737_v42 }
 0x118   : > { %v4797_v54 = vrot.slane %v1319_v46, 11 }
 0x119   : > { %776 = vmatmul.bf16.gmra.mxu0 %v5255_v41  ;;  %v905_v0 = vmax.f32 %v738_v53, 0.0 }
 0x11a   : > { %v1330_v2 = vsel %vm6251_vm7, %v4797_v54, %v1329_v58 }
 0x11b   : > { %v1703_v8 = vunpack.c.l.b16 %v1330_v2 }
 0x11c   : > { %v1176_v49 = vld [vmem:[#allocation2 + $0x1c] sm:$0x1]  ;;  %v1245_v50 = vld [vmem:[#allocation2 + $0x18] sm:$0xf] }
 0x11d   : > { %v1177_v52 = vsel %vm6244_vm5, 0, %v1176_v49  ;;  %v1333_v55 = vshrl.u32 %v1245_v50, 16  ;;  %v1336_v60 = vshll.u32 %v1245_v50, 16 }
 0x11e   : > { %1178 = vst [vmem:[#allocation2 + $0x1c] sm:$0x1] %v1177_v52  ;;  %v739_v56 = vpop.f32.mrf.mxu0  ;;  %v5258_v52 = vld [vmem:[#allocation3 + $0x78] sm:$0xff] }
 0x11f   : > { %v740_v57 = vadd.f32 %v6228_v19, %v739_v56  ;;  %v1335_v59 = vrot.slane %v1333_v55, 7 }
 0x121   : > { %v906_v1 = vmax.f32 %v740_v57, 0.0  ;;  %v1338_v4 = vor.u32 %v1336_v60, %v1335_v59 }
 0x123   : > { %v5409_v5 = vpack.c.bf16 %v906_v1, %v905_v0  ;;  %v1339_v6 = vsel %vm6251_vm7, %v1331_v63, %v1338_v4  ;;  %v5259_v1 = vld [vmem:[#allocation3 + $0x80] sm:$0xff] }
 0x124   : > { %v1704_v9 = vunpack.c.l.b16 %v1339_v6 }
 0x125   : > { %5649 = vst [vmem:[#allocation2 + $0x20] sm:$0xff] %v5409_v5  }
 0x126   : > { %v742_v11 = vpop.f32.mrf.mxu0  ;;  %v1735_v12 = vpack.c.b16 %v1704_v9, %v1703_v8 }
 0x127   : > { %v743_v15 = vadd.f32 %v6228_v19, %v742_v11 }
 0x128   : > { %1823 = vmatmul.bf16.vlgmr.msrb.gmra.mxu1 %v1735_v12  ;;  %1969 = vmatmul.bf16.gmra.mxu2 %v1735_v12 }
 0x129   : > { %781 = vmatmul.bf16.gmra.mxu0 %v5256_v10  ;;  %v907_v18 = vmax.f32 %v743_v15, 0.0 }
 0x12c   : > { %v1122_v13 = vld [vmem:[#allocation2 + $0x20] sm:$0x8]  ;;  %v1247_v22 = vld [vmem:[#allocation2 + $0x24] sm:$0xf] }
 0x12d   : > { %v1123_v14 = vsel %vm6233_vm2, 0, %v1122_v13  ;;  %v1346_v26 = vshrl.u32 %v1247_v22, 16  ;;  %v1349_v32 = vshll.u32 %v1247_v22, 16 }
 0x12e   : > { %1124 = vst [vmem:[#allocation2 + $0x20] sm:$0x8] %v1123_v14  ;;  %v744_v16 = vpop.f32.mrf.mxu0 }
 0x12f   : > { %v745_v17 = vadd.f32 %v6228_v19, %v744_v16  ;;  %v1348_v28 = vrot.slane %v1346_v26, 7 }
 0x131   : > { %v908_v20 = vmax.f32 %v745_v17, 0.0  ;;  %v1351_v40 = vor.u32 %v1349_v32, %v1348_v28  ;;  %v1353_v43 = vrot.slane %v1348_v28, 4 }
 0x133   : > { %v5414_v21 = vpack.c.bf16 %v908_v20, %v907_v18 }
 0x135   : > { %5650 = vst [vmem:[#allocation2 + $0x28] sm:$0xff] %v5414_v21   ;;  %v1246_v25 = vld [vmem:[#allocation2 + $0x20] sm:$0x8] }
 0x136   : > { %v747_v24 = vpop.f32.mrf.mxu0  ;;  %v1341_v27 = vshrl.u32 %v1246_v25, 16 }
 0x137   : > { %v748_v34 = vadd.f32 %v6228_v19, %v747_v24 }
 0x138   : > { %v4798_v35 = vrot.slane %v1341_v27, 11 }
 0x139   : > { %786 = vmatmul.bf16.gmra.mxu0 %v5257_v23  ;;  %v909_v44 = vmax.f32 %v748_v34, 0.0  ;;  %v882_v34 = vpop.f32.mrf.mxu1 }
 0x13a   : > { %v1352_v46 = vsel %vm6251_vm7, %v4798_v35, %v1351_v40  ;;  %v883_v40 = vadd.f32 %v6228_v19, %v882_v34  ;;  %v5262_v34 = vld [vmem:[#allocation3 + $0x98] sm:$0xff] }
 0x13b   : > { %v1705_v50 = vunpack.c.l.b16 %v1352_v46 }
 0x13c   : > { %v1179_v29 = vld [vmem:[#allocation2 + $0x2c] sm:$0x1]  ;;  %v1248_v31 = vld [vmem:[#allocation2 + $0x28] sm:$0xf] }
 0x13d   : > { %v1180_v33 = vsel %vm6244_vm5, 0, %v1179_v29  ;;  %v1355_v37 = vshrl.u32 %v1248_v31, 16  ;;  %v1358_v42 = vshll.u32 %v1248_v31, 16  ;;  %v5260_v31 = vld [vmem:[#allocation3 + $0x88] sm:$0xff] }
 0x13e   : > { %1181 = vst [vmem:[#allocation2 + $0x2c] sm:$0x1] %v1180_v33  ;;  %v749_v38 = vpop.f32.mrf.mxu0 }
 0x13f   : > { %v750_v39 = vadd.f32 %v6228_v19, %v749_v38  ;;  %v1357_v41 = vrot.slane %v1355_v37, 7 }
 0x141   : > { %v910_v45 = vmax.f32 %v750_v39, 0.0  ;;  %v1360_v47 = vor.u32 %v1358_v42, %v1357_v41  ;;  %v884_v41 = vpop.f32.mrf.mxu1 }
 0x143   : > { %v5419_v48 = vpack.c.bf16 %v910_v45, %v909_v44  ;;  %v1361_v49 = vsel %vm6251_vm7, %v1353_v43, %v1360_v47  ;;  %v885_v43 = vadd.f32 %v6228_v19, %v884_v41  ;;  %v963_v44 = vmax.f32 %v883_v40, 0.0 }
 0x144   : > { %v1706_v51 = vunpack.c.l.b16 %v1361_v49 }
 0x145   : > { %5651 = vst [vmem:[#allocation2 + $0x30] sm:$0xff] %v5419_v48   ;;  %v964_v47 = vmax.f32 %v885_v43, 0.0 }
 0x146   : > { %v752_v53 = vpop.f32.mrf.mxu0  ;;  %v1736_v54 = vpack.c.b16 %v1706_v51, %v1705_v50  ;;  %v892_v50 = vpop.f32.mrf.mxu2 }
 0x147   : > { %v753_v57 = vadd.f32 %v6228_v19, %v752_v53  ;;  %v5554_v51 = vpack.c.bf16 %v964_v47, %v963_v44 }
 0x148   : > { %1828 = vmatmul.bf16.gmra.mxu1 %v1736_v54  ;;  %1974 = vmatmul.bf16.gmra.mxu2 %v1736_v54 }
 0x149   : > { %2144 = vmatmul.bf16.vlgmr.msra.gmra.mxu3 %v1736_v54  ;;  %791 = vmatmul.bf16.gmra.mxu0 %v5258_v52  ;;  %v911_v60 = vmax.f32 %v753_v57, 0.0  ;;  %v5261_v52 = vld [vmem:[#allocation3 + $0x90] sm:$0xff]  ;;  %5678 = vst [vmem:[#allocation2 + $0x108] sm:$0xff] %v5554_v51   ;;  %v5263_v51 = vld [vmem:[#allocation3 + $0xa0] sm:$0xff] }
 0x14c   : > { %v1125_v55 = vld [vmem:[#allocation2 + $0x30] sm:$0x8]  ;;  %v1250_v0 = vld [vmem:[#allocation2 + $0x34] sm:$0xf] }
 0x14d   : > { %v1126_v56 = vsel %vm6233_vm2, 0, %v1125_v55  ;;  %v1368_v5 = vshrl.u32 %v1250_v0, 16  ;;  %v1371_v10 = vshll.u32 %v1250_v0, 16 }
 0x14e   : > { %1127 = vst [vmem:[#allocation2 + $0x30] sm:$0x8] %v1126_v56  ;;  %v754_v58 = vpop.f32.mrf.mxu0  ;;  %v887_v56 = vpop.f32.mrf.mxu1 }
 0x14f   : > { %v755_v59 = vadd.f32 %v6228_v19, %v754_v58  ;;  %v1370_v7 = vrot.slane %v1368_v5, 7  ;;  %v893_v58 = vadd.f32 %v6228_v19, %v892_v50 }
 0x151   : > { %v912_v62 = vmax.f32 %v755_v59, 0.0  ;;  %v1373_v17 = vor.u32 %v1371_v10, %v1370_v7  ;;  %v1375_v21 = vrot.slane %v1370_v7, 4  ;;  %v967_v5 = vmax.f32 %v893_v58, 0.0  ;;  %v894_v7 = vpop.f32.mrf.mxu2 }
 0x153   : > { %v5424_v63 = vpack.c.bf16 %v912_v62, %v911_v60 }
 0x155   : > { %5652 = vst [vmem:[#allocation2 + $0x38] sm:$0xff] %v5424_v63   ;;  %v1249_v4 = vld [vmem:[#allocation2 + $0x30] sm:$0x8] }
 0x156   : > { %v757_v2 = vpop.f32.mrf.mxu0  ;;  %v1363_v6 = vshrl.u32 %v1249_v4, 16 }
 0x157   : > { %v758_v12 = vadd.f32 %v6228_v19, %v757_v2 }
 0x158   : > { %v4799_v13 = vrot.slane %v1363_v6, 11  ;;  %v1221_v6 = vld [vmem:[#allocation2 + $0x10c] sm:$0x1] }
 0x159   : > { %796 = vmatmul.bf16.gmra.mxu0 %v5259_v1  ;;  %v913_v22 = vmax.f32 %v758_v12, 0.0  ;;  %v1222_v10 = vsel %vm6244_vm5, 0, %v1221_v6  ;;  %v888_v12 = vadd.f32 %v6228_v19, %v887_v56 }
 0x15a   : > { %v1374_v24 = vsel %vm6251_vm7, %v4799_v13, %v1373_v17  ;;  %v889_v13 = vpop.f32.mrf.mxu1  ;;  %1223 = vst [vmem:[#allocation2 + $0x10c] sm:$0x1] %v1222_v10 }
 0x15b   : > { %v1707_v28 = vunpack.c.l.b16 %v1374_v24  ;;  %v890_v17 = vadd.f32 %v6228_v19, %v889_v13 }
 0x15c   : > { %v1182_v8 = vld [vmem:[#allocation2 + $0x3c] sm:$0x1]  ;;  %v1251_v9 = vld [vmem:[#allocation2 + $0x38] sm:$0xf] }
 0x15d   : > { %v1183_v11 = vsel %vm6244_vm5, 0, %v1182_v8  ;;  %v1377_v14 = vshrl.u32 %v1251_v9, 16  ;;  %v1380_v20 = vshll.u32 %v1251_v9, 16 }
 0x15e   : > { %1184 = vst [vmem:[#allocation2 + $0x3c] sm:$0x1] %v1183_v11  ;;  %v759_v15 = vpop.f32.mrf.mxu0  ;;  %v895_v11 = vadd.f32 %v6228_v19, %v894_v7 }
 0x15f   : > { %v760_v16 = vadd.f32 %v6228_v19, %v759_v15  ;;  %v1379_v18 = vrot.slane %v1377_v14, 7 }
 0x161   : > { %v914_v23 = vmax.f32 %v760_v16, 0.0  ;;  %v1382_v25 = vor.u32 %v1380_v20, %v1379_v18 }
 0x163   : > { %v5429_v26 = vpack.c.bf16 %v914_v23, %v913_v22  ;;  %v1383_v27 = vsel %vm6251_vm7, %v1375_v21, %v1382_v25  ;;  %v968_v21 = vmax.f32 %v895_v11, 0.0  ;;  %v965_v22 = vmax.f32 %v888_v12, 0.0 }
 0x164   : > { %v1708_v29 = vunpack.c.l.b16 %v1383_v27 }
 0x165   : > { %5653 = vst [vmem:[#allocation2 + $0x40] sm:$0xff] %v5429_v26   ;;  %v966_v26 = vmax.f32 %v890_v17, 0.0  ;;  %v5564_v27 = vpack.c.bf16 %v968_v21, %v967_v5  ;;  %v5264_v17 = vld [vmem:[#allocation3 + $0xa8] sm:$0xff] }
 0x166   : > { %v762_v32 = vpop.f32.mrf.mxu0  ;;  %v1737_v33 = vpack.c.b16 %v1708_v29, %v1707_v28 }
 0x167   : > { %v763_v38 = vadd.f32 %v6228_v19, %v762_v32  ;;  %5680 = vst [vmem:[#allocation2 + $0x118] sm:$0xff] %v5564_v27  }
 0x168   : > { %1833 = vmatmul.bf16.gmra.mxu1 %v1737_v33  ;;  %1979 = vmatmul.bf16.gmra.mxu2 %v1737_v33  ;;  %1238 = vst [vmem:[#allocation2 + $0x118] sm:$0xf] %v6032_v30 }
 0x169   : > { %2149 = vmatmul.bf16.gmra.mxu3 %v1737_v33  ;;  %801 = vmatmul.bf16.gmra.mxu0 %v5260_v31  ;;  %v915_v45 = vmax.f32 %v763_v38, 0.0  ;;  %v5559_v31 = vpack.c.bf16 %v966_v26, %v965_v22 }
 0x16b   : > { %5679 = vst [vmem:[#allocation2 + $0x110] sm:$0xff] %v5559_v31  }
 0x16c   : > { %v1128_v35 = vld [vmem:[#allocation2 + $0x40] sm:$0x8]  ;;  %v1253_v49 = vld [vmem:[#allocation2 + $0x44] sm:$0xf]  ;;  %1237 = vst [vmem:[#allocation2 + $0x114] sm:$0xf] %v6032_v30 }
 0x16d   : > { %v1129_v37 = vsel %vm6233_vm2, 0, %v1128_v35  ;;  %v1390_v55 = vshrl.u32 %v1253_v49, 16  ;;  %v1393_v0 = vshll.u32 %v1253_v49, 16 }
 0x16e   : > { %1130 = vst [vmem:[#allocation2 + $0x40] sm:$0x8] %v1129_v37  ;;  %v764_v39 = vpop.f32.mrf.mxu0  ;;  %v1224_v38 = vld [vmem:[#allocation2 + $0x11c] sm:$0x1] }
 0x16f   : > { %v765_v42 = vadd.f32 %v6228_v19, %v764_v39  ;;  %v1392_v59 = vrot.slane %v1390_v55, 7  ;;  %v1225_v40 = vsel %vm6244_vm5, 0, %v1224_v38 }
 0x170   : > { %1226 = vst [vmem:[#allocation2 + $0x11c] sm:$0x1] %v1225_v40 }
 0x171   : > { %v916_v46 = vmax.f32 %v765_v42, 0.0  ;;  %v1395_v9 = vor.u32 %v1393_v0, %v1392_v59  ;;  %v1397_v20 = vrot.slane %v1392_v59, 4  ;;  %1239 = vst [vmem:[#allocation2 + $0x11c] sm:$0xf] %v6032_v30 }
 0x172   : > { %v1167_v44 = vld [vmem:[#allocation2 + $0x110] sm:$0x8] }
 0x173   : > { %v5434_v48 = vpack.c.bf16 %v916_v46, %v915_v45  ;;  %v1168_v46 = vsel %vm6233_vm2, 0, %v1167_v44 }
 0x174   : > { %1169 = vst [vmem:[#allocation2 + $0x110] sm:$0x8] %v1168_v46 }
 0x175   : > { %5654 = vst [vmem:[#allocation2 + $0x48] sm:$0xff] %v5434_v48   ;;  %v1252_v54 = vld [vmem:[#allocation2 + $0x40] sm:$0x8] }
 0x176   : > { %v767_v53 = vpop.f32.mrf.mxu0  ;;  %v1385_v57 = vshrl.u32 %v1252_v54, 16  ;;  %1236 = vst [vmem:[#allocation2 + $0x110] sm:$0xf] %v6032_v30 }
 0x177   : > { %v768_v62 = vadd.f32 %v6228_v19, %v767_v53 }
 0x178   : > { %v4800_v2 = vrot.slane %v1385_v57, 11 }
 0x179   : > { %806 = vmatmul.bf16.gmra.mxu0 %v5261_v52  ;;  %v917_v18 = vmax.f32 %v768_v62, 0.0 }
 0x17a   : > { %v1396_v24 = vsel %vm6251_vm7, %v4800_v2, %v1395_v9 }
 0x17b   : > { %v1709_v32 = vunpack.c.l.b16 %v1396_v24 }
 0x17c   : > { %v1185_v60 = vld [vmem:[#allocation2 + $0x4c] sm:$0x1]  ;;  %v1254_v63 = vld [vmem:[#allocation2 + $0x48] sm:$0xf] }
 0x17d   : > { %v1186_v1 = vsel %vm6244_vm5, 0, %v1185_v60  ;;  %v1399_v4 = vshrl.u32 %v1254_v63, 16  ;;  %v1402_v16 = vshll.u32 %v1254_v63, 16 }
 0x17e   : > { %1187 = vst [vmem:[#allocation2 + $0x4c] sm:$0x1] %v1186_v1  ;;  %v769_v8 = vpop.f32.mrf.mxu0 }
 0x17f   : > { %v770_v14 = vadd.f32 %v6228_v19, %v769_v8  ;;  %v1401_v15 = vrot.slane %v1399_v4, 7 }
 0x181   : > { %v918_v23 = vmax.f32 %v770_v14, 0.0  ;;  %v1404_v25 = vor.u32 %v1402_v16, %v1401_v15 }
 0x183   : > { %v5439_v28 = vpack.c.bf16 %v918_v23, %v917_v18  ;;  %v1405_v29 = vsel %vm6251_vm7, %v1397_v20, %v1404_v25 }
 0x184   : > { %v1710_v33 = vunpack.c.l.b16 %v1405_v29 }
 0x185   : > { %5655 = vst [vmem:[#allocation2 + $0x50] sm:$0xff] %v5439_v28  }
 0x186   : > { %v772_v35 = vpop.f32.mrf.mxu0  ;;  %v1738_v37 = vpack.c.b16 %v1710_v33, %v1709_v32  ;;  %v5265_v32 = vld [vmem:[#allocation3 + $0xb0] sm:$0xff] }
 0x187   : > { %v773_v42 = vadd.f32 %v6228_v19, %v772_v35 }
 0x188   : > { %1838 = vmatmul.bf16.gmra.mxu1 %v1738_v37  ;;  %1984 = vmatmul.bf16.gmra.mxu2 %v1738_v37 }
 0x189   : > { %2154 = vmatmul.bf16.gmra.mxu3 %v1738_v37  ;;  %811 = vmatmul.bf16.gmra.mxu0 %v5262_v34  ;;  %v919_v47 = vmax.f32 %v773_v42, 0.0 }
 0x18c   : > { %v1131_v39 = vld [vmem:[#allocation2 + $0x50] sm:$0x8]  ;;  %v1256_v50 = vld [vmem:[#allocation2 + $0x54] sm:$0xf]  ;;  %v1965_v15 = vpop.f32.mrf.mxu2 }
 0x18d   : > { %v1132_v41 = vsel %vm6233_vm2, 0, %v1131_v39  ;;  %v1412_v54 = vshrl.u32 %v1256_v50, 16  ;;  %v1415_v59 = vshll.u32 %v1256_v50, 16 }
 0x18e   : > { %1133 = vst [vmem:[#allocation2 + $0x50] sm:$0x8] %v1132_v41  ;;  %v774_v43 = vpop.f32.mrf.mxu0 }
 0x18f   : > { %v775_v45 = vadd.f32 %v6228_v19, %v774_v43  ;;  %v1414_v56 = vrot.slane %v1412_v54, 7 }
 0x191   : > { %v920_v48 = vmax.f32 %v775_v45, 0.0  ;;  %v1417_v2 = vor.u32 %v1415_v59, %v1414_v56  ;;  %v1419_v6 = vrot.slane %v1414_v56, 4 }
 0x193   : > { %v5444_v49 = vpack.c.bf16 %v920_v48, %v919_v47 }
 0x194   : > { %v6344_v38 = vpop.f32.mrf.mxu2 }
 0x195   : > { %5656 = vst [vmem:[#allocation2 + $0x58] sm:$0xff] %v5444_v49   ;;  %v1255_v53 = vld [vmem:[#allocation2 + $0x50] sm:$0x8] }
 0x196   : > { %v777_v52 = vpop.f32.mrf.mxu0  ;;  %v1407_v55 = vshrl.u32 %v1255_v53, 16 }
 0x197   : > { %v778_v62 = vadd.f32 %v6228_v19, %v777_v52 }
 0x198   : > { %v4801_v63 = vrot.slane %v1407_v55, 11 }
 0x199   : > { %816 = vmatmul.bf16.gmra.mxu0 %v5263_v51  ;;  %v921_v7 = vmax.f32 %v778_v62, 0.0 }
 0x19a   : > { %v1418_v9 = vsel %vm6251_vm7, %v4801_v63, %v1417_v2 }
 0x19b   : > { %v1711_v13 = vunpack.c.l.b16 %v1418_v9 }
 0x19c   : > { %v1188_v57 = vld [vmem:[#allocation2 + $0x5c] sm:$0x1]  ;;  %v1257_v58 = vld [vmem:[#allocation2 + $0x58] sm:$0xf] }
 0x19d   : > { %v1189_v60 = vsel %vm6244_vm5, 0, %v1188_v57  ;;  %v1421_v30 = vshrl.u32 %v1257_v58, 16  ;;  %v1424_v5 = vshll.u32 %v1257_v58, 16 }
 0x19e   : > { %1190 = vst [vmem:[#allocation2 + $0x5c] sm:$0x1] %v1189_v60  ;;  %v779_v0 = vpop.f32.mrf.mxu0 }
 0x19f   : > { %v780_v1 = vadd.f32 %v6228_v19, %v779_v0  ;;  %v1423_v4 = vrot.slane %v1421_v30, 7  ;;  %v5266_v0 = vld [vmem:[#allocation3 + $0xb8] sm:$0xff] }
 0x1a1   : > { %v922_v8 = vmax.f32 %v780_v1, 0.0  ;;  %v1426_v10 = vor.u32 %v1424_v5, %v1423_v4 }
 0x1a3   : > { %v5449_v11 = vpack.c.bf16 %v922_v8, %v921_v7  ;;  %v1427_v12 = vsel %vm6251_vm7, %v1419_v6, %v1426_v10 }
 0x1a4   : > { %v1712_v14 = vunpack.c.l.b16 %v1427_v12 }
 0x1a5   : > { %5657 = vst [vmem:[#allocation2 + $0x60] sm:$0xff] %v5449_v11   ;;  %v1824_v16 = vpop.f32.mrf.mxu1 }
 0x1a6   : > { %v6338_v18 = vadd.f32 %v1965_v15, %v1824_v16  ;;  %v782_v20 = vpop.f32.mrf.mxu0  ;;  %v1739_v21 = vpack.c.b16 %v1712_v14, %v1711_v13  ;;  %v5267_v16 = vld [vmem:[#allocation3 + $0xc0] sm:$0xff] }
 0x1a7   : > { %v783_v24 = vadd.f32 %v6228_v19, %v782_v20 }
 0x1a8   : > { %1843 = vmatmul.bf16.gmra.mxu1 %v1739_v21  ;;  %1989 = vmatmul.bf16.gmra.mxu2 %v1739_v21 }
 0x1a9   : > { %2159 = vmatmul.bf16.gmra.mxu3 %v1739_v21  ;;  %821 = vmatmul.bf16.gmra.mxu0 %v5264_v17  ;;  %v923_v27 = vmax.f32 %v783_v24, 0.0 }
 0x1ab   : > { %v1970_v63 = vpop.f32.mrf.mxu2 }
 0x1ac   : > { %v1134_v22 = vld [vmem:[#allocation2 + $0x60] sm:$0x8]  ;;  %v1259_v31 = vld [vmem:[#allocation2 + $0x64] sm:$0xf] }
 0x1ad   : > { %v1135_v23 = vsel %vm6233_vm2, 0, %v1134_v22  ;;  %v1434_v35 = vshrl.u32 %v1259_v31, 16  ;;  %v1437_v42 = vshll.u32 %v1259_v31, 16  ;;  %v6346_v43 = vpop.f32.mrf.mxu1 }
 0x1ae   : > { %1136 = vst [vmem:[#allocation2 + $0x60] sm:$0x8] %v1135_v23  ;;  %v784_v25 = vpop.f32.mrf.mxu0 }
 0x1af   : > { %v785_v26 = vadd.f32 %v6228_v19, %v784_v25  ;;  %v1436_v39 = vrot.slane %v1434_v35, 7 }
 0x1b1   : > { %v924_v28 = vmax.f32 %v785_v26, 0.0  ;;  %v1439_v50 = vor.u32 %v1437_v42, %v1436_v39  ;;  %v1441_v53 = vrot.slane %v1436_v39, 4 }
 0x1b3   : > { %v5454_v29 = vpack.c.bf16 %v924_v28, %v923_v27  ;;  %v6365_v26 = vpop.f32.mrf.mxu2 }
 0x1b5   : > { %5658 = vst [vmem:[#allocation2 + $0x68] sm:$0xff] %v5454_v29   ;;  %v1258_v34 = vld [vmem:[#allocation2 + $0x60] sm:$0x8] }
 0x1b6   : > { %v787_v33 = vpop.f32.mrf.mxu0  ;;  %v1429_v37 = vshrl.u32 %v1258_v34, 16 }
 0x1b7   : > { %v788_v45 = vadd.f32 %v6228_v19, %v787_v33 }
 0x1b8   : > { %v4802_v46 = vrot.slane %v1429_v37, 11 }
 0x1b9   : > { %826 = vmatmul.bf16.gmra.mxu0 %v5265_v32  ;;  %v925_v54 = vmax.f32 %v788_v45, 0.0 }
 0x1ba   : > { %v1440_v56 = vsel %vm6251_vm7, %v4802_v46, %v1439_v50 }
 0x1bb   : > { %v1713_v60 = vunpack.c.l.b16 %v1440_v56 }
 0x1bc   : > { %v1191_v40 = vld [vmem:[#allocation2 + $0x6c] sm:$0x1]  ;;  %v1260_v41 = vld [vmem:[#allocation2 + $0x68] sm:$0xf] }
 0x1bd   : > { %v1192_v44 = vsel %vm6244_vm5, 0, %v1191_v40  ;;  %v1443_v47 = vshrl.u32 %v1260_v41, 16  ;;  %v1446_v52 = vshll.u32 %v1260_v41, 16 }
 0x1be   : > { %1193 = vst [vmem:[#allocation2 + $0x6c] sm:$0x1] %v1192_v44  ;;  %v789_v48 = vpop.f32.mrf.mxu0 }
 0x1bf   : > { %v790_v49 = vadd.f32 %v6228_v19, %v789_v48  ;;  %v1445_v51 = vrot.slane %v1443_v47, 7 }
 0x1c1   : > { %v926_v55 = vmax.f32 %v790_v49, 0.0  ;;  %v1448_v57 = vor.u32 %v1446_v52, %v1445_v51  ;;  %v5268_v52 = vld [vmem:[#allocation3 + $0xc8] sm:$0xff] }
 0x1c3   : > { %v5459_v58 = vpack.c.bf16 %v926_v55, %v925_v54  ;;  %v1449_v59 = vsel %vm6251_vm7, %v1441_v53, %v1448_v57 }
 0x1c4   : > { %v1714_v62 = vunpack.c.l.b16 %v1449_v59  ;;  %v6386_v59 = vld [vmem:[%s7133_s2] ss:$0 sm:$0xff] }
 0x1c5   : > { %5659 = vst [vmem:[#allocation2 + $0x70] sm:$0xff] %v5459_v58   ;;  %v1829_v30 = vpop.f32.mrf.mxu1 }
 0x1c6   : > { %v6356_v1 = vadd.f32 %v1970_v63, %v1829_v30  ;;  %v792_v2 = vpop.f32.mrf.mxu0  ;;  %v1740_v4 = vpack.c.b16 %v1714_v62, %v1713_v60 }
 0x1c7   : > { %v793_v8 = vadd.f32 %v6228_v19, %v792_v2 }
 0x1c8   : > { %1848 = vmatmul.bf16.gmra.mxu1 %v1740_v4  ;;  %1994 = vmatmul.bf16.gmra.mxu2 %v1740_v4 }
 0x1c9   : > { %2164 = vmatmul.bf16.gmra.mxu3 %v1740_v4  ;;  %831 = vmatmul.bf16.gmra.mxu0 %v5266_v0  ;;  %v927_v12 = vmax.f32 %v793_v8, 0.0 }
 0x1cb   : > { %v1975_v51 = vpop.f32.mrf.mxu2 }
 0x1cc   : > { %v1137_v5 = vld [vmem:[#allocation2 + $0x70] sm:$0x8]  ;;  %v2145_v6 = vpop.f32.mrf.mxu3  ;;  %v1262_v15 = vld [vmem:[#allocation2 + $0x74] sm:$0xf] }
 0x1cd   : > { %v1138_v7 = vsel %vm6233_vm2, 0, %v1137_v5  ;;  %v6362_v9 = vadd.f32 %v2145_v6, %v6338_v18  ;;  %v1456_v21 = vshrl.u32 %v1262_v15, 16  ;;  %v1459_v18 = vshll.u32 %v1262_v15, 16  ;;  %v6367_v27 = vpop.f32.mrf.mxu1  ;;  %v5269_v6 = vld [vmem:[#allocation3 + $0xd0] sm:$0xff] }
 0x1ce   : > { %1139 = vst [vmem:[#allocation2 + $0x70] sm:$0x8] %v1138_v7  ;;  %v794_v10 = vpop.f32.mrf.mxu0 }
 0x1cf   : > { %v795_v11 = vadd.f32 %v6228_v19, %v794_v10  ;;  %v1458_v23 = vrot.slane %v1456_v21, 7 }
 0x1d1   : > { %v928_v13 = vmax.f32 %v795_v11, 0.0  ;;  %v1461_v35 = vor.u32 %v1459_v18, %v1458_v23  ;;  %v1463_v40 = vrot.slane %v1458_v23, 4 }
 0x1d3   : > { %v5464_v14 = vpack.c.bf16 %v928_v13, %v927_v12  ;;  %v6393_v15 = vpop.f32.mrf.mxu2 }
 0x1d4   : > { %v6377_v48 = vpop.f32.mrf.mxu3 }
 0x1d5   : > { %5660 = vst [vmem:[#allocation2 + $0x78] sm:$0xff] %v5464_v14   ;;  %v1261_v20 = vld [vmem:[#allocation2 + $0x70] sm:$0x8] }
 0x1d6   : > { %v797_v17 = vpop.f32.mrf.mxu0  ;;  %v1451_v22 = vshrl.u32 %v1261_v20, 16 }
 0x1d7   : > { %v798_v29 = vadd.f32 %v6228_v19, %v797_v17 }
 0x1d8   : > { %v4803_v31 = vrot.slane %v1451_v22, 11 }
 0x1d9   : > { %836 = vmatmul.bf16.gmra.mxu0 %v5267_v16  ;;  %v929_v41 = vmax.f32 %v798_v29, 0.0 }
 0x1da   : > { %v1462_v44 = vsel %vm6251_vm7, %v4803_v31, %v1461_v35 }
 0x1db   : > { %v1715_v49 = vunpack.c.l.b16 %v1462_v44 }
 0x1dc   : > { %v1194_v24 = vld [vmem:[#allocation2 + $0x7c] sm:$0x1]  ;;  %v1263_v25 = vld [vmem:[#allocation2 + $0x78] sm:$0xf] }
 0x1dd   : > { %v1195_v28 = vsel %vm6244_vm5, 0, %v1194_v24  ;;  %v1465_v32 = vshrl.u32 %v1263_v25, 16  ;;  %v1468_v39 = vshll.u32 %v1263_v25, 16  ;;  %v5344_v24 = vld [vmem:[#allocation8 + $0x138] sm:$0xff] }
 0x1de   : > { %1196 = vst [vmem:[#allocation2 + $0x7c] sm:$0x1] %v1195_v28  ;;  %v799_v33 = vpop.f32.mrf.mxu0  ;;  %2610 = vmatpush.bf16.msra.mxu2 %v5344_v24 }
 0x1df   : > { %v800_v34 = vadd.f32 %v6228_v19, %v799_v33  ;;  %v1467_v37 = vrot.slane %v1465_v32, 7 }
 0x1e1   : > { %v930_v42 = vmax.f32 %v800_v34, 0.0  ;;  %v1470_v45 = vor.u32 %v1468_v39, %v1467_v37 }
 0x1e3   : > { %v5469_v46 = vpack.c.bf16 %v930_v42, %v929_v41  ;;  %v1471_v47 = vsel %vm6251_vm7, %v1463_v40, %v1470_v45 }
 0x1e4   : > { %v1716_v50 = vunpack.c.l.b16 %v1471_v47 }
 0x1e5   : > { %5661 = vst [vmem:[#allocation2 + $0x80] sm:$0xff] %v5469_v46   ;;  %v1834_v19 = vpop.f32.mrf.mxu1  ;;  %v5270_v46 = vld [vmem:[#allocation3 + $0xd8] sm:$0xff] }
 0x1e6   : > { %v6379_v53 = vadd.f32 %v1975_v51, %v1834_v19  ;;  %v802_v54 = vpop.f32.mrf.mxu0  ;;  %v1741_v55 = vpack.c.b16 %v1716_v50, %v1715_v49 }
 0x1e7   : > { %v803_v60 = vadd.f32 %v6386_v59, %v802_v54 }
 0x1e8   : > { %1853 = vmatmul.bf16.gmra.mxu1 %v1741_v55  ;;  %1999 = vmatmul.bf16.gmra.mxu2 %v1741_v55 }
 0x1e9   : > { %2169 = vmatmul.bf16.gmra.mxu3 %v1741_v55  ;;  %841 = vmatmul.bf16.gmra.mxu0 %v5268_v52  ;;  %v931_v0 = vmax.f32 %v803_v60, 0.0 }
 0x1eb   : > { %v1980_v44 = vpop.f32.mrf.mxu2 }
 0x1ec   : > { %v1140_v56 = vld [vmem:[#allocation2 + $0x80] sm:$0x8]  ;;  %v2150_v57 = vpop.f32.mrf.mxu3  ;;  %v1265_v5 = vld [vmem:[#allocation2 + $0x84] sm:$0xf] }
 0x1ed   : > { %v1141_v58 = vsel %vm6233_vm2, 0, %v1140_v56  ;;  %v6390_v62 = vadd.f32 %v2150_v57, %v6356_v1  ;;  %v1478_v10 = vshrl.u32 %v1265_v5, 16  ;;  %v1481_v1 = vshll.u32 %v1265_v5, 16  ;;  %v6395_v16 = vpop.f32.mrf.mxu1  ;;  %v5352_v57 = vld [vmem:[#allocation8 + $0x1f8] sm:$0xff] }
 0x1ee   : > { %1142 = vst [vmem:[#allocation2 + $0x80] sm:$0x8] %v1141_v58  ;;  %v804_v63 = vpop.f32.mrf.mxu0  ;;  %v5336_v58 = vld [vmem:[#allocation8 + $0x78] sm:$0xff]  ;;  %2802 = vmatpush.bf16.msrb.mxu3 %v5352_v57 }
 0x1ef   : > { %v805_v30 = vadd.f32 %v6386_v59, %v804_v63  ;;  %v1480_v12 = vrot.slane %v1478_v10, 7  ;;  %2418 = vmatpush.bf16.msra.mxu1 %v5336_v58 }
 0x1f1   : > { %v932_v2 = vmax.f32 %v805_v30, 0.0  ;;  %v1483_v18 = vor.u32 %v1481_v1, %v1480_v12  ;;  %v1485_v31 = vrot.slane %v1480_v12, 4 }
 0x1f3   : > { %v5474_v4 = vpack.c.bf16 %v932_v2, %v931_v0 }
 0x1f4   : > { %v6405_v40 = vpop.f32.mrf.mxu3 }
 0x1f5   : > { %5662 = vst [vmem:[#allocation2 + $0x88] sm:$0xff] %v5474_v4   ;;  %v1264_v8 = vld [vmem:[#allocation2 + $0x80] sm:$0x8] }
 0x1f6   : > { %v807_v7 = vpop.f32.mrf.mxu0  ;;  %v1473_v11 = vshrl.u32 %v1264_v8, 16  ;;  %v5271_v4 = vld [vmem:[#allocation3 + $0xe0] sm:$0xff] }
 0x1f7   : > { %v808_v20 = vadd.f32 %v6386_v59, %v807_v7 }
 0x1f8   : > { %v4804_v21 = vrot.slane %v1473_v11, 11 }
 0x1f9   : > { %846 = vmatmul.bf16.gmra.mxu0 %v5269_v6  ;;  %v933_v32 = vmax.f32 %v808_v20, 0.0 }
 0x1fa   : > { %v1484_v34 = vsel %vm6251_vm7, %v4804_v21, %v1483_v18 }
 0x1fb   : > { %v1717_v41 = vunpack.c.l.b16 %v1484_v34 }
 0x1fc   : > { %v1197_v13 = vld [vmem:[#allocation2 + $0x8c] sm:$0x1]  ;;  %v1266_v14 = vld [vmem:[#allocation2 + $0x88] sm:$0xf] }
 0x1fd   : > { %v1198_v17 = vsel %vm6244_vm5, 0, %v1197_v13  ;;  %v1487_v22 = vshrl.u32 %v1266_v14, 16  ;;  %v1490_v29 = vshll.u32 %v1266_v14, 16  ;;  %v6416_v13 = vpop.f32.mrf.mxu2 }
 0x1fe   : > { %1199 = vst [vmem:[#allocation2 + $0x8c] sm:$0x1] %v1198_v17  ;;  %v809_v23 = vpop.f32.mrf.mxu0 }
 0x1ff   : > { %v810_v25 = vadd.f32 %v6386_v59, %v809_v23  ;;  %v1489_v28 = vrot.slane %v1487_v22, 7  ;;  %v5343_v23 = vld [vmem:[#allocation8 + $0x130] sm:$0xff] }
 0x200   : > { %2611 = vmatpush.bf16.msra.mxu2 %v5343_v23 }
 0x201   : > { %v934_v33 = vmax.f32 %v810_v25, 0.0  ;;  %v1492_v35 = vor.u32 %v1490_v29, %v1489_v28 }
 0x203   : > { %v5479_v37 = vpack.c.bf16 %v934_v33, %v933_v32  ;;  %v1493_v39 = vsel %vm6251_vm7, %v1485_v31, %v1492_v35 }
 0x204   : > { %v1718_v42 = vunpack.c.l.b16 %v1493_v39 }
 0x205   : > { %5663 = vst [vmem:[#allocation2 + $0x90] sm:$0xff] %v5479_v37   ;;  %v1839_v45 = vpop.f32.mrf.mxu1 }
 0x206   : > { %v6407_v47 = vadd.f32 %v1980_v44, %v1839_v45  ;;  %v812_v49 = vpop.f32.mrf.mxu0  ;;  %v1742_v50 = vpack.c.b16 %v1718_v42, %v1717_v41 }
 0x207   : > { %v813_v54 = vadd.f32 %v6386_v59, %v812_v49 }
 0x208   : > { %1858 = vmatmul.bf16.gmra.mxu1 %v1742_v50  ;;  %2004 = vmatmul.bf16.gmra.mxu2 %v1742_v50 }
 0x209   : > { %2174 = vmatmul.bf16.gmra.mxu3 %v1742_v50  ;;  %851 = vmatmul.bf16.gmra.mxu0 %v5270_v46  ;;  %v935_v63 = vmax.f32 %v813_v54, 0.0  ;;  %v5272_v46 = vld [vmem:[#allocation3 + $0xe8] sm:$0xff] }
 0x20b   : > { %v1985_v44 = vpop.f32.mrf.mxu2 }
 0x20c   : > { %v1143_v51 = vld [vmem:[#allocation2 + $0x90] sm:$0x8]  ;;  %v2155_v19 = vpop.f32.mrf.mxu3  ;;  %v1268_v2 = vld [vmem:[#allocation2 + $0x94] sm:$0xf] }
 0x20d   : > { %v1144_v52 = vsel %vm6233_vm2, 0, %v1143_v51  ;;  %v6413_v55 = vadd.f32 %v2155_v19, %v6379_v53  ;;  %v1500_v7 = vshrl.u32 %v1268_v2, 16  ;;  %v1503_v12 = vshll.u32 %v1268_v2, 16  ;;  %v6418_v14 = vpop.f32.mrf.mxu1 }
 0x20e   : > { %1145 = vst [vmem:[#allocation2 + $0x90] sm:$0x8] %v1144_v52  ;;  %v814_v56 = vpop.f32.mrf.mxu0 }
 0x20f   : > { %v815_v60 = vadd.f32 %v6386_v59, %v814_v56  ;;  %v1502_v8 = vrot.slane %v1500_v7, 7 }
 0x211   : > { %v936_v30 = vmax.f32 %v815_v60, 0.0  ;;  %v1505_v25 = vor.u32 %v1503_v12, %v1502_v8  ;;  %v1507_v29 = vrot.slane %v1502_v8, 4  ;;  %v5351_v60 = vld [vmem:[#allocation8 + $0x1f0] sm:$0xff] }
 0x212   : > { %2803 = vmatpush.bf16.msrb.mxu3 %v5351_v60 }
 0x213   : > { %v5484_v0 = vpack.c.bf16 %v936_v30, %v935_v63  ;;  %v5335_v63 = vld [vmem:[#allocation8 + $0x70] sm:$0xff] }
 0x214   : > { %v6428_v39 = vpop.f32.mrf.mxu3  ;;  %2419 = vmatpush.bf16.msra.mxu1 %v5335_v63 }
 0x215   : > { %5664 = vst [vmem:[#allocation2 + $0x98] sm:$0xff] %v5484_v0   ;;  %v1267_v6 = vld [vmem:[#allocation2 + $0x90] sm:$0x8] }
 0x216   : > { %v817_v5 = vpop.f32.mrf.mxu0  ;;  %v1495_v53 = vshrl.u32 %v1267_v6, 16  ;;  %v5273_v6 = vld [vmem:[#allocation3 + $0xf0] sm:$0xff] }
 0x217   : > { %v818_v17 = vadd.f32 %v6386_v59, %v817_v5 }
 0x218   : > { %v4805_v20 = vrot.slane %v1495_v53, 11 }
 0x219   : > { %856 = vmatmul.bf16.gmra.mxu0 %v5271_v4  ;;  %v937_v31 = vmax.f32 %v818_v17, 0.0  ;;  %v6439_v17 = vpop.f32.mrf.mxu2 }
 0x21a   : > { %v1506_v33 = vsel %vm6251_vm7, %v4805_v20, %v1505_v25 }
 0x21b   : > { %v1719_v41 = vunpack.c.l.b16 %v1506_v33 }
 0x21c   : > { %v1200_v10 = vld [vmem:[#allocation2 + $0x9c] sm:$0x1]  ;;  %v1269_v11 = vld [vmem:[#allocation2 + $0x98] sm:$0xf] }
 0x21d   : > { %v1201_v1 = vsel %vm6244_vm5, 0, %v1200_v10  ;;  %v1509_v21 = vshrl.u32 %v1269_v11, 16  ;;  %v1512_v28 = vshll.u32 %v1269_v11, 16 }
 0x21e   : > { %1202 = vst [vmem:[#allocation2 + $0x9c] sm:$0x1] %v1201_v1  ;;  %v819_v22 = vpop.f32.mrf.mxu0 }
 0x21f   : > { %v820_v24 = vadd.f32 %v6386_v59, %v819_v22  ;;  %v1511_v18 = vrot.slane %v1509_v21, 7 }
 0x221   : > { %v938_v32 = vmax.f32 %v820_v24, 0.0  ;;  %v1514_v34 = vor.u32 %v1512_v28, %v1511_v18  ;;  %v5342_v18 = vld [vmem:[#allocation8 + $0x128] sm:$0xff] }
 0x222   : > { %2612 = vmatpush.bf16.msra.mxu2 %v5342_v18 }
 0x223   : > { %v5489_v35 = vpack.c.bf16 %v938_v32, %v937_v31  ;;  %v1515_v37 = vsel %vm6251_vm7, %v1507_v29, %v1514_v34 }
 0x224   : > { %v1720_v42 = vunpack.c.l.b16 %v1515_v37 }
 0x225   : > { %5665 = vst [vmem:[#allocation2 + $0xa0] sm:$0xff] %v5489_v35   ;;  %v1844_v45 = vpop.f32.mrf.mxu1 }
 0x226   : > { %v6430_v49 = vadd.f32 %v1985_v44, %v1844_v45  ;;  %v822_v50 = vpop.f32.mrf.mxu0  ;;  %v1743_v51 = vpack.c.b16 %v1720_v42, %v1719_v41 }
 0x227   : > { %v823_v56 = vadd.f32 %v6386_v59, %v822_v50 }
 0x228   : > { %1863 = vmatmul.bf16.gmra.mxu1 %v1743_v51  ;;  %2009 = vmatmul.bf16.gmra.mxu2 %v1743_v51 }
 0x229   : > { %2179 = vmatmul.bf16.gmra.mxu3 %v1743_v51  ;;  %861 = vmatmul.bf16.gmra.mxu0 %v5272_v46  ;;  %v939_v0 = vmax.f32 %v823_v56, 0.0 }
 0x22b   : > { %v1990_v51 = vpop.f32.mrf.mxu2 }
 0x22c   : > { %v1146_v19 = vld [vmem:[#allocation2 + $0xa0] sm:$0x8]  ;;  %v2160_v52 = vpop.f32.mrf.mxu3  ;;  %v1271_v5 = vld [vmem:[#allocation2 + $0xa4] sm:$0xf] }
 0x22d   : > { %v1147_v54 = vsel %vm6233_vm2, 0, %v1146_v19  ;;  %v6436_v57 = vadd.f32 %v2160_v52, %v6407_v47  ;;  %v1522_v8 = vshrl.u32 %v1271_v5, 16  ;;  %v1525_v1 = vshll.u32 %v1271_v5, 16  ;;  %v6441_v20 = vpop.f32.mrf.mxu1  ;;  %v5274_v52 = vld [vmem:[#allocation3 + $0xf8] sm:$0xff]  ;;  %v5350_v5 = vld [vmem:[#allocation8 + $0x1e8] sm:$0xff] }
 0x22e   : > { %1148 = vst [vmem:[#allocation2 + $0xa0] sm:$0x8] %v1147_v54  ;;  %v824_v58 = vpop.f32.mrf.mxu0  ;;  %2804 = vmatpush.bf16.msrb.mxu3 %v5350_v5 }
 0x22f   : > { %v825_v30 = vadd.f32 %v6386_v59, %v824_v58  ;;  %v1524_v10 = vrot.slane %v1522_v8, 7 }
 0x231   : > { %v940_v2 = vmax.f32 %v825_v30, 0.0  ;;  %v1527_v29 = vor.u32 %v1525_v1, %v1524_v10  ;;  %v1529_v33 = vrot.slane %v1524_v10, 4 }
 0x233   : > { %v5494_v4 = vpack.c.bf16 %v940_v2, %v939_v0  ;;  %v6462_v18 = vpop.f32.mrf.mxu2 }
 0x234   : > { %v6451_v45 = vpop.f32.mrf.mxu3 }
 0x235   : > { %5666 = vst [vmem:[#allocation2 + $0xa8] sm:$0xff] %v5494_v4   ;;  %v1270_v53 = vld [vmem:[#allocation2 + $0xa0] sm:$0x8] }
 0x236   : > { %v827_v7 = vpop.f32.mrf.mxu0  ;;  %v1517_v47 = vshrl.u32 %v1270_v53, 16 }
 0x237   : > { %v828_v22 = vadd.f32 %v6386_v59, %v827_v7 }
 0x238   : > { %v4806_v23 = vrot.slane %v1517_v47, 11 }
 0x239   : > { %866 = vmatmul.bf16.gmra.mxu0 %v5273_v6  ;;  %v941_v34 = vmax.f32 %v828_v22, 0.0  ;;  %v5334_v6 = vld [vmem:[#allocation8 + $0x68] sm:$0xff] }
 0x23a   : > { %v1528_v37 = vsel %vm6251_vm7, %v4806_v23, %v1527_v29  ;;  %2420 = vmatpush.bf16.msra.mxu1 %v5334_v6 }
 0x23b   : > { %v1721_v46 = vunpack.c.l.b16 %v1528_v37 }
 0x23c   : > { %v1203_v11 = vld [vmem:[#allocation2 + $0xac] sm:$0x1]  ;;  %v1272_v12 = vld [vmem:[#allocation2 + $0xa8] sm:$0xf] }
 0x23d   : > { %v1204_v21 = vsel %vm6244_vm5, 0, %v1203_v11  ;;  %v1531_v24 = vshrl.u32 %v1272_v12, 16  ;;  %v1534_v32 = vshll.u32 %v1272_v12, 16  ;;  %v5275_v11 = vld [vmem:[#allocation3 + $0x100] sm:$0xff] }
 0x23e   : > { %1205 = vst [vmem:[#allocation2 + $0xac] sm:$0x1] %v1204_v21  ;;  %v829_v25 = vpop.f32.mrf.mxu0 }
 0x23f   : > { %v830_v28 = vadd.f32 %v6386_v59, %v829_v25  ;;  %v1533_v31 = vrot.slane %v1531_v24, 7 }
 0x241   : > { %v942_v35 = vmax.f32 %v830_v28, 0.0  ;;  %v1536_v41 = vor.u32 %v1534_v32, %v1533_v31 }
 0x243   : > { %v5499_v42 = vpack.c.bf16 %v942_v35, %v941_v34  ;;  %v1537_v44 = vsel %vm6251_vm7, %v1529_v33, %v1536_v41  ;;  %v5341_v35 = vld [vmem:[#allocation8 + $0x120] sm:$0xff] }
 0x244   : > { %v1722_v50 = vunpack.c.l.b16 %v1537_v44  ;;  %2613 = vmatpush.bf16.msra.mxu2 %v5341_v35 }
 0x245   : > { %5667 = vst [vmem:[#allocation2 + $0xb0] sm:$0xff] %v5499_v42   ;;  %v1849_v19 = vpop.f32.mrf.mxu1 }
 0x246   : > { %v6453_v54 = vadd.f32 %v1990_v51, %v1849_v19  ;;  %v832_v56 = vpop.f32.mrf.mxu0  ;;  %v1744_v58 = vpack.c.b16 %v1722_v50, %v1721_v46 }
 0x247   : > { %v833_v0 = vadd.f32 %v6386_v59, %v832_v56 }
 0x248   : > { %1868 = vmatmul.bf16.gmra.mxu1 %v1744_v58  ;;  %2014 = vmatmul.bf16.gmra.mxu2 %v1744_v58 }
 0x249   : > { %2184 = vmatmul.bf16.gmra.mxu3 %v1744_v58  ;;  %871 = vmatmul.bf16.gmra.mxu0 %v5274_v52  ;;  %v943_v53 = vmax.f32 %v833_v0, 0.0 }
 0x24b   : > { %v1995_v0 = vpop.f32.mrf.mxu2 }
 0x24c   : > { %v1149_v60 = vld [vmem:[#allocation2 + $0xb0] sm:$0x8]  ;;  %v2165_v63 = vpop.f32.mrf.mxu3  ;;  %v1274_v10 = vld [vmem:[#allocation2 + $0xb4] sm:$0xf] }
 0x24d   : > { %v1150_v30 = vsel %vm6233_vm2, 0, %v1149_v60  ;;  %v6459_v2 = vadd.f32 %v2165_v63, %v6430_v49  ;;  %v1544_v21 = vshrl.u32 %v1274_v10, 16  ;;  %v1547_v25 = vshll.u32 %v1274_v10, 16  ;;  %v6464_v28 = vpop.f32.mrf.mxu1 }
 0x24e   : > { %1151 = vst [vmem:[#allocation2 + $0xb0] sm:$0x8] %v1150_v30  ;;  %v834_v4 = vpop.f32.mrf.mxu0 }
 0x24f   : > { %v835_v7 = vadd.f32 %v6386_v59, %v834_v4  ;;  %v1546_v22 = vrot.slane %v1544_v21, 7  ;;  %v5333_v21 = vld [vmem:[#allocation8 + $0x60] sm:$0xff] }
 0x250   : > { %2421 = vmatpush.bf16.msra.mxu1 %v5333_v21 }
 0x251   : > { %v944_v8 = vmax.f32 %v835_v7, 0.0  ;;  %v1549_v41 = vor.u32 %v1547_v25, %v1546_v22  ;;  %v1551_v46 = vrot.slane %v1546_v22, 4 }
 0x253   : > { %v5504_v47 = vpack.c.bf16 %v944_v8, %v943_v53 }
 0x254   : > { %v6474_v60 = vpop.f32.mrf.mxu3 }
 0x255   : > { %5668 = vst [vmem:[#allocation2 + $0xb8] sm:$0xff] %v5504_v47   ;;  %v1273_v1 = vld [vmem:[#allocation2 + $0xb0] sm:$0x8] }
 0x256   : > { %v837_v12 = vpop.f32.mrf.mxu0  ;;  %v1539_v49 = vshrl.u32 %v1273_v1, 16  ;;  %v5349_v1 = vld [vmem:[#allocation8 + $0x1e0] sm:$0xff] }
 0x257   : > { %v838_v31 = vadd.f32 %v6386_v59, %v837_v12  ;;  %2805 = vmatpush.bf16.msrb.mxu3 %v5349_v1 }
 0x258   : > { %v4807_v32 = vrot.slane %v1539_v49, 11 }
 0x259   : > { %876 = vmatmul.bf16.gmra.mxu0 %v5275_v11  ;;  %v945_v50 = vmax.f32 %v838_v31, 0.0 }
 0x25a   : > { %v1550_v19 = vsel %vm6251_vm7, %v4807_v32, %v1549_v41  ;;  %v6485_v41 = vpop.f32.mrf.mxu2 }
 0x25b   : > { %v1723_v63 = vunpack.c.l.b16 %v1550_v19 }
 0x25c   : > { %v1206_v23 = vld [vmem:[#allocation2 + $0xbc] sm:$0x1]  ;;  %v1275_v24 = vld [vmem:[#allocation2 + $0xb8] sm:$0xf] }
 0x25d   : > { %v1207_v29 = vsel %vm6244_vm5, 0, %v1206_v23  ;;  %v1553_v33 = vshrl.u32 %v1275_v24, 16  ;;  %v1556_v44 = vshll.u32 %v1275_v24, 16 }
 0x25e   : > { %1208 = vst [vmem:[#allocation2 + $0xbc] sm:$0x1] %v1207_v29  ;;  %v839_v34 = vpop.f32.mrf.mxu0 }
 0x25f   : > { %v840_v37 = vadd.f32 %v6386_v59, %v839_v34  ;;  %v1555_v42 = vrot.slane %v1553_v33, 7 }
 0x261   : > { %v946_v51 = vmax.f32 %v840_v37, 0.0  ;;  %v1558_v52 = vor.u32 %v1556_v44, %v1555_v42 }
 0x263   : > { %v5509_v56 = vpack.c.bf16 %v946_v51, %v945_v50  ;;  %v1559_v58 = vsel %vm6251_vm7, %v1551_v46, %v1558_v52  ;;  %v5340_v52 = vld [vmem:[#allocation8 + $0x118] sm:$0xff] }
 0x264   : > { %v1724_v30 = vunpack.c.l.b16 %v1559_v58  ;;  %2614 = vmatpush.bf16.msra.mxu2 %v5340_v52 }
 0x265   : > { %5669 = vst [vmem:[#allocation2 + $0xc0] sm:$0xff] %v5509_v56   ;;  %v1854_v4 = vpop.f32.mrf.mxu1 }
 0x266   : > { %v6476_v5 = vadd.f32 %v1995_v0, %v1854_v4  ;;  %v842_v6 = vpop.f32.mrf.mxu0  ;;  %v1745_v7 = vpack.c.b16 %v1724_v30, %v1723_v63 }
 0x267   : > { %v843_v10 = vadd.f32 %v6386_v59, %v842_v6 }
 0x268   : > { %1873 = vmatmul.bf16.gmra.mxu1 %v1745_v7  ;;  %2019 = vmatmul.bf16.gmra.mxu2 %v1745_v7 }
 0x269   : > { %2189 = vmatmul.bf16.gmra.mxu3 %v1745_v7  ;;  %v947_v22 = vmax.f32 %v843_v10, 0.0 }
 0x26b   : > { %v2000_v21 = vpop.f32.mrf.mxu2 }
 0x26c   : > { %v1152_v53 = vld [vmem:[#allocation2 + $0xc0] sm:$0x8]  ;;  %v2170_v8 = vpop.f32.mrf.mxu3  ;;  %v1277_v25 = vld [vmem:[#allocation2 + $0xc4] sm:$0xf] }
 0x26d   : > { %v1153_v47 = vsel %vm6233_vm2, 0, %v1152_v53  ;;  %v6482_v11 = vadd.f32 %v2170_v8, %v6453_v54  ;;  %v1566_v32 = vshrl.u32 %v1277_v25, 16  ;;  %v1569_v37 = vshll.u32 %v1277_v25, 16  ;;  %v6487_v42 = vpop.f32.mrf.mxu1 }
 0x26e   : > { %1154 = vst [vmem:[#allocation2 + $0xc0] sm:$0x8] %v1153_v47  ;;  %v844_v12 = vpop.f32.mrf.mxu0 }
 0x26f   : > { %v845_v49 = vadd.f32 %v6386_v59, %v844_v12  ;;  %v1568_v34 = vrot.slane %v1566_v32, 7 }
 0x271   : > { %v948_v23 = vmax.f32 %v845_v49, 0.0  ;;  %v1571_v58 = vor.u32 %v1569_v37, %v1568_v34  ;;  %v1573_v0 = vrot.slane %v1568_v34, 4  ;;  %v5384_v37 = vld [vmem:[#allocation9 + $0x38] sm:$0xff] }
 0x272   : > { %4194 = vmatpush.bf16.msrb.mxu0 %v5384_v37 }
 0x273   : > { %v5514_v24 = vpack.c.bf16 %v948_v23, %v947_v22 }
 0x274   : > { %v6497_v10 = vpop.f32.mrf.mxu3 }
 0x275   : > { %5670 = vst [vmem:[#allocation2 + $0xc8] sm:$0xff] %v5514_v24   ;;  %v1276_v31 = vld [vmem:[#allocation2 + $0xc0] sm:$0x8] }
 0x276   : > { %v847_v29 = vpop.f32.mrf.mxu0  ;;  %v1561_v33 = vshrl.u32 %v1276_v31, 16 }
 0x277   : > { %v848_v46 = vadd.f32 %v6386_v59, %v847_v29 }
 0x278   : > { %v4808_v50 = vrot.slane %v1561_v33, 11 }
 0x279   : > { %v949_v4 = vmax.f32 %v848_v46, 0.0 }
 0x27a   : > { %v1572_v7 = vsel %vm6251_vm7, %v4808_v50, %v1571_v58 }
 0x27b   : > { %v1725_v12 = vunpack.c.l.b16 %v1572_v7 }
 0x27c   : > { %v1209_v54 = vld [vmem:[#allocation2 + $0xcc] sm:$0x1]  ;;  %v1278_v35 = vld [vmem:[#allocation2 + $0xc8] sm:$0xf] }
 0x27d   : > { %v1210_v44 = vsel %vm6244_vm5, 0, %v1209_v54  ;;  %v1575_v51 = vshrl.u32 %v1278_v35, 16  ;;  %v1578_v30 = vshll.u32 %v1278_v35, 16  ;;  %v5348_v54 = vld [vmem:[#allocation8 + $0x1d8] sm:$0xff] }
 0x27e   : > { %1211 = vst [vmem:[#allocation2 + $0xcc] sm:$0x1] %v1210_v44  ;;  %v849_v19 = vpop.f32.mrf.mxu0  ;;  %v5332_v35 = vld [vmem:[#allocation8 + $0x58] sm:$0xff]  ;;  %2806 = vmatpush.bf16.msrb.mxu3 %v5348_v54 }
 0x27f   : > { %v850_v56 = vadd.f32 %v6386_v59, %v849_v19  ;;  %v1577_v63 = vrot.slane %v1575_v51, 7  ;;  %2422 = vmatpush.bf16.msra.mxu1 %v5332_v35 }
 0x281   : > { %v950_v6 = vmax.f32 %v850_v56, 0.0  ;;  %v1580_v53 = vor.u32 %v1578_v30, %v1577_v63 }
 0x283   : > { %v5519_v8 = vpack.c.bf16 %v950_v6, %v949_v4  ;;  %v1581_v47 = vsel %vm6251_vm7, %v1573_v0, %v1580_v53  ;;  %v6508_v6 = vpop.f32.mrf.mxu2 }
 0x284   : > { %v1726_v1 = vunpack.c.l.b16 %v1581_v47 }
 0x285   : > { %5671 = vst [vmem:[#allocation2 + $0xd0] sm:$0xff] %v5519_v8   ;;  %v1859_v49 = vpop.f32.mrf.mxu1 }
 0x286   : > { %v6499_v22 = vadd.f32 %v2000_v21, %v1859_v49  ;;  %v852_v23 = vpop.f32.mrf.mxu0  ;;  %v1746_v24 = vpack.c.b16 %v1726_v1, %v1725_v12  ;;  %v5339_v21 = vld [vmem:[#allocation8 + $0x110] sm:$0xff] }
 0x287   : > { %v853_v32 = vadd.f32 %v6386_v59, %v852_v23  ;;  %2615 = vmatpush.bf16.msra.mxu2 %v5339_v21 }
 0x288   : > { %1878 = vmatmul.bf16.gmra.mxu1 %v1746_v24  ;;  %2024 = vmatmul.bf16.gmra.mxu2 %v1746_v24 }
 0x289   : > { %2194 = vmatmul.bf16.gmra.mxu3 %v1746_v24  ;;  %v951_v46 = vmax.f32 %v853_v32, 0.0 }
 0x28c   : > { %v1155_v25 = vld [vmem:[#allocation2 + $0xd0] sm:$0x8]  ;;  %v2175_v29 = vpop.f32.mrf.mxu3  ;;  %v1280_v19 = vld [vmem:[#allocation2 + $0xd4] sm:$0xf] }
 0x28d   : > { %v1156_v31 = vsel %vm6233_vm2, 0, %v1155_v25  ;;  %v6505_v33 = vadd.f32 %v2175_v29, %v6476_v5  ;;  %v1588_v58 = vshrl.u32 %v1280_v19, 16  ;;  %v1591_v4 = vshll.u32 %v1280_v19, 16  ;;  %v6510_v7 = vpop.f32.mrf.mxu1 }
 0x28e   : > { %1157 = vst [vmem:[#allocation2 + $0xd0] sm:$0x8] %v1156_v31  ;;  %v854_v34 = vpop.f32.mrf.mxu0 }
 0x28f   : > { %v855_v44 = vadd.f32 %v6386_v59, %v854_v34  ;;  %v1590_v63 = vrot.slane %v1588_v58, 7 }
 0x291   : > { %v952_v50 = vmax.f32 %v855_v44, 0.0  ;;  %v1593_v23 = vor.u32 %v1591_v4, %v1590_v63  ;;  %v1595_v29 = vrot.slane %v1590_v63, 4 }
 0x293   : > { %v5524_v51 = vpack.c.bf16 %v952_v50, %v951_v46 }
 0x294   : > { %v6520_v44 = vpop.f32.mrf.mxu3 }
 0x295   : > { %5672 = vst [vmem:[#allocation2 + $0xd8] sm:$0xff] %v5524_v51   ;;  %v1279_v56 = vld [vmem:[#allocation2 + $0xd0] sm:$0x8]  ;;  %v2005_v51 = vpop.f32.mrf.mxu2 }
 0x296   : > { %v857_v52 = vpop.f32.mrf.mxu0  ;;  %v1583_v5 = vshrl.u32 %v1279_v56, 16 }
 0x297   : > { %v858_v8 = vadd.f32 %v6386_v59, %v857_v52 }
 0x298   : > { %v4809_v47 = vrot.slane %v1583_v5, 11 }
 0x299   : > { %v953_v31 = vmax.f32 %v858_v8, 0.0  ;;  %v5347_v8 = vld [vmem:[#allocation8 + $0x1d0] sm:$0xff] }
 0x29a   : > { %v1594_v34 = vsel %vm6251_vm7, %v4809_v47, %v1593_v23  ;;  %v5331_v47 = vld [vmem:[#allocation8 + $0x50] sm:$0xff]  ;;  %2807 = vmatpush.bf16.msrb.mxu3 %v5347_v8 }
 0x29b   : > { %v1727_v46 = vunpack.c.l.b16 %v1594_v34  ;;  %2423 = vmatpush.bf16.msra.mxu1 %v5331_v47 }
 0x29c   : > { %v1212_v30 = vld [vmem:[#allocation2 + $0xdc] sm:$0x1]  ;;  %v1281_v0 = vld [vmem:[#allocation2 + $0xd8] sm:$0xf] }
 0x29d   : > { %v1213_v53 = vsel %vm6244_vm5, 0, %v1212_v30  ;;  %v1597_v12 = vshrl.u32 %v1281_v0, 16  ;;  %v1600_v25 = vshll.u32 %v1281_v0, 16 }
 0x29e   : > { %1214 = vst [vmem:[#allocation2 + $0xdc] sm:$0x1] %v1213_v53  ;;  %v859_v1 = vpop.f32.mrf.mxu0 }
 0x29f   : > { %v860_v49 = vadd.f32 %v6386_v59, %v859_v1  ;;  %v1599_v24 = vrot.slane %v1597_v12, 7 }
 0x2a1   : > { %v954_v32 = vmax.f32 %v860_v49, 0.0  ;;  %v1602_v54 = vor.u32 %v1600_v25, %v1599_v24 }
 0x2a3   : > { %v5529_v35 = vpack.c.bf16 %v954_v32, %v953_v31  ;;  %v1603_v37 = vsel %vm6251_vm7, %v1595_v29, %v1602_v54 }
 0x2a4   : > { %v1728_v50 = vunpack.c.l.b16 %v1603_v37 }
 0x2a5   : > { %5673 = vst [vmem:[#allocation2 + $0xe0] sm:$0xff] %v5529_v35   ;;  %v1864_v19 = vpop.f32.mrf.mxu1  ;;  %v6531_v35 = vpop.f32.mrf.mxu2 }
 0x2a6   : > { %v6522_v52 = vadd.f32 %v2005_v51, %v1864_v19  ;;  %v862_v56 = vpop.f32.mrf.mxu0  ;;  %v1747_v58 = vpack.c.b16 %v1728_v50, %v1727_v46 }
 0x2a7   : > { %v863_v0 = vadd.f32 %v6386_v59, %v862_v56 }
 0x2a8   : > { %1883 = vmatmul.bf16.gmra.mxu1 %v1747_v58  ;;  %2029 = vmatmul.bf16.gmra.mxu2 %v1747_v58 }
 0x2a9   : > { %2199 = vmatmul.bf16.gmra.mxu3 %v1747_v58  ;;  %v955_v1 = vmax.f32 %v863_v0, 0.0  ;;  %v5338_v58 = vld [vmem:[#allocation8 + $0x108] sm:$0xff] }
 0x2aa   : > { %2616 = vmatpush.bf16.msra.mxu2 %v5338_v58  ;;  %v5346_v58 = vld [vmem:[#allocation8 + $0x1c8] sm:$0xff] }
 0x2ab   : > { %2808 = vmatpush.bf16.msrb.mxu3 %v5346_v58 }
 0x2ac   : > { %v1158_v5 = vld [vmem:[#allocation2 + $0xe0] sm:$0x8]  ;;  %v2180_v63 = vpop.f32.mrf.mxu3  ;;  %v1283_v23 = vld [vmem:[#allocation2 + $0xe4] sm:$0xf] }
 0x2ad   : > { %v1159_v30 = vsel %vm6233_vm2, 0, %v1158_v5  ;;  %v6528_v4 = vadd.f32 %v2180_v63, %v6499_v22  ;;  %v1610_v29 = vshrl.u32 %v1283_v23, 16  ;;  %v1613_v54 = vshll.u32 %v1283_v23, 16  ;;  %v6533_v37 = vpop.f32.mrf.mxu1 }
 0x2ae   : > { %1160 = vst [vmem:[#allocation2 + $0xe0] sm:$0x8] %v1159_v30  ;;  %v864_v53 = vpop.f32.mrf.mxu0 }
 0x2af   : > { %v865_v12 = vadd.f32 %v6386_v59, %v864_v53  ;;  %v1612_v32 = vrot.slane %v1610_v29, 7  ;;  %v2010_v29 = vpop.f32.mrf.mxu2 }
 0x2b1   : > { %v956_v21 = vmax.f32 %v865_v12, 0.0  ;;  %v1615_v63 = vor.u32 %v1613_v54, %v1612_v32  ;;  %v1617_v53 = vrot.slane %v1612_v32, 4 }
 0x2b3   : > { %v5534_v49 = vpack.c.bf16 %v956_v21, %v955_v1 }
 0x2b4   : > { %v6543_v23 = vpop.f32.mrf.mxu3 }
 0x2b5   : > { %5674 = vst [vmem:[#allocation2 + $0xe8] sm:$0xff] %v5534_v49   ;;  %v1282_v25 = vld [vmem:[#allocation2 + $0xe0] sm:$0x8] }
 0x2b6   : > { %v867_v24 = vpop.f32.mrf.mxu0  ;;  %v1605_v31 = vshrl.u32 %v1282_v25, 16 }
 0x2b7   : > { %v868_v50 = vadd.f32 %v6386_v59, %v867_v24 }
 0x2b8   : > { %v4810_v51 = vrot.slane %v1605_v31, 11 }
 0x2b9   : > { %v957_v8 = vmax.f32 %v868_v50, 0.0 }
 0x2ba   : > { %v1616_v12 = vsel %vm6251_vm7, %v4810_v51, %v1615_v63  ;;  %v5383_v63 = vld [vmem:[#allocation9 + $0x30] sm:$0xff] }
 0x2bb   : > { %v1729_v24 = vunpack.c.l.b16 %v1616_v12  ;;  %4195 = vmatpush.bf16.msrb.mxu0 %v5383_v63  ;;  %v5337_v12 = vld [vmem:[#allocation8 + $0x100] sm:$0xff] }
 0x2bc   : > { %v1215_v22 = vld [vmem:[#allocation2 + $0xec] sm:$0x1]  ;;  %v1284_v34 = vld [vmem:[#allocation2 + $0xe8] sm:$0xf]  ;;  %2617 = vmatpush.bf16.msra.mxu2 %v5337_v12 }
 0x2bd   : > { %v1216_v46 = vsel %vm6244_vm5, 0, %v1215_v22  ;;  %v1619_v19 = vshrl.u32 %v1284_v34, 16  ;;  %v1622_v0 = vshll.u32 %v1284_v34, 16 }
 0x2be   : > { %1217 = vst [vmem:[#allocation2 + $0xec] sm:$0x1] %v1216_v46  ;;  %v869_v56 = vpop.f32.mrf.mxu0 }
 0x2bf   : > { %v870_v5 = vadd.f32 %v6386_v59, %v869_v56  ;;  %v1621_v30 = vrot.slane %v1619_v19, 7 }
 0x2c1   : > { %v958_v47 = vmax.f32 %v870_v5, 0.0  ;;  %v1624_v1 = vor.u32 %v1622_v0, %v1621_v30  ;;  %v5330_v5 = vld [vmem:[#allocation8 + $0x48] sm:$0xff] }
 0x2c2   : > { %2424 = vmatpush.bf16.msra.mxu1 %v5330_v5 }
 0x2c3   : > { %v5539_v21 = vpack.c.bf16 %v958_v47, %v957_v8  ;;  %v1625_v49 = vsel %vm6251_vm7, %v1617_v53, %v1624_v1 }
 0x2c4   : > { %v1730_v25 = vunpack.c.l.b16 %v1625_v49 }
 0x2c5   : > { %5675 = vst [vmem:[#allocation2 + $0xf0] sm:$0xff] %v5539_v21   ;;  %v1869_v31 = vpop.f32.mrf.mxu1 }
 0x2c6   : > { %v6545_v22 = vadd.f32 %v2010_v29, %v1869_v31  ;;  %v872_v32 = vpop.f32.mrf.mxu0  ;;  %v1748_v34 = vpack.c.b16 %v1730_v25, %v1729_v24 }
 0x2c7   : > { %v873_v51 = vadd.f32 %v6386_v59, %v872_v32  ;;  %v6554_v32 = vpop.f32.mrf.mxu2 }
 0x2c8   : > { %1888 = vmatmul.bf16.gmra.mxu1 %v1748_v34  ;;  %2034 = vmatmul.bf16.gmra.mxu2 %v1748_v34  ;;  %7168 = vst [vmem:[#allocation20_spill] sm:$0xff] %v6554_v32 }
 0x2c9   : > { %2204 = vmatmul.bf16.gmra.mxu3 %v1748_v34  ;;  %v959_v0 = vmax.f32 %v873_v51, 0.0 }
 0x2cc   : > { %v1161_v54 = vld [vmem:[#allocation2 + $0xf0] sm:$0x8]  ;;  %v2185_v46 = vpop.f32.mrf.mxu3  ;;  %v1286_v47 = vld [vmem:[#allocation2 + $0xf4] sm:$0xf] }
 0x2cd   : > { %v1162_v50 = vsel %vm6233_vm2, 0, %v1161_v54  ;;  %v6551_v19 = vadd.f32 %v2185_v46, %v6522_v52  ;;  %v1632_v52 = vshrl.u32 %v1286_v47, 16  ;;  %v1635_v31 = vshll.u32 %v1286_v47, 16  ;;  %v6556_v34 = vpop.f32.mrf.mxu1 }
 0x2ce   : > { %1163 = vst [vmem:[#allocation2 + $0xf0] sm:$0x8] %v1162_v50  ;;  %v874_v56 = vpop.f32.mrf.mxu0 }
 0x2cf   : > { %v875_v30 = vadd.f32 %v6386_v59, %v874_v56  ;;  %v1634_v24 = vrot.slane %v1632_v52, 7  ;;  %7169 = vst [vmem:[#allocation21_spill] sm:$0xff] %v6556_v34 }
 0x2d1   : > { %v960_v53 = vmax.f32 %v875_v30, 0.0  ;;  %v1637_v5 = vor.u32 %v1635_v31, %v1634_v24 }
 0x2d3   : > { %v5544_v8 = vpack.c.bf16 %v960_v53, %v959_v0  ;;  %v5345_v0 = vld [vmem:[#allocation8 + $0x1c0] sm:$0xff] }
 0x2d4   : > { %v5329_v53 = vld [vmem:[#allocation8 + $0x40] sm:$0xff]  ;;  %2809 = vmatpush.bf16.msrb.mxu3 %v5345_v0 }
 0x2d5   : > { %5676 = vst [vmem:[#allocation2 + $0xf8] sm:$0xff] %v5544_v8   ;;  %v1285_v21 = vld [vmem:[#allocation2 + $0xf0] sm:$0x8]  ;;  %v1639_v8 = vrot.slane %v1634_v24, 4  ;;  %2425 = vmatpush.bf16.msra.mxu1 %v5329_v53 }
 0x2d6   : > { %v877_v1 = vpop.f32.mrf.mxu0  ;;  %v1627_v49 = vshrl.u32 %v1285_v21, 16 }
 0x2d7   : > { %v878_v46 = vadd.f32 %v6386_v59, %v877_v1 }
 0x2d8   : > { %v4811_v50 = vrot.slane %v1627_v49, 11  ;;  %v6566_v49 = vpop.f32.mrf.mxu3 }
 0x2d9   : > { %v961_v47 = vmax.f32 %v878_v46, 0.0  ;;  %v1290_v46 = vld [vmem:[#allocation2 + $0x108] sm:$0xf] }
 0x2da   : > { %v1638_v61 = vsel %vm6251_vm7, %v4811_v50, %v1637_v5 }
 0x2dc   : > { %v1218_v25 = vld [vmem:[#allocation2 + $0xfc] sm:$0x1]  ;;  %v1287_v29 = vld [vmem:[#allocation2 + $0xf8] sm:$0xf] }
 0x2dd   : > { %v1219_v54 = vsel %vm6244_vm5, 0, %v1218_v25  ;;  %v1641_v51 = vshrl.u32 %v1287_v29, 16  ;;  %v1644_v30 = vshll.u32 %v1287_v29, 16  ;;  %v2015_v29 = vpop.f32.mrf.mxu2 }
 0x2de   : > { %1220 = vst [vmem:[#allocation2 + $0xfc] sm:$0x1] %v1219_v54  ;;  %v879_v56 = vpop.f32.mrf.mxu0 }
 0x2df   : > { %v880_v58 = vadd.f32 %v6386_v59, %v879_v56  ;;  %v1643_v63 = vrot.slane %v1641_v51, 7  ;;  %v1731_v59 = vunpack.c.l.b16 %v1638_v61 }
 0x2e1   : > { %v962_v12 = vmax.f32 %v880_v58, 0.0  ;;  %v1646_v21 = vor.u32 %v1644_v30, %v1643_v63  ;;  %v1679_v30 = vshrl.u32 %v1290_v46, 16 }
 0x2e3   : > { %v5549_v1 = vpack.c.bf16 %v962_v12, %v961_v47  ;;  %v1647_v52 = vsel %vm6251_vm7, %v1639_v8, %v1646_v21  ;;  %v1681_v53 = vrot.slane %v1679_v30, 7  ;;  %v1682_v8 = vshll.u32 %v1290_v46, 16  ;;  %v1292_v12 = vld [vmem:[#allocation2 + $0x114] sm:$0xf]  ;;  %v1293_v21 = vld [vmem:[#allocation2 + $0x118] sm:$0xf] }
 0x2e4   : > { %v1732_v25 = vunpack.c.l.b16 %v1647_v52 }
 0x2e5   : > { %5677 = vst [vmem:[#allocation2 + $0x100] sm:$0xff] %v5549_v1   ;;  %v1874_v31 = vpop.f32.mrf.mxu1  ;;  %v5288_v1 = vld [vmem:[#allocation2 + $0x14] sm:$0xff]  ;;  %v6579_v32 = vpop.f32.mrf.mxu2 }
 0x2e6   : > { %v6568_v24 = vadd.f32 %v2015_v29, %v1874_v31  ;;  %v1749_v54 = vpack.c.b16 %v1732_v25, %v1731_v59  ;;  %v1684_v25 = vor.u32 %v1682_v8, %v1681_v53  ;;  %v2051_v29 = vshrl.u32 %v1292_v12, 16  ;;  %7170 = vst [vmem:[#allocation22_spill] sm:$0xff] %v6579_v32 }
 0x2e7   : > { %v2063_v8 = vshll.u32 %v1293_v21, 16 }
 0x2e8   : > { %1893 = vmatmul.bf16.gmra.mxu1 %v1749_v54  ;;  %2039 = vmatmul.bf16.gmra.mxu2 %v1749_v54 }
 0x2e9   : > { %2209 = vmatmul.bf16.gmra.mxu3 %v1749_v54  ;;  %v1291_v54 = vld [vmem:[#allocation2 + $0x110] sm:$0x8] }
 0x2ea   : > { %v2046_v30 = vshrl.u32 %v1291_v54, 16 }
 0x2ec   : > { %v1164_v50 = vld [vmem:[#allocation2 + $0x100] sm:$0x8]  ;;  %v2190_v51 = vpop.f32.mrf.mxu3  ;;  %v1289_v56 = vld [vmem:[#allocation2 + $0x104] sm:$0xf] }
 0x2ed   : > { %v1165_v58 = vsel %vm6233_vm2, 0, %v1164_v50  ;;  %v6573_v5 = vadd.f32 %v2190_v51, %v6545_v22  ;;  %v1670_v63 = vshrl.u32 %v1289_v56, 16  ;;  %v1673_v59 = vshll.u32 %v1289_v56, 16  ;;  %v5368_v51 = vld [vmem:[#allocation8 + $0x178] sm:$0xff] }
 0x2ee   : > { %1166 = vst [vmem:[#allocation2 + $0x100] sm:$0x8] %v1165_v58  ;;  %v2060_v50 = vshrl.u32 %v1293_v21, 16  ;;  %3707 = vmatpush.bf16.msrb.mxu2 %v5368_v51  ;;  %v2054_v56 = vshll.u32 %v1292_v12, 16  ;;  %v5289_v51 = vld [vmem:[#allocation2 + $0x24] sm:$0xff] }
 0x2ef   : > { %v1672_v0 = vrot.slane %v1670_v63, 7 }
 0x2f0   : > { %v2062_v53 = vrot.slane %v2060_v50, 7 }
 0x2f1   : > { %v1677_v47 = vrot.slane %v1672_v0, 4  ;;  %v1675_v31 = vor.u32 %v1673_v59, %v1672_v0  ;;  %v6581_v0 = vpop.f32.mrf.mxu1  ;;  %v5360_v59 = vld [vmem:[#allocation8 + $0xb8] sm:$0xff] }
 0x2f2   : > { %3493 = vmatpush.bf16.msrb.mxu1 %v5360_v59  ;;  %3708 = vmatpush.bf16.msrb.mxu2 %v5367_v3  ;;  %v5359_v59 = vld [vmem:[#allocation8 + $0xb0] sm:$0xff]  ;;  %v5293_v3 = vld [vmem:[#allocation2 + $0x64] sm:$0xff] }
 0x2f3   : > { %v1685_v22 = vsel %vm6251_vm7, %v1677_v47, %v1684_v25  ;;  %v5376_v47 = vld [vmem:[#allocation8 + $0x238] sm:$0xff]  ;;  %v4877_v25 = vrot.slane %v2046_v30, 11 }
 0x2f4   : > { %v1734_v63 = vunpack.c.l.b16 %v1685_v22  ;;  %3921 = vmatpush.bf16.msra.mxu3 %v5376_v47  ;;  %v6583_v22 = vpop.f32.mrf.mxu3  ;;  %v5375_v47 = vld [vmem:[#allocation8 + $0x230] sm:$0xff] }
 0x2f5   : > { %v1288_v61 = vld [vmem:[#allocation2 + $0x100] sm:$0x8] }
 0x2f6   : > { %v1665_v52 = vshrl.u32 %v1288_v61, 16  ;;  %v2053_v61 = vrot.slane %v2051_v29, 7  ;;  %v2020_v29 = vpop.f32.mrf.mxu2  ;;  %3494 = vmatpush.bf16.msrb.mxu1 %v5359_v59 }
 0x2f8   : > { %2618 = vmatmul.bf16.vlgmr.msra.gmra.mxu2 %v5288_v1  ;;  %v4812_v36 = vrot.slane %v1665_v52, 11  ;;  %v2056_v34 = vor.u32 %v2054_v56, %v2053_v61  ;;  %3922 = vmatpush.bf16.msra.mxu3 %v5375_v47  ;;  %v5381_v47 = vld [vmem:[#allocation9 + $0x20] sm:$0xff] }
 0x2fa   : > { %v1676_v46 = vsel %vm6251_vm7, %v4812_v36, %v1675_v31  ;;  %v2058_v36 = vrot.slane %v2053_v61, 4  ;;  %v2065_v31 = vor.u32 %v2063_v8, %v2062_v53  ;;  %v2057_v12 = vsel %vm6251_vm7, %v4877_v25, %v2056_v34  ;;  %v5287_v61 = vld [vmem:[#allocation2 + $0x4] sm:$0xff]  ;;  %v5290_v34 = vld [vmem:[#allocation2 + $0x34] sm:$0xff] }
 0x2fb   : > { %v1733_v58 = vunpack.c.l.b16 %v1676_v46  ;;  %v5382_v46 = vld [vmem:[#allocation9 + $0x28] sm:$0xff] }
 0x2fc   : > { %v2066_v21 = vsel %vm6251_vm7, %v2058_v36, %v2065_v31  ;;  %4196 = vmatpush.bf16.msrb.mxu0 %v5382_v46 }
 0x2fd   : > { %v1750_v52 = vpack.c.b16 %v1734_v63, %v1733_v58  ;;  %v2084_v58 = vunpack.c.l.b16 %v2057_v12  ;;  %v2085_v63 = vunpack.c.l.b16 %v2066_v21  ;;  %v5291_v12 = vld [vmem:[#allocation2 + $0x44] sm:$0xff] }
 0x2fe   : > { %v6592_v8 = vpop.f32.mrf.mxu2 }
 0x2ff   : > { %1898 = vmatmul.bf16.gmra.mxu1 %v1750_v52  ;;  %2214 = vmatmul.bf16.gmra.mxu3 %v1750_v52  ;;  %v2086_v30 = vpack.c.b16 %v2085_v63, %v2084_v58  ;;  %7171 = vst [vmem:[#allocation23_spill] sm:$0xff] %v6592_v8  ;;  %v5374_v63 = vld [vmem:[#allocation8 + $0x228] sm:$0xff] }
 0x300   : > { %3923 = vmatpush.bf16.msra.mxu3 %v5374_v63  ;;  %4197 = vmatpush.bf16.msrb.mxu0 %v5381_v47  ;;  %v5365_v63 = vld [vmem:[#allocation8 + $0x160] sm:$0xff] }
 0x305   : > { %v1879_v54 = vpop.f32.mrf.mxu1 }
 0x306   : > { %v2021_v50 = vadd.f32 %v2020_v29, %v1879_v54  ;;  %v5292_v54 = vld [vmem:[#allocation2 + $0x54] sm:$0xff] }
 0x308   : > { %2623 = vmatmul.bf16.gmra.mxu2 %v5289_v51 }
 0x30c   : > { %v2195_v56 = vpop.f32.mrf.mxu3 }
 0x30d   : > { %v6590_v53 = vadd.f32 %v2195_v56, %v6568_v24  ;;  %v6594_v52 = vpop.f32.mrf.mxu1  ;;  %v2025_v24 = vpop.f32.mrf.mxu2 }
 0x30e   : > { %7172 = vst [vmem:[#allocation24_spill] sm:$0xff] %v6594_v52 }
 0x30f   : > { %2219 = vmatmul.bf16.gmra.mxu3 %v2086_v30  ;;  %2426 = vmatmul.bf16.vlgmr.msra.gmra.mxu1 %v5287_v61  ;;  %v5358_v30 = vld [vmem:[#allocation8 + $0xa8] sm:$0xff] }
 0x310   : > { %3495 = vmatpush.bf16.msrb.mxu1 %v5358_v30  ;;  %v5373_v30 = vld [vmem:[#allocation8 + $0x220] sm:$0xff] }
 0x311   : > { %3924 = vmatpush.bf16.msra.mxu3 %v5373_v30 }
 0x314   : > { %v6596_v25 = vpop.f32.mrf.mxu3 }
 0x315   : > { %7173 = vst [vmem:[#allocation25_spill] sm:$0xff] %v6596_v25  ;;  %v6600_v46 = vpop.f32.mrf.mxu2  ;;  %v5356_v25 = vld [vmem:[#allocation8 + $0x98] sm:$0xff] }
 0x316   : > { %7175 = vst [vmem:[#allocation27_spill] sm:$0xff] %v6600_v46  ;;  %v5357_v46 = vld [vmem:[#allocation8 + $0xa0] sm:$0xff] }
 0x317   : > { %3496 = vmatpush.bf16.msrb.mxu1 %v5357_v46  ;;  %v5296_v46 = vld [vmem:[#allocation2 + $0x94] sm:$0xff] }
 0x318   : > { %2628 = vmatmul.bf16.gmra.mxu2 %v5290_v34 }
 0x31b   : > { %3497 = vmatpush.bf16.msrb.mxu1 %v5356_v25 }
 0x31f   : > { %2431 = vmatmul.bf16.gmra.mxu1 %v5288_v1  ;;  %2810 = vmatmul.bf16.vlgmr.msrb.gmra.mxu3 %v5289_v51  ;;  %v5366_v1 = vld [vmem:[#allocation8 + $0x168] sm:$0xff] }
 0x320   : > { %3709 = vmatpush.bf16.msrb.mxu2 %v5366_v1 }
 0x324   : > { %3710 = vmatpush.bf16.msrb.mxu2 %v5365_v63 }
 0x325   : > { %v1884_v36 = vpop.f32.mrf.mxu1 }
 0x326   : > { %v2026_v31 = vadd.f32 %v2025_v24, %v1884_v36  ;;  %v5294_v36 = vld [vmem:[#allocation2 + $0x74] sm:$0xff] }
 0x328   : > { %2633 = vmatmul.bf16.gmra.mxu2 %v5291_v12 }
 0x32c   : > { %v2200_v21 = vpop.f32.mrf.mxu3 }
 0x32d   : > { %v6598_v29 = vadd.f32 %v2200_v21, %v2021_v50  ;;  %v6602_v58 = vpop.f32.mrf.mxu1  ;;  %v2030_v50 = vpop.f32.mrf.mxu2 }
 0x32e   : > { %7176 = vst [vmem:[#allocation28_spill] sm:$0xff] %v6602_v58 }
 0x32f   : > { %7174 = vst [vmem:[#allocation26_spill] sm:$0xff] %v6598_v29  ;;  %2436 = vmatmul.bf16.gmra.mxu1 %v5289_v51  ;;  %2815 = vmatmul.bf16.gmra.mxu3 %v5290_v34 }
 0x334   : > { %v6604_v61 = vpop.f32.mrf.mxu3 }
 0x335   : > { %7177 = vst [vmem:[#allocation29_spill] sm:$0xff] %v6604_v61 }
 0x338   : > { %2638 = vmatmul.bf16.gmra.mxu2 %v5292_v54 }
 0x33f   : > { %2441 = vmatmul.bf16.gmra.mxu1 %v5290_v34  ;;  %2820 = vmatmul.bf16.gmra.mxu3 %v5291_v12  ;;  %v2032_v34 = vpop.f32.mrf.mxu2 }
 0x345   : > { %v1889_v56 = vpop.f32.mrf.mxu1 }
 0x346   : > { %v2031_v51 = vadd.f32 %v2030_v50, %v1889_v56 }
 0x348   : > { %2643 = vmatmul.bf16.gmra.mxu2 %v5293_v3 }
 0x34b   : > { %v2035_v21 = vpop.f32.mrf.mxu2 }
 0x34c   : > { %v2205_v59 = vpop.f32.mrf.mxu3 }
 0x34d   : > { %v6606_v24 = vadd.f32 %v2205_v59, %v2026_v31  ;;  %v1891_v1 = vpop.f32.mrf.mxu1 }
 0x34f   : > { %7178 = vst [vmem:[#allocation30_spill] sm:$0xff] %v6606_v24  ;;  %2446 = vmatmul.bf16.gmra.mxu1 %v5291_v12  ;;  %2825 = vmatmul.bf16.gmra.mxu3 %v5292_v54  ;;  %v5295_v12 = vld [vmem:[#allocation2 + $0x84] sm:$0xff] }
 0x353   : > { %v2037_v50 = vpop.f32.mrf.mxu2 }
 0x354   : > { %v6608_v56 = vpop.f32.mrf.mxu3 }
 0x355   : > { %7179 = vst [vmem:[#allocation31_spill] sm:$0xff] %v6608_v56 }
 0x358   : > { %2648 = vmatmul.bf16.gmra.mxu2 %v5294_v36 }
 0x35f   : > { %2451 = vmatmul.bf16.gmra.mxu1 %v5292_v54  ;;  %2830 = vmatmul.bf16.gmra.mxu3 %v5293_v3  ;;  %v2033_v54 = vadd.f32 %v2032_v34, %v1891_v1  ;;  %v5297_v1 = vld [vmem:[#allocation2 + $0xa4] sm:$0xff] }
 0x365   : > { %v1894_v31 = vpop.f32.mrf.mxu1 }
 0x366   : > { %v2036_v47 = vadd.f32 %v2035_v21, %v1894_v31  ;;  %v5364_v21 = vld [vmem:[#allocation8 + $0x158] sm:$0xff] }
 0x367   : > { %v5372_v31 = vld [vmem:[#allocation8 + $0x218] sm:$0xff]  ;;  %3711 = vmatpush.bf16.msrb.mxu2 %v5364_v21 }
 0x368   : > { %2653 = vmatmul.bf16.gmra.mxu2 %v5295_v12  ;;  %3925 = vmatpush.bf16.msra.mxu3 %v5372_v31 }
 0x36b   : > { %v2040_v59 = vpop.f32.mrf.mxu2 }
 0x36c   : > { %v2210_v58 = vpop.f32.mrf.mxu3 }
 0x36d   : > { %v6610_v24 = vadd.f32 %v2210_v58, %v2031_v51  ;;  %v1896_v8 = vpop.f32.mrf.mxu1 }
 0x36f   : > { %7180 = vst [vmem:[#allocation32_spill] sm:$0xff] %v6610_v24  ;;  %2456 = vmatmul.bf16.gmra.mxu1 %v5293_v3  ;;  %2835 = vmatmul.bf16.gmra.mxu3 %v5294_v36 }
 0x373   : > { %v2042_v61 = vpop.f32.mrf.mxu2 }
 0x374   : > { %v2212_v52 = vpop.f32.mrf.mxu3 }
 0x375   : > { %v6612_v63 = vadd.f32 %v2212_v52, %v2033_v54  ;;  %v2038_v54 = vadd.f32 %v2037_v50, %v1896_v8 }
 0x377   : > { %7181 = vst [vmem:[#allocation33_spill] sm:$0xff] %v6612_v63 }
 0x378   : > { %2658 = vmatmul.bf16.gmra.mxu2 %v5296_v46 }
 0x37b   : > { %v2619_v30 = vpop.f32.mrf.mxu2 }
 0x37c   : > { %v1899_v56 = vpop.f32.mrf.mxu1 }
 0x37d   : > { %v2041_v29 = vadd.f32 %v2040_v59, %v1899_v56 }
 0x37f   : > { %2461 = vmatmul.bf16.gmra.mxu1 %v5294_v36  ;;  %2840 = vmatmul.bf16.gmra.mxu3 %v5295_v12  ;;  %v5380_v36 = vld [vmem:[#allocation9 + $0x18] sm:$0xff] }
 0x380   : > { %4198 = vmatpush.bf16.msrb.mxu0 %v5380_v36 }
 0x382   : > { %v2215_v58 = vpop.f32.mrf.mxu3 }
 0x383   : > { %v6614_v51 = vadd.f32 %v2215_v58, %v2036_v47  ;;  %v2621_v3 = vpop.f32.mrf.mxu2  ;;  %v1968_v47 = vadd.f32 %v6344_v38, %v6346_v43  ;;  %v5298_v58 = vld [vmem:[#allocation2 + $0xb4] sm:$0xff] }
 0x384   : > { %v1901_v34 = vpop.f32.mrf.mxu1  ;;  %v5371_v43 = vld [vmem:[#allocation8 + $0x210] sm:$0xff] }
 0x385   : > { %v2043_v52 = vadd.f32 %v2042_v61, %v1901_v34  ;;  %v2226_v61 = vadd.f32 %v6377_v48, %v1968_v47  ;;  %v5355_v48 = vld [vmem:[#allocation8 + $0x90] sm:$0xff]  ;;  %3926 = vmatpush.bf16.msra.mxu3 %v5371_v43 }
 0x386   : > { %3498 = vmatpush.bf16.msrb.mxu1 %v5355_v48 }
 0x388   : > { %2663 = vmatmul.bf16.gmra.mxu2 %v5297_v1 }
 0x38a   : > { %v2217_v63 = vpop.f32.mrf.mxu3 }
 0x38b   : > { %v6616_v24 = vadd.f32 %v2217_v63, %v2038_v54  ;;  %v2624_v56 = vpop.f32.mrf.mxu2 }
 0x38c   : > { %v2427_v59 = vpop.f32.mrf.mxu1 }
 0x38d   : > { %v2507_v32 = vadd.f32 %v2427_v59, %v6362_v9 }
 0x38f   : > { %2466 = vmatmul.bf16.gmra.mxu1 %v5295_v12  ;;  %2845 = vmatmul.bf16.gmra.mxu3 %v5296_v46  ;;  %v2699_v25 = vadd.f32 %v2619_v30, %v2507_v32  ;;  %v5363_v30 = vld [vmem:[#allocation8 + $0x150] sm:$0xff] }
 0x390   : > { %3712 = vmatpush.bf16.msrb.mxu2 %v5363_v30 }
 0x392   : > { %v2220_v21 = vpop.f32.mrf.mxu3 }
 0x393   : > { %v6622_v31 = vadd.f32 %v2220_v21, %v2041_v29  ;;  %v2626_v8 = vpop.f32.mrf.mxu2  ;;  %v1973_v29 = vadd.f32 %v6365_v26, %v6367_v27 }
 0x394   : > { %v2429_v50 = vpop.f32.mrf.mxu1 }
 0x395   : > { %v2508_v63 = vadd.f32 %v2429_v50, %v2226_v61  ;;  %v5299_v61 = vld [vmem:[#allocation2 + $0xc4] sm:$0xff] }
 0x397   : > { %v2700_v34 = vadd.f32 %v2621_v3, %v2508_v63 }
 0x398   : > { %2668 = vmatmul.bf16.gmra.mxu2 %v5298_v58 }
 0x39a   : > { %v2222_v54 = vpop.f32.mrf.mxu3 }
 0x39b   : > { %v6624_v9 = vadd.f32 %v2222_v54, %v2043_v52  ;;  %v2629_v12 = vpop.f32.mrf.mxu2  ;;  %v2228_v52 = vadd.f32 %v6405_v40, %v1973_v29  ;;  %v1978_v40 = vadd.f32 %v6393_v15, %v6395_v16  ;;  %v5370_v16 = vld [vmem:[#allocation8 + $0x208] sm:$0xff] }
 0x39c   : > { %v2432_v36 = vpop.f32.mrf.mxu1  ;;  %3927 = vmatpush.bf16.msra.mxu3 %v5370_v16 }
 0x39d   : > { %v2509_v32 = vadd.f32 %v2432_v36, %v6390_v62  ;;  %v2230_v36 = vadd.f32 %v6428_v39, %v1978_v40  ;;  %v5354_v39 = vld [vmem:[#allocation8 + $0x88] sm:$0xff] }
 0x39e   : > { %3499 = vmatpush.bf16.msrb.mxu1 %v5354_v39  ;;  %v5369_v39 = vld [vmem:[#allocation8 + $0x200] sm:$0xff] }
 0x39f   : > { %2471 = vmatmul.bf16.gmra.mxu1 %v5296_v46  ;;  %2850 = vmatmul.bf16.gmra.mxu3 %v5297_v1  ;;  %v2701_v38 = vadd.f32 %v2624_v56, %v2509_v32 }
 0x3a0   : > { %3928 = vmatpush.bf16.msra.mxu3 %v5369_v39 }
 0x3a2   : > { %v2811_v3 = vpop.f32.mrf.mxu3 }
 0x3a3   : > { %v6630_v59 = vadd.f32 %v2811_v3, %v2699_v25  ;;  %v2631_v47 = vpop.f32.mrf.mxu2 }
 0x3a4   : > { %v2434_v21 = vpop.f32.mrf.mxu1 }
 0x3a5   : > { %v2510_v62 = vadd.f32 %v2434_v21, %v2228_v52  ;;  %v5362_v52 = vld [vmem:[#allocation8 + $0x148] sm:$0xff] }
 0x3a6   : > { %3713 = vmatpush.bf16.msrb.mxu2 %v5362_v52 }
 0x3a7   : > { %v2702_v46 = vadd.f32 %v2626_v8, %v2510_v62 }
 0x3a8   : > { %2673 = vmatmul.bf16.gmra.mxu2 %v5299_v61 }
 0x3aa   : > { %v2813_v56 = vpop.f32.mrf.mxu3 }
 0x3ab   : > { %v6632_v50 = vadd.f32 %v2813_v56, %v2700_v34  ;;  %v2634_v63 = vpop.f32.mrf.mxu2  ;;  %v5300_v34 = vld [vmem:[#allocation2 + $0xd4] sm:$0xff] }
 0x3ac   : > { %v2437_v54 = vpop.f32.mrf.mxu1 }
 0x3ad   : > { %v2511_v26 = vadd.f32 %v2437_v54, %v6413_v55  ;;  %v6648_v54 = vld [vmem:[#allocation2 + $0xe4] sm:$0xff] }
 0x3af   : > { %2476 = vmatmul.bf16.gmra.mxu1 %v5297_v1  ;;  %2855 = vmatmul.bf16.gmra.mxu3 %v5298_v58  ;;  %v2703_v27 = vadd.f32 %v2629_v12, %v2511_v26 }
 0x3b2   : > { %v2816_v25 = vpop.f32.mrf.mxu3 }
 0x3b3   : > { %v6638_v32 = vadd.f32 %v2816_v25, %v2701_v38  ;;  %v2636_v8 = vpop.f32.mrf.mxu2  ;;  %v1983_v38 = vadd.f32 %v6416_v13, %v6418_v14  ;;  %v5379_v25 = vld [vmem:[#allocation9 + $0x10] sm:$0xff] }
 0x3b4   : > { %v2439_v30 = vpop.f32.mrf.mxu1  ;;  %4199 = vmatpush.bf16.msrb.mxu0 %v5379_v25 }
 0x3b5   : > { %v2512_v43 = vadd.f32 %v2439_v30, %v2230_v36  ;;  %v2232_v21 = vadd.f32 %v6451_v45, %v1983_v38  ;;  %v5353_v38 = vld [vmem:[#allocation8 + $0x80] sm:$0xff] }
 0x3b6   : > { %3500 = vmatpush.bf16.msrb.mxu1 %v5353_v38  ;;  %v2930_v38 = vld [vmem:[#allocation2 + $0x28] sm:$0xf] }
 0x3b7   : > { %v2704_v48 = vadd.f32 %v2631_v47, %v2512_v43 }
 0x3b8   : > { %2678 = vmatmul.bf16.gmra.mxu2 %v5300_v34 }
 0x3ba   : > { %v2818_v29 = vpop.f32.mrf.mxu3 }
 0x3bb   : > { %v6640_v3 = vadd.f32 %v2818_v29, %v2702_v46  ;;  %v2639_v55 = vpop.f32.mrf.mxu2  ;;  %v5361_v29 = vld [vmem:[#allocation8 + $0x140] sm:$0xff] }
 0x3bc   : > { %v2442_v1 = vpop.f32.mrf.mxu1  ;;  %3714 = vmatpush.bf16.msrb.mxu2 %v5361_v29 }
 0x3bd   : > { %v2513_v12 = vadd.f32 %v2442_v1, %v6436_v57 }
 0x3bf   : > { %2481 = vmatmul.bf16.gmra.mxu1 %v5298_v58  ;;  %2860 = vmatmul.bf16.gmra.mxu3 %v5299_v61  ;;  %v2705_v15 = vadd.f32 %v2634_v63, %v2513_v12  ;;  %v6659_v12 = vld [vmem:[#allocation2 + $0xf4] sm:$0xff] }
 0x3c2   : > { %v2821_v47 = vpop.f32.mrf.mxu3 }
 0x3c3   : > { %v6646_v62 = vadd.f32 %v2821_v47, %v2703_v27  ;;  %v2641_v46 = vpop.f32.mrf.mxu2  ;;  %v1988_v27 = vadd.f32 %v6439_v17, %v6441_v20 }
 0x3c4   : > { %v2444_v56 = vpop.f32.mrf.mxu1 }
 0x3c5   : > { %v2514_v57 = vadd.f32 %v2444_v56, %v2232_v21  ;;  %v1993_v21 = vadd.f32 %v6462_v18, %v6464_v28 }
 0x3c7   : > { %v2706_v58 = vadd.f32 %v2636_v8, %v2514_v57  ;;  %v2234_v8 = vadd.f32 %v6474_v60, %v1988_v27  ;;  %v2926_v60 = vld [vmem:[#allocation2 + $0x14] sm:$0xf] }
 0x3c8   : > { %2683 = vmatmul.bf16.gmra.mxu2 %v6648_v54  ;;  %v3005_v47 = vshrl.u32 %v2926_v60, 16 }
 0x3ca   : > { %v2823_v63 = vpop.f32.mrf.mxu3 }
 0x3cb   : > { %v6651_v26 = vadd.f32 %v2823_v63, %v2704_v48  ;;  %v2644_v40 = vpop.f32.mrf.mxu2 }
 0x3cc   : > { %v2447_v13 = vpop.f32.mrf.mxu1 }
 0x3cd   : > { %v2515_v14 = vadd.f32 %v2447_v13, %v6459_v2 }
 0x3cf   : > { %2486 = vmatmul.bf16.gmra.mxu1 %v5299_v61  ;;  %2865 = vmatmul.bf16.gmra.mxu3 %v5300_v34  ;;  %v2707_v45 = vadd.f32 %v2639_v55, %v2515_v14  ;;  %v2928_v14 = vld [vmem:[#allocation2 + $0x1c] sm:$0x1] }
 0x3d0   : > { %v3024_v18 = vshll.u32 %v2928_v14, 16 }
 0x3d2   : > { %v2826_v36 = vpop.f32.mrf.mxu3 }
 0x3d3   : > { %v6657_v30 = vadd.f32 %v2826_v36, %v2705_v15  ;;  %v2646_v43 = vpop.f32.mrf.mxu2  ;;  %v2927_v15 = vld [vmem:[#allocation2 + $0x18] sm:$0xf] }
 0x3d4   : > { %v2449_v48 = vpop.f32.mrf.mxu1  ;;  %v3014_v56 = vshll.u32 %v2927_v15, 16  ;;  %v3018_v57 = vshrl.u32 %v2927_v15, 16 }
 0x3d5   : > { %v2516_v1 = vadd.f32 %v2449_v48, %v2234_v8  ;;  %v6671_v48 = vld [vmem:[#allocation2 + $0x104] sm:$0xff] }
 0x3d6   : > { %v3016_v36 = vrot.slane %v3014_v56, 5  ;;  %v3020_v8 = vrot.slane %v3018_v57, 4  ;;  %v1998_v56 = vadd.f32 %v6485_v41, %v6487_v42  ;;  %v3042_v57 = vshrl.u32 %v2930_v38, 16 }
 0x3d7   : > { %v2708_v2 = vadd.f32 %v2641_v46, %v2516_v1  ;;  %v3008_v46 = vshll.u32 %v2926_v60, 16 }
 0x3d8   : > { %2688 = vmatmul.bf16.gmra.mxu2 %v6659_v12 }
 0x3d9   : > { %v3010_v27 = vrot.slane %v3008_v46, 5  ;;  %v2929_v46 = vld [vmem:[#allocation2 + $0x24] sm:$0xf] }
 0x3da   : > { %v2828_v61 = vpop.f32.mrf.mxu3 }
 0x3db   : > { %v6662_v55 = vadd.f32 %v2828_v61, %v2706_v58  ;;  %v2649_v52 = vpop.f32.mrf.mxu2 }
 0x3dc   : > { %v2452_v17 = vpop.f32.mrf.mxu1 }
 0x3dd   : > { %v2517_v20 = vadd.f32 %v2452_v17, %v6482_v11  ;;  %v2236_v11 = vadd.f32 %v6497_v10, %v1993_v21  ;;  %v3021_v10 = vor.u32 %v3020_v8, %v3016_v36  ;;  %v3026_v17 = vrot.slane %v3024_v18, 5  ;;  %v2931_v18 = vld [vmem:[#allocation2 + $0x2c] sm:$0x1] }
 0x3df   : > { %2491 = vmatmul.bf16.gmra.mxu1 %v5300_v34  ;;  %2870 = vmatmul.bf16.gmra.mxu3 %v6648_v54  ;;  %v2709_v16 = vadd.f32 %v2644_v40, %v2517_v20  ;;  %v3007_v40 = vrot.slane %v3005_v47, 4  ;;  %v3022_v39 = vrot.slane %v3021_v10, 4 }
 0x3e1   : > { %v3011_v29 = vor.u32 %v3010_v27, %v3007_v40  ;;  %v3027_v47 = vsel %vm6678_vm10, %v3022_v39, %v3026_v17  ;;  %v2238_v40 = vadd.f32 %v6520_v44, %v1998_v56  ;;  %v3048_v44 = vshll.u32 %v2931_v18, 16 }
 0x3e2   : > { %v2831_v58 = vpop.f32.mrf.mxu3  ;;  %v3384_v14 = vunpack.c.l.b16 %v3027_v47 }
 0x3e3   : > { %v6669_v63 = vadd.f32 %v2831_v58, %v2707_v45  ;;  %v2651_v34 = vpop.f32.mrf.mxu2  ;;  %v2923_v58 = vld [vmem:[#allocation2 + $0x4] sm:$0xf] }
 0x3e4   : > { %v2454_v13 = vpop.f32.mrf.mxu1  ;;  %v2984_v10 = vshll.u32 %v2923_v58, 16 }
 0x3e5   : > { %v2518_v25 = vadd.f32 %v2454_v13, %v2236_v11  ;;  %v2924_v11 = vld [vmem:[#allocation2 + $0x8] sm:$0xf] }
 0x3e6   : > { %v2990_v41 = vshll.u32 %v2924_v11, 16  ;;  %v2994_v42 = vshrl.u32 %v2924_v11, 16 }
 0x3e7   : > { %v2710_v28 = vadd.f32 %v2646_v43, %v2518_v25  ;;  %v3012_v43 = vrot.slane %v3011_v29, 4  ;;  %v2981_v29 = vshrl.u32 %v2923_v58, 16 }
 0x3e8   : > { %2693 = vmatmul.bf16.gmra.mxu2 %v6671_v48  ;;  %v2992_v47 = vrot.slane %v2990_v41, 5 }
 0x3ea   : > { %v2833_v45 = vpop.f32.mrf.mxu3 }
 0x3eb   : > { %v6674_v1 = vadd.f32 %v2833_v45, %v2708_v2  ;;  %v6676_v61 = vpop.f32.mrf.mxu2  ;;  %v3017_v2 = vsel %vm6678_vm10, %v3012_v43, %v3016_v36  ;;  %v3029_v36 = vshrl.u32 %v2929_v46, 16 }
 0x3ec   : > { %v2457_v20 = vpop.f32.mrf.mxu1 }
 0x3ed   : > { %v2519_v15 = vadd.f32 %v2457_v20, %v6505_v33  ;;  %v3038_v33 = vshll.u32 %v2930_v38, 16  ;;  %v3044_v20 = vrot.slane %v3042_v57, 4  ;;  %v3031_v43 = vrot.slane %v3029_v36, 4 }
 0x3ee   : > { %v2983_v38 = vrot.slane %v2981_v29, 4  ;;  %v3050_v57 = vrot.slane %v3048_v44, 5 }
 0x3ef   : > { %2496 = vmatmul.bf16.gmra.mxu1 %v6648_v54  ;;  %2875 = vmatmul.bf16.gmra.mxu3 %v6659_v12  ;;  %v6689_v21 = vadd.f32 %v2649_v52, %v2519_v15  ;;  %v3383_v54 = vunpack.c.l.b16 %v3017_v2  ;;  %v3032_v52 = vshll.u32 %v2929_v46, 16  ;;  %v3040_v17 = vrot.slane %v3038_v33, 5 }
 0x3f0   : > { %v2986_v2 = vrot.slane %v2984_v10, 5  ;;  %v2996_v46 = vrot.slane %v2994_v42, 4  ;;  %v2932_v10 = vld [vmem:[#allocation2 + $0x34] sm:$0xf] }
 0x3f1   : > { %v6698_v15 = vpack.c.b16 %v3384_v14, %v3383_v54  ;;  %v3034_v39 = vrot.slane %v3032_v52, 5  ;;  %v3045_v56 = vor.u32 %v3044_v20, %v3040_v17  ;;  %v2003_v20 = vadd.f32 %v6508_v6, %v6510_v7 }
 0x3f2   : > { %v2836_v13 = vpop.f32.mrf.mxu3  ;;  %v2987_v14 = vor.u32 %v2986_v2, %v2983_v38  ;;  %v3053_v44 = vshrl.u32 %v2932_v10, 16  ;;  %v3056_v38 = vshll.u32 %v2932_v10, 16 }
 0x3f3   : > { %v6694_v25 = vadd.f32 %v2836_v13, %v2709_v16  ;;  %v6696_v27 = vpop.f32.mrf.mxu2  ;;  %v2925_v13 = vld [vmem:[#allocation2 + $0xc] sm:$0x1]  ;;  %v3035_v33 = vor.u32 %v3034_v39, %v3031_v43  ;;  %v3046_v52 = vrot.slane %v3045_v56, 4  ;;  %v2240_v2 = vadd.f32 %v6543_v23, %v2003_v20 }
 0x3f4   : > { %v2459_v8 = vpop.f32.mrf.mxu1  ;;  %v3000_v36 = vshll.u32 %v2925_v13, 16  ;;  %v2988_v41 = vrot.slane %v2987_v14, 4  ;;  %v3055_v14 = vrot.slane %v3053_v44, 4  ;;  %v3058_v23 = vrot.slane %v3056_v38, 5 }
 0x3f5   : > { %7184 = vst [vmem:[#allocation34_spill] sm:$0xff] %v6694_v25  ;;  %v2520_v45 = vadd.f32 %v2459_v8, %v2238_v40  ;;  %v2997_v40 = vor.u32 %v2996_v46, %v2992_v47  ;;  %v2933_v8 = vld [vmem:[#allocation2 + $0x38] sm:$0xf]  ;;  %v3036_v18 = vrot.slane %v3035_v33, 4  ;;  %v2008_v44 = vadd.f32 %v6531_v35, %v6533_v37 }
 0x3f6   : > { %v3062_v43 = vshll.u32 %v2933_v8, 16  ;;  %v2993_v6 = vsel %vm6678_vm10, %v2988_v41, %v2992_v47  ;;  %v3059_v41 = vor.u32 %v3058_v23, %v3055_v14  ;;  %v2937_v23 = vld [vmem:[#allocation2 + $0x4c] sm:$0x1] }
 0x3f7   : > { %v2712_v16 = vadd.f32 %v2651_v34, %v2520_v45  ;;  %v2998_v42 = vrot.slane %v2997_v40, 4  ;;  %v3002_v45 = vrot.slane %v3000_v36, 5  ;;  %v3381_v40 = vunpack.c.l.b16 %v2993_v6 }
 0x3f8   : > { %3715 = vmatmul.bf16.vlgmr.msrb.gmra.mxu2 %v6698_v15  ;;  %v3064_v33 = vrot.slane %v3062_v43, 5  ;;  %v2936_v43 = vld [vmem:[#allocation2 + $0x48] sm:$0xf]  ;;  %v2242_v6 = vadd.f32 %v6566_v49, %v2008_v44 }
 0x3f9   : > { %v3003_v7 = vsel %vm6678_vm10, %v2998_v42, %v3002_v45 }
 0x3fa   : > { %v2838_v58 = vpop.f32.mrf.mxu3 }
 0x3fb   : > { %v6701_v25 = vadd.f32 %v2838_v58, %v2710_v28  ;;  %v6703_v11 = vpop.f32.mrf.mxu2  ;;  %v3051_v28 = vsel %vm6678_vm10, %v3046_v52, %v3050_v57 }
 0x3fc   : > { %v2462_v54 = vpop.f32.mrf.mxu1 }
 0x3fd   : > { %v2521_v34 = vadd.f32 %v2462_v54, %v6528_v4  ;;  %v3041_v4 = vsel %vm6678_vm10, %v3036_v18, %v3040_v17  ;;  %v2934_v17 = vld [vmem:[#allocation2 + $0x3c] sm:$0x1] }
 0x3fe   : > { %v3385_v13 = vunpack.c.l.b16 %v3041_v4  ;;  %v3072_v36 = vshll.u32 %v2934_v17, 16 }
 0x3ff   : > { %2501 = vmatmul.bf16.gmra.mxu1 %v6659_v12  ;;  %2880 = vmatmul.bf16.gmra.mxu3 %v6671_v48  ;;  %v2713_v29 = vadd.f32 %v6676_v61, %v2521_v34  ;;  %v3066_v12 = vshrl.u32 %v2933_v8, 16  ;;  %v3386_v48 = vunpack.c.l.b16 %v3051_v28  ;;  %v5304_v28 = vld [vmem:[#allocation2 + $0x114] sm:$0xff] }
 0x400   : > { %v3074_v42 = vrot.slane %v3072_v36, 5 }
 0x401   : > { %v3068_v57 = vrot.slane %v3066_v12, 4  ;;  %v6723_v54 = vpack.c.b16 %v3386_v48, %v3385_v13  ;;  %v3060_v12 = vrot.slane %v3059_v41, 4  ;;  %v2935_v48 = vld [vmem:[#allocation2 + $0x44] sm:$0xf] }
 0x402   : > { %v2841_v39 = vpop.f32.mrf.mxu3 }
 0x403   : > { %v6717_v61 = vadd.f32 %v2841_v39, %v6689_v21  ;;  %v2661_v46 = vpop.f32.mrf.mxu2  ;;  %v3382_v21 = vunpack.c.l.b16 %v3003_v7  ;;  %v3069_v52 = vor.u32 %v3068_v57, %v3064_v33  ;;  %v3065_v38 = vsel %vm6678_vm10, %v3060_v12, %v3064_v33 }
 0x404   : > { %v2464_v56 = vpop.f32.mrf.mxu1  ;;  %v3387_v14 = vunpack.c.l.b16 %v3065_v38 }
 0x405   : > { %v2522_v58 = vadd.f32 %v2464_v56, %v2240_v2  ;;  %v3413_v10 = vpack.c.b16 %v3382_v21, %v3381_v40  ;;  %v3070_v4 = vrot.slane %v3069_v52, 4  ;;  %v3086_v2 = vshll.u32 %v2936_v43, 16 }
 0x406   : > { %v3096_v52 = vshll.u32 %v2937_v23, 16 }
 0x407   : > { %v2714_v34 = vadd.f32 %v6696_v27, %v2522_v58  ;;  %v3075_v27 = vsel %vm6678_vm10, %v3070_v4, %v3074_v42  ;;  %v3077_v58 = vshrl.u32 %v2935_v48, 16  ;;  %v3088_v35 = vrot.slane %v3086_v2, 5 }
 0x408   : > { %3720 = vmatmul.bf16.gmra.mxu2 %v6723_v54  ;;  %v3388_v13 = vunpack.c.l.b16 %v3075_v27  ;;  %v3098_v42 = vrot.slane %v3096_v52, 5 }
 0x409   : > { %v3079_v33 = vrot.slane %v3077_v58, 4 }
 0x40a   : > { %v2843_v47 = vpop.f32.mrf.mxu3  ;;  %v6740_v21 = vpack.c.b16 %v3388_v13, %v3387_v14  ;;  %v2940_v14 = vld [vmem:[#allocation2 + $0x5c] sm:$0x1] }
 0x40b   : > { %v6727_v8 = vadd.f32 %v2843_v47, %v2712_v16  ;;  %v2664_v18 = vpop.f32.mrf.mxu2  ;;  %v5378_v16 = vld [vmem:[#allocation9 + $0x8] sm:$0xff]  ;;  %v3120_v52 = vshll.u32 %v2940_v14, 16 }
 0x40c   : > { %v2467_v45 = vpop.f32.mrf.mxu1  ;;  %4200 = vmatpush.bf16.msrb.mxu0 %v5378_v16  ;;  %v2938_v16 = vld [vmem:[#allocation2 + $0x54] sm:$0xf] }
 0x40d   : > { %v2523_v20 = vadd.f32 %v2467_v45, %v6551_v19  ;;  %v3090_v19 = vshrl.u32 %v2936_v43, 16  ;;  %v2939_v43 = vld [vmem:[#allocation2 + $0x58] sm:$0xf]  ;;  %v3101_v58 = vshrl.u32 %v2938_v16, 16 }
 0x40e   : > { %v3110_v2 = vshll.u32 %v2939_v43, 16 }
 0x40f   : > { %2885 = vmatmul.bf16.gmra.mxu3 %v5304_v28  ;;  %3501 = vmatmul.bf16.vlgmr.msrb.gmra.mxu1 %v3413_v10  ;;  %v2715_v39 = vadd.f32 %v6703_v11, %v2523_v20  ;;  %v3080_v11 = vshll.u32 %v2935_v48, 16  ;;  %v3092_v37 = vrot.slane %v3090_v19, 4  ;;  %v7186_v48 = vld [vmem:[#allocation20_spill] sm:$0xff] }
 0x411   : > { %v3082_v36 = vrot.slane %v3080_v11, 5  ;;  %v3093_v49 = vor.u32 %v3092_v37, %v3088_v35  ;;  %v3104_v11 = vshll.u32 %v2938_v16, 16 }
 0x412   : > { %v2846_v56 = vpop.f32.mrf.mxu3 }
 0x413   : > { %v6738_v7 = vadd.f32 %v2846_v56, %v2713_v29  ;;  %v2666_v17 = vpop.f32.mrf.mxu2  ;;  %v3083_v41 = vor.u32 %v3082_v36, %v3079_v33  ;;  %v3094_v4 = vrot.slane %v3093_v49, 4  ;;  %v3106_v36 = vrot.slane %v3104_v11, 5 }
 0x414   : > { %v2469_v57 = vpop.f32.mrf.mxu1 }
 0x415   : > { %v2524_v40 = vadd.f32 %v2469_v57, %v2242_v6  ;;  %v3084_v12 = vrot.slane %v3083_v41, 4 }
 0x417   : > { %v2716_v47 = vadd.f32 %v2661_v46, %v2524_v40  ;;  %v3099_v46 = vsel %vm6678_vm10, %v3094_v4, %v3098_v42  ;;  %v3089_v38 = vsel %vm6678_vm10, %v3084_v12, %v3088_v35  ;;  %v3112_v40 = vrot.slane %v3110_v2, 5  ;;  %v2942_v12 = vld [vmem:[#allocation2 + $0x68] sm:$0xf] }
 0x418   : > { %3725 = vmatmul.bf16.gmra.mxu2 %v6740_v21  ;;  %v3390_v56 = vunpack.c.l.b16 %v3099_v46  ;;  %v3103_v35 = vrot.slane %v3101_v58, 4 }
 0x41a   : > { %v2848_v29 = vpop.f32.mrf.mxu3  ;;  %v3107_v42 = vor.u32 %v3106_v36, %v3103_v35 }
 0x41b   : > { %v6743_v28 = vadd.f32 %v2848_v29, %v2714_v34  ;;  %v2669_v10 = vpop.f32.mrf.mxu2  ;;  %v7185_v34 = vld [vmem:[#allocation21_spill] sm:$0xff] }
 0x41c   : > { %v2472_v45 = vpop.f32.mrf.mxu1  ;;  %v2013_v44 = vadd.f32 %v7186_v48, %v7185_v34  ;;  %v3108_v46 = vrot.slane %v3107_v42, 4  ;;  %v2941_v34 = vld [vmem:[#allocation2 + $0x64] sm:$0xf] }
 0x41d   : > { %v2525_v20 = vadd.f32 %v2472_v45, %v6573_v5  ;;  %v3114_v5 = vshrl.u32 %v2939_v43, 16  ;;  %v3122_v45 = vrot.slane %v3120_v52, 5  ;;  %v3125_v58 = vshrl.u32 %v2941_v34, 16 }
 0x41e   : > { %v3128_v11 = vshll.u32 %v2941_v34, 16 }
 0x41f   : > { %3506 = vmatmul.bf16.gmra.mxu1 %v6698_v15  ;;  %3929 = vmatmul.bf16.vlgmr.msra.gmra.mxu3 %v6723_v54  ;;  %v2717_v27 = vadd.f32 %v2664_v18, %v2525_v20  ;;  %v2244_v15 = vadd.f32 %v6583_v22, %v2013_v44  ;;  %v3389_v18 = vunpack.c.l.b16 %v3089_v38  ;;  %v3116_v37 = vrot.slane %v3114_v5, 4 }
 0x420   : > { %v3113_v44 = vsel %vm6678_vm10, %v3108_v46, %v3112_v40  ;;  %v3134_v38 = vshll.u32 %v2942_v12, 16  ;;  %v3130_v35 = vrot.slane %v3128_v11, 5 }
 0x421   : > { %v6757_v33 = vpack.c.b16 %v3390_v56, %v3389_v18  ;;  %v3117_v22 = vor.u32 %v3116_v37, %v3112_v40  ;;  %v2943_v18 = vld [vmem:[#allocation2 + $0x6c] sm:$0x1]  ;;  %v3127_v40 = vrot.slane %v3125_v58, 4 }
 0x422   : > { %v2851_v19 = vpop.f32.mrf.mxu3  ;;  %v3144_v36 = vshll.u32 %v2943_v18, 16  ;;  %v7192_v58 = vld [vmem:[#allocation29_spill] sm:$0xff] }
 0x423   : > { %v6755_v13 = vadd.f32 %v2851_v19, %v2715_v39  ;;  %v2671_v6 = vpop.f32.mrf.mxu2  ;;  %v3118_v43 = vrot.slane %v3117_v22, 4  ;;  %v7188_v19 = vld [vmem:[#allocation25_spill] sm:$0xff] }
 0x424   : > { %v2474_v57 = vpop.f32.mrf.mxu1 }
 0x425   : > { %v2526_v23 = vadd.f32 %v2474_v57, %v2244_v15 }
 0x427   : > { %v2718_v49 = vadd.f32 %v2666_v17, %v2526_v23  ;;  %v3123_v17 = vsel %vm6678_vm10, %v3118_v43, %v3122_v45  ;;  %v3136_v23 = vrot.slane %v3134_v38, 5  ;;  %v3131_v45 = vor.u32 %v3130_v35, %v3127_v40  ;;  %v7189_v43 = vld [vmem:[#allocation26_spill] sm:$0xff] }
 0x428   : > { %3730 = vmatmul.bf16.gmra.mxu2 %v6757_v33  ;;  %v3392_v5 = vunpack.c.l.b16 %v3123_v17  ;;  %v2945_v17 = vld [vmem:[#allocation2 + $0x78] sm:$0xf] }
 0x429   : > { %v3132_v34 = vrot.slane %v3131_v45, 4 }
 0x42a   : > { %v2853_v39 = vpop.f32.mrf.mxu3 }
 0x42b   : > { %v6760_v29 = vadd.f32 %v2853_v39, %v2716_v47  ;;  %v2674_v41 = vpop.f32.mrf.mxu2  ;;  %v7187_v47 = vld [vmem:[#allocation22_spill] sm:$0xff] }
 0x42c   : > { %v2477_v20 = vpop.f32.mrf.mxu1  ;;  %v2018_v48 = vadd.f32 %v7187_v47, %v6581_v0 }
 0x42d   : > { %v2527_v4 = vadd.f32 %v2477_v20, %v6590_v53  ;;  %v3138_v53 = vshrl.u32 %v2942_v12, 16  ;;  %v3146_v20 = vrot.slane %v3144_v36, 5 }
 0x42f   : > { %3511 = vmatmul.bf16.gmra.mxu1 %v6723_v54  ;;  %3934 = vmatmul.bf16.gmra.mxu3 %v6740_v21  ;;  %v2719_v16 = vadd.f32 %v2669_v10, %v2527_v4  ;;  %v2246_v54 = vadd.f32 %v7188_v19, %v2018_v48  ;;  %v3391_v10 = vunpack.c.l.b16 %v3113_v44  ;;  %v3140_v0 = vrot.slane %v3138_v53, 4  ;;  %v2944_v48 = vld [vmem:[#allocation2 + $0x74] sm:$0xf]  ;;  %v7191_v44 = vld [vmem:[#allocation23_spill] sm:$0xff] }
 0x430   : > { %v3137_v53 = vsel %vm6678_vm10, %v3132_v34, %v3136_v23  ;;  %v3152_v18 = vshll.u32 %v2944_v48, 16 }
 0x431   : > { %v6774_v37 = vpack.c.b16 %v3392_v5, %v3391_v10  ;;  %v3141_v22 = vor.u32 %v3140_v0, %v3136_v23  ;;  %v3162_v5 = vshrl.u32 %v2945_v17, 16  ;;  %v3149_v10 = vshrl.u32 %v2944_v48, 16  ;;  %v2946_v0 = vld [vmem:[#allocation2 + $0x7c] sm:$0x1] }
 0x432   : > { %v2856_v2 = vpop.f32.mrf.mxu3  ;;  %v3168_v45 = vshll.u32 %v2946_v0, 16 }
 0x433   : > { %v6772_v56 = vadd.f32 %v2856_v2, %v2717_v27  ;;  %v2676_v15 = vpop.f32.mrf.mxu2  ;;  %v3142_v46 = vrot.slane %v3141_v22, 4  ;;  %v3158_v2 = vshll.u32 %v2945_v17, 16  ;;  %v3164_v36 = vrot.slane %v3162_v5, 4  ;;  %v7194_v5 = vld [vmem:[#allocation28_spill] sm:$0xff] }
 0x434   : > { %v2479_v57 = vpop.f32.mrf.mxu1  ;;  %v3151_v23 = vrot.slane %v3149_v10, 4  ;;  %v3170_v17 = vrot.slane %v3168_v45, 5  ;;  %v2949_v45 = vld [vmem:[#allocation2 + $0x8c] sm:$0x1] }
 0x435   : > { %v2528_v14 = vadd.f32 %v2479_v57, %v2246_v54  ;;  %v3160_v35 = vrot.slane %v3158_v2, 5  ;;  %v5377_v2 = vld [vmem:[#allocation9] sm:$0xff] }
 0x436   : > { %4201 = vmatpush.bf16.msrb.mxu0 %v5377_v2 }
 0x437   : > { %v2720_v52 = vadd.f32 %v2671_v6, %v2528_v14  ;;  %v3147_v6 = vsel %vm6678_vm10, %v3142_v46, %v3146_v20 }
 0x438   : > { %3735 = vmatmul.bf16.gmra.mxu2 %v6774_v37  ;;  %v3394_v54 = vunpack.c.l.b16 %v3147_v6  ;;  %v7193_v6 = vld [vmem:[#allocation30_spill] sm:$0xff] }
 0x43a   : > { %v2858_v27 = vpop.f32.mrf.mxu3 }
 0x43b   : > { %v6777_v39 = vadd.f32 %v2858_v27, %v2718_v49  ;;  %v2679_v42 = vpop.f32.mrf.mxu2  ;;  %v7190_v49 = vld [vmem:[#allocation24_spill] sm:$0xff]  ;;  %v3154_v27 = vrot.slane %v3152_v18, 5 }
 0x43c   : > { %v2482_v4 = vpop.f32.mrf.mxu1  ;;  %v2023_v38 = vadd.f32 %v7191_v44, %v7190_v49  ;;  %v2948_v44 = vld [vmem:[#allocation2 + $0x88] sm:$0xf] }
 0x43d   : > { %v2529_v12 = vadd.f32 %v2482_v4, %v7189_v43  ;;  %v3165_v4 = vor.u32 %v3164_v36, %v3160_v35  ;;  %v3155_v46 = vor.u32 %v3154_v27, %v3151_v23  ;;  %v3186_v10 = vshrl.u32 %v2948_v44, 16 }
 0x43f   : > { %3516 = vmatmul.bf16.gmra.mxu1 %v6740_v21  ;;  %3939 = vmatmul.bf16.gmra.mxu3 %v6757_v33  ;;  %v2721_v47 = vadd.f32 %v2674_v41, %v2529_v12  ;;  %v2248_v21 = vadd.f32 %v7192_v58, %v2023_v38  ;;  %v3393_v41 = vunpack.c.l.b16 %v3137_v53  ;;  %v3166_v49 = vrot.slane %v3165_v4, 4 }
 0x440   : > { %v3156_v38 = vrot.slane %v3155_v46, 4  ;;  %v3188_v46 = vrot.slane %v3186_v10, 4 }
 0x441   : > { %v6791_v22 = vpack.c.b16 %v3394_v54, %v3393_v41 }
 0x442   : > { %v2861_v19 = vpop.f32.mrf.mxu3  ;;  %v3161_v58 = vsel %vm6678_vm10, %v3156_v38, %v3160_v35 }
 0x443   : > { %v6789_v11 = vadd.f32 %v2861_v19, %v2719_v16  ;;  %v2681_v57 = vpop.f32.mrf.mxu2  ;;  %v7195_v19 = vld [vmem:[#allocation27_spill] sm:$0xff]  ;;  %v3395_v27 = vunpack.c.l.b16 %v3161_v58 }
 0x444   : > { %v2484_v14 = vpop.f32.mrf.mxu1  ;;  %v2028_v54 = vadd.f32 %v7195_v19, %v7194_v5  ;;  %v7197_v5 = vld [vmem:[#allocation32_spill] sm:$0xff]  ;;  %v2951_v58 = vld [vmem:[#allocation2 + $0x98] sm:$0xf] }
 0x445   : > { %v2530_v40 = vadd.f32 %v2484_v14, %v2248_v21  ;;  %v3182_v21 = vshll.u32 %v2948_v44, 16  ;;  %v7196_v14 = vld [vmem:[#allocation31_spill] sm:$0xff] }
 0x446   : > { %v2250_v41 = vadd.f32 %v7196_v14, %v2028_v54  ;;  %v3210_v14 = vshrl.u32 %v2951_v58, 16 }
 0x447   : > { %v2722_v20 = vadd.f32 %v2676_v15, %v2530_v40  ;;  %v3171_v15 = vsel %vm6678_vm10, %v3166_v49, %v3170_v17 }
 0x448   : > { %3740 = vmatmul.bf16.gmra.mxu2 %v6791_v22 }
 0x44a   : > { %v2863_v16 = vpop.f32.mrf.mxu3 }
 0x44b   : > { %v6794_v43 = vadd.f32 %v2863_v16, %v2720_v52  ;;  %v2684_v12 = vpop.f32.mrf.mxu2  ;;  %v2947_v52 = vld [vmem:[#allocation2 + $0x84] sm:$0xf]  ;;  %v3184_v16 = vrot.slane %v3182_v21, 5 }
 0x44c   : > { %v2487_v34 = vpop.f32.mrf.mxu1  ;;  %v3173_v36 = vshrl.u32 %v2947_v52, 16 }
 0x44d   : > { %v2531_v48 = vadd.f32 %v2487_v34, %v7193_v6  ;;  %v3192_v6 = vshll.u32 %v2949_v45, 16  ;;  %v3189_v49 = vor.u32 %v3188_v46, %v3184_v16  ;;  %v2952_v46 = vld [vmem:[#allocation2 + $0x9c] sm:$0x1] }
 0x44e   : > { %v3175_v35 = vrot.slane %v3173_v36, 4 }
 0x44f   : > { %3521 = vmatmul.bf16.gmra.mxu1 %v6757_v33  ;;  %3944 = vmatmul.bf16.gmra.mxu3 %v6774_v37  ;;  %v2723_v53 = vadd.f32 %v2679_v42, %v2531_v48  ;;  %v3396_v33 = vunpack.c.l.b16 %v3171_v15  ;;  %v3176_v42 = vshll.u32 %v2947_v52, 16  ;;  %v3194_v2 = vrot.slane %v3192_v6, 5 }
 0x450   : > { %v3190_v54 = vrot.slane %v3189_v49, 4 }
 0x451   : > { %v6808_v17 = vpack.c.b16 %v3396_v33, %v3395_v27  ;;  %v3178_v34 = vrot.slane %v3176_v42, 5  ;;  %v3206_v33 = vshll.u32 %v2951_v58, 16 }
 0x452   : > { %v2866_v18 = vpop.f32.mrf.mxu3 }
 0x453   : > { %v6806_v0 = vadd.f32 %v2866_v18, %v2721_v47  ;;  %v2686_v40 = vpop.f32.mrf.mxu2  ;;  %v3179_v15 = vor.u32 %v3178_v34, %v3175_v35  ;;  %v2950_v18 = vld [vmem:[#allocation2 + $0x94] sm:$0xf]  ;;  %v7198_v35 = vld [vmem:[#allocation33_spill] sm:$0xff]  ;;  %v3208_v6 = vrot.slane %v3206_v33, 5 }
 0x454   : > { %v2489_v23 = vpop.f32.mrf.mxu1  ;;  %v3197_v27 = vshrl.u32 %v2950_v18, 16 }
 0x455   : > { %v2532_v4 = vadd.f32 %v2489_v23, %v2250_v41  ;;  %v3180_v21 = vrot.slane %v3179_v15, 4  ;;  %v3216_v15 = vshll.u32 %v2952_v46, 16 }
 0x457   : > { %v2724_v48 = vadd.f32 %v2681_v57, %v2532_v4  ;;  %v3195_v57 = vsel %vm6678_vm10, %v3190_v54, %v3194_v2  ;;  %v3218_v58 = vrot.slane %v3216_v15, 5 }
 0x458   : > { %3745 = vmatmul.bf16.gmra.mxu2 %v6808_v17  ;;  %v3398_v36 = vunpack.c.l.b16 %v3195_v57 }
 0x45a   : > { %v2868_v47 = vpop.f32.mrf.mxu3 }
 0x45b   : > { %v6811_v44 = vadd.f32 %v2868_v47, %v2722_v20  ;;  %v2689_v38 = vpop.f32.mrf.mxu2  ;;  %v3185_v20 = vsel %vm6678_vm10, %v3180_v21, %v3184_v16  ;;  %v3199_v47 = vrot.slane %v3197_v27, 4 }
 0x45c   : > { %v2492_v52 = vpop.f32.mrf.mxu1  ;;  %v3397_v4 = vunpack.c.l.b16 %v3185_v20  ;;  %v2954_v20 = vld [vmem:[#allocation2 + $0xa8] sm:$0xf] }
 0x45d   : > { %v2533_v19 = vadd.f32 %v2492_v52, %v7197_v5  ;;  %v3234_v27 = vshrl.u32 %v2954_v20, 16 }
 0x45e   : > { %v6823_v49 = vpack.c.b16 %v3398_v36, %v3397_v4  ;;  %v3230_v36 = vshll.u32 %v2954_v20, 16 }
 0x45f   : > { %3526 = vmatmul.bf16.gmra.mxu1 %v6774_v37  ;;  %3949 = vmatmul.bf16.gmra.mxu3 %v6791_v22  ;;  %v2725_v10 = vadd.f32 %v2684_v12, %v2533_v19  ;;  %v3200_v37 = vshll.u32 %v2950_v18, 16  ;;  %v3212_v12 = vrot.slane %v3210_v14, 4 }
 0x461   : > { %v3202_v16 = vrot.slane %v3200_v37, 5 }
 0x462   : > { %v2871_v41 = vpop.f32.mrf.mxu3 }
 0x463   : > { %v6820_v42 = vadd.f32 %v2871_v41, %v2723_v53  ;;  %v2691_v23 = vpop.f32.mrf.mxu2  ;;  %v3213_v53 = vor.u32 %v3212_v12, %v3208_v6  ;;  %v3203_v54 = vor.u32 %v3202_v16, %v3199_v47  ;;  %v2953_v41 = vld [vmem:[#allocation2 + $0xa4] sm:$0xf]  ;;  %v2955_v12 = vld [vmem:[#allocation2 + $0xac] sm:$0x1]  ;;  %v3232_v16 = vrot.slane %v3230_v36, 5 }
 0x464   : > { %v2494_v45 = vpop.f32.mrf.mxu1  ;;  %v3221_v46 = vshrl.u32 %v2953_v41, 16 }
 0x465   : > { %v2534_v34 = vadd.f32 %v2494_v45, %v7198_v35  ;;  %v3214_v18 = vrot.slane %v3213_v53, 4  ;;  %v3204_v33 = vrot.slane %v3203_v54, 4 }
 0x466   : > { %v3223_v53 = vrot.slane %v3221_v46, 4 }
 0x467   : > { %v2726_v2 = vadd.f32 %v2686_v40, %v2534_v34  ;;  %v3219_v40 = vsel %vm6678_vm10, %v3214_v18, %v3218_v58 }
 0x468   : > { %3750 = vmatmul.bf16.gmra.mxu2 %v6823_v49  ;;  %v3400_v45 = vunpack.c.l.b16 %v3219_v40 }
 0x46a   : > { %v2873_v52 = vpop.f32.mrf.mxu3 }
 0x46b   : > { %v6826_v5 = vadd.f32 %v2873_v52, %v2724_v48  ;;  %v2694_v19 = vpop.f32.mrf.mxu2  ;;  %v3209_v48 = vsel %vm6678_vm10, %v3204_v33, %v3208_v6  ;;  %v3240_v52 = vshll.u32 %v2955_v12, 16 }
 0x46c   : > { %v2497_v21 = vpop.f32.mrf.mxu1  ;;  %v3399_v34 = vunpack.c.l.b16 %v3209_v48 }
 0x46d   : > { %v2535_v57 = vadd.f32 %v2497_v21, %v6614_v51  ;;  %v3242_v20 = vrot.slane %v3240_v52, 5 }
 0x46e   : > { %v6838_v15 = vpack.c.b16 %v3400_v45, %v3399_v34 }
 0x46f   : > { %3531 = vmatmul.bf16.gmra.mxu1 %v6791_v22  ;;  %3954 = vmatmul.bf16.gmra.mxu3 %v6808_v17  ;;  %v2727_v14 = vadd.f32 %v2689_v38, %v2535_v57  ;;  %v3224_v22 = vshll.u32 %v2953_v41, 16  ;;  %v3236_v38 = vrot.slane %v3234_v27, 4  ;;  %v2957_v41 = vld [vmem:[#allocation2 + $0xb8] sm:$0xf] }
 0x470   : > { %v3258_v45 = vshrl.u32 %v2957_v41, 16 }
 0x471   : > { %v3226_v6 = vrot.slane %v3224_v22, 5 }
 0x472   : > { %v2876_v37 = vpop.f32.mrf.mxu3 }
 0x473   : > { %v6835_v51 = vadd.f32 %v2876_v37, %v2725_v10  ;;  %v2696_v4 = vpop.f32.mrf.mxu2  ;;  %v3237_v10 = vor.u32 %v3236_v38, %v3232_v16  ;;  %v3227_v18 = vor.u32 %v3226_v6, %v3223_v53  ;;  %v3254_v37 = vshll.u32 %v2957_v41, 16  ;;  %v2958_v38 = vld [vmem:[#allocation2 + $0xbc] sm:$0x1] }
 0x474   : > { %v2499_v35 = vpop.f32.mrf.mxu1  ;;  %v3260_v6 = vrot.slane %v3258_v45, 4 }
 0x475   : > { %v2536_v47 = vadd.f32 %v2499_v35, %v6616_v24  ;;  %v3238_v40 = vrot.slane %v3237_v10, 4 }
 0x477   : > { %v2728_v54 = vadd.f32 %v2691_v23, %v2536_v47  ;;  %v3228_v23 = vrot.slane %v3227_v18, 4  ;;  %v3243_v48 = vsel %vm6678_vm10, %v3238_v40, %v3242_v20 }
 0x478   : > { %3755 = vmatmul.bf16.gmra.mxu2 %v6838_v15  ;;  %v3402_v22 = vunpack.c.l.b16 %v3243_v48  ;;  %v2960_v48 = vld [vmem:[#allocation2 + $0xc8] sm:$0xf] }
 0x479   : > { %v3233_v27 = vsel %vm6678_vm10, %v3228_v23, %v3232_v16  ;;  %v3282_v45 = vshrl.u32 %v2960_v48, 16 }
 0x47a   : > { %v2878_v58 = vpop.f32.mrf.mxu3  ;;  %v3401_v47 = vunpack.c.l.b16 %v3233_v27  ;;  %v2959_v27 = vld [vmem:[#allocation2 + $0xc4] sm:$0xf] }
 0x47b   : > { %v6841_v21 = vadd.f32 %v2878_v58, %v2726_v2  ;;  %v6843_v57 = vpop.f32.mrf.mxu2  ;;  %v2956_v2 = vld [vmem:[#allocation2 + $0xb4] sm:$0xf]  ;;  %v3264_v58 = vshll.u32 %v2958_v38, 16 }
 0x47c   : > { %v2502_v33 = vpop.f32.mrf.mxu1  ;;  %v3248_v34 = vshll.u32 %v2956_v2, 16  ;;  %v6857_v52 = vpack.c.b16 %v3402_v22, %v3401_v47 }
 0x47d   : > { %v2537_v24 = vadd.f32 %v2502_v33, %v6622_v31  ;;  %v3266_v41 = vrot.slane %v3264_v58, 5 }
 0x47e   : > { %v3250_v10 = vrot.slane %v3248_v34, 5 }
 0x47f   : > { %3536 = vmatmul.bf16.gmra.mxu1 %v6808_v17  ;;  %3959 = vmatmul.bf16.gmra.mxu3 %v6823_v49  ;;  %v2729_v36 = vadd.f32 %v2694_v19, %v2537_v24  ;;  %v3245_v17 = vshrl.u32 %v2956_v2, 16  ;;  %v3256_v19 = vrot.slane %v3254_v37, 5  ;;  %v3278_v37 = vshll.u32 %v2960_v48, 16 }
 0x481   : > { %v3247_v16 = vrot.slane %v3245_v17, 4 }
 0x482   : > { %v2881_v46 = vpop.f32.mrf.mxu3 }
 0x483   : > { %v6852_v31 = vadd.f32 %v2881_v46, %v2727_v14  ;;  %v6854_v35 = vpop.f32.mrf.mxu2  ;;  %v3261_v14 = vor.u32 %v3260_v6, %v3256_v19  ;;  %v3251_v40 = vor.u32 %v3250_v10, %v3247_v16  ;;  %v3280_v6 = vrot.slane %v3278_v37, 5 }
 0x484   : > { %v2504_v12 = vpop.f32.mrf.mxu1  ;;  %v3284_v16 = vrot.slane %v3282_v45, 4  ;;  %v2962_v45 = vld [vmem:[#allocation2 + $0xd4] sm:$0xf] }
 0x485   : > { %v2538_v53 = vadd.f32 %v2504_v12, %v6624_v9  ;;  %v3262_v9 = vrot.slane %v3261_v14, 4  ;;  %v3252_v2 = vrot.slane %v3251_v40, 4  ;;  %v3269_v12 = vshrl.u32 %v2959_v27, 16 }
 0x487   : > { %v2730_v18 = vadd.f32 %v2696_v4, %v2538_v53  ;;  %v3267_v4 = vsel %vm6678_vm10, %v3262_v9, %v3266_v41  ;;  %v2961_v53 = vld [vmem:[#allocation2 + $0xcc] sm:$0x1]  ;;  %v3271_v58 = vrot.slane %v3269_v12, 4 }
 0x488   : > { %3760 = vmatmul.bf16.gmra.mxu2 %v6857_v52  ;;  %v3404_v22 = vunpack.c.l.b16 %v3267_v4 }
 0x48a   : > { %v2883_v20 = vpop.f32.mrf.mxu3 }
 0x48b   : > { %v6860_v33 = vadd.f32 %v2883_v20, %v2728_v54  ;;  %v6862_v24 = vpop.f32.mrf.mxu2  ;;  %v3257_v54 = vsel %vm6678_vm10, %v3252_v2, %v3256_v19  ;;  %v3288_v19 = vshll.u32 %v2961_v53, 16  ;;  %v3285_v20 = vor.u32 %v3284_v16, %v3280_v6 }
 0x48c   : > { %v3502_v23 = vpop.f32.mrf.mxu1  ;;  %v3403_v38 = vunpack.c.l.b16 %v3257_v54  ;;  %v3293_v53 = vshrl.u32 %v2962_v45, 16  ;;  %v3296_v16 = vshll.u32 %v2962_v45, 16 }
 0x48d   : > { %v3290_v48 = vrot.slane %v3288_v19, 5  ;;  %v3286_v4 = vrot.slane %v3285_v20, 4  ;;  %v2964_v19 = vld [vmem:[#allocation2 + $0xdc] sm:$0x1] }
 0x48e   : > { %v6874_v10 = vpack.c.b16 %v3404_v22, %v3403_v38 }
 0x48f   : > { %3541 = vmatmul.bf16.gmra.mxu1 %v6823_v49  ;;  %3964 = vmatmul.bf16.gmra.mxu3 %v6838_v15  ;;  %v3272_v49 = vshll.u32 %v2959_v27, 16  ;;  %v2963_v27 = vld [vmem:[#allocation2 + $0xd8] sm:$0xf]  ;;  %v3291_v37 = vsel %vm6678_vm10, %v3286_v4, %v3290_v48  ;;  %v3298_v48 = vrot.slane %v3296_v16, 5  ;;  %v2966_v16 = vld [vmem:[#allocation2 + $0xe8] sm:$0xf] }
 0x490   : > { %v3302_v22 = vshll.u32 %v2963_v27, 16  ;;  %v3306_v12 = vshrl.u32 %v2963_v27, 16  ;;  %v3406_v38 = vunpack.c.l.b16 %v3291_v37  ;;  %v6897_v27 = vld [vmem:[%s7135_s4] ss:$0 sm:$0xff] }
 0x491   : > { %v3274_v14 = vrot.slane %v3272_v49, 5 }
 0x492   : > { %v2886_v46 = vpop.f32.mrf.mxu3 }
 0x493   : > { %v6870_v17 = vadd.f32 %v2886_v46, %v2729_v36  ;;  %v6872_v34 = vpop.f32.mrf.mxu2  ;;  %v3275_v9 = vor.u32 %v3274_v14, %v3271_v58  ;;  %v3582_v46 = vadd.f32 %v3502_v23, %v6630_v59  ;;  %v3308_v59 = vrot.slane %v3306_v12, 4 }
 0x494   : > { %v3504_v47 = vpop.f32.mrf.mxu1 }
 0x495   : > { %v3276_v54 = vrot.slane %v3275_v9, 4  ;;  %v3583_v20 = vadd.f32 %v3504_v47, %v6632_v50  ;;  %v3304_v9 = vrot.slane %v3302_v22, 5 }
 0x497   : > { %v3797_v37 = vadd.f32 %v6854_v35, %v3583_v20  ;;  %v3309_v50 = vor.u32 %v3308_v59, %v3304_v9 }
 0x498   : > { %3765 = vmatmul.bf16.gmra.mxu2 %v6874_v10 }
 0x49a   : > { %v2888_v40 = vpop.f32.mrf.mxu3 }
 0x49b   : > { %v6877_v36 = vadd.f32 %v2888_v40, %v2730_v18  ;;  %v6879_v41 = vpop.f32.mrf.mxu2  ;;  %v3281_v18 = vsel %vm6678_vm10, %v3276_v54, %v3280_v6  ;;  %v3796_v40 = vadd.f32 %v6843_v57, %v3582_v46  ;;  %v3295_v6 = vrot.slane %v3293_v53, 4 }
 0x49c   : > { %v3507_v2 = vpop.f32.mrf.mxu1  ;;  %v3405_v14 = vunpack.c.l.b16 %v3281_v18  ;;  %v3312_v54 = vshll.u32 %v2964_v19, 16 }
 0x49d   : > { %v3299_v57 = vor.u32 %v3298_v48, %v3295_v6  ;;  %v3584_v59 = vadd.f32 %v3507_v2, %v6638_v32  ;;  %v3326_v48 = vshll.u32 %v2966_v16, 16 }
 0x49e   : > { %v6892_v23 = vpack.c.b16 %v3406_v38, %v3405_v14  ;;  %v3314_v22 = vrot.slane %v3312_v54, 5  ;;  %v3310_v38 = vrot.slane %v3309_v50, 4 }
 0x49f   : > { %3546 = vmatmul.bf16.gmra.mxu1 %v6838_v15  ;;  %3969 = vmatmul.bf16.gmra.mxu3 %v6857_v52  ;;  %v3300_v53 = vrot.slane %v3299_v57, 4 }
 0x4a0   : > { %v3315_v35 = vsel %vm6678_vm10, %v3310_v38, %v3314_v22 }
 0x4a1   : > { %v3305_v20 = vsel %vm6678_vm10, %v3300_v53, %v3304_v9  ;;  %v3798_v9 = vadd.f32 %v6862_v24, %v3584_v59 }
 0x4a2   : > { %v3930_v49 = vpop.f32.mrf.mxu3 }
 0x4a3   : > { %v6888_v58 = vpop.f32.mrf.mxu2  ;;  %v4010_v4 = vadd.f32 %v3930_v49, %v3796_v40  ;;  %v2965_v40 = vld [vmem:[#allocation2 + $0xe4] sm:$0xf] }
 0x4a4   : > { %v3509_v15 = vpop.f32.mrf.mxu1 }
 0x4a5   : > { %v4046_v45 = vadd.f32 %v6897_v27, %v4010_v4  ;;  %v3330_v4 = vshrl.u32 %v2966_v16, 16  ;;  %v3585_v22 = vadd.f32 %v3509_v15, %v6640_v3 }
 0x4a7   : > { %v4078_v14 = vmax.f32 %v4046_v45, 0.0  ;;  %v3407_v45 = vunpack.c.l.b16 %v3305_v20  ;;  %v3332_v38 = vrot.slane %v3330_v4, 4 }
 0x4a8   : > { %3770 = vmatmul.bf16.gmra.mxu2 %v6892_v23 }
 0x4aa   : > { %v3932_v47 = vpop.f32.mrf.mxu3 }
 0x4ab   : > { %v4011_v46 = vadd.f32 %v3932_v47, %v3797_v37  ;;  %v6902_v18 = vpop.f32.mrf.mxu2  ;;  %v3408_v37 = vunpack.c.l.b16 %v3315_v35  ;;  %v3320_v47 = vshll.u32 %v2965_v40, 16 }
 0x4ac   : > { %v3512_v12 = vpop.f32.mrf.mxu1 }
 0x4ad   : > { %v4047_v49 = vadd.f32 %v6897_v27, %v4011_v46  ;;  %v2967_v46 = vld [vmem:[#allocation2 + $0xec] sm:$0x1]  ;;  %v6916_v32 = vpack.c.b16 %v3408_v37, %v3407_v45  ;;  %v3322_v16 = vrot.slane %v3320_v47, 5  ;;  %v2968_v45 = vld [vmem:[#allocation2 + $0xf4] sm:$0xf] }
 0x4af   : > { %v4079_v19 = vmax.f32 %v4047_v49, 0.0  ;;  %3551 = vmatmul.bf16.gmra.mxu1 %v6857_v52  ;;  %3974 = vmatmul.bf16.gmra.mxu3 %v6874_v10  ;;  %v3317_v52 = vshrl.u32 %v2965_v40, 16  ;;  %v3328_v49 = vrot.slane %v3326_v48, 5 }
 0x4b1   : > { %v4110_v6 = vpack.c.bf16 %v4079_v19, %v4078_v14  ;;  %v3319_v53 = vrot.slane %v3317_v52, 4  ;;  %v3336_v14 = vshll.u32 %v2967_v46, 16  ;;  %v3799_v19 = vadd.f32 %v6872_v34, %v3585_v22 }
 0x4b2   : > { %v3935_v54 = vpop.f32.mrf.mxu3  ;;  %v3333_v35 = vor.u32 %v3332_v38, %v3328_v49 }
 0x4b3   : > { %v6912_v50 = vpop.f32.mrf.mxu2  ;;  %4202 = vmatmul.bf16.vlgmr.msrb.gmra.mxu0 %v4110_v6  ;;  %v4012_v2 = vadd.f32 %v3935_v54, %v3798_v9  ;;  %v3323_v24 = vor.u32 %v3322_v16, %v3319_v53  ;;  %v3338_v15 = vrot.slane %v3336_v14, 5  ;;  %v2969_v54 = vld [vmem:[#allocation2 + $0xf8] sm:$0xf]  ;;  %v3586_v9 = vadd.f32 %v3512_v12, %v6646_v62 }
 0x4b4   : > { %v3514_v57 = vpop.f32.mrf.mxu1  ;;  %v3334_v4 = vrot.slane %v3333_v35, 4  ;;  %v3350_v46 = vshll.u32 %v2969_v54, 16  ;;  %v3354_v22 = vshrl.u32 %v2969_v54, 16  ;;  %v3341_v14 = vshrl.u32 %v2968_v45, 16  ;;  %v2970_v35 = vld [vmem:[#allocation2 + $0xfc] sm:$0x1] }
 0x4b5   : > { %v4048_v20 = vadd.f32 %v6897_v27, %v4012_v2  ;;  %v3324_v34 = vrot.slane %v3323_v24, 4  ;;  %v3800_v62 = vadd.f32 %v6879_v41, %v3586_v9  ;;  %v2971_v9 = vld [vmem:[#allocation2 + $0x104] sm:$0xf] }
 0x4b6   : > { %v3339_v47 = vsel %vm6678_vm10, %v3334_v4, %v3338_v15  ;;  %v3356_v24 = vrot.slane %v3354_v22, 4  ;;  %v3587_v15 = vadd.f32 %v3514_v57, %v6651_v26  ;;  %v3360_v4 = vshll.u32 %v2970_v35, 16 }
 0x4b7   : > { %v4080_v37 = vmax.f32 %v4048_v20, 0.0  ;;  %v3329_v2 = vsel %vm6678_vm10, %v3324_v34, %v3328_v49  ;;  %v3410_v16 = vunpack.c.l.b16 %v3339_v47  ;;  %v3618_v35 = vshll.u32 %v2971_v9, 16 }
 0x4b8   : > { %3775 = vmatmul.bf16.gmra.mxu2 %v6916_v32  ;;  %v3409_v20 = vunpack.c.l.b16 %v3329_v2  ;;  %v2972_v2 = vld [vmem:[#allocation2 + $0x108] sm:$0xf] }
 0x4ba   : > { %v3937_v40 = vpop.f32.mrf.mxu3  ;;  %v6935_v12 = vpack.c.b16 %v3410_v16, %v3409_v20  ;;  %v3624_v20 = vshll.u32 %v2972_v2, 16 }
 0x4bb   : > { %v4013_v6 = vadd.f32 %v3937_v40, %v3799_v19  ;;  %v6921_v3 = vpop.f32.mrf.mxu2  ;;  %v3344_v19 = vshll.u32 %v2968_v45, 16  ;;  %v3362_v45 = vrot.slane %v3360_v4, 5 }
 0x4bc   : > { %v3517_v59 = vpop.f32.mrf.mxu1 }
 0x4bd   : > { %v4049_v48 = vadd.f32 %v6897_v27, %v4013_v6  ;;  %v3352_v6 = vrot.slane %v3350_v46, 5  ;;  %v3346_v49 = vrot.slane %v3344_v19, 5  ;;  %v3615_v19 = vshrl.u32 %v2971_v9, 16 }
 0x4bf   : > { %v4081_v52 = vmax.f32 %v4049_v48, 0.0  ;;  %3556 = vmatmul.bf16.gmra.mxu1 %v6874_v10  ;;  %3979 = vmatmul.bf16.gmra.mxu3 %v6892_v23  ;;  %v3343_v48 = vrot.slane %v3341_v14, 4 }
 0x4c1   : > { %v4111_v38 = vpack.c.bf16 %v4081_v52, %v4080_v37  ;;  %v3357_v37 = vor.u32 %v3356_v24, %v3352_v6  ;;  %v3801_v52 = vadd.f32 %v6888_v58, %v3587_v15  ;;  %v3347_v47 = vor.u32 %v3346_v49, %v3343_v48 }
 0x4c2   : > { %v3940_v53 = vpop.f32.mrf.mxu3  ;;  %v3588_v24 = vadd.f32 %v3517_v59, %v6657_v30  ;;  %v3628_v48 = vshrl.u32 %v2972_v2, 16 }
 0x4c3   : > { %v6931_v10 = vpop.f32.mrf.mxu2  ;;  %4207 = vmatmul.bf16.gmra.mxu0 %v4111_v38  ;;  %v4014_v54 = vadd.f32 %v3940_v53, %v3800_v62  ;;  %v3358_v57 = vrot.slane %v3357_v37, 4  ;;  %v3348_v53 = vrot.slane %v3347_v47, 4  ;;  %v3617_v37 = vrot.slane %v3615_v19, 4 }
 0x4c4   : > { %v3519_v40 = vpop.f32.mrf.mxu1  ;;  %v3630_v30 = vrot.slane %v3628_v48, 4 }
 0x4c5   : > { %v4050_v46 = vadd.f32 %v6897_v27, %v4014_v54  ;;  %v3363_v16 = vsel %vm6678_vm10, %v3358_v57, %v3362_v45  ;;  %v3353_v62 = vsel %vm6678_vm10, %v3348_v53, %v3352_v6  ;;  %v3589_v47 = vadd.f32 %v3519_v40, %v6662_v55 }
 0x4c6   : > { %v3412_v4 = vunpack.c.l.b16 %v3363_v16  ;;  %v3802_v45 = vadd.f32 %v6902_v18, %v3588_v24 }
 0x4c7   : > { %v4082_v14 = vmax.f32 %v4050_v46, 0.0  ;;  %v3626_v46 = vrot.slane %v3624_v20, 5  ;;  %v3803_v9 = vadd.f32 %v6912_v50, %v3589_v47 }
 0x4c8   : > { %3780 = vmatmul.bf16.gmra.mxu2 %v6935_v12 }
 0x4ca   : > { %v3942_v34 = vpop.f32.mrf.mxu3 }
 0x4cb   : > { %v4015_v22 = vadd.f32 %v3942_v34, %v3801_v52  ;;  %v6940_v26 = vpop.f32.mrf.mxu2  ;;  %v3620_v52 = vrot.slane %v3618_v35, 5  ;;  %v3411_v34 = vunpack.c.l.b16 %v3353_v62 }
 0x4cc   : > { %v3522_v41 = vpop.f32.mrf.mxu1 }
 0x4cd   : > { %v4051_v38 = vadd.f32 %v6897_v27, %v4015_v22  ;;  %v6954_v59 = vpack.c.b16 %v3412_v4, %v3411_v34  ;;  %v2973_v22 = vld [vmem:[#allocation2 + $0x10c] sm:$0x1]  ;;  %v3621_v57 = vor.u32 %v3620_v52, %v3617_v37 }
 0x4ce   : > { %v3634_v2 = vshll.u32 %v2973_v22, 16 }
 0x4cf   : > { %v4083_v58 = vmax.f32 %v4051_v38, 0.0  ;;  %3561 = vmatmul.bf16.gmra.mxu1 %v6892_v23  ;;  %3984 = vmatmul.bf16.gmra.mxu3 %v6916_v32  ;;  %v3631_v38 = vor.u32 %v3630_v30, %v3626_v46  ;;  %v3622_v18 = vrot.slane %v3621_v57, 4 }
 0x4d0   : > { %v3636_v35 = vrot.slane %v3634_v2, 5 }
 0x4d1   : > { %v4112_v15 = vpack.c.bf16 %v4083_v58, %v4082_v14  ;;  %v3632_v19 = vrot.slane %v3631_v38, 4  ;;  %v3627_v50 = vsel %vm6678_vm10, %v3622_v18, %v3626_v46 }
 0x4d2   : > { %v3945_v49 = vpop.f32.mrf.mxu3  ;;  %v3655_v4 = vunpack.c.l.b16 %v3627_v50 }
 0x4d3   : > { %v6950_v54 = vpop.f32.mrf.mxu2  ;;  %4212 = vmatmul.bf16.gmra.mxu0 %v4112_v15  ;;  %v4016_v6 = vadd.f32 %v3945_v49, %v3802_v45  ;;  %v3590_v15 = vadd.f32 %v3522_v41, %v6669_v63  ;;  %v3637_v48 = vsel %vm6678_vm10, %v3632_v19, %v3636_v35 }
 0x4d4   : > { %v3524_v23 = vpop.f32.mrf.mxu1  ;;  %v3656_v34 = vunpack.c.l.b16 %v3637_v48 }
 0x4d5   : > { %v4052_v16 = vadd.f32 %v6897_v27, %v4016_v6  ;;  %v3804_v47 = vadd.f32 %v6921_v3, %v3590_v15 }
 0x4d6   : > { %v3657_v45 = vpack.c.b16 %v3656_v34, %v3655_v4  ;;  %v2976_v4 = vld [vmem:[#allocation2 + $0x11c] sm:$0x1] }
 0x4d7   : > { %v4084_v20 = vmax.f32 %v4052_v16, 0.0 }
 0x4d8   : > { %3785 = vmatmul.bf16.gmra.mxu2 %v6954_v59 }
 0x4da   : > { %v3947_v53 = vpop.f32.mrf.mxu3 }
 0x4db   : > { %v4017_v14 = vadd.f32 %v3947_v53, %v3803_v9  ;;  %v6959_v55 = vpop.f32.mrf.mxu2  ;;  %v2974_v53 = vld [vmem:[#allocation2 + $0x114] sm:$0xf] }
 0x4dc   : > { %v3527_v40 = vpop.f32.mrf.mxu1  ;;  %v3829_v18 = vshrl.u32 %v2974_v53, 16 }
 0x4dd   : > { %v4053_v58 = vadd.f32 %v6897_v27, %v4017_v14 }
 0x4de   : > { %v3831_v15 = vrot.slane %v3829_v18, 4 }
 0x4df   : > { %v4085_v24 = vmax.f32 %v4053_v58, 0.0  ;;  %3566 = vmatmul.bf16.gmra.mxu1 %v6916_v32  ;;  %3989 = vmatmul.bf16.gmra.mxu3 %v6935_v12  ;;  %v3591_v32 = vadd.f32 %v3524_v23, %v6674_v1  ;;  %v7199_v1 = vld [vmem:[#allocation34_spill] sm:$0xff]  ;;  %v3832_v58 = vshll.u32 %v2974_v53, 16 }
 0x4e0   : > { %v3592_v3 = vadd.f32 %v3527_v40, %v7199_v1 }
 0x4e1   : > { %v4113_v62 = vpack.c.bf16 %v4085_v24, %v4084_v20  ;;  %v3805_v63 = vadd.f32 %v6931_v10, %v3591_v32  ;;  %v2975_v10 = vld [vmem:[#allocation2 + $0x118] sm:$0xf] }
 0x4e2   : > { %v3950_v49 = vpop.f32.mrf.mxu3  ;;  %v3838_v19 = vshll.u32 %v2975_v10, 16  ;;  %v3842_v35 = vshrl.u32 %v2975_v10, 16  ;;  %v3806_v24 = vadd.f32 %v6940_v26, %v3592_v3 }
 0x4e3   : > { %4217 = vmatmul.bf16.gmra.mxu0 %v4113_v62  ;;  %v6969_v37 = vpop.f32.mrf.mxu2  ;;  %v4018_v30 = vadd.f32 %v3950_v49, %v3804_v47  ;;  %v3834_v62 = vrot.slane %v3832_v58, 5 }
 0x4e4   : > { %v3529_v52 = vpop.f32.mrf.mxu1  ;;  %v3840_v48 = vrot.slane %v3838_v19, 5  ;;  %v3844_v40 = vrot.slane %v3842_v35, 4 }
 0x4e5   : > { %v4054_v46 = vadd.f32 %v6897_v27, %v4018_v30  ;;  %v3593_v20 = vadd.f32 %v3529_v52, %v6701_v25 }
 0x4e7   : > { %v4086_v38 = vmax.f32 %v4054_v46, 0.0  ;;  %v3807_v49 = vadd.f32 %v6950_v54, %v3593_v20  ;;  %v3848_v46 = vshll.u32 %v2976_v4, 16 }
 0x4e8   : > { %3790 = vmatmul.bf16.gmra.mxu2 %v3657_v45 }
 0x4ea   : > { %v3952_v41 = vpop.f32.mrf.mxu3 }
 0x4eb   : > { %v4019_v22 = vadd.f32 %v3952_v41, %v3805_v63  ;;  %v6976_v9 = vpop.f32.mrf.mxu2  ;;  %v3835_v63 = vor.u32 %v3834_v62, %v3831_v15  ;;  %v3845_v41 = vor.u32 %v3844_v40, %v3840_v48 }
 0x4ec   : > { %v3532_v6 = vpop.f32.mrf.mxu1 }
 0x4ed   : > { %v4055_v57 = vadd.f32 %v6897_v27, %v4019_v22  ;;  %v3836_v22 = vrot.slane %v3835_v63, 4  ;;  %v3594_v54 = vadd.f32 %v3532_v6, %v6717_v61 }
 0x4ef   : > { %v4087_v2 = vmax.f32 %v4055_v57, 0.0  ;;  %3571 = vmatmul.bf16.gmra.mxu1 %v6935_v12  ;;  %3994 = vmatmul.bf16.gmra.mxu3 %v6954_v59  ;;  %v3846_v57 = vrot.slane %v3845_v41, 4  ;;  %v3841_v53 = vsel %vm6678_vm10, %v3836_v22, %v3840_v48 }
 0x4f0   : > { %v3869_v18 = vunpack.c.l.b16 %v3841_v53 }
 0x4f1   : > { %v4114_v23 = vpack.c.bf16 %v4087_v2, %v4086_v38  ;;  %v3850_v38 = vrot.slane %v3848_v46, 5 }
 0x4f2   : > { %v3955_v16 = vpop.f32.mrf.mxu3 }
 0x4f3   : > { %4222 = vmatmul.bf16.gmra.mxu0 %v4114_v23  ;;  %v4020_v50 = vadd.f32 %v3955_v16, %v3806_v24  ;;  %v3753_v12 = vpop.f32.mrf.mxu2  ;;  %v3851_v10 = vsel %vm6678_vm10, %v3846_v57, %v3850_v38 }
 0x4f4   : > { %v3534_v14 = vpop.f32.mrf.mxu1  ;;  %v3870_v58 = vunpack.c.l.b16 %v3851_v10 }
 0x4f5   : > { %v4056_v32 = vadd.f32 %v6897_v27, %v4020_v50  ;;  %v3595_v16 = vadd.f32 %v3534_v14, %v6727_v8 }
 0x4f6   : > { %v3871_v20 = vpack.c.b16 %v3870_v58, %v3869_v18  ;;  %v5206_v18 = vld [vmem:[#allocation3 + $0x14] sm:$0xff]  }
 0x4f7   : > { %v4088_v26 = vmax.f32 %v4056_v32, 0.0  ;;  %v3809_v61 = vadd.f32 %v6969_v37, %v3595_v16 }
 0x4fa   : > { %v3957_v34 = vpop.f32.mrf.mxu3 }
 0x4fb   : > { %v4021_v47 = vadd.f32 %v3957_v34, %v3807_v49  ;;  %v3756_v1 = vpop.f32.mrf.mxu2 }
 0x4fc   : > { %v3537_v30 = vpop.f32.mrf.mxu1 }
 0x4fd   : > { %v4057_v25 = vadd.f32 %v6897_v27, %v4021_v47  ;;  %v3596_v8 = vadd.f32 %v3537_v30, %v6738_v7 }
 0x4ff   : > { %v4089_v52 = vmax.f32 %v4057_v25, 0.0  ;;  %3576 = vmatmul.bf16.gmra.mxu1 %v6954_v59  ;;  %3999 = vmatmul.bf16.gmra.mxu3 %v3657_v45  ;;  %v3808_v59 = vadd.f32 %v6959_v55, %v3594_v54  ;;  %v3810_v40 = vadd.f32 %v6976_v9, %v3596_v8 }
 0x501   : > { %v4115_v2 = vpack.c.bf16 %v4089_v52, %v4088_v26 }
 0x502   : > { %v3960_v3 = vpop.f32.mrf.mxu3 }
 0x503   : > { %4227 = vmatmul.bf16.gmra.mxu0 %v4115_v2  ;;  %v4022_v45 = vadd.f32 %v3960_v3, %v3808_v59  ;;  %v3758_v24 = vpop.f32.mrf.mxu2 }
 0x504   : > { %v3539_v23 = vpop.f32.mrf.mxu1 }
 0x505   : > { %v4058_v19 = vadd.f32 %v6897_v27, %v4022_v45  ;;  %v3597_v37 = vadd.f32 %v3539_v23, %v6743_v28 }
 0x507   : > { %v4090_v60 = vmax.f32 %v4058_v19, 0.0  ;;  %v3811_v34 = vadd.f32 %v3753_v12, %v3597_v37 }
 0x50a   : > { %v3962_v6 = vpop.f32.mrf.mxu3 }
 0x50b   : > { %v4023_v35 = vadd.f32 %v3962_v6, %v3809_v61  ;;  %v3761_v49 = vpop.f32.mrf.mxu2 }
 0x50c   : > { %v3542_v50 = vpop.f32.mrf.mxu1 }
 0x50d   : > { %v4059_v15 = vadd.f32 %v6897_v27, %v4023_v35  ;;  %v3598_v26 = vadd.f32 %v3542_v50, %v6755_v13 }
 0x50f   : > { %v4091_v62 = vmax.f32 %v4059_v15, 0.0  ;;  %4004 = vmatmul.bf16.gmra.mxu3 %v3871_v20  ;;  %v3812_v57 = vadd.f32 %v3756_v1, %v3598_v26  ;;  %v4319_v20 = vunpack.c.l.bf16 %v5206_v18 }
 0x511   : > { %v4116_v55 = vpack.c.bf16 %v4091_v62, %v4090_v60 }
 0x512   : > { %v3965_v14 = vpop.f32.mrf.mxu3 }
 0x513   : > { %4232 = vmatmul.bf16.gmra.mxu0 %v4116_v55  ;;  %v4024_v4 = vadd.f32 %v3965_v14, %v3810_v40  ;;  %v3763_v30 = vpop.f32.mrf.mxu2 }
 0x514   : > { %v3544_v48 = vpop.f32.mrf.mxu1 }
 0x515   : > { %v4060_v47 = vadd.f32 %v6897_v27, %v4024_v4  ;;  %v3599_v9 = vadd.f32 %v3544_v48, %v6760_v29  ;;  %v7010_v29 = vld [vmem:[%s7137_s6] ss:$0 sm:$0xff] }
 0x517   : > { %v4092_v25 = vmax.f32 %v4060_v47, 0.0  ;;  %v3813_v38 = vadd.f32 %v3758_v24, %v3599_v9 }
 0x51a   : > { %v3967_v32 = vpop.f32.mrf.mxu3 }
 0x51b   : > { %v4025_v63 = vadd.f32 %v3967_v32, %v3811_v34  ;;  %v3766_v54 = vpop.f32.mrf.mxu2 }
 0x51c   : > { %v3547_v41 = vpop.f32.mrf.mxu1 }
 0x51d   : > { %v4061_v46 = vadd.f32 %v6897_v27, %v4025_v63  ;;  %v3600_v45 = vadd.f32 %v3547_v41, %v6772_v56  ;;  %v4320_v56 = vunpack.c.h.bf16 %v5206_v18 }
 0x51f   : > { %v4093_v7 = vmax.f32 %v4061_v46, 0.0  ;;  %v3814_v24 = vadd.f32 %v3761_v49, %v3600_v45 }
 0x521   : > { %v4117_v52 = vpack.c.bf16 %v4093_v7, %v4092_v25  ;;  %v5208_v7 = vld [vmem:[#allocation3 + $0x24] sm:$0xff]  }
 0x522   : > { %v3970_v22 = vpop.f32.mrf.mxu3 }
 0x523   : > { %4237 = vmatmul.bf16.gmra.mxu0 %v4117_v52  ;;  %v4026_v12 = vadd.f32 %v3970_v22, %v3812_v57  ;;  %v3768_v61 = vpop.f32.mrf.mxu2 }
 0x524   : > { %v3549_v28 = vpop.f32.mrf.mxu1 }
 0x525   : > { %v4062_v3 = vadd.f32 %v6897_v27, %v4026_v12  ;;  %v3601_v19 = vadd.f32 %v3549_v28, %v6777_v39  ;;  %v4321_v28 = vunpack.c.l.bf16 %v5208_v7  ;;  %v4322_v12 = vunpack.c.h.bf16 %v5208_v7 }
 0x527   : > { %v4094_v16 = vmax.f32 %v4062_v3, 0.0  ;;  %v3815_v8 = vadd.f32 %v3763_v30, %v3601_v19 }
 0x52a   : > { %v3972_v2 = vpop.f32.mrf.mxu3 }
 0x52b   : > { %v4027_v23 = vadd.f32 %v3972_v2, %v3813_v38  ;;  %v3771_v34 = vpop.f32.mrf.mxu2 }
 0x52c   : > { %v3552_v53 = vpop.f32.mrf.mxu1 }
 0x52d   : > { %v4063_v10 = vadd.f32 %v6897_v27, %v4027_v23  ;;  %v3602_v46 = vadd.f32 %v3552_v53, %v6789_v11 }
 0x52f   : > { %v4095_v59 = vmax.f32 %v4063_v10, 0.0  ;;  %v3816_v9 = vadd.f32 %v3766_v54, %v3602_v46 }
 0x530   : > { %v4203_v13 = vpop.f32.mrf.mxu0 }
 0x531   : > { %v4118_v1 = vpack.c.bf16 %v4095_v59, %v4094_v16  ;;  %v4204_v35 = vadd.f32 %v7010_v29, %v4203_v13 }
 0x532   : > { %v3975_v58 = vpop.f32.mrf.mxu3 }
 0x533   : > { %4242 = vmatmul.bf16.gmra.mxu0 %v4118_v1  ;;  %v4028_v50 = vadd.f32 %v3975_v58, %v3814_v24  ;;  %v4351_v60 = vadd.f32 %v4319_v20, %v4204_v35  ;;  %v3773_v38 = vpop.f32.mrf.mxu2 }
 0x534   : > { %v3554_v6 = vpop.f32.mrf.mxu1 }
 0x535   : > { %v4064_v14 = vadd.f32 %v6897_v27, %v4028_v50  ;;  %v4383_v40 = vmax.f32 %v4351_v60, 0.0  ;;  %v3603_v52 = vadd.f32 %v3554_v6, %v6794_v43 }
 0x537   : > { %v4096_v32 = vmax.f32 %v4064_v14, 0.0  ;;  %v3817_v23 = vadd.f32 %v3768_v61, %v3603_v52  ;;  %v5210_v61 = vld [vmem:[#allocation3 + $0x34] sm:$0xff]   ;;  %v5212_v52 = vld [vmem:[#allocation3 + $0x44] sm:$0xff]  }
 0x538   : > { %v4205_v15 = vpop.f32.mrf.mxu0 }
 0x539   : > { %v4206_v62 = vadd.f32 %v7010_v29, %v4205_v15  ;;  %v4323_v15 = vunpack.c.l.bf16 %v5210_v61 }
 0x53a   : > { %v3977_v55 = vpop.f32.mrf.mxu3 }
 0x53b   : > { %v4352_v48 = vadd.f32 %v4320_v56, %v4206_v62  ;;  %v4029_v37 = vadd.f32 %v3977_v55, %v3815_v8  ;;  %v3776_v20 = vpop.f32.mrf.mxu2  ;;  %v4324_v55 = vunpack.c.h.bf16 %v5210_v61  ;;  %v5214_v61 = vld [vmem:[#allocation3 + $0x54] sm:$0xff]  }
 0x53c   : > { %v3557_v39 = vpop.f32.mrf.mxu1 }
 0x53d   : > { %v4384_v4 = vmax.f32 %v4352_v48, 0.0  ;;  %v4065_v49 = vadd.f32 %v6897_v27, %v4029_v37  ;;  %v3604_v19 = vadd.f32 %v3557_v39, %v6806_v0 }
 0x53f   : > { %v5569_v47 = vpack.c.bf16 %v4384_v4, %v4383_v40  ;;  %v4097_v63 = vmax.f32 %v4065_v49, 0.0  ;;  %v3818_v60 = vadd.f32 %v3771_v34, %v3604_v19 }
 0x540   : > { %v4208_v41 = vpop.f32.mrf.mxu0 }
 0x541   : > { %5570 = vst [vmem:[%s7021_s28] sm:$0xff] %v5569_v47   ;;  %v4119_v25 = vpack.c.bf16 %v4097_v63, %v4096_v32  ;;  %v4209_v22 = vadd.f32 %v7010_v29, %v4208_v41 }
 0x542   : > { %v3980_v30 = vpop.f32.mrf.mxu3 }
 0x543   : > { %4247 = vmatmul.bf16.gmra.mxu0 %v4119_v25  ;;  %v4030_v57 = vadd.f32 %v3980_v30, %v3816_v9  ;;  %v4353_v11 = vadd.f32 %v4321_v28, %v4209_v22  ;;  %v3778_v32 = vpop.f32.mrf.mxu2 }
 0x544   : > { %v3559_v26 = vpop.f32.mrf.mxu1 }
 0x545   : > { %v4066_v10 = vadd.f32 %v6897_v27, %v4030_v57  ;;  %v4385_v43 = vmax.f32 %v4353_v11, 0.0  ;;  %v3605_v50 = vadd.f32 %v3559_v26, %v6811_v44  ;;  %v4325_v57 = vunpack.c.l.bf16 %v5212_v52 }
 0x546   : > { %v4326_v11 = vunpack.c.h.bf16 %v5212_v52 }
 0x547   : > { %v4098_v54 = vmax.f32 %v4066_v10, 0.0  ;;  %v3819_v0 = vadd.f32 %v3773_v38, %v3605_v50 }
 0x548   : > { %v4210_v2 = vpop.f32.mrf.mxu0 }
 0x549   : > { %v4211_v3 = vadd.f32 %v7010_v29, %v4210_v2 }
 0x54a   : > { %v3982_v53 = vpop.f32.mrf.mxu3 }
 0x54b   : > { %v4354_v16 = vadd.f32 %v4322_v12, %v4211_v3  ;;  %v4031_v59 = vadd.f32 %v3982_v53, %v3817_v23  ;;  %v3781_v38 = vpop.f32.mrf.mxu2 }
 0x54c   : > { %v3562_v13 = vpop.f32.mrf.mxu1 }
 0x54d   : > { %v4386_v45 = vmax.f32 %v4354_v16, 0.0  ;;  %v4067_v1 = vadd.f32 %v6897_v27, %v4031_v59  ;;  %v3606_v30 = vadd.f32 %v3562_v13, %v6820_v42 }
 0x54f   : > { %v5574_v18 = vpack.c.bf16 %v4386_v45, %v4385_v43  ;;  %v4099_v58 = vmax.f32 %v4067_v1, 0.0  ;;  %v3820_v12 = vadd.f32 %v3776_v20, %v3606_v30  ;;  %v5216_v30 = vld [vmem:[#allocation3 + $0x64] sm:$0xff]  }
 0x550   : > { %v4213_v6 = vpop.f32.mrf.mxu0 }
 0x551   : > { %5681 = vst [vmem:[%s7021_s28 + $0x8] sm:$0xff] %v5574_v18   ;;  %v4120_v35 = vpack.c.bf16 %v4099_v58, %v4098_v54  ;;  %v4214_v56 = vadd.f32 %v7010_v29, %v4213_v6 }
 0x552   : > { %v3985_v24 = vpop.f32.mrf.mxu3 }
 0x553   : > { %4252 = vmatmul.bf16.gmra.mxu0 %v4120_v35  ;;  %v4032_v8 = vadd.f32 %v3985_v24, %v3818_v60  ;;  %v4355_v48 = vadd.f32 %v4323_v15, %v4214_v56  ;;  %v3783_v6 = vpop.f32.mrf.mxu2  ;;  %v4327_v60 = vunpack.c.l.bf16 %v5214_v61 }
 0x554   : > { %v3564_v62 = vpop.f32.mrf.mxu1 }
 0x555   : > { %v4068_v40 = vadd.f32 %v6897_v27, %v4032_v8  ;;  %v4387_v44 = vmax.f32 %v4355_v48, 0.0  ;;  %v3607_v28 = vadd.f32 %v3564_v62, %v6826_v5 }
 0x557   : > { %v4100_v34 = vmax.f32 %v4068_v40, 0.0  ;;  %v3821_v42 = vadd.f32 %v3778_v32, %v3607_v28 }
 0x558   : > { %v4215_v14 = vpop.f32.mrf.mxu0 }
 0x559   : > { %v4216_v37 = vadd.f32 %v7010_v29, %v4215_v14 }
 0x55a   : > { %v3987_v39 = vpop.f32.mrf.mxu3 }
 0x55b   : > { %v4356_v4 = vadd.f32 %v4324_v55, %v4216_v37  ;;  %v4033_v49 = vadd.f32 %v3987_v39, %v3819_v0  ;;  %v4328_v55 = vunpack.c.h.bf16 %v5214_v61  ;;  %v3786_v0 = vpop.f32.mrf.mxu2 }
 0x55c   : > { %v3567_v25 = vpop.f32.mrf.mxu1 }
 0x55d   : > { %v4388_v47 = vmax.f32 %v4356_v4, 0.0  ;;  %v4069_v63 = vadd.f32 %v6897_v27, %v4033_v49  ;;  %v3608_v35 = vadd.f32 %v3567_v25, %v6835_v51 }
 0x55f   : > { %v5579_v41 = vpack.c.bf16 %v4388_v47, %v4387_v44  ;;  %v4101_v46 = vmax.f32 %v4069_v63, 0.0  ;;  %v3822_v62 = vadd.f32 %v3781_v38, %v3608_v35  ;;  %v4330_v38 = vunpack.c.h.bf16 %v5216_v30 }
 0x560   : > { %v4218_v7 = vpop.f32.mrf.mxu0 }
 0x561   : > { %5682 = vst [vmem:[%s7021_s28 + $0x10] sm:$0xff] %v5579_v41   ;;  %v4121_v26 = vpack.c.bf16 %v4101_v46, %v4100_v34  ;;  %v4219_v9 = vadd.f32 %v7010_v29, %v4218_v7 }
 0x562   : > { %v3990_v22 = vpop.f32.mrf.mxu3 }
 0x563   : > { %4257 = vmatmul.bf16.gmra.mxu0 %v4121_v26  ;;  %v4034_v2 = vadd.f32 %v3990_v22, %v3820_v12  ;;  %v4357_v23 = vadd.f32 %v4325_v57, %v4219_v9  ;;  %v3788_v52 = vpop.f32.mrf.mxu2  ;;  %v4329_v9 = vunpack.c.l.bf16 %v5216_v30 }
 0x564   : > { %v3569_v10 = vpop.f32.mrf.mxu1 }
 0x565   : > { %v4070_v59 = vadd.f32 %v6897_v27, %v4034_v2  ;;  %v4389_v5 = vmax.f32 %v4357_v23, 0.0  ;;  %v3609_v56 = vadd.f32 %v3569_v10, %v6841_v21 }
 0x567   : > { %v4102_v54 = vmax.f32 %v4070_v59, 0.0  ;;  %v3823_v51 = vadd.f32 %v3783_v6, %v3609_v56 }
 0x568   : > { %v4220_v3 = vpop.f32.mrf.mxu0 }
 0x569   : > { %v4221_v53 = vadd.f32 %v7010_v29, %v4220_v3 }
 0x56a   : > { %v3992_v16 = vpop.f32.mrf.mxu3 }
 0x56b   : > { %v4358_v13 = vadd.f32 %v4326_v11, %v4221_v53  ;;  %v4035_v43 = vadd.f32 %v3992_v16, %v3821_v42 }
 0x56c   : > { %v3572_v50 = vpop.f32.mrf.mxu1 }
 0x56d   : > { %v4390_v45 = vmax.f32 %v4358_v13, 0.0  ;;  %v4071_v1 = vadd.f32 %v6897_v27, %v4035_v43  ;;  %v3610_v25 = vadd.f32 %v3572_v50, %v6852_v31  ;;  %v3791_v43 = vpop.f32.mrf.mxu2 }
 0x56f   : > { %v5584_v18 = vpack.c.bf16 %v4390_v45, %v4389_v5  ;;  %v4103_v58 = vmax.f32 %v4071_v1, 0.0  ;;  %v3824_v57 = vadd.f32 %v3786_v0, %v3610_v25 }
 0x570   : > { %v4223_v19 = vpop.f32.mrf.mxu0 }
 0x571   : > { %5683 = vst [vmem:[%s7021_s28 + $0x18] sm:$0xff] %v5584_v18   ;;  %v4122_v20 = vpack.c.bf16 %v4103_v58, %v4102_v54  ;;  %v4224_v15 = vadd.f32 %v7010_v29, %v4223_v19  ;;  %v5218_v19 = vld [vmem:[#allocation3 + $0x74] sm:$0xff]  }
 0x572   : > { %v3995_v24 = vpop.f32.mrf.mxu3 }
 0x573   : > { %4262 = vmatmul.bf16.gmra.mxu0 %v4122_v20  ;;  %v4036_v8 = vadd.f32 %v3995_v24, %v3822_v62  ;;  %v4359_v48 = vadd.f32 %v4327_v60, %v4224_v15  ;;  %v4331_v24 = vunpack.c.l.bf16 %v5218_v19  ;;  %v4332_v15 = vunpack.c.h.bf16 %v5218_v19 }
 0x574   : > { %v3574_v47 = vpop.f32.mrf.mxu1 }
 0x575   : > { %v4072_v40 = vadd.f32 %v6897_v27, %v4036_v8  ;;  %v4391_v32 = vmax.f32 %v4359_v48, 0.0  ;;  %v3611_v22 = vadd.f32 %v3574_v47, %v6860_v33  ;;  %v3793_v60 = vpop.f32.mrf.mxu2 }
 0x577   : > { %v4104_v63 = vmax.f32 %v4072_v40, 0.0  ;;  %v3825_v23 = vadd.f32 %v3788_v52, %v3611_v22  ;;  %v5222_v22 = vld [vmem:[#allocation3 + $0x94] sm:$0xff]  }
 0x578   : > { %v4225_v14 = vpop.f32.mrf.mxu0 }
 0x579   : > { %v4226_v37 = vadd.f32 %v7010_v29, %v4225_v14 }
 0x57a   : > { %v3997_v39 = vpop.f32.mrf.mxu3 }
 0x57b   : > { %v4360_v4 = vadd.f32 %v4328_v55, %v4226_v37  ;;  %v4037_v49 = vadd.f32 %v3997_v39, %v3823_v51 }
 0x57c   : > { %v3577_v2 = vpop.f32.mrf.mxu1 }
 0x57d   : > { %v4392_v21 = vmax.f32 %v4360_v4, 0.0  ;;  %v4073_v44 = vadd.f32 %v6897_v27, %v4037_v49  ;;  %v3612_v18 = vadd.f32 %v3577_v2, %v6870_v17 }
 0x57f   : > { %v5589_v34 = vpack.c.bf16 %v4392_v21, %v4391_v32  ;;  %v4105_v41 = vmax.f32 %v4073_v44, 0.0  ;;  %v3826_v50 = vadd.f32 %v3791_v43, %v3612_v18  ;;  %v5220_v44 = vld [vmem:[#allocation3 + $0x84] sm:$0xff]  }
 0x580   : > { %v4228_v46 = vpop.f32.mrf.mxu0 }
 0x581   : > { %5684 = vst [vmem:[%s7021_s28 + $0x20] sm:$0xff] %v5589_v34   ;;  %v4123_v7 = vpack.c.bf16 %v4105_v41, %v4104_v63  ;;  %v4229_v28 = vadd.f32 %v7010_v29, %v4228_v46  ;;  %v4333_v63 = vunpack.c.l.bf16 %v5220_v44  ;;  %v4334_v34 = vunpack.c.h.bf16 %v5220_v44 }
 0x582   : > { %v4000_v26 = vpop.f32.mrf.mxu3 }
 0x583   : > { %4267 = vmatmul.bf16.gmra.mxu0 %v4123_v7  ;;  %v4038_v12 = vadd.f32 %v4000_v26, %v3824_v57  ;;  %v4361_v3 = vadd.f32 %v4329_v9, %v4229_v28  ;;  %v4335_v9 = vunpack.c.l.bf16 %v5222_v22  ;;  %v4336_v57 = vunpack.c.h.bf16 %v5222_v22 }
 0x584   : > { %v3579_v6 = vpop.f32.mrf.mxu1 }
 0x585   : > { %v4074_v42 = vadd.f32 %v6897_v27, %v4038_v12  ;;  %v4393_v59 = vmax.f32 %v4361_v3, 0.0  ;;  %v3613_v20 = vadd.f32 %v3579_v6, %v6877_v36 }
 0x587   : > { %v4106_v5 = vmax.f32 %v4074_v42, 0.0  ;;  %v3827_v55 = vadd.f32 %v3793_v60, %v3613_v20  ;;  %v5224_v42 = vld [vmem:[#allocation3 + $0xa4] sm:$0xff]  }
 0x588   : > { %v4230_v11 = vpop.f32.mrf.mxu0 }
 0x589   : > { %v4231_v31 = vadd.f32 %v7010_v29, %v4230_v11 }
 0x58a   : > { %v4002_v53 = vpop.f32.mrf.mxu3 }
 0x58b   : > { %v4362_v10 = vadd.f32 %v4330_v38, %v4231_v31  ;;  %v4039_v16 = vadd.f32 %v4002_v53, %v3825_v23 }
 0x58d   : > { %v4394_v33 = vmax.f32 %v4362_v10, 0.0  ;;  %v4075_v13 = vadd.f32 %v6897_v27, %v4039_v16  ;;  %v4337_v16 = vunpack.c.l.bf16 %v5224_v42 }
 0x58f   : > { %v5594_v45 = vpack.c.bf16 %v4394_v33, %v4393_v59  ;;  %v4107_v1 = vmax.f32 %v4075_v13, 0.0  ;;  %v4338_v59 = vunpack.c.h.bf16 %v5224_v42 }
 0x590   : > { %v4233_v54 = vpop.f32.mrf.mxu0 }
 0x591   : > { %5685 = vst [vmem:[%s7021_s28 + $0x28] sm:$0xff] %v5594_v45   ;;  %v4124_v58 = vpack.c.bf16 %v4107_v1, %v4106_v5  ;;  %v4234_v61 = vadd.f32 %v7010_v29, %v4233_v54 }
 0x592   : > { %v4005_v35 = vpop.f32.mrf.mxu3 }
 0x593   : > { %4272 = vmatmul.bf16.gmra.mxu0 %v4124_v58  ;;  %v4040_v56 = vadd.f32 %v4005_v35, %v3826_v50  ;;  %v4363_v8 = vadd.f32 %v4331_v24, %v4234_v61  ;;  %v5226_v58 = vld [vmem:[#allocation3 + $0xb4] sm:$0xff]  }
 0x594   : > { %v4339_v19 = vunpack.c.l.bf16 %v5226_v58  ;;  %v4340_v35 = vunpack.c.h.bf16 %v5226_v58 }
 0x595   : > { %v4076_v48 = vadd.f32 %v6897_v27, %v4040_v56  ;;  %v4395_v0 = vmax.f32 %v4363_v8, 0.0  ;;  %v5228_v8 = vld [vmem:[#allocation3 + $0xc4] sm:$0xff]  }
 0x597   : > { %v4108_v40 = vmax.f32 %v4076_v48, 0.0 }
 0x598   : > { %v4235_v62 = vpop.f32.mrf.mxu0 }
 0x599   : > { %v4236_v17 = vadd.f32 %v7010_v29, %v4235_v62 }
 0x59a   : > { %v4007_v14 = vpop.f32.mrf.mxu3 }
 0x59b   : > { %v4364_v37 = vadd.f32 %v4332_v15, %v4236_v17  ;;  %v4041_v51 = vadd.f32 %v4007_v14, %v3827_v55  ;;  %v4341_v55 = vunpack.c.l.bf16 %v5228_v8  ;;  %v4342_v14 = vunpack.c.h.bf16 %v5228_v8 }
 0x59d   : > { %v4396_v36 = vmax.f32 %v4364_v37, 0.0  ;;  %v4077_v39 = vadd.f32 %v6897_v27, %v4041_v51 }
 0x59f   : > { %v5599_v4 = vpack.c.bf16 %v4396_v36, %v4395_v0  ;;  %v4109_v49 = vmax.f32 %v4077_v39, 0.0 }
 0x5a0   : > { %v4238_v32 = vpop.f32.mrf.mxu0 }
 0x5a1   : > { %5686 = vst [vmem:[%s7021_s28 + $0x30] sm:$0xff] %v5599_v4   ;;  %v4125_v21 = vpack.c.bf16 %v4109_v49, %v4108_v40  ;;  %v4239_v47 = vadd.f32 %v7010_v29, %v4238_v32  ;;  %v5230_v49 = vld [vmem:[#allocation3 + $0xd4] sm:$0xff]  }
 0x5a2   : > { %v4344_v44 = vunpack.c.h.bf16 %v5230_v49 }
 0x5a3   : > { %4277 = vmatmul.bf16.gmra.mxu0 %v4125_v21  ;;  %v4365_v46 = vadd.f32 %v4333_v63, %v4239_v47  ;;  %v4343_v21 = vunpack.c.l.bf16 %v5230_v49 }
 0x5a5   : > { %v4397_v30 = vmax.f32 %v4365_v46, 0.0 }
 0x5a8   : > { %v4240_v41 = vpop.f32.mrf.mxu0 }
 0x5a9   : > { %v4241_v25 = vadd.f32 %v7010_v29, %v4240_v41 }
 0x5ab   : > { %v4366_v7 = vadd.f32 %v4334_v34, %v4241_v25 }
 0x5ad   : > { %v4398_v27 = vmax.f32 %v4366_v7, 0.0 }
 0x5af   : > { %v5604_v26 = vpack.c.bf16 %v4398_v27, %v4397_v30  ;;  %v5232_v27 = vld [vmem:[#allocation3 + $0xe4] sm:$0xff]  }
 0x5b0   : > { %v4243_v52 = vpop.f32.mrf.mxu0  ;;  %v4346_v22 = vunpack.c.h.bf16 %v5232_v27 }
 0x5b1   : > { %5687 = vst [vmem:[%s7021_s28 + $0x38] sm:$0xff] %v5604_v26   ;;  %v4244_v28 = vadd.f32 %v7010_v29, %v4243_v52  ;;  %v4345_v52 = vunpack.c.l.bf16 %v5232_v27 }
 0x5b3   : > { %v4367_v38 = vadd.f32 %v4335_v9, %v4244_v28 }
 0x5b5   : > { %v4399_v3 = vmax.f32 %v4367_v38, 0.0 }
 0x5b8   : > { %v4245_v12 = vpop.f32.mrf.mxu0 }
 0x5b9   : > { %v4246_v2 = vadd.f32 %v7010_v29, %v4245_v12 }
 0x5bb   : > { %v4368_v11 = vadd.f32 %v4336_v57, %v4246_v2 }
 0x5bd   : > { %v4400_v31 = vmax.f32 %v4368_v11, 0.0 }
 0x5bf   : > { %v5609_v23 = vpack.c.bf16 %v4400_v31, %v4399_v3  ;;  %v5234_v31 = vld [vmem:[#allocation3 + $0xf4] sm:$0xff]  }
 0x5c0   : > { %v4248_v53 = vpop.f32.mrf.mxu0  ;;  %v4348_v42 = vunpack.c.h.bf16 %v5234_v31 }
 0x5c1   : > { %5688 = vst [vmem:[%s7021_s28 + $0x40] sm:$0xff] %v5609_v23   ;;  %v4249_v10 = vadd.f32 %v7010_v29, %v4248_v53  ;;  %v4347_v53 = vunpack.c.l.bf16 %v5234_v31 }
 0x5c3   : > { %v4369_v13 = vadd.f32 %v4337_v16, %v4249_v10 }
 0x5c5   : > { %v4401_v45 = vmax.f32 %v4369_v13, 0.0 }
 0x5c8   : > { %v4250_v33 = vpop.f32.mrf.mxu0 }
 0x5c9   : > { %v4251_v43 = vadd.f32 %v7010_v29, %v4250_v33 }
 0x5cb   : > { %v4370_v5 = vadd.f32 %v4338_v59, %v4251_v43 }
 0x5cd   : > { %v4402_v1 = vmax.f32 %v4370_v5, 0.0 }
 0x5cf   : > { %v5614_v54 = vpack.c.bf16 %v4402_v1, %v4401_v45  ;;  %v5236_v1 = vld [vmem:[#allocation3 + $0x104] sm:$0xff]  }
 0x5d0   : > { %v4253_v18 = vpop.f32.mrf.mxu0  ;;  %v4350_v58 = vunpack.c.h.bf16 %v5236_v1 }
 0x5d1   : > { %5689 = vst [vmem:[%s7021_s28 + $0x48] sm:$0xff] %v5614_v54   ;;  %v4254_v6 = vadd.f32 %v7010_v29, %v4253_v18  ;;  %v4349_v18 = vunpack.c.l.bf16 %v5236_v1 }
 0x5d3   : > { %v4371_v61 = vadd.f32 %v4339_v19, %v4254_v6 }
 0x5d5   : > { %v4403_v56 = vmax.f32 %v4371_v61, 0.0 }
 0x5d8   : > { %v4255_v20 = vpop.f32.mrf.mxu0 }
 0x5d9   : > { %v4256_v24 = vadd.f32 %v7010_v29, %v4255_v20 }
 0x5db   : > { %v4372_v50 = vadd.f32 %v4340_v35, %v4256_v24 }
 0x5dd   : > { %v4404_v15 = vmax.f32 %v4372_v50, 0.0 }
 0x5df   : > { %v5619_v60 = vpack.c.bf16 %v4404_v15, %v4403_v56 }
 0x5e0   : > { %v4258_v62 = vpop.f32.mrf.mxu0 }
 0x5e1   : > { %5690 = vst [vmem:[%s7021_s28 + $0x50] sm:$0xff] %v5619_v60   ;;  %v4259_v17 = vadd.f32 %v7010_v29, %v4258_v62 }
 0x5e3   : > { %v4373_v37 = vadd.f32 %v4341_v55, %v4259_v17 }
 0x5e5   : > { %v4405_v36 = vmax.f32 %v4373_v37, 0.0 }
 0x5e8   : > { %v4260_v48 = vpop.f32.mrf.mxu0 }
 0x5e9   : > { %v4261_v51 = vadd.f32 %v7010_v29, %v4260_v48 }
 0x5eb   : > { %v4374_v0 = vadd.f32 %v4342_v14, %v4261_v51 }
 0x5ed   : > { %v4406_v39 = vmax.f32 %v4374_v0, 0.0 }
 0x5ef   : > { %v5624_v40 = vpack.c.bf16 %v4406_v39, %v4405_v36 }
 0x5f0   : > { %v4263_v4 = vpop.f32.mrf.mxu0 }
 0x5f1   : > { %5691 = vst [vmem:[%s7021_s28 + $0x58] sm:$0xff] %v5624_v40   ;;  %v4264_v32 = vadd.f32 %v7010_v29, %v4263_v4 }
 0x5f3   : > { %v4375_v63 = vadd.f32 %v4343_v21, %v4264_v32 }
 0x5f5   : > { %v4407_v46 = vmax.f32 %v4375_v63, 0.0 }
 0x5f8   : > { %v4265_v47 = vpop.f32.mrf.mxu0 }
 0x5f9   : > { %v4266_v34 = vadd.f32 %v7010_v29, %v4265_v47 }
 0x5fb   : > { %v4376_v41 = vadd.f32 %v4344_v44, %v4266_v34 }
 0x5fd   : > { %v4408_v25 = vmax.f32 %v4376_v41, 0.0 }
 0x5ff   : > { %v5629_v7 = vpack.c.bf16 %v4408_v25, %v4407_v46 }
 0x600   : > { %v4268_v30 = vpop.f32.mrf.mxu0 }
 0x601   : > { %5692 = vst [vmem:[%s7021_s28 + $0x60] sm:$0xff] %v5629_v7   ;;  %v4269_v26 = vadd.f32 %v7010_v29, %v4268_v30 }
 0x603   : > { %v4377_v9 = vadd.f32 %v4345_v52, %v4269_v26 }
 0x605   : > { %v4409_v38 = vmax.f32 %v4377_v9, 0.0 }
 0x608   : > { %v4270_v28 = vpop.f32.mrf.mxu0 }
 0x609   : > { %v4271_v57 = vadd.f32 %v7010_v29, %v4270_v28 }
 0x60b   : > { %v4378_v12 = vadd.f32 %v4346_v22, %v4271_v57 }
 0x60d   : > { %v4410_v2 = vmax.f32 %v4378_v12, 0.0 }
 0x60f   : > { %v5634_v11 = vpack.c.bf16 %v4410_v2, %v4409_v38 }
 0x610   : > { %v4273_v3 = vpop.f32.mrf.mxu0 }
 0x611   : > { %5693 = vst [vmem:[%s7021_s28 + $0x68] sm:$0xff] %v5634_v11   ;;  %v4274_v23 = vadd.f32 %v7010_v29, %v4273_v3 }
 0x613   : > { %v4379_v16 = vadd.f32 %v4347_v53, %v4274_v23 }
 0x615   : > { %v4411_v13 = vmax.f32 %v4379_v16, 0.0 }
 0x618   : > { %v4275_v10 = vpop.f32.mrf.mxu0 }
 0x619   : > { %v4276_v59 = vadd.f32 %v7010_v29, %v4275_v10 }
 0x61b   : > { %v4380_v33 = vadd.f32 %v4348_v42, %v4276_v59 }
 0x61d   : > { %v4412_v43 = vmax.f32 %v4380_v33, 0.0 }
 0x61f   : > { %v5639_v5 = vpack.c.bf16 %v4412_v43, %v4411_v13 }
 0x620   : > { %v4278_v45 = vpop.f32.mrf.mxu0 }
 0x621   : > { %5694 = vst [vmem:[%s7021_s28 + $0x70] sm:$0xff] %v5639_v5   ;;  %v4279_v54 = vadd.f32 %v7010_v29, %v4278_v45 }
 0x623   : > { %v4381_v19 = vadd.f32 %v4349_v18, %v4279_v54 }
 0x625   : > { %v4413_v61 = vmax.f32 %v4381_v19, 0.0 }
 0x628   : > { %v4280_v6 = vpop.f32.mrf.mxu0 }
 0x629   : > { %v4281_v35 = vadd.f32 %v7010_v29, %v4280_v6 }
 0x62b   : > { %v4382_v20 = vadd.f32 %v4350_v58, %v4281_v35 }
 0x62d   : > { %v4414_v24 = vmax.f32 %v4382_v20, 0.0 }
 0x62f   : > { %v5644_v50 = vpack.c.bf16 %v4414_v24, %v4413_v61 }
 0x631   : > { %5695 = vst [vmem:[%s7021_s28 + $0x78] sm:$0xff] %v5644_v50  }
 0x632   : > { %5961 = shalt.err (!%p5958_p2)
}
 0x633   : > { %s6033_s17 = smov 64   ;;  %s6034_s11 = smov 4  }
 0x634   : > { %5727 = dma.vmem_to_hbm [thread:$0]  (%p6156_p12), %s4496_s30, 2048, %s4498_s12, %s4480_s27, %s6033_s17, %s6033_s17, %s6034_s11  }
 0x635 PF: > { %p5752_p5 = scmp.ge.s32.totalorder %s6024_s29, 2  ;;  %s4512_s15 = sand.u32 1, %s6004_s24  }
 0x636   : > { %p7200_p7 = scmp.ne.s32.totalorder %s7157_s10, 0  ;;  %s4513_s19 = scalar_lea.sflag [#allocation5], %s4512_s15 }
 0x638   : > { %p5743_p8 = pnand %p5752_p5, %p7200_p7 }
 0x63a   : > { %p5744_p9 = pneg %p5743_p8 }
 0x63c   : > { %5999 = dma.done.wait (%p5744_p9), %s4513_s19, 2048  }
 0x63d   : > { %6001 = vsyncadd (%p5744_p9), %s4513_s19, 4294965248  ;;  %s23_s29 = sadd.s32 1, %s6024_s29   ;;  %s7201_s28 = sld [smem:[#allocation16_spill]] }
 0x63e   : > { %p20_p10 = scmp.ge.s32.totalorder %s23_s29, 4   ;;  %s7202_s26 = sld [smem:[#allocation19_spill]] }
 0x63f   : > { %s7203_s27 = sld [smem:[#allocation17_spill]]  ;;  %s7205_s24 = smov %s6008_s25 }
 0x640   : > { %s7204_s23 = sld [smem:[#allocation18_spill]] }
 0x642   :  { %22 = sbr.rel (!%p20_p10) target bundleno = 9 (0x9), region = 113 }
 0x643   : > { %s7206_s25 = smov %s7201_s28 }
 0x646   : > { %s7207_s28 = smov %s7204_s23 }
 0x647   :  { %4519 = vsyncpa [#allocation4], 1 }
 0x648   :  { %4521 = vsyncpa [#allocation4 + $0x1], 1 }
 0x649   :  { %4522 = vsyncpa [#allocation7], 1 }
 0x64a   :  { %4523 = vsyncpa [#allocation10], 1 }
 0x64b   :  { %4524 = vsyncpa [#allocation5], 1 }
 0x64c   :  { %4526 = vsyncpa [#allocation5 + $0x1], 1 }

// kernel: tpu_custom_call.1
= control target key start
LH: loop header
LB: loop body
LE: loop exit
PB: predicated region body
PF: predicated region fallthrough
CT: control target
= control target key end

     0   :  { %s7199_s0 = inlined_call_operand.hbm [shape: bf16[2,18,32,128], index: 0, kind: input, shape index: {}]   ;;  %s7200_s1 = inlined_call_operand.hbm [shape: bf16[128,128], index: 1, kind: input, shape index: {}]   ;;  %s7201_s2 = inlined_call_operand.vmem [shape: f32[1,128], index: 2, kind: input, shape index: {}]   ;;  %s7202_s3 = inlined_call_operand.hbm [shape: bf16[3,3,128,128], index: 3, kind: input, shape index: {}]   ;;  %s7203_s4 = inlined_call_operand.vmem [shape: f32[1,128], index: 4, kind: input, shape index: {}]   ;;  %s7204_s5 = inlined_call_operand.hbm [shape: bf16[128,128], index: 5, kind: input, shape index: {}]   ;;  %s7205_s6 = inlined_call_operand.vmem [shape: f32[1,128], index: 6, kind: input, shape index: {}]   ;;  %s7206_s7 = inlined_call_operand.hbm [shape: bf16[2,16,16,128], index: 7, kind: output, shape index: {}]  }
   0x1   :  { %7210 = sst [smem:[#allocation32_spill]] %s7200_s1 }
   0x2   :  { %7211 = sst [smem:[#allocation33_spill]] %s7202_s3 }
   0x3   :  { %7212 = sst [smem:[#allocation34_spill]] %s7204_s5 }
   0x4   :  { %12 = vsyncpa [#allocation4], 0 }
   0x5   :  { %14 = vsyncpa [#allocation4 + $0x1], 0 }
   0x6   :  { %15 = vsyncpa [#allocation7], 0 }
   0x7   :  { %16 = vsyncpa [#allocation10], 0 }
   0x8   :  { %17 = vsyncpa [#allocation5], 0 }
   0x9   :  { %19 = vsyncpa [#allocation5 + $0x1], 0  ;;  %s6104_s24 = smov 0   ;;  %s6106_s25 = smov 0  }
   0xa   :  { %s6108_s26 = smov 0   ;;  %s6110_s27 = smov 0  }
   0xb   :  { %s6112_s28 = smov 0   ;;  %s6114_s29 = smov 0  }
   0xc LB: > { %s4634_s30 = sadd.s32 4294967295, %s6054_s29   ;;  %s4635_s8 = sadd.s32 4294967294, %s6054_s29   ;;  %s6054_s29 = sphi %s6114_s29, %s25_s29   ;;  %s6050_s28 = sphi %s6112_s28, %s7269_s28   ;;  %s6046_s27 = sphi %s6110_s27, %s7268_s27   ;;  %s6042_s26 = sphi %s6108_s26, %s7267_s26   ;;  %s6038_s25 = sphi %s6106_s25, %s7266_s25   ;;  %s6034_s24 = sphi %s6104_s24, %s7265_s24  }
   0xd   : > { %p57_p0 = scmp.ne.s32.totalorder %s6038_s25, %s6034_s24  ;;  %p6138_p1 = scmp.eq.s32.totalorder %s4634_s30, 0 }
   0xe   : > { %p6142_p2 = scmp.eq.s32.totalorder %s4634_s30, 1  ;;  %p215_p3 = scmp.eq.s32.totalorder %s4635_s8, 1 }
   0xf   : > { %p6148_p4 = por %p6138_p1, %p57_p0  ;;  %p4636_p5 = scmp.ge.s32.totalorder %s6054_s29, 1 }
  0x10   : > { %p6153_p6 = por %p215_p3, %p57_p0  ;;  %p222_p7 = scmp.lt.s32.totalorder %s6054_s29, 3 }
  0x11   : > { %s7217_s1 = sld [smem:[#allocation32_spill]]  ;;  %s6056_s17 = smov [#allocation6]  }
  0x12   : > { %p6161_p8 = pnand %p4636_p5, %p222_p7  ;;  %s235_s18 = sshll.u32 %s6056_s17, 4  ;;  %s236_s18 = int_to_ptr.vmem [resolvable:$true] %s235_s18 }
  0x13   : > { %p4640_p11 = scmp.ge.s32.totalorder %s6054_s29, 2  ;;  %s7220_s3 = sld [smem:[#allocation33_spill]] }
  0x14   : > { %p5758_p9 = pneg %p6161_p8  ;;  %s7207_s23 = smov 64  }
  0x15   : > { %s7208_s30 = smov 4   ;;  %s6059_s8 = smov [#allocation8]  }
  0x16   : > { %p6169_p10 = pnand %p5758_p9, %p6138_p1  ;;  %s252_s13 = sshll.u32 %s6059_s8, 4  ;;  %s253_s13 = int_to_ptr.vmem [resolvable:$true] %s252_s13 }
  0x17   : > { %s233_s15 = sshll.u32 %s7217_s1, 4  ;;  %s7221_s5 = sld [smem:[#allocation34_spill]]  ;;  %s234_s15 = int_to_ptr.hbm [resolvable:$true] %s233_s15 }
  0x18   : > { %5761 = dma.hbm_to_vmem [thread:$0]  (!%p6169_p10), %s234_s15, 1024, %s236_s18, [#allocation7], %s7207_s23, %s7207_s23, %s7208_s30  }
  0x19   : > { %s250_s22 = sshll.u32 %s7220_s3, 4  ;;  %s6060_s21 = smov [#allocation9]   ;;  %s251_s22 = int_to_ptr.hbm [resolvable:$true] %s250_s22 }
  0x1a   : > { %5764 = dma.hbm_to_vmem [thread:$0]  (!%p6169_p10), %s251_s22, 9216, %s253_s13, [#allocation7], %s7207_s23, %s7207_s23, %s7208_s30  }
  0x1b   : > { %s269_s1 = sshll.u32 %s6060_s21, 4  ;;  %s37_s15 = sadd.s32 1, %s6050_s28  ;;  %s270_s1 = int_to_ptr.vmem [resolvable:$true] %s269_s1 }
  0x1c   : > { %p39_p12 = scmp.ge.s32.totalorder %s37_s15, 2  ;;  %s44_s18 = sadd.s32 1, %s6042_s26 }
  0x1d   : > { %s267_s20 = sshll.u32 %s7221_s5, 4  ;;  %p51_p13 = scmp.ne.s32.totalorder %s6042_s26, %s6038_s25  ;;  %s268_s20 = int_to_ptr.hbm [resolvable:$true] %s267_s20 }
  0x1e   : > { %5767 = dma.hbm_to_vmem [thread:$0]  (!%p6169_p10), %s268_s20, 1024, %s270_s1, [#allocation10], %s7207_s23, %s7207_s23, %s7208_s30  }
  0x1f   : > { %p52_p0 = scmp.eq.s32.totalorder %s6054_s29, 0  ;;  %s7271_s15 = smov (%p39_p12, %s37_s15), 0 }
  0x20   : > { %7222 = sst [smem:[#allocation16_spill]] %s7271_s15  ;;  %p6204_p5 = por %p6142_p2, %p51_p13 }
  0x21   : > { %p53_p3 = por %p52_p0, %p51_p13  ;;  %s41_s19 = ssub.s32 %s6050_s28, %s7271_s15 }
  0x22   : > { %p5779_p7 = scmp.lt.s32.totalorder %s6054_s29, 2  ;;  %p42_p9 = scmp.eq.s32.totalorder %s41_s19, 0 }
  0x23   : > { %s286_s8 = sand.u32 1, %s6042_s26   ;;  %s5740_s14 = smul.u32 288, %s6050_s28 }
  0x24   : > { %s5739_s13 = smul.u32 288, %s286_s8  ;;  %p5769_p10 = pnand %p5779_p7, %p53_p3 }
  0x25   : > { %s6213_s1 = scalar_select %p42_p9, %s6042_s26, %s44_s18  }
  0x26   : > { %s290_s17 = scalar_lea.vmem [#allocation3], %s5739_s13  ;;  %s295_s30 = scalar_lea.hbm %s7199_s0, %s5740_s14 }
  0x27   : > { %s298_s20 = sshll.u32 %s290_s17, 4  ;;  %s296_s10 = sshll.u32 %s295_s30, 4  ;;  %s299_s20 = int_to_ptr.vmem [resolvable:$true] %s298_s20  ;;  %s297_s10 = int_to_ptr.hbm [resolvable:$true] %s296_s10 }
  0x28   : > { %s287_s3 = scalar_lea.sflag [#allocation4], %s286_s8  ;;  %s7224_s5 = smov 4  }
  0x29   : > { %s7225_s15 = smov 64   ;;  %310 = sbr.rel (%p6161_p8) target bundleno = 1587 (0x633), region = 48 }
  0x2a   : > { %5771 = dma.hbm_to_vmem [thread:$0]  (!%p5769_p10), %s297_s10, 4608, %s299_s20, %s287_s3, %s7225_s15, %s7225_s15, %s7224_s5  }
  0x2e   : > { %s6225_s18 = sand.u32 1, %s6038_s25  }
  0x2f   : > { %s5741_s19 = smul.u32 288, %s6225_s18  ;;  %s313_s23 = scalar_lea.sflag [#allocation4], %s6225_s18 }
  0x31   : > { %s6229_s13 = scalar_lea.vmem [#allocation3], %s5741_s19 }
  0x32   : > { %6017 = dma.done.wait (%p6148_p4), %s313_s23, 4608  }
  0x33   : > { %6019 = vsyncadd (%p6148_p4), %s313_s23, 4294962688 }
  0x34   : > { %6021 = dma.done.wait (%p6138_p1), [#allocation7], 10240  }
  0x35   : > { %6023 = vsyncadd (%p6138_p1), [#allocation7], 4294957056 }
  0x36   : > { %6025 = dma.done.wait (%p6138_p1), [#allocation10], 1024  }
  0x37   : > { %6027 = vsyncadd (%p6138_p1), [#allocation10], 4294966272  ;;  %v5313_v0 = vld [vmem:[#allocation6 + $0x38] sm:$0xff]  ;;  %v5312_v1 = vld [vmem:[#allocation6 + $0x30] sm:$0xff]  ;;  %v6061_v30 = vmov 0   ;;  %vm1130_vm0 = vcmask 1043459  }
  0x38   : > { %725 = vmatpush.bf16.msra.mxu0 %v5313_v0  ;;  %5724 = vmatpush.bf16.msra.mxu2 %v5313_v0  ;;  %v5311_v2 = vld [vmem:[#allocation6 + $0x28] sm:$0xff]  ;;  %v5310_v3 = vld [vmem:[#allocation6 + $0x20] sm:$0xff]  ;;  %v5309_v4 = vld [vmem:[#allocation6 + $0x18] sm:$0xff]  ;;  %vm1131_vm1 = vsmask.f32 7950  ;;  %vm1187_vm3 = vcmask 1040384  }
  0x39   : > { %5723 = vmatpush.bf16.msra.mxu1 %v5313_v0  ;;  %v5308_v5 = vld [vmem:[#allocation6 + $0x10] sm:$0xff]  ;;  %v5307_v6 = vld [vmem:[#allocation6 + $0x8] sm:$0xff]  ;;  %v5306_v7 = vld [vmem:[#allocation6] sm:$0xff]  ;;  %vm1188_vm4 = vsmask.f32 256  ;;  %s4646_s14 = sshll.u32 %s6225_s18, 7 }
  0x3a   : > { %v5270_v8 = vld [vmem:[%s6229_s13] sm:$0xff]  ;;  %v5271_v9 = vld [vmem:[%s6229_s13 + $0x8] sm:$0xff]  ;;  %v5272_v10 = vld [vmem:[%s6229_s13 + $0x10] sm:$0xff]  ;;  %vm1311_vm6 = vsmask.f32 4368  ;;  %s7074_s17 = scalar_lea.vmem [#allocation11], %s4646_s14 }
  0x3b   : > { %v5273_v11 = vld [vmem:[%s6229_s13 + $0x18] sm:$0xff]  ;;  %v5274_v12 = vld [vmem:[%s6229_s13 + $0x20] sm:$0xff]  ;;  %v5275_v13 = vld [vmem:[%s6229_s13 + $0x28] sm:$0xff]  ;;  %vm2994_vm8 = vsmask.f32 3328  ;;  %s5412_s20 = sshll.u32 %s6046_s27, 7 }
  0x3c   : > { %726 = vmatpush.bf16.msra.mxu0 %v5312_v1  ;;  %5726 = vmatpush.bf16.msra.mxu2 %v5312_v1  ;;  %v5276_v14 = vld [vmem:[%s6229_s13 + $0x30] sm:$0xff]  ;;  %v5277_v15 = vld [vmem:[%s6229_s13 + $0x38] sm:$0xff]  ;;  %v5278_v16 = vld [vmem:[%s6229_s13 + $0x40] sm:$0xff]  ;;  %vm2995_vm9 = vsmask.f32 7440  ;;  %s4511_s19 = scalar_lea.hbm %s7206_s7, %s5412_s20  ;;  %s4512_s23 = sshll.u32 %s7074_s17, 4  ;;  %s4513_s23 = int_to_ptr.vmem [resolvable:$true] %s4512_s23 }
  0x3d   : > { %5725 = vmatpush.bf16.msra.mxu1 %v5312_v1  ;;  %v5339_v18 = vld [vmem:[#allocation8 + $0x38] sm:$0xff]  ;;  %v6255_v19 = vld [vmem:[%s7201_s2] ss:$0 sm:$0xff]  ;;  %v5338_v20 = vld [vmem:[#allocation8 + $0x30] sm:$0xff]  ;;  %s4514_s3 = sshll.u32 %s4511_s19, 4  ;;  %s4497_s27 = scalar_lea.sflag [#allocation5], %s6225_s18  ;;  %s4515_s3 = int_to_ptr.hbm [resolvable:$true] %s4514_s3 }
  0x3e   : > { %v5337_v24 = vld [vmem:[#allocation8 + $0x28] sm:$0xff]  ;;  %v5336_v28 = vld [vmem:[#allocation8 + $0x20] sm:$0xff]  ;;  %v5305_v33 = vld [vmem:[%s6229_s13 + $0x118] sm:$0xff]  ;;  %s5984_s16 = scalar_lea.hbm %s7206_s7, 256 }
  0x3f   : > { %v5279_v29 = vld [vmem:[%s6229_s13 + $0x48] sm:$0xff]  ;;  %v5347_v34 = vld [vmem:[#allocation8 + $0xf8] sm:$0xff]  ;;  %vm6263_vm2 = vmand %vm1130_vm0, %vm1131_vm1 }
  0x40   : > { %727 = vmatpush.bf16.msra.mxu0 %v5311_v2  ;;  %5728 = vmatpush.bf16.msra.mxu2 %v5311_v2  ;;  %v5303_v32 = vld [vmem:[%s6229_s13 + $0x108] sm:$0xff]  ;;  %v5335_v35 = vld [vmem:[#allocation8 + $0x18] sm:$0xff]  ;;  %v5346_v37 = vld [vmem:[#allocation8 + $0xf0] sm:$0xff] }
  0x41   : > { %5727 = vmatpush.bf16.msra.mxu1 %v5311_v2  ;;  %v5334_v38 = vld [vmem:[#allocation8 + $0x10] sm:$0xff]  ;;  %v5345_v44 = vld [vmem:[#allocation8 + $0xe8] sm:$0xff]  ;;  %v5344_v50 = vld [vmem:[#allocation8 + $0xe0] sm:$0xff] }
  0x42   : > { %v5333_v45 = vld [vmem:[#allocation8 + $0x8] sm:$0xff]  ;;  %v5332_v51 = vld [vmem:[#allocation8] sm:$0xff]  ;;  %v5280_v53 = vld [vmem:[%s6229_s13 + $0x50] sm:$0xff] }
  0x43   : > { %v5304_v55 = vld [vmem:[%s6229_s13 + $0x110] sm:$0xff]  ;;  %v5343_v57 = vld [vmem:[#allocation8 + $0xd8] sm:$0xff]  ;;  %vm6276_vm5 = vmand %vm1187_vm3, %vm1188_vm4 }
  0x44   : > { %728 = vmatpush.bf16.msra.mxu0 %v5310_v3  ;;  %5730 = vmatpush.bf16.msra.mxu2 %v5310_v3  ;;  %v5342_v62 = vld [vmem:[#allocation8 + $0xd0] sm:$0xff]  ;;  %vm6283_vm7 = vmor %vm1188_vm4, %vm1311_vm6 }
  0x45   : > { %5729 = vmatpush.bf16.msra.mxu1 %v5310_v3  ;;  %v5394_v3 = vld [vmem:[#allocation8 + $0x170] sm:$0xff]  ;;  %vm6732_vm10 = vmor %vm2994_vm8, %vm2995_vm9 }
  0x48   : > { %729 = vmatpush.bf16.msra.mxu0 %v5309_v4  ;;  %5732 = vmatpush.bf16.msra.mxu2 %v5309_v4 }
  0x49   : > { %5731 = vmatpush.bf16.msra.mxu1 %v5309_v4 }
  0x4c   : > { %730 = vmatpush.bf16.msra.mxu0 %v5308_v5  ;;  %5734 = vmatpush.bf16.msra.mxu2 %v5308_v5 }
  0x4d   : > { %5733 = vmatpush.bf16.msra.mxu1 %v5308_v5 }
  0x50   : > { %731 = vmatpush.bf16.msra.mxu0 %v5307_v6  ;;  %5736 = vmatpush.bf16.msra.mxu2 %v5307_v6 }
  0x51   : > { %5735 = vmatpush.bf16.msra.mxu1 %v5307_v6 }
  0x54   : > { %732 = vmatpush.bf16.msra.mxu0 %v5306_v7  ;;  %5738 = vmatpush.bf16.msra.mxu2 %v5306_v7 }
  0x55   : > { %5737 = vmatpush.bf16.msra.mxu1 %v5306_v7 }
  0x57   : > { %733 = vmatmul.bf16.vlgmr.msra.gmra.mxu0 %v5270_v8  ;;  %908 = vmatmul.bf16.vlgmr.msra.gmra.mxu2 %v5305_v33 }
  0x58   : > { %1973 = vmatpush.bf16.msrb.mxu2 %v5339_v18  ;;  %898 = vmatmul.bf16.vlgmr.msra.gmra.mxu1 %v5303_v32 }
  0x59   : > { %1832 = vmatpush.bf16.msrb.mxu1 %v5347_v34  ;;  %v5353_v34 = vld [vmem:[#allocation8 + $0x1a8] sm:$0xff] }
  0x5c   : > { %1974 = vmatpush.bf16.msrb.mxu2 %v5338_v20  ;;  %v5340_v20 = vld [vmem:[#allocation8 + $0xc0] sm:$0xff] }
  0x5d   : > { %1833 = vmatpush.bf16.msrb.mxu1 %v5346_v37 }
  0x60   : > { %1975 = vmatpush.bf16.msrb.mxu2 %v5337_v24 }
  0x61   : > { %1834 = vmatpush.bf16.msrb.mxu1 %v5345_v44 }
  0x64   : > { %1976 = vmatpush.bf16.msrb.mxu2 %v5336_v28 }
  0x65   : > { %1835 = vmatpush.bf16.msrb.mxu1 %v5344_v50 }
  0x67   : > { %738 = vmatmul.bf16.gmra.mxu0 %v5271_v9 }
  0x68   : > { %1977 = vmatpush.bf16.msrb.mxu2 %v5335_v35  ;;  %903 = vmatmul.bf16.gmra.mxu1 %v5304_v55 }
  0x69   : > { %1836 = vmatpush.bf16.msrb.mxu1 %v5343_v57 }
  0x6c   : > { %1978 = vmatpush.bf16.msrb.mxu2 %v5334_v38 }
  0x6d   : > { %1837 = vmatpush.bf16.msrb.mxu1 %v5342_v62  ;;  %v5349_v62 = vld [vmem:[#allocation8 + $0x188] sm:$0xff] }
  0x70   : > { %1979 = vmatpush.bf16.msrb.mxu2 %v5333_v45  ;;  %v5351_v45 = vld [vmem:[#allocation8 + $0x198] sm:$0xff] }
  0x74   : > { %1980 = vmatpush.bf16.msrb.mxu2 %v5332_v51 }
  0x77   : > { %743 = vmatmul.bf16.gmra.mxu0 %v5272_v10  ;;  %v5341_v10 = vld [vmem:[#allocation8 + $0xc8] sm:$0xff] }
  0x78   : > { %1838 = vmatpush.bf16.msrb.mxu1 %v5341_v10  ;;  %v5283_v10 = vld [vmem:[%s6229_s13 + $0x68] sm:$0xff] }
  0x7c   : > { %1839 = vmatpush.bf16.msrb.mxu1 %v5340_v20 }
  0x87   : > { %748 = vmatmul.bf16.gmra.mxu0 %v5273_v11 }
  0x97   : > { %753 = vmatmul.bf16.gmra.mxu0 %v5274_v12 }
  0xa7   : > { %758 = vmatmul.bf16.gmra.mxu0 %v5275_v13 }
  0xb7   : > { %763 = vmatmul.bf16.gmra.mxu0 %v5276_v14 }
  0xc7   : > { %768 = vmatmul.bf16.gmra.mxu0 %v5277_v15 }
  0xd4   : > { %v734_v17 = vpop.f32.mrf.mxu0 }
  0xd5   : > { %v735_v21 = vadd.f32 %v6255_v19, %v734_v17 }
  0xd7   : > { %773 = vmatmul.bf16.gmra.mxu0 %v5278_v16  ;;  %v914_v25 = vmax.f32 %v735_v21, 0.0 }
  0xdc   : > { %v736_v22 = vpop.f32.mrf.mxu0 }
  0xdd   : > { %v737_v23 = vadd.f32 %v6255_v19, %v736_v22  ;;  %v5281_v22 = vld [vmem:[%s6229_s13 + $0x58] sm:$0xff] }
  0xdf   : > { %v915_v26 = vmax.f32 %v737_v23, 0.0 }
  0xe1   : > { %v5416_v27 = vpack.c.bf16 %v915_v26, %v914_v25  ;;  %v5355_v26 = vld [vmem:[#allocation8 + $0x1b8] sm:$0xff] }
  0xe2   : > { %2153 = vmatpush.bf16.msra.mxu3 %v5355_v26 }
  0xe3   : > { %5417 = vst [vmem:[#allocation2] sm:$0xff] %v5416_v27   ;;  %v5354_v27 = vld [vmem:[#allocation8 + $0x1b0] sm:$0xff] }
  0xe4   : > { %1249 = vst [vmem:[#allocation2 + $0x4] sm:$0xf] %v6061_v30  ;;  %v739_v31 = vpop.f32.mrf.mxu0 }
  0xe5   : > { %v740_v41 = vadd.f32 %v6255_v19, %v739_v31 }
  0xe6   : > { %2154 = vmatpush.bf16.msra.mxu3 %v5354_v27 }
  0xe7   : > { %778 = vmatmul.bf16.gmra.mxu0 %v5279_v29  ;;  %v916_v46 = vmax.f32 %v740_v41, 0.0  ;;  %v5282_v41 = vld [vmem:[%s6229_s13 + $0x60] sm:$0xff] }
  0xea   : > { %v1133_v39 = vld [vmem:[#allocation2] sm:$0x8]  ;;  %2155 = vmatpush.bf16.msra.mxu3 %v5353_v34 }
  0xeb   : > { %v1134_v40 = vsel %vm6263_vm2, 0, %v1133_v39  ;;  %v1258_v48 = vld [vmem:[#allocation2 + $0x4] sm:$0xf] }
  0xec   : > { %1135 = vst [vmem:[#allocation2] sm:$0x8] %v1134_v40  ;;  %v741_v42 = vpop.f32.mrf.mxu0  ;;  %v1319_v52 = vshrl.u32 %v1258_v48, 16  ;;  %v1322_v60 = vshll.u32 %v1258_v48, 16  ;;  %v5352_v39 = vld [vmem:[#allocation8 + $0x1a0] sm:$0xff]  ;;  %v5350_v48 = vld [vmem:[#allocation8 + $0x190] sm:$0xff] }
  0xed   : > { %1248 = vst [vmem:[#allocation2] sm:$0xf] %v6061_v30  ;;  %v742_v43 = vadd.f32 %v6255_v19, %v741_v42 }
  0xee   : > { %v1321_v59 = vrot.slane %v1319_v52, 7  ;;  %2156 = vmatpush.bf16.msra.mxu3 %v5352_v39 }
  0xef   : > { %v917_v47 = vmax.f32 %v742_v43, 0.0 }
  0xf0   : > { %v1324_v1 = vor.u32 %v1322_v60, %v1321_v59  ;;  %v1326_v12 = vrot.slane %v1321_v59, 4 }
  0xf1   : > { %v5421_v49 = vpack.c.bf16 %v917_v47, %v916_v46 }
  0xf2   : > { %2157 = vmatpush.bf16.msra.mxu3 %v5351_v45 }
  0xf3   : > { %5673 = vst [vmem:[#allocation2 + $0x8] sm:$0xff] %v5421_v49  }
  0xf4   : > { %1250 = vst [vmem:[#allocation2 + $0x8] sm:$0xf] %v6061_v30  ;;  %v744_v54 = vpop.f32.mrf.mxu0  ;;  %v1257_v56 = vld [vmem:[#allocation2] sm:$0x8] }
  0xf5   : > { %v1314_v58 = vshrl.u32 %v1257_v56, 16  ;;  %v745_v4 = vadd.f32 %v6255_v19, %v744_v54 }
  0xf6   : > { %2158 = vmatpush.bf16.msra.mxu3 %v5350_v48 }
  0xf7   : > { %783 = vmatmul.bf16.gmra.mxu0 %v5280_v53  ;;  %v4823_v0 = vrot.slane %v1314_v58, 11  ;;  %v918_v14 = vmax.f32 %v745_v4, 0.0 }
  0xf9   : > { %v1325_v11 = vsel %vm6283_vm7, %v4823_v0, %v1324_v1 }
  0xfa   : > { %v1190_v63 = vld [vmem:[#allocation2 + $0xc] sm:$0x1]  ;;  %v1921_v18 = vunpack.c.l.b16 %v1325_v11  ;;  %2159 = vmatpush.bf16.msra.mxu3 %v5349_v62 }
  0xfb   : > { %v1191_v2 = vsel %vm6276_vm5, 0, %v1190_v63  ;;  %v1259_v5 = vld [vmem:[#allocation2 + $0x8] sm:$0xf] }
  0xfc   : > { %1192 = vst [vmem:[#allocation2 + $0xc] sm:$0x1] %v1191_v2  ;;  %v746_v6 = vpop.f32.mrf.mxu0  ;;  %v1328_v7 = vshrl.u32 %v1259_v5, 16  ;;  %v1331_v8 = vshll.u32 %v1259_v5, 16 }
  0xfd   : > { %1251 = vst [vmem:[#allocation2 + $0xc] sm:$0xf] %v6061_v30  ;;  %v747_v9 = vadd.f32 %v6255_v19, %v746_v6 }
  0xfe   : > { %v1330_v13 = vrot.slane %v1328_v7, 7  ;;  %v5348_v7 = vld [vmem:[#allocation8 + $0x180] sm:$0xff] }
  0xff   : > { %v919_v15 = vmax.f32 %v747_v9, 0.0  ;;  %2160 = vmatpush.bf16.msra.mxu3 %v5348_v7 }
 0x100   : > { %v1333_v16 = vor.u32 %v1331_v8, %v1330_v13 }
 0x101   : > { %v5426_v17 = vpack.c.bf16 %v919_v15, %v918_v14 }
 0x102   : > { %v1334_v21 = vsel %vm6283_vm7, %v1326_v12, %v1333_v16 }
 0x103   : > { %5674 = vst [vmem:[#allocation2 + $0x10] sm:$0xff] %v5426_v17   ;;  %v1922_v23 = vunpack.c.l.b16 %v1334_v21 }
 0x104   : > { %v749_v24 = vpop.f32.mrf.mxu0 }
 0x105   : > { %v1923_v25 = vpack.c.b16 %v1922_v23, %v1921_v18  ;;  %v750_v31 = vadd.f32 %v6255_v19, %v749_v24  ;;  %v5284_v23 = vld [vmem:[%s6229_s13 + $0x70] sm:$0xff] }
 0x107   : > { %788 = vmatmul.bf16.gmra.mxu0 %v5281_v22  ;;  %1981 = vmatmul.bf16.vlgmr.msrb.gmra.mxu2 %v1923_v25  ;;  %v920_v35 = vmax.f32 %v750_v31, 0.0 }
 0x10a   : > { %v1136_v28 = vld [vmem:[#allocation2 + $0x10] sm:$0x8]  ;;  %v1261_v40 = vld [vmem:[#allocation2 + $0x14] sm:$0xf] }
 0x10b   : > { %v1137_v29 = vsel %vm6263_vm2, 0, %v1136_v28  ;;  %v1341_v44 = vshrl.u32 %v1261_v40, 16  ;;  %v1344_v51 = vshll.u32 %v1261_v40, 16 }
 0x10c   : > { %1138 = vst [vmem:[#allocation2 + $0x10] sm:$0x8] %v1137_v29  ;;  %v751_v32 = vpop.f32.mrf.mxu0 }
 0x10d   : > { %v752_v33 = vadd.f32 %v6255_v19, %v751_v32  ;;  %v1343_v47 = vrot.slane %v1341_v44, 7 }
 0x10f   : > { %v921_v37 = vmax.f32 %v752_v33, 0.0  ;;  %v1346_v58 = vor.u32 %v1344_v51, %v1343_v47  ;;  %v1348_v63 = vrot.slane %v1343_v47, 4 }
 0x111   : > { %v5431_v38 = vpack.c.bf16 %v921_v37, %v920_v35 }
 0x113   : > { %5675 = vst [vmem:[#allocation2 + $0x18] sm:$0xff] %v5431_v38   ;;  %v1260_v43 = vld [vmem:[#allocation2 + $0x10] sm:$0x8] }
 0x114   : > { %v754_v42 = vpop.f32.mrf.mxu0  ;;  %v1336_v46 = vshrl.u32 %v1260_v43, 16 }
 0x115   : > { %v755_v53 = vadd.f32 %v6255_v19, %v754_v42 }
 0x116   : > { %v4824_v54 = vrot.slane %v1336_v46, 11 }
 0x117   : > { %793 = vmatmul.bf16.gmra.mxu0 %v5282_v41  ;;  %v922_v0 = vmax.f32 %v755_v53, 0.0 }
 0x118   : > { %v1347_v2 = vsel %vm6283_vm7, %v4824_v54, %v1346_v58 }
 0x119   : > { %v1720_v8 = vunpack.c.l.b16 %v1347_v2 }
 0x11a   : > { %v1193_v49 = vld [vmem:[#allocation2 + $0x1c] sm:$0x1]  ;;  %v1262_v50 = vld [vmem:[#allocation2 + $0x18] sm:$0xf] }
 0x11b   : > { %v1194_v52 = vsel %vm6276_vm5, 0, %v1193_v49  ;;  %v1350_v55 = vshrl.u32 %v1262_v50, 16  ;;  %v1353_v60 = vshll.u32 %v1262_v50, 16 }
 0x11c   : > { %1195 = vst [vmem:[#allocation2 + $0x1c] sm:$0x1] %v1194_v52  ;;  %v756_v56 = vpop.f32.mrf.mxu0  ;;  %v5285_v52 = vld [vmem:[%s6229_s13 + $0x78] sm:$0xff] }
 0x11d   : > { %v757_v57 = vadd.f32 %v6255_v19, %v756_v56  ;;  %v1352_v59 = vrot.slane %v1350_v55, 7 }
 0x11f   : > { %v923_v1 = vmax.f32 %v757_v57, 0.0  ;;  %v1355_v4 = vor.u32 %v1353_v60, %v1352_v59 }
 0x121   : > { %v5436_v5 = vpack.c.bf16 %v923_v1, %v922_v0  ;;  %v1356_v6 = vsel %vm6283_vm7, %v1348_v63, %v1355_v4  ;;  %v5286_v1 = vld [vmem:[%s6229_s13 + $0x80] sm:$0xff] }
 0x122   : > { %v1721_v9 = vunpack.c.l.b16 %v1356_v6 }
 0x123   : > { %5676 = vst [vmem:[#allocation2 + $0x20] sm:$0xff] %v5436_v5  }
 0x124   : > { %v759_v11 = vpop.f32.mrf.mxu0  ;;  %v1752_v12 = vpack.c.b16 %v1721_v9, %v1720_v8 }
 0x125   : > { %v760_v15 = vadd.f32 %v6255_v19, %v759_v11 }
 0x126   : > { %1840 = vmatmul.bf16.vlgmr.msrb.gmra.mxu1 %v1752_v12  ;;  %1986 = vmatmul.bf16.gmra.mxu2 %v1752_v12 }
 0x127   : > { %798 = vmatmul.bf16.gmra.mxu0 %v5283_v10  ;;  %v924_v18 = vmax.f32 %v760_v15, 0.0 }
 0x12a   : > { %v1139_v13 = vld [vmem:[#allocation2 + $0x20] sm:$0x8]  ;;  %v1264_v22 = vld [vmem:[#allocation2 + $0x24] sm:$0xf] }
 0x12b   : > { %v1140_v14 = vsel %vm6263_vm2, 0, %v1139_v13  ;;  %v1363_v26 = vshrl.u32 %v1264_v22, 16  ;;  %v1366_v32 = vshll.u32 %v1264_v22, 16 }
 0x12c   : > { %1141 = vst [vmem:[#allocation2 + $0x20] sm:$0x8] %v1140_v14  ;;  %v761_v16 = vpop.f32.mrf.mxu0 }
 0x12d   : > { %v762_v17 = vadd.f32 %v6255_v19, %v761_v16  ;;  %v1365_v28 = vrot.slane %v1363_v26, 7 }
 0x12f   : > { %v925_v20 = vmax.f32 %v762_v17, 0.0  ;;  %v1368_v40 = vor.u32 %v1366_v32, %v1365_v28  ;;  %v1370_v43 = vrot.slane %v1365_v28, 4 }
 0x131   : > { %v5441_v21 = vpack.c.bf16 %v925_v20, %v924_v18 }
 0x133   : > { %5677 = vst [vmem:[#allocation2 + $0x28] sm:$0xff] %v5441_v21   ;;  %v1263_v25 = vld [vmem:[#allocation2 + $0x20] sm:$0x8] }
 0x134   : > { %v764_v24 = vpop.f32.mrf.mxu0  ;;  %v1358_v27 = vshrl.u32 %v1263_v25, 16 }
 0x135   : > { %v765_v34 = vadd.f32 %v6255_v19, %v764_v24 }
 0x136   : > { %v4825_v35 = vrot.slane %v1358_v27, 11 }
 0x137   : > { %803 = vmatmul.bf16.gmra.mxu0 %v5284_v23  ;;  %v926_v44 = vmax.f32 %v765_v34, 0.0  ;;  %v899_v34 = vpop.f32.mrf.mxu1 }
 0x138   : > { %v1369_v46 = vsel %vm6283_vm7, %v4825_v35, %v1368_v40  ;;  %v900_v40 = vadd.f32 %v6255_v19, %v899_v34  ;;  %v5289_v34 = vld [vmem:[%s6229_s13 + $0x98] sm:$0xff] }
 0x139   : > { %v1722_v50 = vunpack.c.l.b16 %v1369_v46 }
 0x13a   : > { %v1196_v29 = vld [vmem:[#allocation2 + $0x2c] sm:$0x1]  ;;  %v1265_v31 = vld [vmem:[#allocation2 + $0x28] sm:$0xf] }
 0x13b   : > { %v1197_v33 = vsel %vm6276_vm5, 0, %v1196_v29  ;;  %v1372_v37 = vshrl.u32 %v1265_v31, 16  ;;  %v1375_v42 = vshll.u32 %v1265_v31, 16  ;;  %v5287_v31 = vld [vmem:[%s6229_s13 + $0x88] sm:$0xff] }
 0x13c   : > { %1198 = vst [vmem:[#allocation2 + $0x2c] sm:$0x1] %v1197_v33  ;;  %v766_v38 = vpop.f32.mrf.mxu0 }
 0x13d   : > { %v767_v39 = vadd.f32 %v6255_v19, %v766_v38  ;;  %v1374_v41 = vrot.slane %v1372_v37, 7 }
 0x13f   : > { %v927_v45 = vmax.f32 %v767_v39, 0.0  ;;  %v1377_v47 = vor.u32 %v1375_v42, %v1374_v41  ;;  %v901_v41 = vpop.f32.mrf.mxu1 }
 0x141   : > { %v5446_v48 = vpack.c.bf16 %v927_v45, %v926_v44  ;;  %v1378_v49 = vsel %vm6283_vm7, %v1370_v43, %v1377_v47  ;;  %v902_v43 = vadd.f32 %v6255_v19, %v901_v41  ;;  %v980_v44 = vmax.f32 %v900_v40, 0.0 }
 0x142   : > { %v1723_v51 = vunpack.c.l.b16 %v1378_v49 }
 0x143   : > { %5678 = vst [vmem:[#allocation2 + $0x30] sm:$0xff] %v5446_v48   ;;  %v981_v47 = vmax.f32 %v902_v43, 0.0 }
 0x144   : > { %v769_v53 = vpop.f32.mrf.mxu0  ;;  %v1753_v54 = vpack.c.b16 %v1723_v51, %v1722_v50  ;;  %v909_v50 = vpop.f32.mrf.mxu2 }
 0x145   : > { %v770_v57 = vadd.f32 %v6255_v19, %v769_v53  ;;  %v5581_v51 = vpack.c.bf16 %v981_v47, %v980_v44 }
 0x146   : > { %1845 = vmatmul.bf16.gmra.mxu1 %v1753_v54  ;;  %1991 = vmatmul.bf16.gmra.mxu2 %v1753_v54 }
 0x147   : > { %2161 = vmatmul.bf16.vlgmr.msra.gmra.mxu3 %v1753_v54  ;;  %808 = vmatmul.bf16.gmra.mxu0 %v5285_v52  ;;  %v928_v60 = vmax.f32 %v770_v57, 0.0  ;;  %v5288_v52 = vld [vmem:[%s6229_s13 + $0x90] sm:$0xff]  ;;  %5705 = vst [vmem:[#allocation2 + $0x108] sm:$0xff] %v5581_v51   ;;  %v5290_v51 = vld [vmem:[%s6229_s13 + $0xa0] sm:$0xff] }
 0x14a   : > { %v1142_v55 = vld [vmem:[#allocation2 + $0x30] sm:$0x8]  ;;  %v1267_v0 = vld [vmem:[#allocation2 + $0x34] sm:$0xf] }
 0x14b   : > { %v1143_v56 = vsel %vm6263_vm2, 0, %v1142_v55  ;;  %v1385_v5 = vshrl.u32 %v1267_v0, 16  ;;  %v1388_v10 = vshll.u32 %v1267_v0, 16 }
 0x14c   : > { %1144 = vst [vmem:[#allocation2 + $0x30] sm:$0x8] %v1143_v56  ;;  %v771_v58 = vpop.f32.mrf.mxu0  ;;  %v904_v56 = vpop.f32.mrf.mxu1 }
 0x14d   : > { %v772_v59 = vadd.f32 %v6255_v19, %v771_v58  ;;  %v1387_v7 = vrot.slane %v1385_v5, 7  ;;  %v910_v58 = vadd.f32 %v6255_v19, %v909_v50 }
 0x14f   : > { %v929_v62 = vmax.f32 %v772_v59, 0.0  ;;  %v1390_v17 = vor.u32 %v1388_v10, %v1387_v7  ;;  %v1392_v21 = vrot.slane %v1387_v7, 4  ;;  %v984_v5 = vmax.f32 %v910_v58, 0.0  ;;  %v911_v7 = vpop.f32.mrf.mxu2 }
 0x151   : > { %v5451_v63 = vpack.c.bf16 %v929_v62, %v928_v60 }
 0x153   : > { %5679 = vst [vmem:[#allocation2 + $0x38] sm:$0xff] %v5451_v63   ;;  %v1266_v4 = vld [vmem:[#allocation2 + $0x30] sm:$0x8] }
 0x154   : > { %v774_v2 = vpop.f32.mrf.mxu0  ;;  %v1380_v6 = vshrl.u32 %v1266_v4, 16 }
 0x155   : > { %v775_v12 = vadd.f32 %v6255_v19, %v774_v2 }
 0x156   : > { %v4826_v13 = vrot.slane %v1380_v6, 11  ;;  %v1238_v6 = vld [vmem:[#allocation2 + $0x10c] sm:$0x1] }
 0x157   : > { %813 = vmatmul.bf16.gmra.mxu0 %v5286_v1  ;;  %v930_v22 = vmax.f32 %v775_v12, 0.0  ;;  %v1239_v10 = vsel %vm6276_vm5, 0, %v1238_v6  ;;  %v905_v12 = vadd.f32 %v6255_v19, %v904_v56 }
 0x158   : > { %v1391_v24 = vsel %vm6283_vm7, %v4826_v13, %v1390_v17  ;;  %v906_v13 = vpop.f32.mrf.mxu1  ;;  %1240 = vst [vmem:[#allocation2 + $0x10c] sm:$0x1] %v1239_v10 }
 0x159   : > { %v1724_v28 = vunpack.c.l.b16 %v1391_v24  ;;  %v907_v17 = vadd.f32 %v6255_v19, %v906_v13 }
 0x15a   : > { %v1199_v8 = vld [vmem:[#allocation2 + $0x3c] sm:$0x1]  ;;  %v1268_v9 = vld [vmem:[#allocation2 + $0x38] sm:$0xf] }
 0x15b   : > { %v1200_v11 = vsel %vm6276_vm5, 0, %v1199_v8  ;;  %v1394_v14 = vshrl.u32 %v1268_v9, 16  ;;  %v1397_v20 = vshll.u32 %v1268_v9, 16 }
 0x15c   : > { %1201 = vst [vmem:[#allocation2 + $0x3c] sm:$0x1] %v1200_v11  ;;  %v776_v15 = vpop.f32.mrf.mxu0  ;;  %v912_v11 = vadd.f32 %v6255_v19, %v911_v7 }
 0x15d   : > { %v777_v16 = vadd.f32 %v6255_v19, %v776_v15  ;;  %v1396_v18 = vrot.slane %v1394_v14, 7 }
 0x15f   : > { %v931_v23 = vmax.f32 %v777_v16, 0.0  ;;  %v1399_v25 = vor.u32 %v1397_v20, %v1396_v18 }
 0x161   : > { %v5456_v26 = vpack.c.bf16 %v931_v23, %v930_v22  ;;  %v1400_v27 = vsel %vm6283_vm7, %v1392_v21, %v1399_v25  ;;  %v985_v21 = vmax.f32 %v912_v11, 0.0  ;;  %v982_v22 = vmax.f32 %v905_v12, 0.0 }
 0x162   : > { %v1725_v29 = vunpack.c.l.b16 %v1400_v27 }
 0x163   : > { %5680 = vst [vmem:[#allocation2 + $0x40] sm:$0xff] %v5456_v26   ;;  %v983_v26 = vmax.f32 %v907_v17, 0.0  ;;  %v5591_v27 = vpack.c.bf16 %v985_v21, %v984_v5  ;;  %v5291_v17 = vld [vmem:[%s6229_s13 + $0xa8] sm:$0xff] }
 0x164   : > { %v779_v32 = vpop.f32.mrf.mxu0  ;;  %v1754_v33 = vpack.c.b16 %v1725_v29, %v1724_v28 }
 0x165   : > { %v780_v38 = vadd.f32 %v6255_v19, %v779_v32  ;;  %5707 = vst [vmem:[#allocation2 + $0x118] sm:$0xff] %v5591_v27  }
 0x166   : > { %1850 = vmatmul.bf16.gmra.mxu1 %v1754_v33  ;;  %1996 = vmatmul.bf16.gmra.mxu2 %v1754_v33  ;;  %1255 = vst [vmem:[#allocation2 + $0x118] sm:$0xf] %v6061_v30 }
 0x167   : > { %2166 = vmatmul.bf16.gmra.mxu3 %v1754_v33  ;;  %818 = vmatmul.bf16.gmra.mxu0 %v5287_v31  ;;  %v932_v45 = vmax.f32 %v780_v38, 0.0  ;;  %v5586_v31 = vpack.c.bf16 %v983_v26, %v982_v22 }
 0x169   : > { %5706 = vst [vmem:[#allocation2 + $0x110] sm:$0xff] %v5586_v31  }
 0x16a   : > { %v1145_v35 = vld [vmem:[#allocation2 + $0x40] sm:$0x8]  ;;  %v1270_v49 = vld [vmem:[#allocation2 + $0x44] sm:$0xf]  ;;  %1254 = vst [vmem:[#allocation2 + $0x114] sm:$0xf] %v6061_v30 }
 0x16b   : > { %v1146_v37 = vsel %vm6263_vm2, 0, %v1145_v35  ;;  %v1407_v55 = vshrl.u32 %v1270_v49, 16  ;;  %v1410_v0 = vshll.u32 %v1270_v49, 16 }
 0x16c   : > { %1147 = vst [vmem:[#allocation2 + $0x40] sm:$0x8] %v1146_v37  ;;  %v781_v39 = vpop.f32.mrf.mxu0  ;;  %v1241_v38 = vld [vmem:[#allocation2 + $0x11c] sm:$0x1] }
 0x16d   : > { %v782_v42 = vadd.f32 %v6255_v19, %v781_v39  ;;  %v1409_v59 = vrot.slane %v1407_v55, 7  ;;  %v1242_v40 = vsel %vm6276_vm5, 0, %v1241_v38 }
 0x16e   : > { %1243 = vst [vmem:[#allocation2 + $0x11c] sm:$0x1] %v1242_v40 }
 0x16f   : > { %v933_v46 = vmax.f32 %v782_v42, 0.0  ;;  %v1412_v9 = vor.u32 %v1410_v0, %v1409_v59  ;;  %v1414_v20 = vrot.slane %v1409_v59, 4  ;;  %1256 = vst [vmem:[#allocation2 + $0x11c] sm:$0xf] %v6061_v30 }
 0x170   : > { %v1184_v44 = vld [vmem:[#allocation2 + $0x110] sm:$0x8] }
 0x171   : > { %v5461_v48 = vpack.c.bf16 %v933_v46, %v932_v45  ;;  %v1185_v46 = vsel %vm6263_vm2, 0, %v1184_v44 }
 0x172   : > { %1186 = vst [vmem:[#allocation2 + $0x110] sm:$0x8] %v1185_v46 }
 0x173   : > { %5681 = vst [vmem:[#allocation2 + $0x48] sm:$0xff] %v5461_v48   ;;  %v1269_v54 = vld [vmem:[#allocation2 + $0x40] sm:$0x8] }
 0x174   : > { %v784_v53 = vpop.f32.mrf.mxu0  ;;  %v1402_v57 = vshrl.u32 %v1269_v54, 16  ;;  %1253 = vst [vmem:[#allocation2 + $0x110] sm:$0xf] %v6061_v30 }
 0x175   : > { %v785_v62 = vadd.f32 %v6255_v19, %v784_v53 }
 0x176   : > { %v4827_v2 = vrot.slane %v1402_v57, 11 }
 0x177   : > { %823 = vmatmul.bf16.gmra.mxu0 %v5288_v52  ;;  %v934_v18 = vmax.f32 %v785_v62, 0.0 }
 0x178   : > { %v1413_v24 = vsel %vm6283_vm7, %v4827_v2, %v1412_v9 }
 0x179   : > { %v1726_v32 = vunpack.c.l.b16 %v1413_v24 }
 0x17a   : > { %v1202_v60 = vld [vmem:[#allocation2 + $0x4c] sm:$0x1]  ;;  %v1271_v63 = vld [vmem:[#allocation2 + $0x48] sm:$0xf] }
 0x17b   : > { %v1203_v1 = vsel %vm6276_vm5, 0, %v1202_v60  ;;  %v1416_v4 = vshrl.u32 %v1271_v63, 16  ;;  %v1419_v16 = vshll.u32 %v1271_v63, 16 }
 0x17c   : > { %1204 = vst [vmem:[#allocation2 + $0x4c] sm:$0x1] %v1203_v1  ;;  %v786_v8 = vpop.f32.mrf.mxu0 }
 0x17d   : > { %v787_v14 = vadd.f32 %v6255_v19, %v786_v8  ;;  %v1418_v15 = vrot.slane %v1416_v4, 7 }
 0x17f   : > { %v935_v23 = vmax.f32 %v787_v14, 0.0  ;;  %v1421_v25 = vor.u32 %v1419_v16, %v1418_v15 }
 0x181   : > { %v5466_v28 = vpack.c.bf16 %v935_v23, %v934_v18  ;;  %v1422_v29 = vsel %vm6283_vm7, %v1414_v20, %v1421_v25 }
 0x182   : > { %v1727_v33 = vunpack.c.l.b16 %v1422_v29 }
 0x183   : > { %5682 = vst [vmem:[#allocation2 + $0x50] sm:$0xff] %v5466_v28  }
 0x184   : > { %v789_v35 = vpop.f32.mrf.mxu0  ;;  %v1755_v37 = vpack.c.b16 %v1727_v33, %v1726_v32  ;;  %v5292_v32 = vld [vmem:[%s6229_s13 + $0xb0] sm:$0xff] }
 0x185   : > { %v790_v42 = vadd.f32 %v6255_v19, %v789_v35 }
 0x186   : > { %1855 = vmatmul.bf16.gmra.mxu1 %v1755_v37  ;;  %2001 = vmatmul.bf16.gmra.mxu2 %v1755_v37 }
 0x187   : > { %2171 = vmatmul.bf16.gmra.mxu3 %v1755_v37  ;;  %828 = vmatmul.bf16.gmra.mxu0 %v5289_v34  ;;  %v936_v47 = vmax.f32 %v790_v42, 0.0 }
 0x18a   : > { %v1148_v39 = vld [vmem:[#allocation2 + $0x50] sm:$0x8]  ;;  %v1273_v50 = vld [vmem:[#allocation2 + $0x54] sm:$0xf]  ;;  %v1982_v15 = vpop.f32.mrf.mxu2 }
 0x18b   : > { %v1149_v41 = vsel %vm6263_vm2, 0, %v1148_v39  ;;  %v1429_v54 = vshrl.u32 %v1273_v50, 16  ;;  %v1432_v59 = vshll.u32 %v1273_v50, 16 }
 0x18c   : > { %1150 = vst [vmem:[#allocation2 + $0x50] sm:$0x8] %v1149_v41  ;;  %v791_v43 = vpop.f32.mrf.mxu0 }
 0x18d   : > { %v792_v45 = vadd.f32 %v6255_v19, %v791_v43  ;;  %v1431_v56 = vrot.slane %v1429_v54, 7 }
 0x18f   : > { %v937_v48 = vmax.f32 %v792_v45, 0.0  ;;  %v1434_v2 = vor.u32 %v1432_v59, %v1431_v56  ;;  %v1436_v6 = vrot.slane %v1431_v56, 4 }
 0x191   : > { %v5471_v49 = vpack.c.bf16 %v937_v48, %v936_v47 }
 0x192   : > { %v6388_v38 = vpop.f32.mrf.mxu2 }
 0x193   : > { %5683 = vst [vmem:[#allocation2 + $0x58] sm:$0xff] %v5471_v49   ;;  %v1272_v53 = vld [vmem:[#allocation2 + $0x50] sm:$0x8] }
 0x194   : > { %v794_v52 = vpop.f32.mrf.mxu0  ;;  %v1424_v55 = vshrl.u32 %v1272_v53, 16 }
 0x195   : > { %v795_v62 = vadd.f32 %v6255_v19, %v794_v52 }
 0x196   : > { %v4828_v63 = vrot.slane %v1424_v55, 11 }
 0x197   : > { %833 = vmatmul.bf16.gmra.mxu0 %v5290_v51  ;;  %v938_v7 = vmax.f32 %v795_v62, 0.0 }
 0x198   : > { %v1435_v9 = vsel %vm6283_vm7, %v4828_v63, %v1434_v2 }
 0x199   : > { %v1728_v13 = vunpack.c.l.b16 %v1435_v9 }
 0x19a   : > { %v1205_v57 = vld [vmem:[#allocation2 + $0x5c] sm:$0x1]  ;;  %v1274_v58 = vld [vmem:[#allocation2 + $0x58] sm:$0xf] }
 0x19b   : > { %v1206_v60 = vsel %vm6276_vm5, 0, %v1205_v57  ;;  %v1438_v30 = vshrl.u32 %v1274_v58, 16  ;;  %v1441_v5 = vshll.u32 %v1274_v58, 16 }
 0x19c   : > { %1207 = vst [vmem:[#allocation2 + $0x5c] sm:$0x1] %v1206_v60  ;;  %v796_v0 = vpop.f32.mrf.mxu0 }
 0x19d   : > { %v797_v1 = vadd.f32 %v6255_v19, %v796_v0  ;;  %v1440_v4 = vrot.slane %v1438_v30, 7  ;;  %v5293_v0 = vld [vmem:[%s6229_s13 + $0xb8] sm:$0xff] }
 0x19f   : > { %v939_v8 = vmax.f32 %v797_v1, 0.0  ;;  %v1443_v10 = vor.u32 %v1441_v5, %v1440_v4 }
 0x1a1   : > { %v5476_v11 = vpack.c.bf16 %v939_v8, %v938_v7  ;;  %v1444_v12 = vsel %vm6283_vm7, %v1436_v6, %v1443_v10 }
 0x1a2   : > { %v1729_v14 = vunpack.c.l.b16 %v1444_v12 }
 0x1a3   : > { %5684 = vst [vmem:[#allocation2 + $0x60] sm:$0xff] %v5476_v11   ;;  %v1841_v16 = vpop.f32.mrf.mxu1 }
 0x1a4   : > { %v6381_v18 = vadd.f32 %v1982_v15, %v1841_v16  ;;  %v799_v20 = vpop.f32.mrf.mxu0  ;;  %v1756_v21 = vpack.c.b16 %v1729_v14, %v1728_v13  ;;  %v5294_v16 = vld [vmem:[%s6229_s13 + $0xc0] sm:$0xff] }
 0x1a5   : > { %v800_v24 = vadd.f32 %v6255_v19, %v799_v20 }
 0x1a6   : > { %1860 = vmatmul.bf16.gmra.mxu1 %v1756_v21  ;;  %2006 = vmatmul.bf16.gmra.mxu2 %v1756_v21 }
 0x1a7   : > { %2176 = vmatmul.bf16.gmra.mxu3 %v1756_v21  ;;  %838 = vmatmul.bf16.gmra.mxu0 %v5291_v17  ;;  %v940_v27 = vmax.f32 %v800_v24, 0.0 }
 0x1a9   : > { %v1987_v63 = vpop.f32.mrf.mxu2 }
 0x1aa   : > { %v1151_v22 = vld [vmem:[#allocation2 + $0x60] sm:$0x8]  ;;  %v1276_v31 = vld [vmem:[#allocation2 + $0x64] sm:$0xf] }
 0x1ab   : > { %v1152_v23 = vsel %vm6263_vm2, 0, %v1151_v22  ;;  %v1451_v35 = vshrl.u32 %v1276_v31, 16  ;;  %v1454_v42 = vshll.u32 %v1276_v31, 16  ;;  %v6390_v43 = vpop.f32.mrf.mxu1 }
 0x1ac   : > { %1153 = vst [vmem:[#allocation2 + $0x60] sm:$0x8] %v1152_v23  ;;  %v801_v25 = vpop.f32.mrf.mxu0 }
 0x1ad   : > { %v802_v26 = vadd.f32 %v6255_v19, %v801_v25  ;;  %v1453_v39 = vrot.slane %v1451_v35, 7 }
 0x1af   : > { %v941_v28 = vmax.f32 %v802_v26, 0.0  ;;  %v1456_v50 = vor.u32 %v1454_v42, %v1453_v39  ;;  %v1458_v53 = vrot.slane %v1453_v39, 4 }
 0x1b1   : > { %v5481_v29 = vpack.c.bf16 %v941_v28, %v940_v27  ;;  %v6411_v26 = vpop.f32.mrf.mxu2 }
 0x1b3   : > { %5685 = vst [vmem:[#allocation2 + $0x68] sm:$0xff] %v5481_v29   ;;  %v1275_v34 = vld [vmem:[#allocation2 + $0x60] sm:$0x8] }
 0x1b4   : > { %v804_v33 = vpop.f32.mrf.mxu0  ;;  %v1446_v37 = vshrl.u32 %v1275_v34, 16 }
 0x1b5   : > { %v805_v45 = vadd.f32 %v6255_v19, %v804_v33 }
 0x1b6   : > { %v4829_v46 = vrot.slane %v1446_v37, 11 }
 0x1b7   : > { %843 = vmatmul.bf16.gmra.mxu0 %v5292_v32  ;;  %v942_v54 = vmax.f32 %v805_v45, 0.0 }
 0x1b8   : > { %v1457_v56 = vsel %vm6283_vm7, %v4829_v46, %v1456_v50 }
 0x1b9   : > { %v1730_v60 = vunpack.c.l.b16 %v1457_v56 }
 0x1ba   : > { %v1208_v40 = vld [vmem:[#allocation2 + $0x6c] sm:$0x1]  ;;  %v1277_v41 = vld [vmem:[#allocation2 + $0x68] sm:$0xf] }
 0x1bb   : > { %v1209_v44 = vsel %vm6276_vm5, 0, %v1208_v40  ;;  %v1460_v47 = vshrl.u32 %v1277_v41, 16  ;;  %v1463_v52 = vshll.u32 %v1277_v41, 16 }
 0x1bc   : > { %1210 = vst [vmem:[#allocation2 + $0x6c] sm:$0x1] %v1209_v44  ;;  %v806_v48 = vpop.f32.mrf.mxu0 }
 0x1bd   : > { %v807_v49 = vadd.f32 %v6255_v19, %v806_v48  ;;  %v1462_v51 = vrot.slane %v1460_v47, 7 }
 0x1bf   : > { %v943_v55 = vmax.f32 %v807_v49, 0.0  ;;  %v1465_v57 = vor.u32 %v1463_v52, %v1462_v51  ;;  %v5295_v52 = vld [vmem:[%s6229_s13 + $0xc8] sm:$0xff] }
 0x1c1   : > { %v5486_v58 = vpack.c.bf16 %v943_v55, %v942_v54  ;;  %v1466_v59 = vsel %vm6283_vm7, %v1458_v53, %v1465_v57 }
 0x1c2   : > { %v1731_v62 = vunpack.c.l.b16 %v1466_v59  ;;  %v6433_v59 = vld [vmem:[%s7201_s2] ss:$0 sm:$0xff] }
 0x1c3   : > { %5686 = vst [vmem:[#allocation2 + $0x70] sm:$0xff] %v5486_v58   ;;  %v1846_v30 = vpop.f32.mrf.mxu1 }
 0x1c4   : > { %v6401_v1 = vadd.f32 %v1987_v63, %v1846_v30  ;;  %v809_v2 = vpop.f32.mrf.mxu0  ;;  %v1757_v4 = vpack.c.b16 %v1731_v62, %v1730_v60 }
 0x1c5   : > { %v810_v8 = vadd.f32 %v6255_v19, %v809_v2 }
 0x1c6   : > { %1865 = vmatmul.bf16.gmra.mxu1 %v1757_v4  ;;  %2011 = vmatmul.bf16.gmra.mxu2 %v1757_v4 }
 0x1c7   : > { %2181 = vmatmul.bf16.gmra.mxu3 %v1757_v4  ;;  %848 = vmatmul.bf16.gmra.mxu0 %v5293_v0  ;;  %v944_v12 = vmax.f32 %v810_v8, 0.0 }
 0x1ca   : > { %v1154_v5 = vld [vmem:[#allocation2 + $0x70] sm:$0x8]  ;;  %v2162_v6 = vpop.f32.mrf.mxu3  ;;  %v1279_v15 = vld [vmem:[#allocation2 + $0x74] sm:$0xf] }
 0x1cb   : > { %v1155_v7 = vsel %vm6263_vm2, 0, %v1154_v5  ;;  %v6407_v9 = vadd.f32 %v2162_v6, %v6381_v18  ;;  %v1473_v21 = vshrl.u32 %v1279_v15, 16  ;;  %v1476_v18 = vshll.u32 %v1279_v15, 16  ;;  %v6413_v27 = vpop.f32.mrf.mxu1  ;;  %v5296_v6 = vld [vmem:[%s6229_s13 + $0xd0] sm:$0xff] }
 0x1cc   : > { %1156 = vst [vmem:[#allocation2 + $0x70] sm:$0x8] %v1155_v7  ;;  %v811_v10 = vpop.f32.mrf.mxu0 }
 0x1cd   : > { %v812_v11 = vadd.f32 %v6255_v19, %v811_v10  ;;  %v1475_v23 = vrot.slane %v1473_v21, 7 }
 0x1cf   : > { %v945_v13 = vmax.f32 %v812_v11, 0.0  ;;  %v1478_v35 = vor.u32 %v1476_v18, %v1475_v23  ;;  %v1480_v40 = vrot.slane %v1475_v23, 4 }
 0x1d1   : > { %v5491_v14 = vpack.c.bf16 %v945_v13, %v944_v12 }
 0x1d2   : > { %v6423_v48 = vpop.f32.mrf.mxu3 }
 0x1d3   : > { %5687 = vst [vmem:[#allocation2 + $0x78] sm:$0xff] %v5491_v14   ;;  %v1278_v20 = vld [vmem:[#allocation2 + $0x70] sm:$0x8] }
 0x1d4   : > { %v814_v17 = vpop.f32.mrf.mxu0  ;;  %v1468_v22 = vshrl.u32 %v1278_v20, 16 }
 0x1d5   : > { %v815_v29 = vadd.f32 %v6255_v19, %v814_v17 }
 0x1d6   : > { %v4830_v31 = vrot.slane %v1468_v22, 11 }
 0x1d7   : > { %853 = vmatmul.bf16.gmra.mxu0 %v5294_v16  ;;  %v946_v41 = vmax.f32 %v815_v29, 0.0 }
 0x1d8   : > { %v1479_v44 = vsel %vm6283_vm7, %v4830_v31, %v1478_v35 }
 0x1d9   : > { %v1732_v49 = vunpack.c.l.b16 %v1479_v44 }
 0x1da   : > { %v1211_v24 = vld [vmem:[#allocation2 + $0x7c] sm:$0x1]  ;;  %v1280_v25 = vld [vmem:[#allocation2 + $0x78] sm:$0xf] }
 0x1db   : > { %v1212_v28 = vsel %vm6276_vm5, 0, %v1211_v24  ;;  %v1482_v32 = vshrl.u32 %v1280_v25, 16  ;;  %v1485_v39 = vshll.u32 %v1280_v25, 16  ;;  %v5371_v24 = vld [vmem:[#allocation8 + $0x138] sm:$0xff] }
 0x1dc   : > { %1213 = vst [vmem:[#allocation2 + $0x7c] sm:$0x1] %v1212_v28  ;;  %v816_v33 = vpop.f32.mrf.mxu0  ;;  %2627 = vmatpush.bf16.msra.mxu2 %v5371_v24 }
 0x1dd   : > { %v817_v34 = vadd.f32 %v6255_v19, %v816_v33  ;;  %v1484_v37 = vrot.slane %v1482_v32, 7  ;;  %v1992_v19 = vpop.f32.mrf.mxu2 }
 0x1df   : > { %v947_v42 = vmax.f32 %v817_v34, 0.0  ;;  %v1487_v45 = vor.u32 %v1485_v39, %v1484_v37 }
 0x1e1   : > { %v5496_v46 = vpack.c.bf16 %v947_v42, %v946_v41  ;;  %v1488_v47 = vsel %vm6283_vm7, %v1480_v40, %v1487_v45 }
 0x1e2   : > { %v1733_v50 = vunpack.c.l.b16 %v1488_v47 }
 0x1e3   : > { %5688 = vst [vmem:[#allocation2 + $0x80] sm:$0xff] %v5496_v46   ;;  %v1851_v51 = vpop.f32.mrf.mxu1  ;;  %v5297_v46 = vld [vmem:[%s6229_s13 + $0xd8] sm:$0xff] }
 0x1e4   : > { %v6426_v53 = vadd.f32 %v1992_v19, %v1851_v51  ;;  %v819_v54 = vpop.f32.mrf.mxu0  ;;  %v1758_v55 = vpack.c.b16 %v1733_v50, %v1732_v49 }
 0x1e5   : > { %v820_v60 = vadd.f32 %v6433_v59, %v819_v54  ;;  %v6441_v15 = vpop.f32.mrf.mxu2 }
 0x1e6   : > { %1870 = vmatmul.bf16.gmra.mxu1 %v1758_v55  ;;  %2016 = vmatmul.bf16.gmra.mxu2 %v1758_v55 }
 0x1e7   : > { %2186 = vmatmul.bf16.gmra.mxu3 %v1758_v55  ;;  %858 = vmatmul.bf16.gmra.mxu0 %v5295_v52  ;;  %v948_v0 = vmax.f32 %v820_v60, 0.0 }
 0x1ea   : > { %v1157_v56 = vld [vmem:[#allocation2 + $0x80] sm:$0x8]  ;;  %v2167_v57 = vpop.f32.mrf.mxu3  ;;  %v1282_v5 = vld [vmem:[#allocation2 + $0x84] sm:$0xf] }
 0x1eb   : > { %v1158_v58 = vsel %vm6263_vm2, 0, %v1157_v56  ;;  %v6437_v62 = vadd.f32 %v2167_v57, %v6401_v1  ;;  %v1495_v10 = vshrl.u32 %v1282_v5, 16  ;;  %v1498_v1 = vshll.u32 %v1282_v5, 16  ;;  %v6443_v16 = vpop.f32.mrf.mxu1  ;;  %v5379_v57 = vld [vmem:[#allocation8 + $0x1f8] sm:$0xff] }
 0x1ec   : > { %1159 = vst [vmem:[#allocation2 + $0x80] sm:$0x8] %v1158_v58  ;;  %v821_v63 = vpop.f32.mrf.mxu0  ;;  %v5363_v58 = vld [vmem:[#allocation8 + $0x78] sm:$0xff]  ;;  %2819 = vmatpush.bf16.msrb.mxu3 %v5379_v57 }
 0x1ed   : > { %v822_v30 = vadd.f32 %v6433_v59, %v821_v63  ;;  %v1497_v12 = vrot.slane %v1495_v10, 7  ;;  %v1997_v44 = vpop.f32.mrf.mxu2  ;;  %2435 = vmatpush.bf16.msra.mxu1 %v5363_v58 }
 0x1ef   : > { %v949_v2 = vmax.f32 %v822_v30, 0.0  ;;  %v1500_v18 = vor.u32 %v1498_v1, %v1497_v12  ;;  %v1502_v31 = vrot.slane %v1497_v12, 4 }
 0x1f1   : > { %v5501_v4 = vpack.c.bf16 %v949_v2, %v948_v0 }
 0x1f2   : > { %v6453_v40 = vpop.f32.mrf.mxu3 }
 0x1f3   : > { %5689 = vst [vmem:[#allocation2 + $0x88] sm:$0xff] %v5501_v4   ;;  %v1281_v8 = vld [vmem:[#allocation2 + $0x80] sm:$0x8] }
 0x1f4   : > { %v824_v7 = vpop.f32.mrf.mxu0  ;;  %v1490_v11 = vshrl.u32 %v1281_v8, 16  ;;  %v5298_v4 = vld [vmem:[%s6229_s13 + $0xe0] sm:$0xff] }
 0x1f5   : > { %v825_v20 = vadd.f32 %v6433_v59, %v824_v7 }
 0x1f6   : > { %v4831_v21 = vrot.slane %v1490_v11, 11 }
 0x1f7   : > { %863 = vmatmul.bf16.gmra.mxu0 %v5296_v6  ;;  %v950_v32 = vmax.f32 %v825_v20, 0.0 }
 0x1f8   : > { %v1501_v34 = vsel %vm6283_vm7, %v4831_v21, %v1500_v18 }
 0x1f9   : > { %v1734_v41 = vunpack.c.l.b16 %v1501_v34 }
 0x1fa   : > { %v1214_v13 = vld [vmem:[#allocation2 + $0x8c] sm:$0x1]  ;;  %v1283_v14 = vld [vmem:[#allocation2 + $0x88] sm:$0xf] }
 0x1fb   : > { %v1215_v17 = vsel %vm6276_vm5, 0, %v1214_v13  ;;  %v1504_v22 = vshrl.u32 %v1283_v14, 16  ;;  %v1507_v29 = vshll.u32 %v1283_v14, 16  ;;  %v6466_v13 = vpop.f32.mrf.mxu2 }
 0x1fc   : > { %1216 = vst [vmem:[#allocation2 + $0x8c] sm:$0x1] %v1215_v17  ;;  %v826_v23 = vpop.f32.mrf.mxu0 }
 0x1fd   : > { %v827_v25 = vadd.f32 %v6433_v59, %v826_v23  ;;  %v1506_v28 = vrot.slane %v1504_v22, 7  ;;  %v5370_v23 = vld [vmem:[#allocation8 + $0x130] sm:$0xff] }
 0x1fe   : > { %2628 = vmatpush.bf16.msra.mxu2 %v5370_v23 }
 0x1ff   : > { %v951_v33 = vmax.f32 %v827_v25, 0.0  ;;  %v1509_v35 = vor.u32 %v1507_v29, %v1506_v28 }
 0x201   : > { %v5506_v37 = vpack.c.bf16 %v951_v33, %v950_v32  ;;  %v1510_v39 = vsel %vm6283_vm7, %v1502_v31, %v1509_v35 }
 0x202   : > { %v1735_v42 = vunpack.c.l.b16 %v1510_v39 }
 0x203   : > { %5690 = vst [vmem:[#allocation2 + $0x90] sm:$0xff] %v5506_v37   ;;  %v1856_v45 = vpop.f32.mrf.mxu1 }
 0x204   : > { %v6456_v47 = vadd.f32 %v1997_v44, %v1856_v45  ;;  %v829_v49 = vpop.f32.mrf.mxu0  ;;  %v1759_v50 = vpack.c.b16 %v1735_v42, %v1734_v41 }
 0x205   : > { %v830_v54 = vadd.f32 %v6433_v59, %v829_v49 }
 0x206   : > { %1875 = vmatmul.bf16.gmra.mxu1 %v1759_v50  ;;  %2021 = vmatmul.bf16.gmra.mxu2 %v1759_v50 }
 0x207   : > { %2191 = vmatmul.bf16.gmra.mxu3 %v1759_v50  ;;  %868 = vmatmul.bf16.gmra.mxu0 %v5297_v46  ;;  %v952_v63 = vmax.f32 %v830_v54, 0.0  ;;  %v5299_v46 = vld [vmem:[%s6229_s13 + $0xe8] sm:$0xff] }
 0x209   : > { %v2002_v44 = vpop.f32.mrf.mxu2 }
 0x20a   : > { %v1160_v19 = vld [vmem:[#allocation2 + $0x90] sm:$0x8]  ;;  %v2172_v51 = vpop.f32.mrf.mxu3  ;;  %v1285_v2 = vld [vmem:[#allocation2 + $0x94] sm:$0xf] }
 0x20b   : > { %v1161_v52 = vsel %vm6263_vm2, 0, %v1160_v19  ;;  %v6462_v55 = vadd.f32 %v2172_v51, %v6426_v53  ;;  %v1517_v7 = vshrl.u32 %v1285_v2, 16  ;;  %v1520_v12 = vshll.u32 %v1285_v2, 16  ;;  %v6468_v14 = vpop.f32.mrf.mxu1 }
 0x20c   : > { %1162 = vst [vmem:[#allocation2 + $0x90] sm:$0x8] %v1161_v52  ;;  %v831_v56 = vpop.f32.mrf.mxu0 }
 0x20d   : > { %v832_v60 = vadd.f32 %v6433_v59, %v831_v56  ;;  %v1519_v8 = vrot.slane %v1517_v7, 7 }
 0x20f   : > { %v953_v30 = vmax.f32 %v832_v60, 0.0  ;;  %v1522_v25 = vor.u32 %v1520_v12, %v1519_v8  ;;  %v1524_v29 = vrot.slane %v1519_v8, 4  ;;  %v5378_v60 = vld [vmem:[#allocation8 + $0x1f0] sm:$0xff] }
 0x210   : > { %2820 = vmatpush.bf16.msrb.mxu3 %v5378_v60 }
 0x211   : > { %v5511_v0 = vpack.c.bf16 %v953_v30, %v952_v63  ;;  %v5362_v63 = vld [vmem:[#allocation8 + $0x70] sm:$0xff] }
 0x212   : > { %v6478_v39 = vpop.f32.mrf.mxu3  ;;  %2436 = vmatpush.bf16.msra.mxu1 %v5362_v63 }
 0x213   : > { %5691 = vst [vmem:[#allocation2 + $0x98] sm:$0xff] %v5511_v0   ;;  %v1284_v6 = vld [vmem:[#allocation2 + $0x90] sm:$0x8] }
 0x214   : > { %v834_v5 = vpop.f32.mrf.mxu0  ;;  %v1512_v53 = vshrl.u32 %v1284_v6, 16  ;;  %v5300_v6 = vld [vmem:[%s6229_s13 + $0xf0] sm:$0xff] }
 0x215   : > { %v835_v17 = vadd.f32 %v6433_v59, %v834_v5 }
 0x216   : > { %v4832_v20 = vrot.slane %v1512_v53, 11 }
 0x217   : > { %873 = vmatmul.bf16.gmra.mxu0 %v5298_v4  ;;  %v954_v31 = vmax.f32 %v835_v17, 0.0  ;;  %v6491_v17 = vpop.f32.mrf.mxu2 }
 0x218   : > { %v1523_v33 = vsel %vm6283_vm7, %v4832_v20, %v1522_v25 }
 0x219   : > { %v1736_v41 = vunpack.c.l.b16 %v1523_v33 }
 0x21a   : > { %v1217_v10 = vld [vmem:[#allocation2 + $0x9c] sm:$0x1]  ;;  %v1286_v11 = vld [vmem:[#allocation2 + $0x98] sm:$0xf] }
 0x21b   : > { %v1218_v1 = vsel %vm6276_vm5, 0, %v1217_v10  ;;  %v1526_v21 = vshrl.u32 %v1286_v11, 16  ;;  %v1529_v28 = vshll.u32 %v1286_v11, 16 }
 0x21c   : > { %1219 = vst [vmem:[#allocation2 + $0x9c] sm:$0x1] %v1218_v1  ;;  %v836_v22 = vpop.f32.mrf.mxu0 }
 0x21d   : > { %v837_v24 = vadd.f32 %v6433_v59, %v836_v22  ;;  %v1528_v18 = vrot.slane %v1526_v21, 7 }
 0x21f   : > { %v955_v32 = vmax.f32 %v837_v24, 0.0  ;;  %v1531_v34 = vor.u32 %v1529_v28, %v1528_v18  ;;  %v5369_v18 = vld [vmem:[#allocation8 + $0x128] sm:$0xff] }
 0x220   : > { %2629 = vmatpush.bf16.msra.mxu2 %v5369_v18 }
 0x221   : > { %v5516_v35 = vpack.c.bf16 %v955_v32, %v954_v31  ;;  %v1532_v37 = vsel %vm6283_vm7, %v1524_v29, %v1531_v34 }
 0x222   : > { %v1737_v42 = vunpack.c.l.b16 %v1532_v37 }
 0x223   : > { %5692 = vst [vmem:[#allocation2 + $0xa0] sm:$0xff] %v5516_v35   ;;  %v1861_v45 = vpop.f32.mrf.mxu1 }
 0x224   : > { %v6481_v49 = vadd.f32 %v2002_v44, %v1861_v45  ;;  %v839_v50 = vpop.f32.mrf.mxu0  ;;  %v1760_v19 = vpack.c.b16 %v1737_v42, %v1736_v41 }
 0x225   : > { %v840_v56 = vadd.f32 %v6433_v59, %v839_v50 }
 0x226   : > { %1880 = vmatmul.bf16.gmra.mxu1 %v1760_v19  ;;  %2026 = vmatmul.bf16.gmra.mxu2 %v1760_v19 }
 0x227   : > { %2196 = vmatmul.bf16.gmra.mxu3 %v1760_v19  ;;  %878 = vmatmul.bf16.gmra.mxu0 %v5299_v46  ;;  %v956_v0 = vmax.f32 %v840_v56, 0.0 }
 0x229   : > { %v2007_v19 = vpop.f32.mrf.mxu2 }
 0x22a   : > { %v1163_v51 = vld [vmem:[#allocation2 + $0xa0] sm:$0x8]  ;;  %v2177_v52 = vpop.f32.mrf.mxu3  ;;  %v1288_v5 = vld [vmem:[#allocation2 + $0xa4] sm:$0xf] }
 0x22b   : > { %v1164_v54 = vsel %vm6263_vm2, 0, %v1163_v51  ;;  %v6487_v57 = vadd.f32 %v2177_v52, %v6456_v47  ;;  %v1539_v8 = vshrl.u32 %v1288_v5, 16  ;;  %v1542_v1 = vshll.u32 %v1288_v5, 16  ;;  %v6493_v20 = vpop.f32.mrf.mxu1  ;;  %v5301_v52 = vld [vmem:[%s6229_s13 + $0xf8] sm:$0xff]  ;;  %v5377_v5 = vld [vmem:[#allocation8 + $0x1e8] sm:$0xff] }
 0x22c   : > { %1165 = vst [vmem:[#allocation2 + $0xa0] sm:$0x8] %v1164_v54  ;;  %v841_v58 = vpop.f32.mrf.mxu0  ;;  %2821 = vmatpush.bf16.msrb.mxu3 %v5377_v5 }
 0x22d   : > { %v842_v30 = vadd.f32 %v6433_v59, %v841_v58  ;;  %v1541_v10 = vrot.slane %v1539_v8, 7 }
 0x22f   : > { %v957_v2 = vmax.f32 %v842_v30, 0.0  ;;  %v1544_v29 = vor.u32 %v1542_v1, %v1541_v10  ;;  %v1546_v33 = vrot.slane %v1541_v10, 4 }
 0x231   : > { %v5521_v4 = vpack.c.bf16 %v957_v2, %v956_v0  ;;  %v6516_v18 = vpop.f32.mrf.mxu2 }
 0x232   : > { %v6503_v45 = vpop.f32.mrf.mxu3 }
 0x233   : > { %5693 = vst [vmem:[#allocation2 + $0xa8] sm:$0xff] %v5521_v4   ;;  %v1287_v53 = vld [vmem:[#allocation2 + $0xa0] sm:$0x8] }
 0x234   : > { %v844_v7 = vpop.f32.mrf.mxu0  ;;  %v1534_v47 = vshrl.u32 %v1287_v53, 16 }
 0x235   : > { %v845_v22 = vadd.f32 %v6433_v59, %v844_v7 }
 0x236   : > { %v4833_v23 = vrot.slane %v1534_v47, 11 }
 0x237   : > { %883 = vmatmul.bf16.gmra.mxu0 %v5300_v6  ;;  %v958_v34 = vmax.f32 %v845_v22, 0.0  ;;  %v5361_v6 = vld [vmem:[#allocation8 + $0x68] sm:$0xff] }
 0x238   : > { %v1545_v37 = vsel %vm6283_vm7, %v4833_v23, %v1544_v29  ;;  %2437 = vmatpush.bf16.msra.mxu1 %v5361_v6 }
 0x239   : > { %v1738_v46 = vunpack.c.l.b16 %v1545_v37 }
 0x23a   : > { %v1220_v11 = vld [vmem:[#allocation2 + $0xac] sm:$0x1]  ;;  %v1289_v12 = vld [vmem:[#allocation2 + $0xa8] sm:$0xf] }
 0x23b   : > { %v1221_v21 = vsel %vm6276_vm5, 0, %v1220_v11  ;;  %v1548_v24 = vshrl.u32 %v1289_v12, 16  ;;  %v1551_v32 = vshll.u32 %v1289_v12, 16  ;;  %v5302_v11 = vld [vmem:[%s6229_s13 + $0x100] sm:$0xff] }
 0x23c   : > { %1222 = vst [vmem:[#allocation2 + $0xac] sm:$0x1] %v1221_v21  ;;  %v846_v25 = vpop.f32.mrf.mxu0 }
 0x23d   : > { %v847_v28 = vadd.f32 %v6433_v59, %v846_v25  ;;  %v1550_v31 = vrot.slane %v1548_v24, 7 }
 0x23f   : > { %v959_v35 = vmax.f32 %v847_v28, 0.0  ;;  %v1553_v41 = vor.u32 %v1551_v32, %v1550_v31 }
 0x241   : > { %v5526_v42 = vpack.c.bf16 %v959_v35, %v958_v34  ;;  %v1554_v44 = vsel %vm6283_vm7, %v1546_v33, %v1553_v41  ;;  %v5368_v35 = vld [vmem:[#allocation8 + $0x120] sm:$0xff] }
 0x242   : > { %v1739_v50 = vunpack.c.l.b16 %v1554_v44  ;;  %2630 = vmatpush.bf16.msra.mxu2 %v5368_v35 }
 0x243   : > { %5694 = vst [vmem:[#allocation2 + $0xb0] sm:$0xff] %v5526_v42   ;;  %v1866_v51 = vpop.f32.mrf.mxu1 }
 0x244   : > { %v6506_v54 = vadd.f32 %v2007_v19, %v1866_v51  ;;  %v849_v56 = vpop.f32.mrf.mxu0  ;;  %v1761_v58 = vpack.c.b16 %v1739_v50, %v1738_v46 }
 0x245   : > { %v850_v0 = vadd.f32 %v6433_v59, %v849_v56 }
 0x246   : > { %1885 = vmatmul.bf16.gmra.mxu1 %v1761_v58  ;;  %2031 = vmatmul.bf16.gmra.mxu2 %v1761_v58 }
 0x247   : > { %2201 = vmatmul.bf16.gmra.mxu3 %v1761_v58  ;;  %888 = vmatmul.bf16.gmra.mxu0 %v5301_v52  ;;  %v960_v53 = vmax.f32 %v850_v0, 0.0 }
 0x249   : > { %v2012_v0 = vpop.f32.mrf.mxu2 }
 0x24a   : > { %v1166_v60 = vld [vmem:[#allocation2 + $0xb0] sm:$0x8]  ;;  %v2182_v63 = vpop.f32.mrf.mxu3  ;;  %v1291_v10 = vld [vmem:[#allocation2 + $0xb4] sm:$0xf] }
 0x24b   : > { %v1167_v30 = vsel %vm6263_vm2, 0, %v1166_v60  ;;  %v6512_v2 = vadd.f32 %v2182_v63, %v6481_v49  ;;  %v1561_v21 = vshrl.u32 %v1291_v10, 16  ;;  %v1564_v25 = vshll.u32 %v1291_v10, 16  ;;  %v6518_v28 = vpop.f32.mrf.mxu1 }
 0x24c   : > { %1168 = vst [vmem:[#allocation2 + $0xb0] sm:$0x8] %v1167_v30  ;;  %v851_v4 = vpop.f32.mrf.mxu0 }
 0x24d   : > { %v852_v7 = vadd.f32 %v6433_v59, %v851_v4  ;;  %v1563_v22 = vrot.slane %v1561_v21, 7  ;;  %v5360_v21 = vld [vmem:[#allocation8 + $0x60] sm:$0xff] }
 0x24e   : > { %2438 = vmatpush.bf16.msra.mxu1 %v5360_v21 }
 0x24f   : > { %v961_v8 = vmax.f32 %v852_v7, 0.0  ;;  %v1566_v41 = vor.u32 %v1564_v25, %v1563_v22  ;;  %v1568_v46 = vrot.slane %v1563_v22, 4 }
 0x251   : > { %v5531_v47 = vpack.c.bf16 %v961_v8, %v960_v53 }
 0x252   : > { %v6528_v60 = vpop.f32.mrf.mxu3 }
 0x253   : > { %5695 = vst [vmem:[#allocation2 + $0xb8] sm:$0xff] %v5531_v47   ;;  %v1290_v1 = vld [vmem:[#allocation2 + $0xb0] sm:$0x8] }
 0x254   : > { %v854_v12 = vpop.f32.mrf.mxu0  ;;  %v1556_v49 = vshrl.u32 %v1290_v1, 16  ;;  %v5376_v1 = vld [vmem:[#allocation8 + $0x1e0] sm:$0xff] }
 0x255   : > { %v855_v31 = vadd.f32 %v6433_v59, %v854_v12  ;;  %2822 = vmatpush.bf16.msrb.mxu3 %v5376_v1 }
 0x256   : > { %v4834_v32 = vrot.slane %v1556_v49, 11 }
 0x257   : > { %893 = vmatmul.bf16.gmra.mxu0 %v5302_v11  ;;  %v962_v50 = vmax.f32 %v855_v31, 0.0 }
 0x258   : > { %v1567_v51 = vsel %vm6283_vm7, %v4834_v32, %v1566_v41  ;;  %v6539_v41 = vpop.f32.mrf.mxu2 }
 0x259   : > { %v1740_v63 = vunpack.c.l.b16 %v1567_v51 }
 0x25a   : > { %v1223_v23 = vld [vmem:[#allocation2 + $0xbc] sm:$0x1]  ;;  %v1292_v24 = vld [vmem:[#allocation2 + $0xb8] sm:$0xf] }
 0x25b   : > { %v1224_v29 = vsel %vm6276_vm5, 0, %v1223_v23  ;;  %v1570_v33 = vshrl.u32 %v1292_v24, 16  ;;  %v1573_v44 = vshll.u32 %v1292_v24, 16 }
 0x25c   : > { %1225 = vst [vmem:[#allocation2 + $0xbc] sm:$0x1] %v1224_v29  ;;  %v856_v34 = vpop.f32.mrf.mxu0 }
 0x25d   : > { %v857_v37 = vadd.f32 %v6433_v59, %v856_v34  ;;  %v1572_v42 = vrot.slane %v1570_v33, 7 }
 0x25f   : > { %v963_v19 = vmax.f32 %v857_v37, 0.0  ;;  %v1575_v52 = vor.u32 %v1573_v44, %v1572_v42 }
 0x261   : > { %v5536_v56 = vpack.c.bf16 %v963_v19, %v962_v50  ;;  %v1576_v58 = vsel %vm6283_vm7, %v1568_v46, %v1575_v52  ;;  %v5367_v52 = vld [vmem:[#allocation8 + $0x118] sm:$0xff] }
 0x262   : > { %v1741_v30 = vunpack.c.l.b16 %v1576_v58  ;;  %2631 = vmatpush.bf16.msra.mxu2 %v5367_v52 }
 0x263   : > { %5696 = vst [vmem:[#allocation2 + $0xc0] sm:$0xff] %v5536_v56   ;;  %v1871_v4 = vpop.f32.mrf.mxu1 }
 0x264   : > { %v6530_v5 = vadd.f32 %v2012_v0, %v1871_v4  ;;  %v859_v6 = vpop.f32.mrf.mxu0  ;;  %v1762_v7 = vpack.c.b16 %v1741_v30, %v1740_v63 }
 0x265   : > { %v860_v10 = vadd.f32 %v6433_v59, %v859_v6 }
 0x266   : > { %1890 = vmatmul.bf16.gmra.mxu1 %v1762_v7  ;;  %2036 = vmatmul.bf16.gmra.mxu2 %v1762_v7 }
 0x267   : > { %2206 = vmatmul.bf16.gmra.mxu3 %v1762_v7  ;;  %v964_v22 = vmax.f32 %v860_v10, 0.0 }
 0x269   : > { %v2017_v21 = vpop.f32.mrf.mxu2 }
 0x26a   : > { %v1169_v53 = vld [vmem:[#allocation2 + $0xc0] sm:$0x8]  ;;  %v2187_v8 = vpop.f32.mrf.mxu3  ;;  %v1294_v25 = vld [vmem:[#allocation2 + $0xc4] sm:$0xf] }
 0x26b   : > { %v1170_v47 = vsel %vm6263_vm2, 0, %v1169_v53  ;;  %v6536_v11 = vadd.f32 %v2187_v8, %v6506_v54  ;;  %v1583_v32 = vshrl.u32 %v1294_v25, 16  ;;  %v1586_v37 = vshll.u32 %v1294_v25, 16  ;;  %v6541_v42 = vpop.f32.mrf.mxu1 }
 0x26c   : > { %1171 = vst [vmem:[#allocation2 + $0xc0] sm:$0x8] %v1170_v47  ;;  %v861_v12 = vpop.f32.mrf.mxu0 }
 0x26d   : > { %v862_v49 = vadd.f32 %v6433_v59, %v861_v12  ;;  %v1585_v34 = vrot.slane %v1583_v32, 7 }
 0x26f   : > { %v965_v23 = vmax.f32 %v862_v49, 0.0  ;;  %v1588_v58 = vor.u32 %v1586_v37, %v1585_v34  ;;  %v1590_v0 = vrot.slane %v1585_v34, 4  ;;  %v5411_v37 = vld [vmem:[#allocation9 + $0x38] sm:$0xff] }
 0x270   : > { %4211 = vmatpush.bf16.msrb.mxu0 %v5411_v37 }
 0x271   : > { %v5541_v24 = vpack.c.bf16 %v965_v23, %v964_v22 }
 0x272   : > { %v6551_v10 = vpop.f32.mrf.mxu3 }
 0x273   : > { %5697 = vst [vmem:[#allocation2 + $0xc8] sm:$0xff] %v5541_v24   ;;  %v1293_v31 = vld [vmem:[#allocation2 + $0xc0] sm:$0x8] }
 0x274   : > { %v864_v29 = vpop.f32.mrf.mxu0  ;;  %v1578_v33 = vshrl.u32 %v1293_v31, 16 }
 0x275   : > { %v865_v46 = vadd.f32 %v6433_v59, %v864_v29 }
 0x276   : > { %v4835_v50 = vrot.slane %v1578_v33, 11 }
 0x277   : > { %v966_v4 = vmax.f32 %v865_v46, 0.0 }
 0x278   : > { %v1589_v7 = vsel %vm6283_vm7, %v4835_v50, %v1588_v58 }
 0x279   : > { %v1742_v12 = vunpack.c.l.b16 %v1589_v7 }
 0x27a   : > { %v1226_v54 = vld [vmem:[#allocation2 + $0xcc] sm:$0x1]  ;;  %v1295_v35 = vld [vmem:[#allocation2 + $0xc8] sm:$0xf] }
 0x27b   : > { %v1227_v44 = vsel %vm6276_vm5, 0, %v1226_v54  ;;  %v1592_v19 = vshrl.u32 %v1295_v35, 16  ;;  %v1595_v30 = vshll.u32 %v1295_v35, 16  ;;  %v5375_v54 = vld [vmem:[#allocation8 + $0x1d8] sm:$0xff] }
 0x27c   : > { %1228 = vst [vmem:[#allocation2 + $0xcc] sm:$0x1] %v1227_v44  ;;  %v866_v51 = vpop.f32.mrf.mxu0  ;;  %v5359_v35 = vld [vmem:[#allocation8 + $0x58] sm:$0xff]  ;;  %2823 = vmatpush.bf16.msrb.mxu3 %v5375_v54 }
 0x27d   : > { %v867_v56 = vadd.f32 %v6433_v59, %v866_v51  ;;  %v1594_v63 = vrot.slane %v1592_v19, 7  ;;  %2439 = vmatpush.bf16.msra.mxu1 %v5359_v35 }
 0x27f   : > { %v967_v6 = vmax.f32 %v867_v56, 0.0  ;;  %v1597_v53 = vor.u32 %v1595_v30, %v1594_v63 }
 0x281   : > { %v5546_v8 = vpack.c.bf16 %v967_v6, %v966_v4  ;;  %v1598_v47 = vsel %vm6283_vm7, %v1590_v0, %v1597_v53  ;;  %v6562_v6 = vpop.f32.mrf.mxu2 }
 0x282   : > { %v1743_v1 = vunpack.c.l.b16 %v1598_v47 }
 0x283   : > { %5698 = vst [vmem:[#allocation2 + $0xd0] sm:$0xff] %v5546_v8   ;;  %v1876_v49 = vpop.f32.mrf.mxu1 }
 0x284   : > { %v6553_v22 = vadd.f32 %v2017_v21, %v1876_v49  ;;  %v869_v23 = vpop.f32.mrf.mxu0  ;;  %v1763_v24 = vpack.c.b16 %v1743_v1, %v1742_v12  ;;  %v5366_v21 = vld [vmem:[#allocation8 + $0x110] sm:$0xff] }
 0x285   : > { %v870_v32 = vadd.f32 %v6433_v59, %v869_v23  ;;  %2632 = vmatpush.bf16.msra.mxu2 %v5366_v21 }
 0x286   : > { %1895 = vmatmul.bf16.gmra.mxu1 %v1763_v24  ;;  %2041 = vmatmul.bf16.gmra.mxu2 %v1763_v24 }
 0x287   : > { %2211 = vmatmul.bf16.gmra.mxu3 %v1763_v24  ;;  %v968_v46 = vmax.f32 %v870_v32, 0.0 }
 0x28a   : > { %v1172_v25 = vld [vmem:[#allocation2 + $0xd0] sm:$0x8]  ;;  %v2192_v29 = vpop.f32.mrf.mxu3  ;;  %v1297_v51 = vld [vmem:[#allocation2 + $0xd4] sm:$0xf] }
 0x28b   : > { %v1173_v31 = vsel %vm6263_vm2, 0, %v1172_v25  ;;  %v6559_v33 = vadd.f32 %v2192_v29, %v6530_v5  ;;  %v1605_v58 = vshrl.u32 %v1297_v51, 16  ;;  %v1608_v4 = vshll.u32 %v1297_v51, 16  ;;  %v6564_v7 = vpop.f32.mrf.mxu1 }
 0x28c   : > { %1174 = vst [vmem:[#allocation2 + $0xd0] sm:$0x8] %v1173_v31  ;;  %v871_v34 = vpop.f32.mrf.mxu0 }
 0x28d   : > { %v872_v44 = vadd.f32 %v6433_v59, %v871_v34  ;;  %v1607_v63 = vrot.slane %v1605_v58, 7 }
 0x28f   : > { %v969_v50 = vmax.f32 %v872_v44, 0.0  ;;  %v1610_v23 = vor.u32 %v1608_v4, %v1607_v63  ;;  %v1612_v29 = vrot.slane %v1607_v63, 4 }
 0x291   : > { %v5551_v19 = vpack.c.bf16 %v969_v50, %v968_v46 }
 0x292   : > { %v6574_v44 = vpop.f32.mrf.mxu3 }
 0x293   : > { %5699 = vst [vmem:[#allocation2 + $0xd8] sm:$0xff] %v5551_v19   ;;  %v1296_v56 = vld [vmem:[#allocation2 + $0xd0] sm:$0x8]  ;;  %v2022_v19 = vpop.f32.mrf.mxu2 }
 0x294   : > { %v874_v52 = vpop.f32.mrf.mxu0  ;;  %v1600_v5 = vshrl.u32 %v1296_v56, 16 }
 0x295   : > { %v875_v8 = vadd.f32 %v6433_v59, %v874_v52 }
 0x296   : > { %v4836_v47 = vrot.slane %v1600_v5, 11 }
 0x297   : > { %v970_v31 = vmax.f32 %v875_v8, 0.0  ;;  %v5374_v8 = vld [vmem:[#allocation8 + $0x1d0] sm:$0xff] }
 0x298   : > { %v1611_v34 = vsel %vm6283_vm7, %v4836_v47, %v1610_v23  ;;  %v5358_v47 = vld [vmem:[#allocation8 + $0x50] sm:$0xff]  ;;  %2824 = vmatpush.bf16.msrb.mxu3 %v5374_v8 }
 0x299   : > { %v1744_v46 = vunpack.c.l.b16 %v1611_v34  ;;  %2440 = vmatpush.bf16.msra.mxu1 %v5358_v47 }
 0x29a   : > { %v1229_v30 = vld [vmem:[#allocation2 + $0xdc] sm:$0x1]  ;;  %v1298_v0 = vld [vmem:[#allocation2 + $0xd8] sm:$0xf] }
 0x29b   : > { %v1230_v53 = vsel %vm6276_vm5, 0, %v1229_v30  ;;  %v1614_v12 = vshrl.u32 %v1298_v0, 16  ;;  %v1617_v25 = vshll.u32 %v1298_v0, 16 }
 0x29c   : > { %1231 = vst [vmem:[#allocation2 + $0xdc] sm:$0x1] %v1230_v53  ;;  %v876_v1 = vpop.f32.mrf.mxu0 }
 0x29d   : > { %v877_v49 = vadd.f32 %v6433_v59, %v876_v1  ;;  %v1616_v24 = vrot.slane %v1614_v12, 7 }
 0x29f   : > { %v971_v32 = vmax.f32 %v877_v49, 0.0  ;;  %v1619_v54 = vor.u32 %v1617_v25, %v1616_v24 }
 0x2a1   : > { %v5556_v35 = vpack.c.bf16 %v971_v32, %v970_v31  ;;  %v1620_v37 = vsel %vm6283_vm7, %v1612_v29, %v1619_v54 }
 0x2a2   : > { %v1745_v50 = vunpack.c.l.b16 %v1620_v37 }
 0x2a3   : > { %5700 = vst [vmem:[#allocation2 + $0xe0] sm:$0xff] %v5556_v35   ;;  %v1881_v51 = vpop.f32.mrf.mxu1  ;;  %v6585_v35 = vpop.f32.mrf.mxu2 }
 0x2a4   : > { %v6576_v52 = vadd.f32 %v2022_v19, %v1881_v51  ;;  %v879_v56 = vpop.f32.mrf.mxu0  ;;  %v1764_v58 = vpack.c.b16 %v1745_v50, %v1744_v46 }
 0x2a5   : > { %v880_v0 = vadd.f32 %v6433_v59, %v879_v56 }
 0x2a6   : > { %1900 = vmatmul.bf16.gmra.mxu1 %v1764_v58  ;;  %2046 = vmatmul.bf16.gmra.mxu2 %v1764_v58 }
 0x2a7   : > { %2216 = vmatmul.bf16.gmra.mxu3 %v1764_v58  ;;  %v972_v1 = vmax.f32 %v880_v0, 0.0  ;;  %v5365_v58 = vld [vmem:[#allocation8 + $0x108] sm:$0xff] }
 0x2a8   : > { %2633 = vmatpush.bf16.msra.mxu2 %v5365_v58  ;;  %v5373_v58 = vld [vmem:[#allocation8 + $0x1c8] sm:$0xff] }
 0x2a9   : > { %2825 = vmatpush.bf16.msrb.mxu3 %v5373_v58 }
 0x2aa   : > { %v1175_v5 = vld [vmem:[#allocation2 + $0xe0] sm:$0x8]  ;;  %v2197_v63 = vpop.f32.mrf.mxu3  ;;  %v1300_v23 = vld [vmem:[#allocation2 + $0xe4] sm:$0xf] }
 0x2ab   : > { %v1176_v30 = vsel %vm6263_vm2, 0, %v1175_v5  ;;  %v6582_v4 = vadd.f32 %v2197_v63, %v6553_v22  ;;  %v1627_v29 = vshrl.u32 %v1300_v23, 16  ;;  %v1630_v54 = vshll.u32 %v1300_v23, 16  ;;  %v6587_v37 = vpop.f32.mrf.mxu1 }
 0x2ac   : > { %1177 = vst [vmem:[#allocation2 + $0xe0] sm:$0x8] %v1176_v30  ;;  %v881_v53 = vpop.f32.mrf.mxu0 }
 0x2ad   : > { %v882_v12 = vadd.f32 %v6433_v59, %v881_v53  ;;  %v1629_v32 = vrot.slane %v1627_v29, 7  ;;  %v2027_v29 = vpop.f32.mrf.mxu2 }
 0x2af   : > { %v973_v21 = vmax.f32 %v882_v12, 0.0  ;;  %v1632_v63 = vor.u32 %v1630_v54, %v1629_v32  ;;  %v1634_v53 = vrot.slane %v1629_v32, 4 }
 0x2b1   : > { %v5561_v49 = vpack.c.bf16 %v973_v21, %v972_v1 }
 0x2b2   : > { %v6597_v23 = vpop.f32.mrf.mxu3 }
 0x2b3   : > { %5701 = vst [vmem:[#allocation2 + $0xe8] sm:$0xff] %v5561_v49   ;;  %v1299_v25 = vld [vmem:[#allocation2 + $0xe0] sm:$0x8] }
 0x2b4   : > { %v884_v24 = vpop.f32.mrf.mxu0  ;;  %v1622_v31 = vshrl.u32 %v1299_v25, 16 }
 0x2b5   : > { %v885_v50 = vadd.f32 %v6433_v59, %v884_v24 }
 0x2b6   : > { %v4837_v19 = vrot.slane %v1622_v31, 11 }
 0x2b7   : > { %v974_v8 = vmax.f32 %v885_v50, 0.0 }
 0x2b8   : > { %v1633_v12 = vsel %vm6283_vm7, %v4837_v19, %v1632_v63  ;;  %v5410_v63 = vld [vmem:[#allocation9 + $0x30] sm:$0xff] }
 0x2b9   : > { %v1746_v24 = vunpack.c.l.b16 %v1633_v12  ;;  %4212 = vmatpush.bf16.msrb.mxu0 %v5410_v63  ;;  %v5364_v12 = vld [vmem:[#allocation8 + $0x100] sm:$0xff] }
 0x2ba   : > { %v1232_v22 = vld [vmem:[#allocation2 + $0xec] sm:$0x1]  ;;  %v1301_v34 = vld [vmem:[#allocation2 + $0xe8] sm:$0xf]  ;;  %2634 = vmatpush.bf16.msra.mxu2 %v5364_v12 }
 0x2bb   : > { %v1233_v46 = vsel %vm6276_vm5, 0, %v1232_v22  ;;  %v1636_v51 = vshrl.u32 %v1301_v34, 16  ;;  %v1639_v0 = vshll.u32 %v1301_v34, 16 }
 0x2bc   : > { %1234 = vst [vmem:[#allocation2 + $0xec] sm:$0x1] %v1233_v46  ;;  %v886_v56 = vpop.f32.mrf.mxu0 }
 0x2bd   : > { %v887_v5 = vadd.f32 %v6433_v59, %v886_v56  ;;  %v1638_v30 = vrot.slane %v1636_v51, 7 }
 0x2bf   : > { %v975_v47 = vmax.f32 %v887_v5, 0.0  ;;  %v1641_v1 = vor.u32 %v1639_v0, %v1638_v30  ;;  %v5357_v5 = vld [vmem:[#allocation8 + $0x48] sm:$0xff] }
 0x2c0   : > { %2441 = vmatpush.bf16.msra.mxu1 %v5357_v5 }
 0x2c1   : > { %v5566_v21 = vpack.c.bf16 %v975_v47, %v974_v8  ;;  %v1642_v49 = vsel %vm6283_vm7, %v1634_v53, %v1641_v1 }
 0x2c2   : > { %v1747_v25 = vunpack.c.l.b16 %v1642_v49 }
 0x2c3   : > { %5702 = vst [vmem:[#allocation2 + $0xf0] sm:$0xff] %v5566_v21   ;;  %v1886_v31 = vpop.f32.mrf.mxu1 }
 0x2c4   : > { %v6599_v22 = vadd.f32 %v2027_v29, %v1886_v31  ;;  %v889_v32 = vpop.f32.mrf.mxu0  ;;  %v1765_v34 = vpack.c.b16 %v1747_v25, %v1746_v24 }
 0x2c5   : > { %v890_v19 = vadd.f32 %v6433_v59, %v889_v32  ;;  %v6608_v32 = vpop.f32.mrf.mxu2 }
 0x2c6   : > { %1905 = vmatmul.bf16.gmra.mxu1 %v1765_v34  ;;  %2051 = vmatmul.bf16.gmra.mxu2 %v1765_v34  ;;  %7232 = vst [vmem:[#allocation17_spill] sm:$0xff] %v6608_v32 }
 0x2c7   : > { %2221 = vmatmul.bf16.gmra.mxu3 %v1765_v34  ;;  %v976_v0 = vmax.f32 %v890_v19, 0.0 }
 0x2ca   : > { %v1178_v54 = vld [vmem:[#allocation2 + $0xf0] sm:$0x8]  ;;  %v2202_v46 = vpop.f32.mrf.mxu3  ;;  %v1303_v47 = vld [vmem:[#allocation2 + $0xf4] sm:$0xf] }
 0x2cb   : > { %v1179_v50 = vsel %vm6263_vm2, 0, %v1178_v54  ;;  %v6605_v51 = vadd.f32 %v2202_v46, %v6576_v52  ;;  %v1649_v52 = vshrl.u32 %v1303_v47, 16  ;;  %v1652_v31 = vshll.u32 %v1303_v47, 16  ;;  %v6610_v34 = vpop.f32.mrf.mxu1 }
 0x2cc   : > { %1180 = vst [vmem:[#allocation2 + $0xf0] sm:$0x8] %v1179_v50  ;;  %v891_v56 = vpop.f32.mrf.mxu0 }
 0x2cd   : > { %v892_v30 = vadd.f32 %v6433_v59, %v891_v56  ;;  %v1651_v24 = vrot.slane %v1649_v52, 7  ;;  %7233 = vst [vmem:[#allocation18_spill] sm:$0xff] %v6610_v34 }
 0x2cf   : > { %v977_v53 = vmax.f32 %v892_v30, 0.0  ;;  %v1654_v5 = vor.u32 %v1652_v31, %v1651_v24 }
 0x2d1   : > { %v5571_v8 = vpack.c.bf16 %v977_v53, %v976_v0  ;;  %v5372_v0 = vld [vmem:[#allocation8 + $0x1c0] sm:$0xff] }
 0x2d2   : > { %v5356_v53 = vld [vmem:[#allocation8 + $0x40] sm:$0xff]  ;;  %2826 = vmatpush.bf16.msrb.mxu3 %v5372_v0 }
 0x2d3   : > { %5703 = vst [vmem:[#allocation2 + $0xf8] sm:$0xff] %v5571_v8   ;;  %v1302_v21 = vld [vmem:[#allocation2 + $0xf0] sm:$0x8]  ;;  %v1656_v8 = vrot.slane %v1651_v24, 4  ;;  %2442 = vmatpush.bf16.msra.mxu1 %v5356_v53 }
 0x2d4   : > { %v894_v1 = vpop.f32.mrf.mxu0  ;;  %v1644_v49 = vshrl.u32 %v1302_v21, 16 }
 0x2d5   : > { %v895_v46 = vadd.f32 %v6433_v59, %v894_v1 }
 0x2d6   : > { %v4838_v50 = vrot.slane %v1644_v49, 11  ;;  %v6620_v49 = vpop.f32.mrf.mxu3 }
 0x2d7   : > { %v978_v47 = vmax.f32 %v895_v46, 0.0  ;;  %v1307_v46 = vld [vmem:[#allocation2 + $0x108] sm:$0xf] }
 0x2d8   : > { %v1655_v61 = vsel %vm6283_vm7, %v4838_v50, %v1654_v5 }
 0x2da   : > { %v1235_v25 = vld [vmem:[#allocation2 + $0xfc] sm:$0x1]  ;;  %v1304_v29 = vld [vmem:[#allocation2 + $0xf8] sm:$0xf] }
 0x2db   : > { %v1236_v54 = vsel %vm6276_vm5, 0, %v1235_v25  ;;  %v1658_v19 = vshrl.u32 %v1304_v29, 16  ;;  %v1661_v30 = vshll.u32 %v1304_v29, 16  ;;  %v2032_v29 = vpop.f32.mrf.mxu2 }
 0x2dc   : > { %1237 = vst [vmem:[#allocation2 + $0xfc] sm:$0x1] %v1236_v54  ;;  %v896_v56 = vpop.f32.mrf.mxu0 }
 0x2dd   : > { %v897_v58 = vadd.f32 %v6433_v59, %v896_v56  ;;  %v1660_v63 = vrot.slane %v1658_v19, 7  ;;  %v1748_v59 = vunpack.c.l.b16 %v1655_v61 }
 0x2df   : > { %v979_v12 = vmax.f32 %v897_v58, 0.0  ;;  %v1663_v21 = vor.u32 %v1661_v30, %v1660_v63  ;;  %v1696_v30 = vshrl.u32 %v1307_v46, 16 }
 0x2e1   : > { %v5576_v1 = vpack.c.bf16 %v979_v12, %v978_v47  ;;  %v1664_v52 = vsel %vm6283_vm7, %v1656_v8, %v1663_v21  ;;  %v1698_v53 = vrot.slane %v1696_v30, 7  ;;  %v1699_v8 = vshll.u32 %v1307_v46, 16  ;;  %v1309_v12 = vld [vmem:[#allocation2 + $0x114] sm:$0xf]  ;;  %v1310_v21 = vld [vmem:[#allocation2 + $0x118] sm:$0xf] }
 0x2e2   : > { %v1749_v25 = vunpack.c.l.b16 %v1664_v52 }
 0x2e3   : > { %5704 = vst [vmem:[#allocation2 + $0x100] sm:$0xff] %v5576_v1   ;;  %v1891_v31 = vpop.f32.mrf.mxu1  ;;  %v5315_v1 = vld [vmem:[#allocation2 + $0x14] sm:$0xff]  ;;  %v6633_v32 = vpop.f32.mrf.mxu2 }
 0x2e4   : > { %v6622_v24 = vadd.f32 %v2032_v29, %v1891_v31  ;;  %v1766_v54 = vpack.c.b16 %v1749_v25, %v1748_v59  ;;  %v1701_v25 = vor.u32 %v1699_v8, %v1698_v53  ;;  %v2068_v29 = vshrl.u32 %v1309_v12, 16  ;;  %7234 = vst [vmem:[#allocation19_spill] sm:$0xff] %v6633_v32 }
 0x2e5   : > { %v2080_v8 = vshll.u32 %v1310_v21, 16 }
 0x2e6   : > { %1910 = vmatmul.bf16.gmra.mxu1 %v1766_v54  ;;  %2056 = vmatmul.bf16.gmra.mxu2 %v1766_v54 }
 0x2e7   : > { %2226 = vmatmul.bf16.gmra.mxu3 %v1766_v54  ;;  %v1308_v54 = vld [vmem:[#allocation2 + $0x110] sm:$0x8] }
 0x2e8   : > { %v2063_v30 = vshrl.u32 %v1308_v54, 16 }
 0x2ea   : > { %v1181_v50 = vld [vmem:[#allocation2 + $0x100] sm:$0x8]  ;;  %v2207_v19 = vpop.f32.mrf.mxu3  ;;  %v1306_v56 = vld [vmem:[#allocation2 + $0x104] sm:$0xf] }
 0x2eb   : > { %v1182_v58 = vsel %vm6263_vm2, 0, %v1181_v50  ;;  %v6627_v5 = vadd.f32 %v2207_v19, %v6599_v22  ;;  %v1687_v63 = vshrl.u32 %v1306_v56, 16  ;;  %v1690_v59 = vshll.u32 %v1306_v56, 16  ;;  %v5395_v19 = vld [vmem:[#allocation8 + $0x178] sm:$0xff] }
 0x2ec   : > { %1183 = vst [vmem:[#allocation2 + $0x100] sm:$0x8] %v1182_v58  ;;  %v2077_v50 = vshrl.u32 %v1310_v21, 16  ;;  %3724 = vmatpush.bf16.msrb.mxu2 %v5395_v19  ;;  %v2071_v56 = vshll.u32 %v1309_v12, 16  ;;  %v5316_v19 = vld [vmem:[#allocation2 + $0x24] sm:$0xff] }
 0x2ed   : > { %v1689_v0 = vrot.slane %v1687_v63, 7 }
 0x2ee   : > { %v2079_v53 = vrot.slane %v2077_v50, 7 }
 0x2ef   : > { %v1694_v47 = vrot.slane %v1689_v0, 4  ;;  %v1692_v31 = vor.u32 %v1690_v59, %v1689_v0  ;;  %v6635_v0 = vpop.f32.mrf.mxu1  ;;  %v5387_v59 = vld [vmem:[#allocation8 + $0xb8] sm:$0xff] }
 0x2f0   : > { %3510 = vmatpush.bf16.msrb.mxu1 %v5387_v59  ;;  %3725 = vmatpush.bf16.msrb.mxu2 %v5394_v3  ;;  %v5386_v59 = vld [vmem:[#allocation8 + $0xb0] sm:$0xff]  ;;  %v5320_v3 = vld [vmem:[#allocation2 + $0x64] sm:$0xff] }
 0x2f1   : > { %v1702_v22 = vsel %vm6283_vm7, %v1694_v47, %v1701_v25  ;;  %v5403_v47 = vld [vmem:[#allocation8 + $0x238] sm:$0xff]  ;;  %v4904_v25 = vrot.slane %v2063_v30, 11 }
 0x2f2   : > { %v1751_v63 = vunpack.c.l.b16 %v1702_v22  ;;  %3938 = vmatpush.bf16.msra.mxu3 %v5403_v47  ;;  %v6637_v22 = vpop.f32.mrf.mxu3  ;;  %v5402_v47 = vld [vmem:[#allocation8 + $0x230] sm:$0xff] }
 0x2f3   : > { %v1305_v61 = vld [vmem:[#allocation2 + $0x100] sm:$0x8] }
 0x2f4   : > { %v1682_v52 = vshrl.u32 %v1305_v61, 16  ;;  %v2070_v61 = vrot.slane %v2068_v29, 7  ;;  %v2037_v29 = vpop.f32.mrf.mxu2  ;;  %3511 = vmatpush.bf16.msrb.mxu1 %v5386_v59 }
 0x2f6   : > { %2635 = vmatmul.bf16.vlgmr.msra.gmra.mxu2 %v5315_v1  ;;  %v4839_v36 = vrot.slane %v1682_v52, 11  ;;  %v2073_v34 = vor.u32 %v2071_v56, %v2070_v61  ;;  %3939 = vmatpush.bf16.msra.mxu3 %v5402_v47  ;;  %v5408_v47 = vld [vmem:[#allocation9 + $0x20] sm:$0xff] }
 0x2f8   : > { %v1693_v46 = vsel %vm6283_vm7, %v4839_v36, %v1692_v31  ;;  %v2075_v36 = vrot.slane %v2070_v61, 4  ;;  %v2082_v31 = vor.u32 %v2080_v8, %v2079_v53  ;;  %v2074_v12 = vsel %vm6283_vm7, %v4904_v25, %v2073_v34  ;;  %v5314_v61 = vld [vmem:[#allocation2 + $0x4] sm:$0xff]  ;;  %v5317_v34 = vld [vmem:[#allocation2 + $0x34] sm:$0xff] }
 0x2f9   : > { %v1750_v58 = vunpack.c.l.b16 %v1693_v46  ;;  %v5409_v46 = vld [vmem:[#allocation9 + $0x28] sm:$0xff] }
 0x2fa   : > { %v2083_v21 = vsel %vm6283_vm7, %v2075_v36, %v2082_v31  ;;  %4213 = vmatpush.bf16.msrb.mxu0 %v5409_v46 }
 0x2fb   : > { %v1767_v52 = vpack.c.b16 %v1751_v63, %v1750_v58  ;;  %v2101_v58 = vunpack.c.l.b16 %v2074_v12  ;;  %v2102_v63 = vunpack.c.l.b16 %v2083_v21  ;;  %v5318_v12 = vld [vmem:[#allocation2 + $0x44] sm:$0xff] }
 0x2fc   : > { %v6646_v8 = vpop.f32.mrf.mxu2 }
 0x2fd   : > { %1915 = vmatmul.bf16.gmra.mxu1 %v1767_v52  ;;  %2231 = vmatmul.bf16.gmra.mxu3 %v1767_v52  ;;  %v2103_v30 = vpack.c.b16 %v2102_v63, %v2101_v58  ;;  %7235 = vst [vmem:[#allocation20_spill] sm:$0xff] %v6646_v8  ;;  %v5401_v63 = vld [vmem:[#allocation8 + $0x228] sm:$0xff] }
 0x2fe   : > { %3940 = vmatpush.bf16.msra.mxu3 %v5401_v63  ;;  %4214 = vmatpush.bf16.msrb.mxu0 %v5408_v47  ;;  %v5392_v63 = vld [vmem:[#allocation8 + $0x160] sm:$0xff] }
 0x303   : > { %v1896_v54 = vpop.f32.mrf.mxu1 }
 0x304   : > { %v2038_v50 = vadd.f32 %v2037_v29, %v1896_v54  ;;  %v5319_v54 = vld [vmem:[#allocation2 + $0x54] sm:$0xff] }
 0x306   : > { %2640 = vmatmul.bf16.gmra.mxu2 %v5316_v19 }
 0x30a   : > { %v2212_v56 = vpop.f32.mrf.mxu3 }
 0x30b   : > { %v6644_v53 = vadd.f32 %v2212_v56, %v6622_v24  ;;  %v6648_v52 = vpop.f32.mrf.mxu1  ;;  %v2042_v24 = vpop.f32.mrf.mxu2 }
 0x30c   : > { %7236 = vst [vmem:[#allocation21_spill] sm:$0xff] %v6648_v52 }
 0x30d   : > { %2236 = vmatmul.bf16.gmra.mxu3 %v2103_v30  ;;  %2443 = vmatmul.bf16.vlgmr.msra.gmra.mxu1 %v5314_v61  ;;  %v5385_v30 = vld [vmem:[#allocation8 + $0xa8] sm:$0xff] }
 0x30e   : > { %3512 = vmatpush.bf16.msrb.mxu1 %v5385_v30  ;;  %v5400_v30 = vld [vmem:[#allocation8 + $0x220] sm:$0xff] }
 0x30f   : > { %3941 = vmatpush.bf16.msra.mxu3 %v5400_v30 }
 0x312   : > { %v6650_v25 = vpop.f32.mrf.mxu3 }
 0x313   : > { %7237 = vst [vmem:[#allocation22_spill] sm:$0xff] %v6650_v25  ;;  %v6654_v46 = vpop.f32.mrf.mxu2  ;;  %v5383_v25 = vld [vmem:[#allocation8 + $0x98] sm:$0xff] }
 0x314   : > { %7239 = vst [vmem:[#allocation24_spill] sm:$0xff] %v6654_v46  ;;  %v5384_v46 = vld [vmem:[#allocation8 + $0xa0] sm:$0xff] }
 0x315   : > { %3513 = vmatpush.bf16.msrb.mxu1 %v5384_v46  ;;  %v5323_v46 = vld [vmem:[#allocation2 + $0x94] sm:$0xff] }
 0x316   : > { %2645 = vmatmul.bf16.gmra.mxu2 %v5317_v34 }
 0x319   : > { %3514 = vmatpush.bf16.msrb.mxu1 %v5383_v25 }
 0x31d   : > { %2448 = vmatmul.bf16.gmra.mxu1 %v5315_v1  ;;  %2827 = vmatmul.bf16.vlgmr.msrb.gmra.mxu3 %v5316_v19  ;;  %v5393_v1 = vld [vmem:[#allocation8 + $0x168] sm:$0xff] }
 0x31e   : > { %3726 = vmatpush.bf16.msrb.mxu2 %v5393_v1 }
 0x322   : > { %3727 = vmatpush.bf16.msrb.mxu2 %v5392_v63 }
 0x323   : > { %v1901_v36 = vpop.f32.mrf.mxu1 }
 0x324   : > { %v2043_v31 = vadd.f32 %v2042_v24, %v1901_v36  ;;  %v5321_v36 = vld [vmem:[#allocation2 + $0x74] sm:$0xff] }
 0x326   : > { %2650 = vmatmul.bf16.gmra.mxu2 %v5318_v12 }
 0x32a   : > { %v2217_v21 = vpop.f32.mrf.mxu3 }
 0x32b   : > { %v6652_v29 = vadd.f32 %v2217_v21, %v2038_v50  ;;  %v6656_v58 = vpop.f32.mrf.mxu1  ;;  %v2047_v50 = vpop.f32.mrf.mxu2 }
 0x32c   : > { %7240 = vst [vmem:[#allocation25_spill] sm:$0xff] %v6656_v58 }
 0x32d   : > { %7238 = vst [vmem:[#allocation23_spill] sm:$0xff] %v6652_v29  ;;  %2453 = vmatmul.bf16.gmra.mxu1 %v5316_v19  ;;  %2832 = vmatmul.bf16.gmra.mxu3 %v5317_v34 }
 0x332   : > { %v6658_v61 = vpop.f32.mrf.mxu3 }
 0x333   : > { %7241 = vst [vmem:[#allocation26_spill] sm:$0xff] %v6658_v61 }
 0x336   : > { %2655 = vmatmul.bf16.gmra.mxu2 %v5319_v54 }
 0x33d   : > { %2458 = vmatmul.bf16.gmra.mxu1 %v5317_v34  ;;  %2837 = vmatmul.bf16.gmra.mxu3 %v5318_v12  ;;  %v2049_v34 = vpop.f32.mrf.mxu2 }
 0x343   : > { %v1906_v56 = vpop.f32.mrf.mxu1 }
 0x344   : > { %v2048_v19 = vadd.f32 %v2047_v50, %v1906_v56 }
 0x346   : > { %2660 = vmatmul.bf16.gmra.mxu2 %v5320_v3 }
 0x349   : > { %v2052_v21 = vpop.f32.mrf.mxu2 }
 0x34a   : > { %v2222_v59 = vpop.f32.mrf.mxu3 }
 0x34b   : > { %v6660_v24 = vadd.f32 %v2222_v59, %v2043_v31  ;;  %v1908_v1 = vpop.f32.mrf.mxu1 }
 0x34d   : > { %7242 = vst [vmem:[#allocation27_spill] sm:$0xff] %v6660_v24  ;;  %2463 = vmatmul.bf16.gmra.mxu1 %v5318_v12  ;;  %2842 = vmatmul.bf16.gmra.mxu3 %v5319_v54  ;;  %v5322_v12 = vld [vmem:[#allocation2 + $0x84] sm:$0xff] }
 0x351   : > { %v2054_v50 = vpop.f32.mrf.mxu2 }
 0x352   : > { %v6662_v56 = vpop.f32.mrf.mxu3 }
 0x353   : > { %7243 = vst [vmem:[#allocation28_spill] sm:$0xff] %v6662_v56 }
 0x356   : > { %2665 = vmatmul.bf16.gmra.mxu2 %v5321_v36 }
 0x35d   : > { %2468 = vmatmul.bf16.gmra.mxu1 %v5319_v54  ;;  %2847 = vmatmul.bf16.gmra.mxu3 %v5320_v3  ;;  %v2050_v54 = vadd.f32 %v2049_v34, %v1908_v1  ;;  %v5324_v1 = vld [vmem:[#allocation2 + $0xa4] sm:$0xff] }
 0x363   : > { %v1911_v31 = vpop.f32.mrf.mxu1 }
 0x364   : > { %v2053_v47 = vadd.f32 %v2052_v21, %v1911_v31  ;;  %v5391_v21 = vld [vmem:[#allocation8 + $0x158] sm:$0xff] }
 0x365   : > { %v5399_v31 = vld [vmem:[#allocation8 + $0x218] sm:$0xff]  ;;  %3728 = vmatpush.bf16.msrb.mxu2 %v5391_v21 }
 0x366   : > { %2670 = vmatmul.bf16.gmra.mxu2 %v5322_v12  ;;  %3942 = vmatpush.bf16.msra.mxu3 %v5399_v31 }
 0x369   : > { %v2057_v59 = vpop.f32.mrf.mxu2 }
 0x36a   : > { %v2227_v58 = vpop.f32.mrf.mxu3 }
 0x36b   : > { %v6664_v24 = vadd.f32 %v2227_v58, %v2048_v19  ;;  %v1913_v8 = vpop.f32.mrf.mxu1 }
 0x36d   : > { %7244 = vst [vmem:[#allocation29_spill] sm:$0xff] %v6664_v24  ;;  %2473 = vmatmul.bf16.gmra.mxu1 %v5320_v3  ;;  %2852 = vmatmul.bf16.gmra.mxu3 %v5321_v36 }
 0x371   : > { %v2059_v61 = vpop.f32.mrf.mxu2 }
 0x372   : > { %v2229_v52 = vpop.f32.mrf.mxu3 }
 0x373   : > { %v6666_v63 = vadd.f32 %v2229_v52, %v2050_v54  ;;  %v2055_v54 = vadd.f32 %v2054_v50, %v1913_v8 }
 0x375   : > { %7245 = vst [vmem:[#allocation30_spill] sm:$0xff] %v6666_v63 }
 0x376   : > { %2675 = vmatmul.bf16.gmra.mxu2 %v5323_v46 }
 0x379   : > { %v2636_v30 = vpop.f32.mrf.mxu2 }
 0x37a   : > { %v1916_v56 = vpop.f32.mrf.mxu1 }
 0x37b   : > { %v2058_v29 = vadd.f32 %v2057_v59, %v1916_v56 }
 0x37d   : > { %2478 = vmatmul.bf16.gmra.mxu1 %v5321_v36  ;;  %2857 = vmatmul.bf16.gmra.mxu3 %v5322_v12  ;;  %v5407_v36 = vld [vmem:[#allocation9 + $0x18] sm:$0xff] }
 0x37e   : > { %4215 = vmatpush.bf16.msrb.mxu0 %v5407_v36 }
 0x380   : > { %v2232_v58 = vpop.f32.mrf.mxu3 }
 0x381   : > { %v6668_v19 = vadd.f32 %v2232_v58, %v2053_v47  ;;  %v2638_v3 = vpop.f32.mrf.mxu2  ;;  %v1985_v47 = vadd.f32 %v6388_v38, %v6390_v43  ;;  %v5325_v58 = vld [vmem:[#allocation2 + $0xb4] sm:$0xff] }
 0x382   : > { %v1918_v34 = vpop.f32.mrf.mxu1  ;;  %v5398_v43 = vld [vmem:[#allocation8 + $0x210] sm:$0xff] }
 0x383   : > { %v2060_v52 = vadd.f32 %v2059_v61, %v1918_v34  ;;  %v2243_v61 = vadd.f32 %v6423_v48, %v1985_v47  ;;  %v5382_v48 = vld [vmem:[#allocation8 + $0x90] sm:$0xff]  ;;  %3943 = vmatpush.bf16.msra.mxu3 %v5398_v43 }
 0x384   : > { %3515 = vmatpush.bf16.msrb.mxu1 %v5382_v48 }
 0x386   : > { %2680 = vmatmul.bf16.gmra.mxu2 %v5324_v1 }
 0x388   : > { %v2234_v63 = vpop.f32.mrf.mxu3 }
 0x389   : > { %v6670_v24 = vadd.f32 %v2234_v63, %v2055_v54  ;;  %v2641_v56 = vpop.f32.mrf.mxu2 }
 0x38a   : > { %v2444_v59 = vpop.f32.mrf.mxu1 }
 0x38b   : > { %v2524_v32 = vadd.f32 %v2444_v59, %v6407_v9 }
 0x38d   : > { %2483 = vmatmul.bf16.gmra.mxu1 %v5322_v12  ;;  %2862 = vmatmul.bf16.gmra.mxu3 %v5323_v46  ;;  %v2716_v25 = vadd.f32 %v2636_v30, %v2524_v32  ;;  %v5390_v30 = vld [vmem:[#allocation8 + $0x150] sm:$0xff] }
 0x38e   : > { %3729 = vmatpush.bf16.msrb.mxu2 %v5390_v30 }
 0x390   : > { %v2237_v21 = vpop.f32.mrf.mxu3 }
 0x391   : > { %v6676_v31 = vadd.f32 %v2237_v21, %v2058_v29  ;;  %v2643_v8 = vpop.f32.mrf.mxu2  ;;  %v1990_v29 = vadd.f32 %v6411_v26, %v6413_v27 }
 0x392   : > { %v2446_v50 = vpop.f32.mrf.mxu1 }
 0x393   : > { %v2525_v63 = vadd.f32 %v2446_v50, %v2243_v61  ;;  %v5326_v61 = vld [vmem:[#allocation2 + $0xc4] sm:$0xff] }
 0x395   : > { %v2717_v34 = vadd.f32 %v2638_v3, %v2525_v63 }
 0x396   : > { %2685 = vmatmul.bf16.gmra.mxu2 %v5325_v58 }
 0x398   : > { %v2239_v54 = vpop.f32.mrf.mxu3 }
 0x399   : > { %v6678_v9 = vadd.f32 %v2239_v54, %v2060_v52  ;;  %v2646_v12 = vpop.f32.mrf.mxu2  ;;  %v2245_v52 = vadd.f32 %v6453_v40, %v1990_v29  ;;  %v1995_v40 = vadd.f32 %v6441_v15, %v6443_v16  ;;  %v5397_v16 = vld [vmem:[#allocation8 + $0x208] sm:$0xff] }
 0x39a   : > { %v2449_v36 = vpop.f32.mrf.mxu1  ;;  %3944 = vmatpush.bf16.msra.mxu3 %v5397_v16 }
 0x39b   : > { %v2526_v32 = vadd.f32 %v2449_v36, %v6437_v62  ;;  %v2247_v36 = vadd.f32 %v6478_v39, %v1995_v40  ;;  %v5381_v39 = vld [vmem:[#allocation8 + $0x88] sm:$0xff] }
 0x39c   : > { %3516 = vmatpush.bf16.msrb.mxu1 %v5381_v39  ;;  %v5396_v39 = vld [vmem:[#allocation8 + $0x200] sm:$0xff] }
 0x39d   : > { %2488 = vmatmul.bf16.gmra.mxu1 %v5323_v46  ;;  %2867 = vmatmul.bf16.gmra.mxu3 %v5324_v1  ;;  %v2718_v38 = vadd.f32 %v2641_v56, %v2526_v32 }
 0x39e   : > { %3945 = vmatpush.bf16.msra.mxu3 %v5396_v39 }
 0x3a0   : > { %v2828_v3 = vpop.f32.mrf.mxu3 }
 0x3a1   : > { %v6684_v59 = vadd.f32 %v2828_v3, %v2716_v25  ;;  %v2648_v47 = vpop.f32.mrf.mxu2 }
 0x3a2   : > { %v2451_v21 = vpop.f32.mrf.mxu1 }
 0x3a3   : > { %v2527_v62 = vadd.f32 %v2451_v21, %v2245_v52  ;;  %v5389_v52 = vld [vmem:[#allocation8 + $0x148] sm:$0xff] }
 0x3a4   : > { %3730 = vmatpush.bf16.msrb.mxu2 %v5389_v52 }
 0x3a5   : > { %v2719_v46 = vadd.f32 %v2643_v8, %v2527_v62 }
 0x3a6   : > { %2690 = vmatmul.bf16.gmra.mxu2 %v5326_v61 }
 0x3a8   : > { %v2830_v56 = vpop.f32.mrf.mxu3 }
 0x3a9   : > { %v6686_v50 = vadd.f32 %v2830_v56, %v2717_v34  ;;  %v2651_v63 = vpop.f32.mrf.mxu2  ;;  %v5327_v34 = vld [vmem:[#allocation2 + $0xd4] sm:$0xff] }
 0x3aa   : > { %v2454_v54 = vpop.f32.mrf.mxu1 }
 0x3ab   : > { %v2528_v26 = vadd.f32 %v2454_v54, %v6462_v55  ;;  %v6702_v54 = vld [vmem:[#allocation2 + $0xe4] sm:$0xff] }
 0x3ad   : > { %2493 = vmatmul.bf16.gmra.mxu1 %v5324_v1  ;;  %2872 = vmatmul.bf16.gmra.mxu3 %v5325_v58  ;;  %v2720_v27 = vadd.f32 %v2646_v12, %v2528_v26 }
 0x3b0   : > { %v2833_v25 = vpop.f32.mrf.mxu3 }
 0x3b1   : > { %v6692_v32 = vadd.f32 %v2833_v25, %v2718_v38  ;;  %v2653_v8 = vpop.f32.mrf.mxu2  ;;  %v2000_v38 = vadd.f32 %v6466_v13, %v6468_v14  ;;  %v5406_v25 = vld [vmem:[#allocation9 + $0x10] sm:$0xff] }
 0x3b2   : > { %v2456_v30 = vpop.f32.mrf.mxu1  ;;  %4216 = vmatpush.bf16.msrb.mxu0 %v5406_v25 }
 0x3b3   : > { %v2529_v43 = vadd.f32 %v2456_v30, %v2247_v36  ;;  %v2249_v21 = vadd.f32 %v6503_v45, %v2000_v38  ;;  %v5380_v38 = vld [vmem:[#allocation8 + $0x80] sm:$0xff] }
 0x3b4   : > { %3517 = vmatpush.bf16.msrb.mxu1 %v5380_v38  ;;  %v2947_v38 = vld [vmem:[#allocation2 + $0x28] sm:$0xf] }
 0x3b5   : > { %v2721_v48 = vadd.f32 %v2648_v47, %v2529_v43 }
 0x3b6   : > { %2695 = vmatmul.bf16.gmra.mxu2 %v5327_v34 }
 0x3b8   : > { %v2835_v29 = vpop.f32.mrf.mxu3 }
 0x3b9   : > { %v6694_v3 = vadd.f32 %v2835_v29, %v2719_v46  ;;  %v2656_v55 = vpop.f32.mrf.mxu2  ;;  %v5388_v29 = vld [vmem:[#allocation8 + $0x140] sm:$0xff] }
 0x3ba   : > { %v2459_v1 = vpop.f32.mrf.mxu1  ;;  %3731 = vmatpush.bf16.msrb.mxu2 %v5388_v29 }
 0x3bb   : > { %v2530_v12 = vadd.f32 %v2459_v1, %v6487_v57 }
 0x3bd   : > { %2498 = vmatmul.bf16.gmra.mxu1 %v5325_v58  ;;  %2877 = vmatmul.bf16.gmra.mxu3 %v5326_v61  ;;  %v2722_v15 = vadd.f32 %v2651_v63, %v2530_v12  ;;  %v6713_v12 = vld [vmem:[#allocation2 + $0xf4] sm:$0xff] }
 0x3c0   : > { %v2838_v47 = vpop.f32.mrf.mxu3 }
 0x3c1   : > { %v6700_v62 = vadd.f32 %v2838_v47, %v2720_v27  ;;  %v2658_v46 = vpop.f32.mrf.mxu2  ;;  %v2005_v27 = vadd.f32 %v6491_v17, %v6493_v20 }
 0x3c2   : > { %v2461_v56 = vpop.f32.mrf.mxu1 }
 0x3c3   : > { %v2531_v57 = vadd.f32 %v2461_v56, %v2249_v21  ;;  %v2010_v21 = vadd.f32 %v6516_v18, %v6518_v28 }
 0x3c5   : > { %v2723_v58 = vadd.f32 %v2653_v8, %v2531_v57  ;;  %v2251_v8 = vadd.f32 %v6528_v60, %v2005_v27  ;;  %v2943_v60 = vld [vmem:[#allocation2 + $0x14] sm:$0xf] }
 0x3c6   : > { %2700 = vmatmul.bf16.gmra.mxu2 %v6702_v54  ;;  %v3022_v47 = vshrl.u32 %v2943_v60, 16 }
 0x3c8   : > { %v2840_v63 = vpop.f32.mrf.mxu3 }
 0x3c9   : > { %v6705_v26 = vadd.f32 %v2840_v63, %v2721_v48  ;;  %v2661_v40 = vpop.f32.mrf.mxu2 }
 0x3ca   : > { %v2464_v13 = vpop.f32.mrf.mxu1 }
 0x3cb   : > { %v2532_v14 = vadd.f32 %v2464_v13, %v6512_v2 }
 0x3cd   : > { %2503 = vmatmul.bf16.gmra.mxu1 %v5326_v61  ;;  %2882 = vmatmul.bf16.gmra.mxu3 %v5327_v34  ;;  %v2724_v45 = vadd.f32 %v2656_v55, %v2532_v14  ;;  %v2945_v14 = vld [vmem:[#allocation2 + $0x1c] sm:$0x1] }
 0x3ce   : > { %v3041_v18 = vshll.u32 %v2945_v14, 16 }
 0x3d0   : > { %v2843_v36 = vpop.f32.mrf.mxu3 }
 0x3d1   : > { %v6711_v30 = vadd.f32 %v2843_v36, %v2722_v15  ;;  %v2663_v43 = vpop.f32.mrf.mxu2  ;;  %v2944_v15 = vld [vmem:[#allocation2 + $0x18] sm:$0xf] }
 0x3d2   : > { %v2466_v48 = vpop.f32.mrf.mxu1  ;;  %v3031_v56 = vshll.u32 %v2944_v15, 16  ;;  %v3035_v57 = vshrl.u32 %v2944_v15, 16 }
 0x3d3   : > { %v2533_v1 = vadd.f32 %v2466_v48, %v2251_v8  ;;  %v6725_v48 = vld [vmem:[#allocation2 + $0x104] sm:$0xff] }
 0x3d4   : > { %v3033_v36 = vrot.slane %v3031_v56, 5  ;;  %v3037_v8 = vrot.slane %v3035_v57, 4  ;;  %v2015_v56 = vadd.f32 %v6539_v41, %v6541_v42  ;;  %v3059_v57 = vshrl.u32 %v2947_v38, 16 }
 0x3d5   : > { %v2725_v2 = vadd.f32 %v2658_v46, %v2533_v1  ;;  %v3025_v46 = vshll.u32 %v2943_v60, 16 }
 0x3d6   : > { %2705 = vmatmul.bf16.gmra.mxu2 %v6713_v12 }
 0x3d7   : > { %v3027_v27 = vrot.slane %v3025_v46, 5  ;;  %v2946_v46 = vld [vmem:[#allocation2 + $0x24] sm:$0xf] }
 0x3d8   : > { %v2845_v61 = vpop.f32.mrf.mxu3 }
 0x3d9   : > { %v6716_v55 = vadd.f32 %v2845_v61, %v2723_v58  ;;  %v2666_v52 = vpop.f32.mrf.mxu2 }
 0x3da   : > { %v2469_v17 = vpop.f32.mrf.mxu1 }
 0x3db   : > { %v2534_v20 = vadd.f32 %v2469_v17, %v6536_v11  ;;  %v2253_v11 = vadd.f32 %v6551_v10, %v2010_v21  ;;  %v3038_v10 = vor.u32 %v3037_v8, %v3033_v36  ;;  %v3043_v17 = vrot.slane %v3041_v18, 5  ;;  %v2948_v18 = vld [vmem:[#allocation2 + $0x2c] sm:$0x1] }
 0x3dd   : > { %2508 = vmatmul.bf16.gmra.mxu1 %v5327_v34  ;;  %2887 = vmatmul.bf16.gmra.mxu3 %v6702_v54  ;;  %v2726_v16 = vadd.f32 %v2661_v40, %v2534_v20  ;;  %v3024_v40 = vrot.slane %v3022_v47, 4  ;;  %v3039_v39 = vrot.slane %v3038_v10, 4 }
 0x3df   : > { %v3028_v29 = vor.u32 %v3027_v27, %v3024_v40  ;;  %v3044_v47 = vsel %vm6732_vm10, %v3039_v39, %v3043_v17  ;;  %v2255_v40 = vadd.f32 %v6574_v44, %v2015_v56  ;;  %v3065_v44 = vshll.u32 %v2948_v18, 16 }
 0x3e0   : > { %v2848_v58 = vpop.f32.mrf.mxu3  ;;  %v3401_v14 = vunpack.c.l.b16 %v3044_v47 }
 0x3e1   : > { %v6723_v63 = vadd.f32 %v2848_v58, %v2724_v45  ;;  %v2668_v34 = vpop.f32.mrf.mxu2  ;;  %v2940_v58 = vld [vmem:[#allocation2 + $0x4] sm:$0xf] }
 0x3e2   : > { %v2471_v13 = vpop.f32.mrf.mxu1  ;;  %v3001_v10 = vshll.u32 %v2940_v58, 16 }
 0x3e3   : > { %v2535_v25 = vadd.f32 %v2471_v13, %v2253_v11  ;;  %v2941_v11 = vld [vmem:[#allocation2 + $0x8] sm:$0xf] }
 0x3e4   : > { %v3007_v41 = vshll.u32 %v2941_v11, 16  ;;  %v3011_v42 = vshrl.u32 %v2941_v11, 16 }
 0x3e5   : > { %v2727_v28 = vadd.f32 %v2663_v43, %v2535_v25  ;;  %v3029_v43 = vrot.slane %v3028_v29, 4  ;;  %v2998_v29 = vshrl.u32 %v2940_v58, 16 }
 0x3e6   : > { %2710 = vmatmul.bf16.gmra.mxu2 %v6725_v48  ;;  %v3009_v47 = vrot.slane %v3007_v41, 5 }
 0x3e8   : > { %v2850_v45 = vpop.f32.mrf.mxu3 }
 0x3e9   : > { %v6728_v1 = vadd.f32 %v2850_v45, %v2725_v2  ;;  %v6730_v61 = vpop.f32.mrf.mxu2  ;;  %v3034_v2 = vsel %vm6732_vm10, %v3029_v43, %v3033_v36  ;;  %v3046_v36 = vshrl.u32 %v2946_v46, 16 }
 0x3ea   : > { %v2474_v20 = vpop.f32.mrf.mxu1 }
 0x3eb   : > { %v2536_v15 = vadd.f32 %v2474_v20, %v6559_v33  ;;  %v3055_v33 = vshll.u32 %v2947_v38, 16  ;;  %v3061_v20 = vrot.slane %v3059_v57, 4  ;;  %v3048_v43 = vrot.slane %v3046_v36, 4 }
 0x3ec   : > { %v3000_v38 = vrot.slane %v2998_v29, 4  ;;  %v3067_v57 = vrot.slane %v3065_v44, 5 }
 0x3ed   : > { %2513 = vmatmul.bf16.gmra.mxu1 %v6702_v54  ;;  %2892 = vmatmul.bf16.gmra.mxu3 %v6713_v12  ;;  %v6743_v21 = vadd.f32 %v2666_v52, %v2536_v15  ;;  %v3400_v54 = vunpack.c.l.b16 %v3034_v2  ;;  %v3049_v52 = vshll.u32 %v2946_v46, 16  ;;  %v3057_v17 = vrot.slane %v3055_v33, 5 }
 0x3ee   : > { %v3003_v2 = vrot.slane %v3001_v10, 5  ;;  %v3013_v46 = vrot.slane %v3011_v42, 4  ;;  %v2949_v10 = vld [vmem:[#allocation2 + $0x34] sm:$0xf] }
 0x3ef   : > { %v6752_v15 = vpack.c.b16 %v3401_v14, %v3400_v54  ;;  %v3051_v39 = vrot.slane %v3049_v52, 5  ;;  %v3062_v56 = vor.u32 %v3061_v20, %v3057_v17  ;;  %v2020_v20 = vadd.f32 %v6562_v6, %v6564_v7 }
 0x3f0   : > { %v2853_v13 = vpop.f32.mrf.mxu3  ;;  %v3004_v14 = vor.u32 %v3003_v2, %v3000_v38  ;;  %v3070_v44 = vshrl.u32 %v2949_v10, 16  ;;  %v3073_v38 = vshll.u32 %v2949_v10, 16 }
 0x3f1   : > { %v6748_v25 = vadd.f32 %v2853_v13, %v2726_v16  ;;  %v6750_v27 = vpop.f32.mrf.mxu2  ;;  %v2942_v13 = vld [vmem:[#allocation2 + $0xc] sm:$0x1]  ;;  %v3052_v33 = vor.u32 %v3051_v39, %v3048_v43  ;;  %v3063_v52 = vrot.slane %v3062_v56, 4  ;;  %v2257_v2 = vadd.f32 %v6597_v23, %v2020_v20 }
 0x3f2   : > { %v2476_v8 = vpop.f32.mrf.mxu1  ;;  %v3017_v36 = vshll.u32 %v2942_v13, 16  ;;  %v3005_v41 = vrot.slane %v3004_v14, 4  ;;  %v3072_v14 = vrot.slane %v3070_v44, 4  ;;  %v3075_v23 = vrot.slane %v3073_v38, 5 }
 0x3f3   : > { %7248 = vst [vmem:[#allocation31_spill] sm:$0xff] %v6748_v25  ;;  %v2537_v45 = vadd.f32 %v2476_v8, %v2255_v40  ;;  %v3014_v40 = vor.u32 %v3013_v46, %v3009_v47  ;;  %v2950_v8 = vld [vmem:[#allocation2 + $0x38] sm:$0xf]  ;;  %v3053_v18 = vrot.slane %v3052_v33, 4  ;;  %v2025_v44 = vadd.f32 %v6585_v35, %v6587_v37 }
 0x3f4   : > { %v3079_v43 = vshll.u32 %v2950_v8, 16  ;;  %v3010_v6 = vsel %vm6732_vm10, %v3005_v41, %v3009_v47  ;;  %v3076_v41 = vor.u32 %v3075_v23, %v3072_v14  ;;  %v2954_v23 = vld [vmem:[#allocation2 + $0x4c] sm:$0x1] }
 0x3f5   : > { %v2729_v16 = vadd.f32 %v2668_v34, %v2537_v45  ;;  %v3015_v42 = vrot.slane %v3014_v40, 4  ;;  %v3019_v45 = vrot.slane %v3017_v36, 5  ;;  %v3398_v40 = vunpack.c.l.b16 %v3010_v6 }
 0x3f6   : > { %3732 = vmatmul.bf16.vlgmr.msrb.gmra.mxu2 %v6752_v15  ;;  %v3081_v33 = vrot.slane %v3079_v43, 5  ;;  %v2953_v43 = vld [vmem:[#allocation2 + $0x48] sm:$0xf]  ;;  %v2259_v6 = vadd.f32 %v6620_v49, %v2025_v44 }
 0x3f7   : > { %v3020_v7 = vsel %vm6732_vm10, %v3015_v42, %v3019_v45 }
 0x3f8   : > { %v2855_v58 = vpop.f32.mrf.mxu3 }
 0x3f9   : > { %v6755_v25 = vadd.f32 %v2855_v58, %v2727_v28  ;;  %v6757_v11 = vpop.f32.mrf.mxu2  ;;  %v3068_v28 = vsel %vm6732_vm10, %v3063_v52, %v3067_v57 }
 0x3fa   : > { %v2479_v54 = vpop.f32.mrf.mxu1 }
 0x3fb   : > { %v2538_v34 = vadd.f32 %v2479_v54, %v6582_v4  ;;  %v3058_v4 = vsel %vm6732_vm10, %v3053_v18, %v3057_v17  ;;  %v2951_v17 = vld [vmem:[#allocation2 + $0x3c] sm:$0x1] }
 0x3fc   : > { %v3402_v13 = vunpack.c.l.b16 %v3058_v4  ;;  %v3089_v36 = vshll.u32 %v2951_v17, 16 }
 0x3fd   : > { %2518 = vmatmul.bf16.gmra.mxu1 %v6713_v12  ;;  %2897 = vmatmul.bf16.gmra.mxu3 %v6725_v48  ;;  %v2730_v29 = vadd.f32 %v6730_v61, %v2538_v34  ;;  %v3083_v12 = vshrl.u32 %v2950_v8, 16  ;;  %v3403_v48 = vunpack.c.l.b16 %v3068_v28  ;;  %v5331_v28 = vld [vmem:[#allocation2 + $0x114] sm:$0xff] }
 0x3fe   : > { %v3091_v42 = vrot.slane %v3089_v36, 5 }
 0x3ff   : > { %v3085_v57 = vrot.slane %v3083_v12, 4  ;;  %v6777_v54 = vpack.c.b16 %v3403_v48, %v3402_v13  ;;  %v3077_v12 = vrot.slane %v3076_v41, 4  ;;  %v2952_v48 = vld [vmem:[#allocation2 + $0x44] sm:$0xf] }
 0x400   : > { %v2858_v39 = vpop.f32.mrf.mxu3 }
 0x401   : > { %v6771_v61 = vadd.f32 %v2858_v39, %v6743_v21  ;;  %v2678_v46 = vpop.f32.mrf.mxu2  ;;  %v3399_v21 = vunpack.c.l.b16 %v3020_v7  ;;  %v3086_v52 = vor.u32 %v3085_v57, %v3081_v33  ;;  %v3082_v38 = vsel %vm6732_vm10, %v3077_v12, %v3081_v33 }
 0x402   : > { %v2481_v56 = vpop.f32.mrf.mxu1  ;;  %v3404_v14 = vunpack.c.l.b16 %v3082_v38 }
 0x403   : > { %v2539_v58 = vadd.f32 %v2481_v56, %v2257_v2  ;;  %v3430_v10 = vpack.c.b16 %v3399_v21, %v3398_v40  ;;  %v3087_v4 = vrot.slane %v3086_v52, 4  ;;  %v3103_v2 = vshll.u32 %v2953_v43, 16 }
 0x404   : > { %v3113_v52 = vshll.u32 %v2954_v23, 16 }
 0x405   : > { %v2731_v34 = vadd.f32 %v6750_v27, %v2539_v58  ;;  %v3092_v27 = vsel %vm6732_vm10, %v3087_v4, %v3091_v42  ;;  %v3094_v58 = vshrl.u32 %v2952_v48, 16  ;;  %v3105_v35 = vrot.slane %v3103_v2, 5 }
 0x406   : > { %3737 = vmatmul.bf16.gmra.mxu2 %v6777_v54  ;;  %v3405_v13 = vunpack.c.l.b16 %v3092_v27  ;;  %v3115_v42 = vrot.slane %v3113_v52, 5 }
 0x407   : > { %v3096_v33 = vrot.slane %v3094_v58, 4 }
 0x408   : > { %v2860_v47 = vpop.f32.mrf.mxu3  ;;  %v6794_v21 = vpack.c.b16 %v3405_v13, %v3404_v14  ;;  %v2957_v14 = vld [vmem:[#allocation2 + $0x5c] sm:$0x1] }
 0x409   : > { %v6781_v8 = vadd.f32 %v2860_v47, %v2729_v16  ;;  %v2681_v18 = vpop.f32.mrf.mxu2  ;;  %v5405_v16 = vld [vmem:[#allocation9 + $0x8] sm:$0xff]  ;;  %v3137_v52 = vshll.u32 %v2957_v14, 16 }
 0x40a   : > { %v2484_v45 = vpop.f32.mrf.mxu1  ;;  %4217 = vmatpush.bf16.msrb.mxu0 %v5405_v16  ;;  %v2955_v16 = vld [vmem:[#allocation2 + $0x54] sm:$0xf] }
 0x40b   : > { %v2540_v20 = vadd.f32 %v2484_v45, %v6605_v51  ;;  %v3107_v51 = vshrl.u32 %v2953_v43, 16  ;;  %v2956_v43 = vld [vmem:[#allocation2 + $0x58] sm:$0xf]  ;;  %v3118_v58 = vshrl.u32 %v2955_v16, 16 }
 0x40c   : > { %v3127_v2 = vshll.u32 %v2956_v43, 16 }
 0x40d   : > { %2902 = vmatmul.bf16.gmra.mxu3 %v5331_v28  ;;  %3518 = vmatmul.bf16.vlgmr.msrb.gmra.mxu1 %v3430_v10  ;;  %v2732_v39 = vadd.f32 %v6757_v11, %v2540_v20  ;;  %v3097_v11 = vshll.u32 %v2952_v48, 16  ;;  %v3109_v37 = vrot.slane %v3107_v51, 4  ;;  %v7250_v48 = vld [vmem:[#allocation17_spill] sm:$0xff] }
 0x40f   : > { %v3099_v36 = vrot.slane %v3097_v11, 5  ;;  %v3110_v49 = vor.u32 %v3109_v37, %v3105_v35  ;;  %v3121_v11 = vshll.u32 %v2955_v16, 16 }
 0x410   : > { %v2863_v56 = vpop.f32.mrf.mxu3 }
 0x411   : > { %v6792_v7 = vadd.f32 %v2863_v56, %v2730_v29  ;;  %v2683_v17 = vpop.f32.mrf.mxu2  ;;  %v3100_v41 = vor.u32 %v3099_v36, %v3096_v33  ;;  %v3111_v4 = vrot.slane %v3110_v49, 4  ;;  %v3123_v36 = vrot.slane %v3121_v11, 5 }
 0x412   : > { %v2486_v57 = vpop.f32.mrf.mxu1 }
 0x413   : > { %v2541_v40 = vadd.f32 %v2486_v57, %v2259_v6  ;;  %v3101_v12 = vrot.slane %v3100_v41, 4 }
 0x415   : > { %v2733_v47 = vadd.f32 %v2678_v46, %v2541_v40  ;;  %v3116_v46 = vsel %vm6732_vm10, %v3111_v4, %v3115_v42  ;;  %v3106_v38 = vsel %vm6732_vm10, %v3101_v12, %v3105_v35  ;;  %v3129_v40 = vrot.slane %v3127_v2, 5  ;;  %v2959_v12 = vld [vmem:[#allocation2 + $0x68] sm:$0xf] }
 0x416   : > { %3742 = vmatmul.bf16.gmra.mxu2 %v6794_v21  ;;  %v3407_v56 = vunpack.c.l.b16 %v3116_v46  ;;  %v3120_v35 = vrot.slane %v3118_v58, 4 }
 0x418   : > { %v2865_v29 = vpop.f32.mrf.mxu3  ;;  %v3124_v42 = vor.u32 %v3123_v36, %v3120_v35 }
 0x419   : > { %v6797_v28 = vadd.f32 %v2865_v29, %v2731_v34  ;;  %v2686_v10 = vpop.f32.mrf.mxu2  ;;  %v7249_v34 = vld [vmem:[#allocation18_spill] sm:$0xff] }
 0x41a   : > { %v2489_v45 = vpop.f32.mrf.mxu1  ;;  %v2030_v44 = vadd.f32 %v7250_v48, %v7249_v34  ;;  %v3125_v46 = vrot.slane %v3124_v42, 4  ;;  %v2958_v34 = vld [vmem:[#allocation2 + $0x64] sm:$0xf] }
 0x41b   : > { %v2542_v20 = vadd.f32 %v2489_v45, %v6627_v5  ;;  %v3131_v5 = vshrl.u32 %v2956_v43, 16  ;;  %v3139_v45 = vrot.slane %v3137_v52, 5  ;;  %v3142_v58 = vshrl.u32 %v2958_v34, 16 }
 0x41c   : > { %v3145_v11 = vshll.u32 %v2958_v34, 16 }
 0x41d   : > { %3523 = vmatmul.bf16.gmra.mxu1 %v6752_v15  ;;  %3946 = vmatmul.bf16.vlgmr.msra.gmra.mxu3 %v6777_v54  ;;  %v2734_v27 = vadd.f32 %v2681_v18, %v2542_v20  ;;  %v2261_v15 = vadd.f32 %v6637_v22, %v2030_v44  ;;  %v3406_v18 = vunpack.c.l.b16 %v3106_v38  ;;  %v3133_v37 = vrot.slane %v3131_v5, 4 }
 0x41e   : > { %v3130_v44 = vsel %vm6732_vm10, %v3125_v46, %v3129_v40  ;;  %v3151_v38 = vshll.u32 %v2959_v12, 16  ;;  %v3147_v35 = vrot.slane %v3145_v11, 5 }
 0x41f   : > { %v6811_v33 = vpack.c.b16 %v3407_v56, %v3406_v18  ;;  %v3134_v22 = vor.u32 %v3133_v37, %v3129_v40  ;;  %v2960_v18 = vld [vmem:[#allocation2 + $0x6c] sm:$0x1]  ;;  %v3144_v40 = vrot.slane %v3142_v58, 4 }
 0x420   : > { %v2868_v51 = vpop.f32.mrf.mxu3  ;;  %v3161_v36 = vshll.u32 %v2960_v18, 16  ;;  %v7256_v58 = vld [vmem:[#allocation26_spill] sm:$0xff] }
 0x421   : > { %v6809_v13 = vadd.f32 %v2868_v51, %v2732_v39  ;;  %v2688_v6 = vpop.f32.mrf.mxu2  ;;  %v3135_v43 = vrot.slane %v3134_v22, 4  ;;  %v7252_v51 = vld [vmem:[#allocation22_spill] sm:$0xff] }
 0x422   : > { %v2491_v57 = vpop.f32.mrf.mxu1 }
 0x423   : > { %v2543_v23 = vadd.f32 %v2491_v57, %v2261_v15 }
 0x425   : > { %v2735_v49 = vadd.f32 %v2683_v17, %v2543_v23  ;;  %v3140_v17 = vsel %vm6732_vm10, %v3135_v43, %v3139_v45  ;;  %v3153_v23 = vrot.slane %v3151_v38, 5  ;;  %v3148_v45 = vor.u32 %v3147_v35, %v3144_v40  ;;  %v7253_v43 = vld [vmem:[#allocation23_spill] sm:$0xff] }
 0x426   : > { %3747 = vmatmul.bf16.gmra.mxu2 %v6811_v33  ;;  %v3409_v5 = vunpack.c.l.b16 %v3140_v17  ;;  %v2962_v17 = vld [vmem:[#allocation2 + $0x78] sm:$0xf] }
 0x427   : > { %v3149_v34 = vrot.slane %v3148_v45, 4 }
 0x428   : > { %v2870_v39 = vpop.f32.mrf.mxu3 }
 0x429   : > { %v6814_v29 = vadd.f32 %v2870_v39, %v2733_v47  ;;  %v2691_v41 = vpop.f32.mrf.mxu2  ;;  %v7251_v47 = vld [vmem:[#allocation19_spill] sm:$0xff] }
 0x42a   : > { %v2494_v20 = vpop.f32.mrf.mxu1  ;;  %v2035_v48 = vadd.f32 %v7251_v47, %v6635_v0 }
 0x42b   : > { %v2544_v4 = vadd.f32 %v2494_v20, %v6644_v53  ;;  %v3155_v53 = vshrl.u32 %v2959_v12, 16  ;;  %v3163_v20 = vrot.slane %v3161_v36, 5 }
 0x42d   : > { %3528 = vmatmul.bf16.gmra.mxu1 %v6777_v54  ;;  %3951 = vmatmul.bf16.gmra.mxu3 %v6794_v21  ;;  %v2736_v16 = vadd.f32 %v2686_v10, %v2544_v4  ;;  %v2263_v54 = vadd.f32 %v7252_v51, %v2035_v48  ;;  %v3408_v10 = vunpack.c.l.b16 %v3130_v44  ;;  %v3157_v0 = vrot.slane %v3155_v53, 4  ;;  %v2961_v48 = vld [vmem:[#allocation2 + $0x74] sm:$0xf]  ;;  %v7255_v44 = vld [vmem:[#allocation20_spill] sm:$0xff] }
 0x42e   : > { %v3154_v53 = vsel %vm6732_vm10, %v3149_v34, %v3153_v23  ;;  %v3169_v18 = vshll.u32 %v2961_v48, 16 }
 0x42f   : > { %v6828_v37 = vpack.c.b16 %v3409_v5, %v3408_v10  ;;  %v3158_v22 = vor.u32 %v3157_v0, %v3153_v23  ;;  %v3179_v5 = vshrl.u32 %v2962_v17, 16  ;;  %v3166_v10 = vshrl.u32 %v2961_v48, 16  ;;  %v2963_v0 = vld [vmem:[#allocation2 + $0x7c] sm:$0x1] }
 0x430   : > { %v2873_v2 = vpop.f32.mrf.mxu3  ;;  %v3185_v45 = vshll.u32 %v2963_v0, 16 }
 0x431   : > { %v6826_v56 = vadd.f32 %v2873_v2, %v2734_v27  ;;  %v2693_v15 = vpop.f32.mrf.mxu2  ;;  %v3159_v46 = vrot.slane %v3158_v22, 4  ;;  %v3175_v2 = vshll.u32 %v2962_v17, 16  ;;  %v3181_v36 = vrot.slane %v3179_v5, 4  ;;  %v7258_v5 = vld [vmem:[#allocation25_spill] sm:$0xff] }
 0x432   : > { %v2496_v57 = vpop.f32.mrf.mxu1  ;;  %v3168_v23 = vrot.slane %v3166_v10, 4  ;;  %v3187_v17 = vrot.slane %v3185_v45, 5  ;;  %v2966_v45 = vld [vmem:[#allocation2 + $0x8c] sm:$0x1] }
 0x433   : > { %v2545_v14 = vadd.f32 %v2496_v57, %v2263_v54  ;;  %v3177_v35 = vrot.slane %v3175_v2, 5  ;;  %v5404_v2 = vld [vmem:[#allocation9] sm:$0xff] }
 0x434   : > { %4218 = vmatpush.bf16.msrb.mxu0 %v5404_v2 }
 0x435   : > { %v2737_v52 = vadd.f32 %v2688_v6, %v2545_v14  ;;  %v3164_v6 = vsel %vm6732_vm10, %v3159_v46, %v3163_v20 }
 0x436   : > { %3752 = vmatmul.bf16.gmra.mxu2 %v6828_v37  ;;  %v3411_v54 = vunpack.c.l.b16 %v3164_v6  ;;  %v7257_v6 = vld [vmem:[#allocation27_spill] sm:$0xff] }
 0x438   : > { %v2875_v27 = vpop.f32.mrf.mxu3 }
 0x439   : > { %v6831_v39 = vadd.f32 %v2875_v27, %v2735_v49  ;;  %v2696_v42 = vpop.f32.mrf.mxu2  ;;  %v7254_v49 = vld [vmem:[#allocation21_spill] sm:$0xff]  ;;  %v3171_v27 = vrot.slane %v3169_v18, 5 }
 0x43a   : > { %v2499_v4 = vpop.f32.mrf.mxu1  ;;  %v2040_v38 = vadd.f32 %v7255_v44, %v7254_v49  ;;  %v2965_v44 = vld [vmem:[#allocation2 + $0x88] sm:$0xf] }
 0x43b   : > { %v2546_v12 = vadd.f32 %v2499_v4, %v7253_v43  ;;  %v3182_v4 = vor.u32 %v3181_v36, %v3177_v35  ;;  %v3172_v46 = vor.u32 %v3171_v27, %v3168_v23  ;;  %v3203_v10 = vshrl.u32 %v2965_v44, 16 }
 0x43d   : > { %3533 = vmatmul.bf16.gmra.mxu1 %v6794_v21  ;;  %3956 = vmatmul.bf16.gmra.mxu3 %v6811_v33  ;;  %v2738_v47 = vadd.f32 %v2691_v41, %v2546_v12  ;;  %v2265_v21 = vadd.f32 %v7256_v58, %v2040_v38  ;;  %v3410_v41 = vunpack.c.l.b16 %v3154_v53  ;;  %v3183_v49 = vrot.slane %v3182_v4, 4 }
 0x43e   : > { %v3173_v38 = vrot.slane %v3172_v46, 4  ;;  %v3205_v46 = vrot.slane %v3203_v10, 4 }
 0x43f   : > { %v6845_v22 = vpack.c.b16 %v3411_v54, %v3410_v41 }
 0x440   : > { %v2878_v51 = vpop.f32.mrf.mxu3  ;;  %v3178_v58 = vsel %vm6732_vm10, %v3173_v38, %v3177_v35 }
 0x441   : > { %v6843_v11 = vadd.f32 %v2878_v51, %v2736_v16  ;;  %v2698_v57 = vpop.f32.mrf.mxu2  ;;  %v7259_v51 = vld [vmem:[#allocation24_spill] sm:$0xff]  ;;  %v3412_v27 = vunpack.c.l.b16 %v3178_v58 }
 0x442   : > { %v2501_v14 = vpop.f32.mrf.mxu1  ;;  %v2045_v54 = vadd.f32 %v7259_v51, %v7258_v5  ;;  %v7261_v5 = vld [vmem:[#allocation29_spill] sm:$0xff]  ;;  %v2968_v58 = vld [vmem:[#allocation2 + $0x98] sm:$0xf] }
 0x443   : > { %v2547_v40 = vadd.f32 %v2501_v14, %v2265_v21  ;;  %v3199_v21 = vshll.u32 %v2965_v44, 16  ;;  %v7260_v14 = vld [vmem:[#allocation28_spill] sm:$0xff] }
 0x444   : > { %v2267_v41 = vadd.f32 %v7260_v14, %v2045_v54  ;;  %v3227_v14 = vshrl.u32 %v2968_v58, 16 }
 0x445   : > { %v2739_v20 = vadd.f32 %v2693_v15, %v2547_v40  ;;  %v3188_v15 = vsel %vm6732_vm10, %v3183_v49, %v3187_v17 }
 0x446   : > { %3757 = vmatmul.bf16.gmra.mxu2 %v6845_v22 }
 0x448   : > { %v2880_v16 = vpop.f32.mrf.mxu3 }
 0x449   : > { %v6848_v43 = vadd.f32 %v2880_v16, %v2737_v52  ;;  %v2701_v12 = vpop.f32.mrf.mxu2  ;;  %v2964_v52 = vld [vmem:[#allocation2 + $0x84] sm:$0xf]  ;;  %v3201_v16 = vrot.slane %v3199_v21, 5 }
 0x44a   : > { %v2504_v34 = vpop.f32.mrf.mxu1  ;;  %v3190_v36 = vshrl.u32 %v2964_v52, 16 }
 0x44b   : > { %v2548_v48 = vadd.f32 %v2504_v34, %v7257_v6  ;;  %v3209_v6 = vshll.u32 %v2966_v45, 16  ;;  %v3206_v49 = vor.u32 %v3205_v46, %v3201_v16  ;;  %v2969_v46 = vld [vmem:[#allocation2 + $0x9c] sm:$0x1] }
 0x44c   : > { %v3192_v35 = vrot.slane %v3190_v36, 4 }
 0x44d   : > { %3538 = vmatmul.bf16.gmra.mxu1 %v6811_v33  ;;  %3961 = vmatmul.bf16.gmra.mxu3 %v6828_v37  ;;  %v2740_v53 = vadd.f32 %v2696_v42, %v2548_v48  ;;  %v3413_v33 = vunpack.c.l.b16 %v3188_v15  ;;  %v3193_v42 = vshll.u32 %v2964_v52, 16  ;;  %v3211_v2 = vrot.slane %v3209_v6, 5 }
 0x44e   : > { %v3207_v54 = vrot.slane %v3206_v49, 4 }
 0x44f   : > { %v6862_v17 = vpack.c.b16 %v3413_v33, %v3412_v27  ;;  %v3195_v34 = vrot.slane %v3193_v42, 5  ;;  %v3223_v33 = vshll.u32 %v2968_v58, 16 }
 0x450   : > { %v2883_v18 = vpop.f32.mrf.mxu3 }
 0x451   : > { %v6860_v0 = vadd.f32 %v2883_v18, %v2738_v47  ;;  %v2703_v40 = vpop.f32.mrf.mxu2  ;;  %v3196_v15 = vor.u32 %v3195_v34, %v3192_v35  ;;  %v2967_v18 = vld [vmem:[#allocation2 + $0x94] sm:$0xf]  ;;  %v7262_v35 = vld [vmem:[#allocation30_spill] sm:$0xff]  ;;  %v3225_v6 = vrot.slane %v3223_v33, 5 }
 0x452   : > { %v2506_v23 = vpop.f32.mrf.mxu1  ;;  %v3214_v27 = vshrl.u32 %v2967_v18, 16 }
 0x453   : > { %v2549_v4 = vadd.f32 %v2506_v23, %v2267_v41  ;;  %v3197_v21 = vrot.slane %v3196_v15, 4  ;;  %v3233_v15 = vshll.u32 %v2969_v46, 16 }
 0x455   : > { %v2741_v48 = vadd.f32 %v2698_v57, %v2549_v4  ;;  %v3212_v57 = vsel %vm6732_vm10, %v3207_v54, %v3211_v2  ;;  %v3235_v58 = vrot.slane %v3233_v15, 5 }
 0x456   : > { %3762 = vmatmul.bf16.gmra.mxu2 %v6862_v17  ;;  %v3415_v36 = vunpack.c.l.b16 %v3212_v57 }
 0x458   : > { %v2885_v47 = vpop.f32.mrf.mxu3 }
 0x459   : > { %v6865_v44 = vadd.f32 %v2885_v47, %v2739_v20  ;;  %v2706_v38 = vpop.f32.mrf.mxu2  ;;  %v3202_v20 = vsel %vm6732_vm10, %v3197_v21, %v3201_v16  ;;  %v3216_v47 = vrot.slane %v3214_v27, 4 }
 0x45a   : > { %v2509_v52 = vpop.f32.mrf.mxu1  ;;  %v3414_v4 = vunpack.c.l.b16 %v3202_v20  ;;  %v2971_v20 = vld [vmem:[#allocation2 + $0xa8] sm:$0xf] }
 0x45b   : > { %v2550_v51 = vadd.f32 %v2509_v52, %v7261_v5  ;;  %v3251_v27 = vshrl.u32 %v2971_v20, 16 }
 0x45c   : > { %v6877_v49 = vpack.c.b16 %v3415_v36, %v3414_v4  ;;  %v3247_v36 = vshll.u32 %v2971_v20, 16 }
 0x45d   : > { %3543 = vmatmul.bf16.gmra.mxu1 %v6828_v37  ;;  %3966 = vmatmul.bf16.gmra.mxu3 %v6845_v22  ;;  %v2742_v10 = vadd.f32 %v2701_v12, %v2550_v51  ;;  %v3217_v37 = vshll.u32 %v2967_v18, 16  ;;  %v3229_v12 = vrot.slane %v3227_v14, 4 }
 0x45f   : > { %v3219_v16 = vrot.slane %v3217_v37, 5 }
 0x460   : > { %v2888_v41 = vpop.f32.mrf.mxu3 }
 0x461   : > { %v6874_v42 = vadd.f32 %v2888_v41, %v2740_v53  ;;  %v2708_v23 = vpop.f32.mrf.mxu2  ;;  %v3230_v53 = vor.u32 %v3229_v12, %v3225_v6  ;;  %v3220_v54 = vor.u32 %v3219_v16, %v3216_v47  ;;  %v2970_v41 = vld [vmem:[#allocation2 + $0xa4] sm:$0xf]  ;;  %v2972_v12 = vld [vmem:[#allocation2 + $0xac] sm:$0x1]  ;;  %v3249_v16 = vrot.slane %v3247_v36, 5 }
 0x462   : > { %v2511_v45 = vpop.f32.mrf.mxu1  ;;  %v3238_v46 = vshrl.u32 %v2970_v41, 16 }
 0x463   : > { %v2551_v34 = vadd.f32 %v2511_v45, %v7262_v35  ;;  %v3231_v18 = vrot.slane %v3230_v53, 4  ;;  %v3221_v33 = vrot.slane %v3220_v54, 4 }
 0x464   : > { %v3240_v53 = vrot.slane %v3238_v46, 4 }
 0x465   : > { %v2743_v2 = vadd.f32 %v2703_v40, %v2551_v34  ;;  %v3236_v40 = vsel %vm6732_vm10, %v3231_v18, %v3235_v58 }
 0x466   : > { %3767 = vmatmul.bf16.gmra.mxu2 %v6877_v49  ;;  %v3417_v45 = vunpack.c.l.b16 %v3236_v40 }
 0x468   : > { %v2890_v52 = vpop.f32.mrf.mxu3 }
 0x469   : > { %v6880_v5 = vadd.f32 %v2890_v52, %v2741_v48  ;;  %v2711_v51 = vpop.f32.mrf.mxu2  ;;  %v3226_v48 = vsel %vm6732_vm10, %v3221_v33, %v3225_v6  ;;  %v3257_v52 = vshll.u32 %v2972_v12, 16 }
 0x46a   : > { %v2514_v21 = vpop.f32.mrf.mxu1  ;;  %v3416_v34 = vunpack.c.l.b16 %v3226_v48 }
 0x46b   : > { %v2552_v57 = vadd.f32 %v2514_v21, %v6668_v19  ;;  %v3259_v20 = vrot.slane %v3257_v52, 5 }
 0x46c   : > { %v6892_v15 = vpack.c.b16 %v3417_v45, %v3416_v34 }
 0x46d   : > { %3548 = vmatmul.bf16.gmra.mxu1 %v6845_v22  ;;  %3971 = vmatmul.bf16.gmra.mxu3 %v6862_v17  ;;  %v2744_v14 = vadd.f32 %v2706_v38, %v2552_v57  ;;  %v3241_v22 = vshll.u32 %v2970_v41, 16  ;;  %v3253_v38 = vrot.slane %v3251_v27, 4  ;;  %v2974_v41 = vld [vmem:[#allocation2 + $0xb8] sm:$0xf] }
 0x46e   : > { %v3275_v45 = vshrl.u32 %v2974_v41, 16 }
 0x46f   : > { %v3243_v6 = vrot.slane %v3241_v22, 5 }
 0x470   : > { %v2893_v37 = vpop.f32.mrf.mxu3 }
 0x471   : > { %v6889_v19 = vadd.f32 %v2893_v37, %v2742_v10  ;;  %v2713_v4 = vpop.f32.mrf.mxu2  ;;  %v3254_v10 = vor.u32 %v3253_v38, %v3249_v16  ;;  %v3244_v18 = vor.u32 %v3243_v6, %v3240_v53  ;;  %v3271_v37 = vshll.u32 %v2974_v41, 16  ;;  %v2975_v38 = vld [vmem:[#allocation2 + $0xbc] sm:$0x1] }
 0x472   : > { %v2516_v35 = vpop.f32.mrf.mxu1  ;;  %v3277_v6 = vrot.slane %v3275_v45, 4 }
 0x473   : > { %v2553_v47 = vadd.f32 %v2516_v35, %v6670_v24  ;;  %v3255_v40 = vrot.slane %v3254_v10, 4 }
 0x475   : > { %v2745_v54 = vadd.f32 %v2708_v23, %v2553_v47  ;;  %v3245_v23 = vrot.slane %v3244_v18, 4  ;;  %v3260_v48 = vsel %vm6732_vm10, %v3255_v40, %v3259_v20 }
 0x476   : > { %3772 = vmatmul.bf16.gmra.mxu2 %v6892_v15  ;;  %v3419_v22 = vunpack.c.l.b16 %v3260_v48  ;;  %v2977_v48 = vld [vmem:[#allocation2 + $0xc8] sm:$0xf] }
 0x477   : > { %v3250_v27 = vsel %vm6732_vm10, %v3245_v23, %v3249_v16  ;;  %v3299_v45 = vshrl.u32 %v2977_v48, 16 }
 0x478   : > { %v2895_v58 = vpop.f32.mrf.mxu3  ;;  %v3418_v47 = vunpack.c.l.b16 %v3250_v27  ;;  %v2976_v27 = vld [vmem:[#allocation2 + $0xc4] sm:$0xf] }
 0x479   : > { %v6895_v21 = vadd.f32 %v2895_v58, %v2743_v2  ;;  %v6897_v57 = vpop.f32.mrf.mxu2  ;;  %v2973_v2 = vld [vmem:[#allocation2 + $0xb4] sm:$0xf]  ;;  %v3281_v58 = vshll.u32 %v2975_v38, 16 }
 0x47a   : > { %v2519_v33 = vpop.f32.mrf.mxu1  ;;  %v3265_v34 = vshll.u32 %v2973_v2, 16  ;;  %v6911_v52 = vpack.c.b16 %v3419_v22, %v3418_v47 }
 0x47b   : > { %v2554_v24 = vadd.f32 %v2519_v33, %v6676_v31  ;;  %v3283_v41 = vrot.slane %v3281_v58, 5 }
 0x47c   : > { %v3267_v10 = vrot.slane %v3265_v34, 5 }
 0x47d   : > { %3553 = vmatmul.bf16.gmra.mxu1 %v6862_v17  ;;  %3976 = vmatmul.bf16.gmra.mxu3 %v6877_v49  ;;  %v2746_v36 = vadd.f32 %v2711_v51, %v2554_v24  ;;  %v3262_v17 = vshrl.u32 %v2973_v2, 16  ;;  %v3273_v51 = vrot.slane %v3271_v37, 5  ;;  %v3295_v37 = vshll.u32 %v2977_v48, 16 }
 0x47f   : > { %v3264_v16 = vrot.slane %v3262_v17, 4 }
 0x480   : > { %v2898_v46 = vpop.f32.mrf.mxu3 }
 0x481   : > { %v6906_v31 = vadd.f32 %v2898_v46, %v2744_v14  ;;  %v6908_v35 = vpop.f32.mrf.mxu2  ;;  %v3278_v14 = vor.u32 %v3277_v6, %v3273_v51  ;;  %v3268_v40 = vor.u32 %v3267_v10, %v3264_v16  ;;  %v3297_v6 = vrot.slane %v3295_v37, 5 }
 0x482   : > { %v2521_v12 = vpop.f32.mrf.mxu1  ;;  %v3301_v16 = vrot.slane %v3299_v45, 4  ;;  %v2979_v45 = vld [vmem:[#allocation2 + $0xd4] sm:$0xf] }
 0x483   : > { %v2555_v53 = vadd.f32 %v2521_v12, %v6678_v9  ;;  %v3279_v9 = vrot.slane %v3278_v14, 4  ;;  %v3269_v2 = vrot.slane %v3268_v40, 4  ;;  %v3286_v12 = vshrl.u32 %v2976_v27, 16 }
 0x485   : > { %v2747_v18 = vadd.f32 %v2713_v4, %v2555_v53  ;;  %v3284_v4 = vsel %vm6732_vm10, %v3279_v9, %v3283_v41  ;;  %v2978_v53 = vld [vmem:[#allocation2 + $0xcc] sm:$0x1]  ;;  %v3288_v58 = vrot.slane %v3286_v12, 4 }
 0x486   : > { %3777 = vmatmul.bf16.gmra.mxu2 %v6911_v52  ;;  %v3421_v22 = vunpack.c.l.b16 %v3284_v4 }
 0x488   : > { %v2900_v20 = vpop.f32.mrf.mxu3 }
 0x489   : > { %v6914_v33 = vadd.f32 %v2900_v20, %v2745_v54  ;;  %v6916_v24 = vpop.f32.mrf.mxu2  ;;  %v3274_v54 = vsel %vm6732_vm10, %v3269_v2, %v3273_v51  ;;  %v3305_v51 = vshll.u32 %v2978_v53, 16  ;;  %v3302_v20 = vor.u32 %v3301_v16, %v3297_v6 }
 0x48a   : > { %v3519_v23 = vpop.f32.mrf.mxu1  ;;  %v3420_v38 = vunpack.c.l.b16 %v3274_v54  ;;  %v3310_v53 = vshrl.u32 %v2979_v45, 16  ;;  %v3313_v16 = vshll.u32 %v2979_v45, 16 }
 0x48b   : > { %v3307_v48 = vrot.slane %v3305_v51, 5  ;;  %v3303_v4 = vrot.slane %v3302_v20, 4  ;;  %v2981_v51 = vld [vmem:[#allocation2 + $0xdc] sm:$0x1] }
 0x48c   : > { %v6928_v10 = vpack.c.b16 %v3421_v22, %v3420_v38 }
 0x48d   : > { %3558 = vmatmul.bf16.gmra.mxu1 %v6877_v49  ;;  %3981 = vmatmul.bf16.gmra.mxu3 %v6892_v15  ;;  %v3289_v49 = vshll.u32 %v2976_v27, 16  ;;  %v2980_v27 = vld [vmem:[#allocation2 + $0xd8] sm:$0xf]  ;;  %v3308_v37 = vsel %vm6732_vm10, %v3303_v4, %v3307_v48  ;;  %v3315_v48 = vrot.slane %v3313_v16, 5  ;;  %v2983_v16 = vld [vmem:[#allocation2 + $0xe8] sm:$0xf] }
 0x48e   : > { %v3319_v22 = vshll.u32 %v2980_v27, 16  ;;  %v3323_v12 = vshrl.u32 %v2980_v27, 16  ;;  %v3423_v38 = vunpack.c.l.b16 %v3308_v37  ;;  %v6951_v27 = vld [vmem:[%s7203_s4] ss:$0 sm:$0xff] }
 0x48f   : > { %v3291_v14 = vrot.slane %v3289_v49, 5 }
 0x490   : > { %v2903_v46 = vpop.f32.mrf.mxu3 }
 0x491   : > { %v6924_v17 = vadd.f32 %v2903_v46, %v2746_v36  ;;  %v6926_v34 = vpop.f32.mrf.mxu2  ;;  %v3292_v9 = vor.u32 %v3291_v14, %v3288_v58  ;;  %v3599_v46 = vadd.f32 %v3519_v23, %v6684_v59  ;;  %v3325_v59 = vrot.slane %v3323_v12, 4 }
 0x492   : > { %v3521_v47 = vpop.f32.mrf.mxu1 }
 0x493   : > { %v3293_v54 = vrot.slane %v3292_v9, 4  ;;  %v3600_v20 = vadd.f32 %v3521_v47, %v6686_v50  ;;  %v3321_v9 = vrot.slane %v3319_v22, 5 }
 0x495   : > { %v3814_v37 = vadd.f32 %v6908_v35, %v3600_v20  ;;  %v3326_v50 = vor.u32 %v3325_v59, %v3321_v9 }
 0x496   : > { %3782 = vmatmul.bf16.gmra.mxu2 %v6928_v10 }
 0x498   : > { %v2905_v40 = vpop.f32.mrf.mxu3 }
 0x499   : > { %v6931_v36 = vadd.f32 %v2905_v40, %v2747_v18  ;;  %v6933_v41 = vpop.f32.mrf.mxu2  ;;  %v3298_v18 = vsel %vm6732_vm10, %v3293_v54, %v3297_v6  ;;  %v3813_v40 = vadd.f32 %v6897_v57, %v3599_v46  ;;  %v3312_v6 = vrot.slane %v3310_v53, 4 }
 0x49a   : > { %v3524_v2 = vpop.f32.mrf.mxu1  ;;  %v3422_v14 = vunpack.c.l.b16 %v3298_v18  ;;  %v3329_v54 = vshll.u32 %v2981_v51, 16 }
 0x49b   : > { %v3316_v57 = vor.u32 %v3315_v48, %v3312_v6  ;;  %v3601_v59 = vadd.f32 %v3524_v2, %v6692_v32  ;;  %v3343_v48 = vshll.u32 %v2983_v16, 16 }
 0x49c   : > { %v6946_v23 = vpack.c.b16 %v3423_v38, %v3422_v14  ;;  %v3331_v22 = vrot.slane %v3329_v54, 5  ;;  %v3327_v38 = vrot.slane %v3326_v50, 4 }
 0x49d   : > { %3563 = vmatmul.bf16.gmra.mxu1 %v6892_v15  ;;  %3986 = vmatmul.bf16.gmra.mxu3 %v6911_v52  ;;  %v3317_v53 = vrot.slane %v3316_v57, 4 }
 0x49e   : > { %v3332_v35 = vsel %vm6732_vm10, %v3327_v38, %v3331_v22 }
 0x49f   : > { %v3322_v20 = vsel %vm6732_vm10, %v3317_v53, %v3321_v9  ;;  %v3815_v9 = vadd.f32 %v6916_v24, %v3601_v59 }
 0x4a0   : > { %v3947_v49 = vpop.f32.mrf.mxu3 }
 0x4a1   : > { %v6942_v58 = vpop.f32.mrf.mxu2  ;;  %v4027_v4 = vadd.f32 %v3947_v49, %v3813_v40  ;;  %v2982_v40 = vld [vmem:[#allocation2 + $0xe4] sm:$0xf] }
 0x4a2   : > { %v3526_v15 = vpop.f32.mrf.mxu1 }
 0x4a3   : > { %v4063_v45 = vadd.f32 %v6951_v27, %v4027_v4  ;;  %v3347_v4 = vshrl.u32 %v2983_v16, 16  ;;  %v3602_v22 = vadd.f32 %v3526_v15, %v6694_v3 }
 0x4a5   : > { %v4095_v14 = vmax.f32 %v4063_v45, 0.0  ;;  %v3424_v45 = vunpack.c.l.b16 %v3322_v20  ;;  %v3349_v38 = vrot.slane %v3347_v4, 4 }
 0x4a6   : > { %3787 = vmatmul.bf16.gmra.mxu2 %v6946_v23 }
 0x4a8   : > { %v3949_v47 = vpop.f32.mrf.mxu3 }
 0x4a9   : > { %v4028_v46 = vadd.f32 %v3949_v47, %v3814_v37  ;;  %v6956_v18 = vpop.f32.mrf.mxu2  ;;  %v3425_v37 = vunpack.c.l.b16 %v3332_v35  ;;  %v3337_v47 = vshll.u32 %v2982_v40, 16 }
 0x4aa   : > { %v3529_v12 = vpop.f32.mrf.mxu1 }
 0x4ab   : > { %v4064_v49 = vadd.f32 %v6951_v27, %v4028_v46  ;;  %v2984_v46 = vld [vmem:[#allocation2 + $0xec] sm:$0x1]  ;;  %v6970_v32 = vpack.c.b16 %v3425_v37, %v3424_v45  ;;  %v3339_v16 = vrot.slane %v3337_v47, 5  ;;  %v2985_v45 = vld [vmem:[#allocation2 + $0xf4] sm:$0xf] }
 0x4ad   : > { %v4096_v51 = vmax.f32 %v4064_v49, 0.0  ;;  %3568 = vmatmul.bf16.gmra.mxu1 %v6911_v52  ;;  %3991 = vmatmul.bf16.gmra.mxu3 %v6928_v10  ;;  %v3334_v52 = vshrl.u32 %v2982_v40, 16  ;;  %v3345_v49 = vrot.slane %v3343_v48, 5 }
 0x4af   : > { %v4127_v6 = vpack.c.bf16 %v4096_v51, %v4095_v14  ;;  %v3336_v53 = vrot.slane %v3334_v52, 4  ;;  %v3353_v14 = vshll.u32 %v2984_v46, 16  ;;  %v3816_v51 = vadd.f32 %v6926_v34, %v3602_v22 }
 0x4b0   : > { %v3952_v54 = vpop.f32.mrf.mxu3  ;;  %v3350_v35 = vor.u32 %v3349_v38, %v3345_v49 }
 0x4b1   : > { %v6966_v50 = vpop.f32.mrf.mxu2  ;;  %4219 = vmatmul.bf16.vlgmr.msrb.gmra.mxu0 %v4127_v6  ;;  %v4029_v2 = vadd.f32 %v3952_v54, %v3815_v9  ;;  %v3340_v24 = vor.u32 %v3339_v16, %v3336_v53  ;;  %v3355_v15 = vrot.slane %v3353_v14, 5  ;;  %v2986_v54 = vld [vmem:[#allocation2 + $0xf8] sm:$0xf]  ;;  %v3603_v9 = vadd.f32 %v3529_v12, %v6700_v62 }
 0x4b2   : > { %v3531_v57 = vpop.f32.mrf.mxu1  ;;  %v3351_v4 = vrot.slane %v3350_v35, 4  ;;  %v3367_v46 = vshll.u32 %v2986_v54, 16  ;;  %v3371_v22 = vshrl.u32 %v2986_v54, 16  ;;  %v3358_v14 = vshrl.u32 %v2985_v45, 16  ;;  %v2987_v35 = vld [vmem:[#allocation2 + $0xfc] sm:$0x1] }
 0x4b3   : > { %v4065_v20 = vadd.f32 %v6951_v27, %v4029_v2  ;;  %v3341_v34 = vrot.slane %v3340_v24, 4  ;;  %v3817_v62 = vadd.f32 %v6933_v41, %v3603_v9  ;;  %v2988_v9 = vld [vmem:[#allocation2 + $0x104] sm:$0xf] }
 0x4b4   : > { %v3356_v47 = vsel %vm6732_vm10, %v3351_v4, %v3355_v15  ;;  %v3373_v24 = vrot.slane %v3371_v22, 4  ;;  %v3604_v15 = vadd.f32 %v3531_v57, %v6705_v26  ;;  %v3377_v4 = vshll.u32 %v2987_v35, 16 }
 0x4b5   : > { %v4097_v37 = vmax.f32 %v4065_v20, 0.0  ;;  %v3346_v2 = vsel %vm6732_vm10, %v3341_v34, %v3345_v49  ;;  %v3427_v16 = vunpack.c.l.b16 %v3356_v47  ;;  %v3635_v35 = vshll.u32 %v2988_v9, 16 }
 0x4b6   : > { %3792 = vmatmul.bf16.gmra.mxu2 %v6970_v32  ;;  %v3426_v20 = vunpack.c.l.b16 %v3346_v2  ;;  %v2989_v2 = vld [vmem:[#allocation2 + $0x108] sm:$0xf] }
 0x4b8   : > { %v3954_v40 = vpop.f32.mrf.mxu3  ;;  %v6989_v12 = vpack.c.b16 %v3427_v16, %v3426_v20  ;;  %v3641_v20 = vshll.u32 %v2989_v2, 16 }
 0x4b9   : > { %v4030_v6 = vadd.f32 %v3954_v40, %v3816_v51  ;;  %v6975_v3 = vpop.f32.mrf.mxu2  ;;  %v3361_v51 = vshll.u32 %v2985_v45, 16  ;;  %v3379_v45 = vrot.slane %v3377_v4, 5 }
 0x4ba   : > { %v3534_v59 = vpop.f32.mrf.mxu1 }
 0x4bb   : > { %v4066_v48 = vadd.f32 %v6951_v27, %v4030_v6  ;;  %v3369_v6 = vrot.slane %v3367_v46, 5  ;;  %v3363_v49 = vrot.slane %v3361_v51, 5  ;;  %v3632_v51 = vshrl.u32 %v2988_v9, 16 }
 0x4bd   : > { %v4098_v52 = vmax.f32 %v4066_v48, 0.0  ;;  %3573 = vmatmul.bf16.gmra.mxu1 %v6928_v10  ;;  %3996 = vmatmul.bf16.gmra.mxu3 %v6946_v23  ;;  %v3360_v48 = vrot.slane %v3358_v14, 4 }
 0x4bf   : > { %v4128_v38 = vpack.c.bf16 %v4098_v52, %v4097_v37  ;;  %v3374_v37 = vor.u32 %v3373_v24, %v3369_v6  ;;  %v3818_v52 = vadd.f32 %v6942_v58, %v3604_v15  ;;  %v3364_v47 = vor.u32 %v3363_v49, %v3360_v48 }
 0x4c0   : > { %v3957_v53 = vpop.f32.mrf.mxu3  ;;  %v3605_v24 = vadd.f32 %v3534_v59, %v6711_v30  ;;  %v3645_v48 = vshrl.u32 %v2989_v2, 16 }
 0x4c1   : > { %v6985_v10 = vpop.f32.mrf.mxu2  ;;  %4224 = vmatmul.bf16.gmra.mxu0 %v4128_v38  ;;  %v4031_v54 = vadd.f32 %v3957_v53, %v3817_v62  ;;  %v3375_v57 = vrot.slane %v3374_v37, 4  ;;  %v3365_v53 = vrot.slane %v3364_v47, 4  ;;  %v3634_v37 = vrot.slane %v3632_v51, 4 }
 0x4c2   : > { %v3536_v40 = vpop.f32.mrf.mxu1  ;;  %v3647_v30 = vrot.slane %v3645_v48, 4 }
 0x4c3   : > { %v4067_v46 = vadd.f32 %v6951_v27, %v4031_v54  ;;  %v3380_v16 = vsel %vm6732_vm10, %v3375_v57, %v3379_v45  ;;  %v3370_v62 = vsel %vm6732_vm10, %v3365_v53, %v3369_v6  ;;  %v3606_v47 = vadd.f32 %v3536_v40, %v6716_v55 }
 0x4c4   : > { %v3429_v4 = vunpack.c.l.b16 %v3380_v16  ;;  %v3819_v45 = vadd.f32 %v6956_v18, %v3605_v24 }
 0x4c5   : > { %v4099_v14 = vmax.f32 %v4067_v46, 0.0  ;;  %v3643_v46 = vrot.slane %v3641_v20, 5  ;;  %v3820_v9 = vadd.f32 %v6966_v50, %v3606_v47 }
 0x4c6   : > { %3797 = vmatmul.bf16.gmra.mxu2 %v6989_v12 }
 0x4c8   : > { %v3959_v34 = vpop.f32.mrf.mxu3 }
 0x4c9   : > { %v4032_v22 = vadd.f32 %v3959_v34, %v3818_v52  ;;  %v6994_v26 = vpop.f32.mrf.mxu2  ;;  %v3637_v52 = vrot.slane %v3635_v35, 5  ;;  %v3428_v34 = vunpack.c.l.b16 %v3370_v62 }
 0x4ca   : > { %v3539_v41 = vpop.f32.mrf.mxu1 }
 0x4cb   : > { %v4068_v38 = vadd.f32 %v6951_v27, %v4032_v22  ;;  %v7008_v59 = vpack.c.b16 %v3429_v4, %v3428_v34  ;;  %v2990_v22 = vld [vmem:[#allocation2 + $0x10c] sm:$0x1]  ;;  %v3638_v57 = vor.u32 %v3637_v52, %v3634_v37 }
 0x4cc   : > { %v3651_v2 = vshll.u32 %v2990_v22, 16 }
 0x4cd   : > { %v4100_v58 = vmax.f32 %v4068_v38, 0.0  ;;  %3578 = vmatmul.bf16.gmra.mxu1 %v6946_v23  ;;  %4001 = vmatmul.bf16.gmra.mxu3 %v6970_v32  ;;  %v3648_v38 = vor.u32 %v3647_v30, %v3643_v46  ;;  %v3639_v18 = vrot.slane %v3638_v57, 4 }
 0x4ce   : > { %v3653_v35 = vrot.slane %v3651_v2, 5 }
 0x4cf   : > { %v4129_v15 = vpack.c.bf16 %v4100_v58, %v4099_v14  ;;  %v3649_v51 = vrot.slane %v3648_v38, 4  ;;  %v3644_v50 = vsel %vm6732_vm10, %v3639_v18, %v3643_v46 }
 0x4d0   : > { %v3962_v49 = vpop.f32.mrf.mxu3  ;;  %v3672_v4 = vunpack.c.l.b16 %v3644_v50 }
 0x4d1   : > { %v7004_v54 = vpop.f32.mrf.mxu2  ;;  %4229 = vmatmul.bf16.gmra.mxu0 %v4129_v15  ;;  %v4033_v6 = vadd.f32 %v3962_v49, %v3819_v45  ;;  %v3607_v15 = vadd.f32 %v3539_v41, %v6723_v63  ;;  %v3654_v48 = vsel %vm6732_vm10, %v3649_v51, %v3653_v35 }
 0x4d2   : > { %v3541_v23 = vpop.f32.mrf.mxu1  ;;  %v3673_v34 = vunpack.c.l.b16 %v3654_v48 }
 0x4d3   : > { %v4069_v16 = vadd.f32 %v6951_v27, %v4033_v6  ;;  %v3821_v47 = vadd.f32 %v6975_v3, %v3607_v15 }
 0x4d4   : > { %v3674_v45 = vpack.c.b16 %v3673_v34, %v3672_v4  ;;  %v2993_v4 = vld [vmem:[#allocation2 + $0x11c] sm:$0x1] }
 0x4d5   : > { %v4101_v20 = vmax.f32 %v4069_v16, 0.0 }
 0x4d6   : > { %3802 = vmatmul.bf16.gmra.mxu2 %v7008_v59 }
 0x4d8   : > { %v3964_v53 = vpop.f32.mrf.mxu3 }
 0x4d9   : > { %v4034_v14 = vadd.f32 %v3964_v53, %v3820_v9  ;;  %v7013_v55 = vpop.f32.mrf.mxu2  ;;  %v2991_v53 = vld [vmem:[#allocation2 + $0x114] sm:$0xf] }
 0x4da   : > { %v3544_v40 = vpop.f32.mrf.mxu1  ;;  %v3846_v18 = vshrl.u32 %v2991_v53, 16 }
 0x4db   : > { %v4070_v58 = vadd.f32 %v6951_v27, %v4034_v14 }
 0x4dc   : > { %v3848_v15 = vrot.slane %v3846_v18, 4 }
 0x4dd   : > { %v4102_v24 = vmax.f32 %v4070_v58, 0.0  ;;  %3583 = vmatmul.bf16.gmra.mxu1 %v6970_v32  ;;  %4006 = vmatmul.bf16.gmra.mxu3 %v6989_v12  ;;  %v3608_v32 = vadd.f32 %v3541_v23, %v6728_v1  ;;  %v7263_v1 = vld [vmem:[#allocation31_spill] sm:$0xff]  ;;  %v3849_v58 = vshll.u32 %v2991_v53, 16 }
 0x4de   : > { %v3609_v3 = vadd.f32 %v3544_v40, %v7263_v1 }
 0x4df   : > { %v4130_v62 = vpack.c.bf16 %v4102_v24, %v4101_v20  ;;  %v3822_v63 = vadd.f32 %v6985_v10, %v3608_v32  ;;  %v2992_v10 = vld [vmem:[#allocation2 + $0x118] sm:$0xf] }
 0x4e0   : > { %v3967_v49 = vpop.f32.mrf.mxu3  ;;  %v3855_v51 = vshll.u32 %v2992_v10, 16  ;;  %v3859_v35 = vshrl.u32 %v2992_v10, 16  ;;  %v3823_v24 = vadd.f32 %v6994_v26, %v3609_v3 }
 0x4e1   : > { %4234 = vmatmul.bf16.gmra.mxu0 %v4130_v62  ;;  %v7023_v37 = vpop.f32.mrf.mxu2  ;;  %v4035_v30 = vadd.f32 %v3967_v49, %v3821_v47  ;;  %v3851_v62 = vrot.slane %v3849_v58, 5 }
 0x4e2   : > { %v3546_v52 = vpop.f32.mrf.mxu1  ;;  %v3857_v48 = vrot.slane %v3855_v51, 5  ;;  %v3861_v40 = vrot.slane %v3859_v35, 4 }
 0x4e3   : > { %v4071_v46 = vadd.f32 %v6951_v27, %v4035_v30  ;;  %v3610_v20 = vadd.f32 %v3546_v52, %v6755_v25 }
 0x4e5   : > { %v4103_v38 = vmax.f32 %v4071_v46, 0.0  ;;  %v3824_v49 = vadd.f32 %v7004_v54, %v3610_v20  ;;  %v3865_v46 = vshll.u32 %v2993_v4, 16 }
 0x4e6   : > { %3807 = vmatmul.bf16.gmra.mxu2 %v3674_v45 }
 0x4e8   : > { %v3969_v41 = vpop.f32.mrf.mxu3 }
 0x4e9   : > { %v4036_v22 = vadd.f32 %v3969_v41, %v3822_v63  ;;  %v7030_v9 = vpop.f32.mrf.mxu2  ;;  %v3852_v63 = vor.u32 %v3851_v62, %v3848_v15  ;;  %v3862_v41 = vor.u32 %v3861_v40, %v3857_v48 }
 0x4ea   : > { %v3549_v6 = vpop.f32.mrf.mxu1 }
 0x4eb   : > { %v4072_v57 = vadd.f32 %v6951_v27, %v4036_v22  ;;  %v3853_v22 = vrot.slane %v3852_v63, 4  ;;  %v3611_v54 = vadd.f32 %v3549_v6, %v6771_v61 }
 0x4ed   : > { %v4104_v2 = vmax.f32 %v4072_v57, 0.0  ;;  %3588 = vmatmul.bf16.gmra.mxu1 %v6989_v12  ;;  %4011 = vmatmul.bf16.gmra.mxu3 %v7008_v59  ;;  %v3863_v57 = vrot.slane %v3862_v41, 4  ;;  %v3858_v53 = vsel %vm6732_vm10, %v3853_v22, %v3857_v48 }
 0x4ee   : > { %v3886_v18 = vunpack.c.l.b16 %v3858_v53 }
 0x4ef   : > { %v4131_v23 = vpack.c.bf16 %v4104_v2, %v4103_v38  ;;  %v3867_v38 = vrot.slane %v3865_v46, 5 }
 0x4f0   : > { %v3972_v16 = vpop.f32.mrf.mxu3 }
 0x4f1   : > { %4239 = vmatmul.bf16.gmra.mxu0 %v4131_v23  ;;  %v4037_v50 = vadd.f32 %v3972_v16, %v3823_v24  ;;  %v3770_v12 = vpop.f32.mrf.mxu2  ;;  %v3868_v10 = vsel %vm6732_vm10, %v3863_v57, %v3867_v38 }
 0x4f2   : > { %v3551_v14 = vpop.f32.mrf.mxu1  ;;  %v3887_v58 = vunpack.c.l.b16 %v3868_v10 }
 0x4f3   : > { %v4073_v32 = vadd.f32 %v6951_v27, %v4037_v50  ;;  %v3612_v16 = vadd.f32 %v3551_v14, %v6781_v8 }
 0x4f4   : > { %v3888_v20 = vpack.c.b16 %v3887_v58, %v3886_v18  ;;  %v5233_v18 = vld [vmem:[%s6229_s13 + $0x14] sm:$0xff]  }
 0x4f5   : > { %v4105_v26 = vmax.f32 %v4073_v32, 0.0  ;;  %v3826_v61 = vadd.f32 %v7023_v37, %v3612_v16 }
 0x4f8   : > { %v3974_v34 = vpop.f32.mrf.mxu3 }
 0x4f9   : > { %v4038_v47 = vadd.f32 %v3974_v34, %v3824_v49  ;;  %v3773_v1 = vpop.f32.mrf.mxu2 }
 0x4fa   : > { %v3554_v30 = vpop.f32.mrf.mxu1 }
 0x4fb   : > { %v4074_v25 = vadd.f32 %v6951_v27, %v4038_v47  ;;  %v3613_v8 = vadd.f32 %v3554_v30, %v6792_v7 }
 0x4fd   : > { %v4106_v52 = vmax.f32 %v4074_v25, 0.0  ;;  %3593 = vmatmul.bf16.gmra.mxu1 %v7008_v59  ;;  %4016 = vmatmul.bf16.gmra.mxu3 %v3674_v45  ;;  %v3825_v59 = vadd.f32 %v7013_v55, %v3611_v54  ;;  %v3827_v40 = vadd.f32 %v7030_v9, %v3613_v8 }
 0x4ff   : > { %v4132_v2 = vpack.c.bf16 %v4106_v52, %v4105_v26 }
 0x500   : > { %v3977_v3 = vpop.f32.mrf.mxu3 }
 0x501   : > { %4244 = vmatmul.bf16.gmra.mxu0 %v4132_v2  ;;  %v4039_v45 = vadd.f32 %v3977_v3, %v3825_v59  ;;  %v3775_v24 = vpop.f32.mrf.mxu2 }
 0x502   : > { %v3556_v23 = vpop.f32.mrf.mxu1 }
 0x503   : > { %v4075_v51 = vadd.f32 %v6951_v27, %v4039_v45  ;;  %v3614_v37 = vadd.f32 %v3556_v23, %v6797_v28 }
 0x505   : > { %v4107_v60 = vmax.f32 %v4075_v51, 0.0  ;;  %v3828_v34 = vadd.f32 %v3770_v12, %v3614_v37 }
 0x508   : > { %v3979_v6 = vpop.f32.mrf.mxu3 }
 0x509   : > { %v4040_v35 = vadd.f32 %v3979_v6, %v3826_v61  ;;  %v3778_v49 = vpop.f32.mrf.mxu2 }
 0x50a   : > { %v3559_v50 = vpop.f32.mrf.mxu1 }
 0x50b   : > { %v4076_v15 = vadd.f32 %v6951_v27, %v4040_v35  ;;  %v3615_v26 = vadd.f32 %v3559_v50, %v6809_v13 }
 0x50d   : > { %v4108_v62 = vmax.f32 %v4076_v15, 0.0  ;;  %4021 = vmatmul.bf16.gmra.mxu3 %v3888_v20  ;;  %v3829_v12 = vadd.f32 %v3773_v1, %v3615_v26  ;;  %v4336_v20 = vunpack.c.l.bf16 %v5233_v18 }
 0x50f   : > { %v4133_v55 = vpack.c.bf16 %v4108_v62, %v4107_v60 }
 0x510   : > { %v3982_v14 = vpop.f32.mrf.mxu3 }
 0x511   : > { %4249 = vmatmul.bf16.gmra.mxu0 %v4133_v55  ;;  %v4041_v4 = vadd.f32 %v3982_v14, %v3827_v40  ;;  %v3780_v30 = vpop.f32.mrf.mxu2 }
 0x512   : > { %v3561_v48 = vpop.f32.mrf.mxu1 }
 0x513   : > { %v4077_v47 = vadd.f32 %v6951_v27, %v4041_v4  ;;  %v3616_v9 = vadd.f32 %v3561_v48, %v6814_v29  ;;  %v7064_v29 = vld [vmem:[%s7205_s6] ss:$0 sm:$0xff] }
 0x515   : > { %v4109_v25 = vmax.f32 %v4077_v47, 0.0  ;;  %v3830_v38 = vadd.f32 %v3775_v24, %v3616_v9 }
 0x518   : > { %v3984_v32 = vpop.f32.mrf.mxu3 }
 0x519   : > { %v4042_v63 = vadd.f32 %v3984_v32, %v3828_v34  ;;  %v3783_v54 = vpop.f32.mrf.mxu2 }
 0x51a   : > { %v3564_v41 = vpop.f32.mrf.mxu1 }
 0x51b   : > { %v4078_v46 = vadd.f32 %v6951_v27, %v4042_v63  ;;  %v3617_v45 = vadd.f32 %v3564_v41, %v6826_v56  ;;  %v4337_v56 = vunpack.c.h.bf16 %v5233_v18 }
 0x51d   : > { %v4110_v7 = vmax.f32 %v4078_v46, 0.0  ;;  %v3831_v24 = vadd.f32 %v3778_v49, %v3617_v45 }
 0x51f   : > { %v4134_v52 = vpack.c.bf16 %v4110_v7, %v4109_v25  ;;  %v5235_v7 = vld [vmem:[%s6229_s13 + $0x24] sm:$0xff]  }
 0x520   : > { %v3987_v22 = vpop.f32.mrf.mxu3 }
 0x521   : > { %4254 = vmatmul.bf16.gmra.mxu0 %v4134_v52  ;;  %v4043_v57 = vadd.f32 %v3987_v22, %v3829_v12  ;;  %v3785_v61 = vpop.f32.mrf.mxu2 }
 0x522   : > { %v3566_v28 = vpop.f32.mrf.mxu1 }
 0x523   : > { %v4079_v3 = vadd.f32 %v6951_v27, %v4043_v57  ;;  %v3618_v51 = vadd.f32 %v3566_v28, %v6831_v39  ;;  %v4338_v28 = vunpack.c.l.bf16 %v5235_v7  ;;  %v4339_v57 = vunpack.c.h.bf16 %v5235_v7 }
 0x525   : > { %v4111_v16 = vmax.f32 %v4079_v3, 0.0  ;;  %v3832_v8 = vadd.f32 %v3780_v30, %v3618_v51 }
 0x528   : > { %v3989_v2 = vpop.f32.mrf.mxu3 }
 0x529   : > { %v4044_v23 = vadd.f32 %v3989_v2, %v3830_v38  ;;  %v3788_v49 = vpop.f32.mrf.mxu2 }
 0x52a   : > { %v3569_v53 = vpop.f32.mrf.mxu1 }
 0x52b   : > { %v4080_v10 = vadd.f32 %v6951_v27, %v4044_v23  ;;  %v3619_v46 = vadd.f32 %v3569_v53, %v6843_v11 }
 0x52d   : > { %v4112_v13 = vmax.f32 %v4080_v10, 0.0  ;;  %v3833_v9 = vadd.f32 %v3783_v54, %v3619_v46 }
 0x52e   : > { %v4220_v59 = vpop.f32.mrf.mxu0 }
 0x52f   : > { %v4135_v1 = vpack.c.bf16 %v4112_v13, %v4111_v16  ;;  %v4221_v35 = vadd.f32 %v7064_v29, %v4220_v59 }
 0x530   : > { %v3992_v58 = vpop.f32.mrf.mxu3 }
 0x531   : > { %4259 = vmatmul.bf16.gmra.mxu0 %v4135_v1  ;;  %v4045_v50 = vadd.f32 %v3992_v58, %v3831_v24  ;;  %v4368_v60 = vadd.f32 %v4336_v20, %v4221_v35  ;;  %v3790_v38 = vpop.f32.mrf.mxu2  ;;  %v5237_v20 = vld [vmem:[%s6229_s13 + $0x34] sm:$0xff]  }
 0x532   : > { %v3571_v6 = vpop.f32.mrf.mxu1 }
 0x533   : > { %v4081_v14 = vadd.f32 %v6951_v27, %v4045_v50  ;;  %v4400_v39 = vmax.f32 %v4368_v60, 0.0  ;;  %v3620_v52 = vadd.f32 %v3571_v6, %v6848_v43 }
 0x535   : > { %v4113_v32 = vmax.f32 %v4081_v14, 0.0  ;;  %v3834_v23 = vadd.f32 %v3785_v61, %v3620_v52  ;;  %v5239_v52 = vld [vmem:[%s6229_s13 + $0x44] sm:$0xff]  }
 0x536   : > { %v4222_v15 = vpop.f32.mrf.mxu0 }
 0x537   : > { %v4223_v62 = vadd.f32 %v7064_v29, %v4222_v15  ;;  %v4340_v15 = vunpack.c.l.bf16 %v5237_v20 }
 0x538   : > { %v3994_v55 = vpop.f32.mrf.mxu3 }
 0x539   : > { %v4369_v48 = vadd.f32 %v4337_v56, %v4223_v62  ;;  %v4046_v37 = vadd.f32 %v3994_v55, %v3832_v8  ;;  %v3793_v61 = vpop.f32.mrf.mxu2  ;;  %v4341_v55 = vunpack.c.h.bf16 %v5237_v20  ;;  %v5241_v20 = vld [vmem:[%s6229_s13 + $0x54] sm:$0xff]  }
 0x53a   : > { %v3574_v40 = vpop.f32.mrf.mxu1 }
 0x53b   : > { %v4401_v4 = vmax.f32 %v4369_v48, 0.0  ;;  %v4082_v34 = vadd.f32 %v6951_v27, %v4046_v37  ;;  %v3621_v51 = vadd.f32 %v3574_v40, %v6860_v0 }
 0x53d   : > { %v5596_v47 = vpack.c.bf16 %v4401_v4, %v4400_v39  ;;  %v4114_v63 = vmax.f32 %v4082_v34, 0.0  ;;  %v3835_v60 = vadd.f32 %v3788_v49, %v3621_v51 }
 0x53e   : > { %v4225_v41 = vpop.f32.mrf.mxu0 }
 0x53f   : > { %5597 = vst [vmem:[%s7074_s17] sm:$0xff] %v5596_v47   ;;  %v4136_v25 = vpack.c.bf16 %v4114_v63, %v4113_v32  ;;  %v4226_v22 = vadd.f32 %v7064_v29, %v4225_v41 }
 0x540   : > { %v3997_v30 = vpop.f32.mrf.mxu3 }
 0x541   : > { %4264 = vmatmul.bf16.gmra.mxu0 %v4136_v25  ;;  %v4047_v12 = vadd.f32 %v3997_v30, %v3833_v9  ;;  %v4370_v11 = vadd.f32 %v4338_v28, %v4226_v22 }
 0x542   : > { %v3576_v26 = vpop.f32.mrf.mxu1 }
 0x543   : > { %v4083_v10 = vadd.f32 %v6951_v27, %v4047_v12  ;;  %v4402_v59 = vmax.f32 %v4370_v11, 0.0  ;;  %v3622_v50 = vadd.f32 %v3576_v26, %v6865_v44  ;;  %v3795_v44 = vpop.f32.mrf.mxu2  ;;  %v4342_v12 = vunpack.c.l.bf16 %v5239_v52 }
 0x544   : > { %v4343_v11 = vunpack.c.h.bf16 %v5239_v52 }
 0x545   : > { %v4115_v1 = vmax.f32 %v4083_v10, 0.0  ;;  %v3836_v0 = vadd.f32 %v3790_v38, %v3622_v50 }
 0x546   : > { %v4227_v2 = vpop.f32.mrf.mxu0 }
 0x547   : > { %v4228_v3 = vadd.f32 %v7064_v29, %v4227_v2 }
 0x548   : > { %v3999_v53 = vpop.f32.mrf.mxu3 }
 0x549   : > { %v4371_v16 = vadd.f32 %v4339_v57, %v4228_v3  ;;  %v4048_v13 = vadd.f32 %v3999_v53, %v3834_v23 }
 0x54a   : > { %v3579_v43 = vpop.f32.mrf.mxu1 }
 0x54b   : > { %v4403_v45 = vmax.f32 %v4371_v16, 0.0  ;;  %v4084_v54 = vadd.f32 %v6951_v27, %v4048_v13  ;;  %v3623_v30 = vadd.f32 %v3579_v43, %v6874_v42  ;;  %v3798_v38 = vpop.f32.mrf.mxu2 }
 0x54d   : > { %v5601_v18 = vpack.c.bf16 %v4403_v45, %v4402_v59  ;;  %v4116_v58 = vmax.f32 %v4084_v54, 0.0  ;;  %v3837_v57 = vadd.f32 %v3793_v61, %v3623_v30  ;;  %v5243_v30 = vld [vmem:[%s6229_s13 + $0x64] sm:$0xff]  }
 0x54e   : > { %v4230_v6 = vpop.f32.mrf.mxu0 }
 0x54f   : > { %5708 = vst [vmem:[%s7074_s17 + $0x8] sm:$0xff] %v5601_v18   ;;  %v4137_v35 = vpack.c.bf16 %v4116_v58, %v4115_v1  ;;  %v4231_v56 = vadd.f32 %v7064_v29, %v4230_v6 }
 0x550   : > { %v4002_v24 = vpop.f32.mrf.mxu3 }
 0x551   : > { %4269 = vmatmul.bf16.gmra.mxu0 %v4137_v35  ;;  %v4049_v8 = vadd.f32 %v4002_v24, %v3835_v60  ;;  %v4372_v48 = vadd.f32 %v4340_v15, %v4231_v56  ;;  %v4344_v60 = vunpack.c.l.bf16 %v5241_v20 }
 0x552   : > { %v3581_v62 = vpop.f32.mrf.mxu1 }
 0x553   : > { %v4085_v39 = vadd.f32 %v6951_v27, %v4049_v8  ;;  %v4404_v32 = vmax.f32 %v4372_v48, 0.0  ;;  %v3624_v28 = vadd.f32 %v3581_v62, %v6880_v5  ;;  %v3800_v6 = vpop.f32.mrf.mxu2 }
 0x555   : > { %v4117_v63 = vmax.f32 %v4085_v39, 0.0  ;;  %v3838_v42 = vadd.f32 %v3795_v44, %v3624_v28 }
 0x556   : > { %v4232_v14 = vpop.f32.mrf.mxu0 }
 0x557   : > { %v4233_v37 = vadd.f32 %v7064_v29, %v4232_v14 }
 0x558   : > { %v4004_v40 = vpop.f32.mrf.mxu3 }
 0x559   : > { %v4373_v4 = vadd.f32 %v4341_v55, %v4233_v37  ;;  %v4050_v34 = vadd.f32 %v4004_v40, %v3836_v0  ;;  %v4345_v55 = vunpack.c.h.bf16 %v5241_v20 }
 0x55a   : > { %v3584_v25 = vpop.f32.mrf.mxu1 }
 0x55b   : > { %v4405_v47 = vmax.f32 %v4373_v4, 0.0  ;;  %v4086_v49 = vadd.f32 %v6951_v27, %v4050_v34  ;;  %v3625_v35 = vadd.f32 %v3584_v25, %v6889_v19  ;;  %v3803_v0 = vpop.f32.mrf.mxu2 }
 0x55d   : > { %v5606_v41 = vpack.c.bf16 %v4405_v47, %v4404_v32  ;;  %v4118_v46 = vmax.f32 %v4086_v49, 0.0  ;;  %v3839_v62 = vadd.f32 %v3798_v38, %v3625_v35  ;;  %v4347_v38 = vunpack.c.h.bf16 %v5243_v30 }
 0x55e   : > { %v4235_v7 = vpop.f32.mrf.mxu0 }
 0x55f   : > { %5709 = vst [vmem:[%s7074_s17 + $0x10] sm:$0xff] %v5606_v41   ;;  %v4138_v26 = vpack.c.bf16 %v4118_v46, %v4117_v63  ;;  %v4236_v9 = vadd.f32 %v7064_v29, %v4235_v7 }
 0x560   : > { %v4007_v22 = vpop.f32.mrf.mxu3 }
 0x561   : > { %4274 = vmatmul.bf16.gmra.mxu0 %v4138_v26  ;;  %v4051_v2 = vadd.f32 %v4007_v22, %v3837_v57  ;;  %v4374_v23 = vadd.f32 %v4342_v12, %v4236_v9  ;;  %v4346_v9 = vunpack.c.l.bf16 %v5243_v30 }
 0x562   : > { %v3586_v10 = vpop.f32.mrf.mxu1 }
 0x563   : > { %v4087_v13 = vadd.f32 %v6951_v27, %v4051_v2  ;;  %v4406_v59 = vmax.f32 %v4374_v23, 0.0  ;;  %v3626_v56 = vadd.f32 %v3586_v10, %v6895_v21  ;;  %v3805_v52 = vpop.f32.mrf.mxu2 }
 0x565   : > { %v4119_v1 = vmax.f32 %v4087_v13, 0.0  ;;  %v3840_v19 = vadd.f32 %v3800_v6, %v3626_v56 }
 0x566   : > { %v4237_v3 = vpop.f32.mrf.mxu0 }
 0x567   : > { %v4238_v53 = vadd.f32 %v7064_v29, %v4237_v3 }
 0x568   : > { %v4009_v16 = vpop.f32.mrf.mxu3 }
 0x569   : > { %v4375_v43 = vadd.f32 %v4343_v11, %v4238_v53  ;;  %v4052_v5 = vadd.f32 %v4009_v16, %v3838_v42 }
 0x56a   : > { %v3589_v50 = vpop.f32.mrf.mxu1 }
 0x56b   : > { %v4407_v45 = vmax.f32 %v4375_v43, 0.0  ;;  %v4088_v54 = vadd.f32 %v6951_v27, %v4052_v5  ;;  %v3627_v25 = vadd.f32 %v3589_v50, %v6906_v31  ;;  %v3808_v5 = vpop.f32.mrf.mxu2 }
 0x56d   : > { %v5611_v18 = vpack.c.bf16 %v4407_v45, %v4406_v59  ;;  %v4120_v58 = vmax.f32 %v4088_v54, 0.0  ;;  %v3841_v12 = vadd.f32 %v3803_v0, %v3627_v25 }
 0x56e   : > { %v4240_v51 = vpop.f32.mrf.mxu0 }
 0x56f   : > { %5710 = vst [vmem:[%s7074_s17 + $0x18] sm:$0xff] %v5611_v18   ;;  %v4139_v61 = vpack.c.bf16 %v4120_v58, %v4119_v1  ;;  %v4241_v15 = vadd.f32 %v7064_v29, %v4240_v51  ;;  %v5245_v51 = vld [vmem:[%s6229_s13 + $0x74] sm:$0xff]  }
 0x570   : > { %v4012_v24 = vpop.f32.mrf.mxu3 }
 0x571   : > { %4279 = vmatmul.bf16.gmra.mxu0 %v4139_v61  ;;  %v4053_v8 = vadd.f32 %v4012_v24, %v3839_v62  ;;  %v4376_v48 = vadd.f32 %v4344_v60, %v4241_v15  ;;  %v4348_v24 = vunpack.c.l.bf16 %v5245_v51  ;;  %v4349_v15 = vunpack.c.h.bf16 %v5245_v51 }
 0x572   : > { %v3591_v47 = vpop.f32.mrf.mxu1 }
 0x573   : > { %v4089_v39 = vadd.f32 %v6951_v27, %v4053_v8  ;;  %v4408_v21 = vmax.f32 %v4376_v48, 0.0  ;;  %v3628_v22 = vadd.f32 %v3591_v47, %v6914_v33  ;;  %v3810_v60 = vpop.f32.mrf.mxu2 }
 0x575   : > { %v4121_v49 = vmax.f32 %v4089_v39, 0.0  ;;  %v3842_v23 = vadd.f32 %v3805_v52, %v3628_v22  ;;  %v5249_v22 = vld [vmem:[%s6229_s13 + $0x94] sm:$0xff]  }
 0x576   : > { %v4242_v14 = vpop.f32.mrf.mxu0 }
 0x577   : > { %v4243_v37 = vadd.f32 %v7064_v29, %v4242_v14 }
 0x578   : > { %v4014_v40 = vpop.f32.mrf.mxu3 }
 0x579   : > { %v4377_v4 = vadd.f32 %v4345_v55, %v4243_v37  ;;  %v4054_v34 = vadd.f32 %v4014_v40, %v3840_v19 }
 0x57a   : > { %v3594_v2 = vpop.f32.mrf.mxu1 }
 0x57b   : > { %v4409_v44 = vmax.f32 %v4377_v4, 0.0  ;;  %v4090_v32 = vadd.f32 %v6951_v27, %v4054_v34  ;;  %v3629_v18 = vadd.f32 %v3594_v2, %v6924_v17 }
 0x57d   : > { %v5616_v63 = vpack.c.bf16 %v4409_v44, %v4408_v21  ;;  %v4122_v41 = vmax.f32 %v4090_v32, 0.0  ;;  %v3843_v50 = vadd.f32 %v3808_v5, %v3629_v18  ;;  %v5247_v32 = vld [vmem:[%s6229_s13 + $0x84] sm:$0xff]  }
 0x57e   : > { %v4245_v46 = vpop.f32.mrf.mxu0 }
 0x57f   : > { %5711 = vst [vmem:[%s7074_s17 + $0x20] sm:$0xff] %v5616_v63   ;;  %v4140_v7 = vpack.c.bf16 %v4122_v41, %v4121_v49  ;;  %v4246_v28 = vadd.f32 %v7064_v29, %v4245_v46  ;;  %v4350_v49 = vunpack.c.l.bf16 %v5247_v32  ;;  %v4351_v63 = vunpack.c.h.bf16 %v5247_v32 }
 0x580   : > { %v4017_v26 = vpop.f32.mrf.mxu3 }
 0x581   : > { %4284 = vmatmul.bf16.gmra.mxu0 %v4140_v7  ;;  %v4055_v57 = vadd.f32 %v4017_v26, %v3841_v12  ;;  %v4378_v3 = vadd.f32 %v4346_v9, %v4246_v28  ;;  %v4352_v9 = vunpack.c.l.bf16 %v5249_v22  ;;  %v4353_v12 = vunpack.c.h.bf16 %v5249_v22 }
 0x582   : > { %v3596_v6 = vpop.f32.mrf.mxu1 }
 0x583   : > { %v4091_v42 = vadd.f32 %v6951_v27, %v4055_v57  ;;  %v4410_v33 = vmax.f32 %v4378_v3, 0.0  ;;  %v3630_v61 = vadd.f32 %v3596_v6, %v6931_v36 }
 0x585   : > { %v4123_v59 = vmax.f32 %v4091_v42, 0.0  ;;  %v3844_v55 = vadd.f32 %v3810_v60, %v3630_v61  ;;  %v5251_v42 = vld [vmem:[%s6229_s13 + $0xa4] sm:$0xff]  }
 0x586   : > { %v4247_v11 = vpop.f32.mrf.mxu0 }
 0x587   : > { %v4248_v31 = vadd.f32 %v7064_v29, %v4247_v11 }
 0x588   : > { %v4019_v53 = vpop.f32.mrf.mxu3 }
 0x589   : > { %v4379_v10 = vadd.f32 %v4347_v38, %v4248_v31  ;;  %v4056_v16 = vadd.f32 %v4019_v53, %v3842_v23 }
 0x58b   : > { %v4411_v13 = vmax.f32 %v4379_v10, 0.0  ;;  %v4092_v43 = vadd.f32 %v6951_v27, %v4056_v16  ;;  %v4354_v16 = vunpack.c.l.bf16 %v5251_v42 }
 0x58d   : > { %v5621_v45 = vpack.c.bf16 %v4411_v13, %v4410_v33  ;;  %v4124_v54 = vmax.f32 %v4092_v43, 0.0  ;;  %v4355_v33 = vunpack.c.h.bf16 %v5251_v42 }
 0x58e   : > { %v4250_v1 = vpop.f32.mrf.mxu0 }
 0x58f   : > { %5712 = vst [vmem:[%s7074_s17 + $0x28] sm:$0xff] %v5621_v45   ;;  %v4141_v58 = vpack.c.bf16 %v4124_v54, %v4123_v59  ;;  %v4251_v20 = vadd.f32 %v7064_v29, %v4250_v1 }
 0x590   : > { %v4022_v35 = vpop.f32.mrf.mxu3 }
 0x591   : > { %4289 = vmatmul.bf16.gmra.mxu0 %v4141_v58  ;;  %v4057_v56 = vadd.f32 %v4022_v35, %v3843_v50  ;;  %v4380_v8 = vadd.f32 %v4348_v24, %v4251_v20  ;;  %v5253_v58 = vld [vmem:[%s6229_s13 + $0xb4] sm:$0xff]  }
 0x592   : > { %v4356_v51 = vunpack.c.l.bf16 %v5253_v58  ;;  %v4357_v35 = vunpack.c.h.bf16 %v5253_v58 }
 0x593   : > { %v4093_v48 = vadd.f32 %v6951_v27, %v4057_v56  ;;  %v4412_v36 = vmax.f32 %v4380_v8, 0.0  ;;  %v5255_v8 = vld [vmem:[%s6229_s13 + $0xc4] sm:$0xff]  }
 0x595   : > { %v4125_v39 = vmax.f32 %v4093_v48, 0.0 }
 0x596   : > { %v4252_v62 = vpop.f32.mrf.mxu0 }
 0x597   : > { %v4253_v17 = vadd.f32 %v7064_v29, %v4252_v62 }
 0x598   : > { %v4024_v14 = vpop.f32.mrf.mxu3 }
 0x599   : > { %v4381_v37 = vadd.f32 %v4349_v15, %v4253_v17  ;;  %v4058_v19 = vadd.f32 %v4024_v14, %v3844_v55  ;;  %v4358_v55 = vunpack.c.l.bf16 %v5255_v8  ;;  %v4359_v14 = vunpack.c.h.bf16 %v5255_v8 }
 0x59b   : > { %v4413_v0 = vmax.f32 %v4381_v37, 0.0  ;;  %v4094_v40 = vadd.f32 %v6951_v27, %v4058_v19 }
 0x59d   : > { %v5626_v4 = vpack.c.bf16 %v4413_v0, %v4412_v36  ;;  %v4126_v34 = vmax.f32 %v4094_v40, 0.0 }
 0x59e   : > { %v4255_v21 = vpop.f32.mrf.mxu0 }
 0x59f   : > { %5713 = vst [vmem:[%s7074_s17 + $0x30] sm:$0xff] %v5626_v4   ;;  %v4142_v44 = vpack.c.bf16 %v4126_v34, %v4125_v39  ;;  %v4256_v47 = vadd.f32 %v7064_v29, %v4255_v21  ;;  %v5257_v34 = vld [vmem:[%s6229_s13 + $0xd4] sm:$0xff]  }
 0x5a0   : > { %v4361_v32 = vunpack.c.h.bf16 %v5257_v34 }
 0x5a1   : > { %4294 = vmatmul.bf16.gmra.mxu0 %v4142_v44  ;;  %v4382_v46 = vadd.f32 %v4350_v49, %v4256_v47  ;;  %v4360_v44 = vunpack.c.l.bf16 %v5257_v34 }
 0x5a3   : > { %v4414_v27 = vmax.f32 %v4382_v46, 0.0 }
 0x5a6   : > { %v4257_v41 = vpop.f32.mrf.mxu0 }
 0x5a7   : > { %v4258_v25 = vadd.f32 %v7064_v29, %v4257_v41 }
 0x5a9   : > { %v4383_v7 = vadd.f32 %v4351_v63, %v4258_v25 }
 0x5ab   : > { %v4415_v30 = vmax.f32 %v4383_v7, 0.0 }
 0x5ad   : > { %v5631_v26 = vpack.c.bf16 %v4415_v30, %v4414_v27  ;;  %v5259_v30 = vld [vmem:[%s6229_s13 + $0xe4] sm:$0xff]  }
 0x5ae   : > { %v4260_v52 = vpop.f32.mrf.mxu0  ;;  %v4363_v22 = vunpack.c.h.bf16 %v5259_v30 }
 0x5af   : > { %5714 = vst [vmem:[%s7074_s17 + $0x38] sm:$0xff] %v5631_v26   ;;  %v4261_v28 = vadd.f32 %v7064_v29, %v4260_v52  ;;  %v4362_v52 = vunpack.c.l.bf16 %v5259_v30 }
 0x5b1   : > { %v4384_v38 = vadd.f32 %v4352_v9, %v4261_v28 }
 0x5b3   : > { %v4416_v3 = vmax.f32 %v4384_v38, 0.0 }
 0x5b6   : > { %v4262_v57 = vpop.f32.mrf.mxu0 }
 0x5b7   : > { %v4263_v2 = vadd.f32 %v7064_v29, %v4262_v57 }
 0x5b9   : > { %v4385_v11 = vadd.f32 %v4353_v12, %v4263_v2 }
 0x5bb   : > { %v4417_v31 = vmax.f32 %v4385_v11, 0.0 }
 0x5bd   : > { %v5636_v23 = vpack.c.bf16 %v4417_v31, %v4416_v3  ;;  %v5261_v31 = vld [vmem:[%s6229_s13 + $0xf4] sm:$0xff]  }
 0x5be   : > { %v4265_v53 = vpop.f32.mrf.mxu0  ;;  %v4365_v42 = vunpack.c.h.bf16 %v5261_v31 }
 0x5bf   : > { %5715 = vst [vmem:[%s7074_s17 + $0x40] sm:$0xff] %v5636_v23   ;;  %v4266_v10 = vadd.f32 %v7064_v29, %v4265_v53  ;;  %v4364_v53 = vunpack.c.l.bf16 %v5261_v31 }
 0x5c1   : > { %v4386_v43 = vadd.f32 %v4354_v16, %v4266_v10 }
 0x5c3   : > { %v4418_v45 = vmax.f32 %v4386_v43, 0.0 }
 0x5c6   : > { %v4267_v13 = vpop.f32.mrf.mxu0 }
 0x5c7   : > { %v4268_v5 = vadd.f32 %v7064_v29, %v4267_v13 }
 0x5c9   : > { %v4387_v59 = vadd.f32 %v4355_v33, %v4268_v5 }
 0x5cb   : > { %v4419_v54 = vmax.f32 %v4387_v59, 0.0 }
 0x5cd   : > { %v5641_v1 = vpack.c.bf16 %v4419_v54, %v4418_v45  ;;  %v5263_v54 = vld [vmem:[%s6229_s13 + $0x104] sm:$0xff]   ;;  %s5978_s13 = sshra.s32 %s4515_s3, 4  ;;  %s5979_s13 = int_to_ptr.hbm [resolvable:$true] %s5978_s13 }
 0x5ce   : > { %v4270_v18 = vpop.f32.mrf.mxu0  ;;  %v4367_v58 = vunpack.c.h.bf16 %v5263_v54  ;;  %s5980_s5 = scalar_lea.hbm %s5979_s13, 128  ;;  %p5985_p8 = scmp.lt.s32.totalorder %s5979_s13, %s7206_s7 }
 0x5cf   : > { %5716 = vst [vmem:[%s7074_s17 + $0x48] sm:$0xff] %v5641_v1   ;;  %v4271_v6 = vadd.f32 %v7064_v29, %v4270_v18  ;;  %v4366_v18 = vunpack.c.l.bf16 %v5263_v54  ;;  %p5981_p1 = scmp.ne.s32.totalorder %s5979_s13, %s5980_s5  ;;  %p5986_p12 = scmp.lt.s32.totalorder %s5984_s16, %s5980_s5 }
 0x5d1   : > { %v4388_v20 = vadd.f32 %v4356_v51, %v4271_v6  ;;  %p5982_p2 = pnand %p5981_p1, %p6204_p5  ;;  %p5987_p13 = por %p5986_p12, %p5985_p8 }
 0x5d3   : > { %v4420_v56 = vmax.f32 %v4388_v20, 0.0  ;;  %p5983_p4 = pneg %p5982_p2 }
 0x5d5   : > { %p5988_p0 = pnand %p5987_p13, %p5983_p4 }
 0x5d6   : > { %v4272_v61 = vpop.f32.mrf.mxu0 }
 0x5d7   : > { %v4273_v24 = vadd.f32 %v7064_v29, %v4272_v61 }
 0x5d9   : > { %v4389_v50 = vadd.f32 %v4357_v35, %v4273_v24 }
 0x5db   : > { %v4421_v15 = vmax.f32 %v4389_v50, 0.0 }
 0x5dd   : > { %v5646_v60 = vpack.c.bf16 %v4421_v15, %v4420_v56 }
 0x5de   : > { %v4275_v62 = vpop.f32.mrf.mxu0 }
 0x5df   : > { %5717 = vst [vmem:[%s7074_s17 + $0x50] sm:$0xff] %v5646_v60   ;;  %v4276_v17 = vadd.f32 %v7064_v29, %v4275_v62 }
 0x5e1   : > { %v4390_v37 = vadd.f32 %v4358_v55, %v4276_v17 }
 0x5e3   : > { %v4422_v0 = vmax.f32 %v4390_v37, 0.0 }
 0x5e6   : > { %v4277_v48 = vpop.f32.mrf.mxu0 }
 0x5e7   : > { %v4278_v19 = vadd.f32 %v7064_v29, %v4277_v48 }
 0x5e9   : > { %v4391_v36 = vadd.f32 %v4359_v14, %v4278_v19 }
 0x5eb   : > { %v4423_v40 = vmax.f32 %v4391_v36, 0.0 }
 0x5ed   : > { %v5651_v39 = vpack.c.bf16 %v4423_v40, %v4422_v0 }
 0x5ee   : > { %v4280_v4 = vpop.f32.mrf.mxu0 }
 0x5ef   : > { %5718 = vst [vmem:[%s7074_s17 + $0x58] sm:$0xff] %v5651_v39   ;;  %v4281_v21 = vadd.f32 %v7064_v29, %v4280_v4 }
 0x5f1   : > { %v4392_v49 = vadd.f32 %v4360_v44, %v4281_v21 }
 0x5f3   : > { %v4424_v46 = vmax.f32 %v4392_v49, 0.0 }
 0x5f6   : > { %v4282_v47 = vpop.f32.mrf.mxu0 }
 0x5f7   : > { %v4283_v63 = vadd.f32 %v7064_v29, %v4282_v47 }
 0x5f9   : > { %v4393_v41 = vadd.f32 %v4361_v32, %v4283_v63 }
 0x5fb   : > { %v4425_v25 = vmax.f32 %v4393_v41, 0.0 }
 0x5fd   : > { %v5656_v7 = vpack.c.bf16 %v4425_v25, %v4424_v46 }
 0x5fe   : > { %v4285_v27 = vpop.f32.mrf.mxu0 }
 0x5ff   : > { %5719 = vst [vmem:[%s7074_s17 + $0x60] sm:$0xff] %v5656_v7   ;;  %v4286_v26 = vadd.f32 %v7064_v29, %v4285_v27 }
 0x601   : > { %v4394_v9 = vadd.f32 %v4362_v52, %v4286_v26 }
 0x603   : > { %v4426_v38 = vmax.f32 %v4394_v9, 0.0 }
 0x606   : > { %v4287_v28 = vpop.f32.mrf.mxu0 }
 0x607   : > { %v4288_v12 = vadd.f32 %v7064_v29, %v4287_v28 }
 0x609   : > { %v4395_v57 = vadd.f32 %v4363_v22, %v4288_v12 }
 0x60b   : > { %v4427_v2 = vmax.f32 %v4395_v57, 0.0 }
 0x60d   : > { %v5661_v11 = vpack.c.bf16 %v4427_v2, %v4426_v38 }
 0x60e   : > { %v4290_v3 = vpop.f32.mrf.mxu0 }
 0x60f   : > { %5720 = vst [vmem:[%s7074_s17 + $0x68] sm:$0xff] %v5661_v11   ;;  %v4291_v23 = vadd.f32 %v7064_v29, %v4290_v3 }
 0x611   : > { %v4396_v16 = vadd.f32 %v4364_v53, %v4291_v23 }
 0x613   : > { %v4428_v43 = vmax.f32 %v4396_v16, 0.0 }
 0x616   : > { %v4292_v10 = vpop.f32.mrf.mxu0 }
 0x617   : > { %v4293_v33 = vadd.f32 %v7064_v29, %v4292_v10 }
 0x619   : > { %v4397_v13 = vadd.f32 %v4365_v42, %v4293_v33 }
 0x61b   : > { %v4429_v5 = vmax.f32 %v4397_v13, 0.0 }
 0x61d   : > { %v5666_v59 = vpack.c.bf16 %v4429_v5, %v4428_v43 }
 0x61e   : > { %v4295_v45 = vpop.f32.mrf.mxu0 }
 0x61f   : > { %5721 = vst [vmem:[%s7074_s17 + $0x70] sm:$0xff] %v5666_v59   ;;  %v4296_v1 = vadd.f32 %v7064_v29, %v4295_v45 }
 0x621   : > { %v4398_v51 = vadd.f32 %v4366_v18, %v4296_v1 }
 0x623   : > { %v4430_v20 = vmax.f32 %v4398_v51, 0.0 }
 0x626   : > { %v4297_v6 = vpop.f32.mrf.mxu0 }
 0x627   : > { %v4298_v35 = vadd.f32 %v7064_v29, %v4297_v6 }
 0x629   : > { %v4399_v61 = vadd.f32 %v4367_v58, %v4298_v35 }
 0x62b   : > { %v4431_v24 = vmax.f32 %v4399_v61, 0.0 }
 0x62d   : > { %v5671_v50 = vpack.c.bf16 %v4431_v24, %v4430_v20 }
 0x62f   : > { %5722 = vst [vmem:[%s7074_s17 + $0x78] sm:$0xff] %v5671_v50  }
 0x630   : > { %5991 = shalt.err (!%p5988_p0)
}
 0x631   : > { %s6062_s18 = smov 64   ;;  %s6063_s8 = smov 4  }
 0x632   : > { %5756 = dma.vmem_to_hbm [thread:$0]  (%p6204_p5), %s4513_s23, 2048, %s4515_s3, %s4497_s27, %s6062_s18, %s6062_s18, %s6063_s8  }
 0x633 PF: > { %s4529_s14 = sand.u32 1, %s6034_s24   ;;  %p5773_p3 = pnand %p4640_p11, %p6153_p6 }
 0x634   : > { %s4530_s17 = scalar_lea.sflag [#allocation5], %s4529_s14 }
 0x635   : > { %p5774_p7 = pneg %p5773_p3 }
 0x637   : > { %6029 = dma.done.wait (%p5774_p7), %s4530_s17, 2048  }
 0x638   : > { %6031 = vsyncadd (%p5774_p7), %s4530_s17, 4294965248  ;;  %s25_s29 = sadd.s32 1, %s6054_s29   ;;  %s7264_s22 = sld [smem:[#allocation16_spill]] }
 0x639   : > { %p22_p9 = scmp.ge.s32.totalorder %s25_s29, 4   ;;  %s7265_s24 = smov %s6038_s25 }
 0x63a   : > { %s7266_s25 = smov %s6042_s26  ;;  %s7267_s26 = smov %s6213_s1 }
 0x63b   : > { %s7268_s27 = smov %s6050_s28  ;;  %24 = sbr.rel (!%p22_p9) target bundleno = 12 (0xc), region = 120 }
 0x63e   : > { %s7269_s28 = smov %s7264_s22 }
 0x640   :  { %4536 = vsyncpa [#allocation4], 1 }
 0x641   :  { %4538 = vsyncpa [#allocation4 + $0x1], 1 }
 0x642   :  { %4539 = vsyncpa [#allocation7], 1 }
 0x643   :  { %4540 = vsyncpa [#allocation10], 1 }
 0x644   :  { %4541 = vsyncpa [#allocation5], 1 }
 0x645   :  { %4543 = vsyncpa [#allocation5 + $0x1], 1 }

</bundles_post_ra>
